<compile_context>
chip_gen: v6e
topology: v6e:2x2x1
jax: 0.10.0
libtpu: 0.0.40
codegen_flags: <defaults>
</compile_context>

<pallas_src>
import math

import jax
import jax.numpy as jnp
from jax.experimental import pallas as pl
from jax.experimental.pallas import tpu as pltpu


# ----------------------- static layer geometry (16x16 input) ----------------------- #
_H1, _H2, _H3 = 16, 8, 4                       # conv input spatial size per stage
_HP1, _HP2, _HP3 = _H1 + 2, _H2 + 2, _H3 + 2   # zero-padded sizes (pad=1)
_M1, _M2, _M3 = _HP1 * _HP1, _HP2 * _HP2, _HP3 * _HP3   # rows of flattened padded grids
_B1, _B2, _B3 = _HP1 + 1, _HP2 + 1, _HP3 + 1   # tap-margin base offsets (19, 11, 7)
_R1, _R2, _R3 = _M1 + 2 * _B1, _M2 + 2 * _B2, _M3 + 2 * _B3   # 362, 122, 50
_NC_PAD = 128                                  # fc output padded to one full lane tile


def _taps(wp):
    """3x3 tap offsets in a row-major, wp-wide padded grid (dy,dx in {-1,0,1})."""
    return [(dy - 1) * wp + (dx - 1) for dy in range(3) for dx in range(3)]


def _pool4(o_ref, wp, ph, w_half):
    """Max over the four 2x2-window members for pooled row `ph`, all w_half columns."""
    r0 = (2 * ph + 1) * wp + 1
    r1 = (2 * ph + 2) * wp + 1
    a = o_ref[pl.ds(r0, w_half, stride=2), :]
    b = o_ref[pl.ds(r0 + 1, w_half, stride=2), :]
    c = o_ref[pl.ds(r1, w_half, stride=2), :]
    d = o_ref[pl.ds(r1 + 1, w_half, stride=2), :]
    return jnp.maximum(jnp.maximum(a, b), jnp.maximum(c, d))


# --------------------------------- fused kernel ------------------------------------ #
def _fused_cnn_kernel(x_ref, w1_ref, b1_ref, w2_ref, b2_ref, w3_ref, b3_ref,
                      wfc_ref, bfc_ref, out_ref,
                      o1, o2, o3, pf2, pf3, flat3):
    f32, bf16 = jnp.float32, jnp.bfloat16

    # Border + tap-margin rows of the padded activation buffers must be zero.
    pf2[...] = jnp.zeros_like(pf2)
    pf3[...] = jnp.zeros_like(pf3)

    # ---- conv1 (Cin=1): 9 broadcast (rank-1) updates, f32 on the VPU ----
    for k, off in enumerate(_taps(_HP1)):
        s = x_ref[0, _B1 + off:_B1 + off + _M1, :]           # (324, 1) f32
        contrib = s * w1_ref[k:k + 1, :]                      # (324, 32)
        if k == 0:
            o1[...] = contrib + b1_ref[...]
        else:
            o1[...] += contrib

    # ---- maxpool 2x2 + relu -> padded conv2 input ----
    for ph in range(_H2):
        m = jnp.maximum(_pool4(o1, _HP1, ph, _H2), 0.0)       # (8, 32) f32
        r = _B2 + (ph + 1) * _HP2 + 1
        pf2[r:r + _H2, :] = m

    # ---- conv2: 9 shifted matmuls, bf16 MXU inputs, f32 accumulate ----
    for k, off in enumerate(_taps(_HP2)):
        s = pf2[_B2 + off:_B2 + off + _M2, :].astype(bf16)    # (100, 32)
        contrib = jnp.dot(s, w2_ref[k], preferred_element_type=f32)
        if k == 0:
            o2[...] = contrib + b2_ref[...]
        else:
            o2[...] += contrib

    # ---- maxpool 2x2 + relu -> padded conv3 input ----
    for ph in range(_H3):
        m = jnp.maximum(_pool4(o2, _HP2, ph, _H3), 0.0)       # (4, 64)
        r = _B3 + (ph + 1) * _HP3 + 1
        pf3[r:r + _H3, :] = m

    # ---- conv3 ----
    for k, off in enumerate(_taps(_HP3)):
        s = pf3[_B3 + off:_B3 + off + _M3, :].astype(bf16)    # (36, 64)
        contrib = jnp.dot(s, w3_ref[k], preferred_element_type=f32)
        if k == 0:
            o3[...] = contrib + b3_ref[...]
        else:
            o3[...] += contrib

    # ---- maxpool 2x2 + sigmoid -> 4 spatial rows of 128 channels ----
    for ph in range(2):
        m = jax.nn.sigmoid(_pool4(o3, _HP3, ph, 2))           # (2, 128) f32
        flat3[2 * ph:2 * ph + 2, :] = m

    # ---- fc: channels-major flatten folded into per-spatial-position weights ----
    acc = bfc_ref[...]                                        # (1, 128) f32
    for s in range(4):
        row = flat3[s:s + 1, :].astype(bf16)                  # (1, 128)
        acc = acc + jnp.dot(row, wfc_ref[s], preferred_element_type=f32)
    out_ref[0] = acc                                          # lane-dense (1, 128) store


def _fused_forward(pf1, w1, b1, w2, b2, w3, b3, wfc, bfc):
    n = pf1.shape[0]
    grid_spec = pltpu.PrefetchScalarGridSpec(
        num_scalar_prefetch=0,
        grid=(n,),
        in_specs=[
            pl.BlockSpec((1, _R1, 1), lambda i: (i, 0, 0)),        # padded input
            pl.BlockSpec((9, 32), lambda i: (0, 0)),               # conv1 taps
            pl.BlockSpec((1, 32), lambda i: (0, 0)),
            pl.BlockSpec((9, 32, 64), lambda i: (0, 0, 0)),        # conv2 taps (bf16)
            pl.BlockSpec((1, 64), lambda i: (0, 0)),
            pl.BlockSpec((9, 64, 128), lambda i: (0, 0, 0)),       # conv3 taps (bf16)
            pl.BlockSpec((1, 128), lambda i: (0, 0)),
            pl.BlockSpec((4, 128, _NC_PAD), lambda i: (0, 0, 0)),  # fc weights (bf16)
            pl.BlockSpec((1, _NC_PAD), lambda i: (0, 0)),
        ],
        out_specs=pl.BlockSpec((1, 1, _NC_PAD), lambda i: (i, 0, 0)),
        scratch_shapes=[
            pltpu.VMEM((_M1, 32), jnp.float32),    # conv1 output (f32 acc)
            pltpu.VMEM((_M2, 64), jnp.float32),    # conv2 output
            pltpu.VMEM((_M3, 128), jnp.float32),   # conv3 output
            pltpu.VMEM((_R2, 32), jnp.float32),    # padded conv2 input
            pltpu.VMEM((_R3, 64), jnp.float32),    # padded conv3 input
            pltpu.VMEM((4, 128), jnp.float32),     # pooled/sigmoid (spatial, channel)
        ],
    )
    return pl.pallas_call(
        _fused_cnn_kernel,
        out_shape=jax.ShapeDtypeStruct((n, 1, _NC_PAD), jnp.float32),
        grid_spec=grid_spec,
        compiler_params=pltpu.CompilerParams(
            dimension_semantics=("parallel",)),   # v7x: shard batch over both TCs
    )(pf1, w1, b1, w2, b2, w3, b3, wfc, bfc)


# ----------------------------------- forward --------------------------------------- #
@jax.jit
def simple_cnn_forward(params, x_nchw):
    n, c, h, w = x_nchw.shape
    assert (c, h, w) == (1, 16, 16), "SimpleCNN.fc expects 16x16 single-channel input"
    num_classes = params["fc_b"].shape[0]

    # Input -> flattened, zero-padded conv1 grid (pad-1 border + tap margin).
    xp = jnp.pad(x_nchw[:, 0], ((0, 0), (1, 1), (1, 1)))            # (N, 18, 18)
    pf1 = jnp.pad(xp.reshape(n, _M1), ((0, 0), (_B1, _B1)))         # (N, 362)
    pf1 = pf1[:, :, None].astype(jnp.float32)                       # (N, 362, 1)

    # Conv weights -> per-tap (Cin, Cout) matrices; bf16 for the MXU path.
    w1 = params["conv1_w"].reshape(32, 9).T.astype(jnp.float32)                      # (9, 32)
    w2 = params["conv2_w"].transpose(2, 3, 1, 0).reshape(9, 32, 64).astype(jnp.bfloat16)
    w3 = params["conv3_w"].transpose(2, 3, 1, 0).reshape(9, 64, 128).astype(jnp.bfloat16)
    b1 = params["conv1_b"].reshape(1, 32).astype(jnp.float32)
    b2 = params["conv2_b"].reshape(1, 64).astype(jnp.float32)
    b3 = params["conv3_b"].reshape(1, 128).astype(jnp.float32)

    # fc weight -> (spatial s=h*2+w, channel, class), class axis padded to 128 lanes
    # so the only HBM store of the kernel is lane-dense.  This also absorbs the
    # torch channels-major x.view(N, -1) flatten.
    wfc = params["fc_w"].reshape(num_classes, 128, 2, 2).transpose(2, 3, 1, 0)
    wfc = wfc.reshape(4, 128, num_classes)
    wfc = jnp.pad(wfc, ((0, 0), (0, 0), (0, _NC_PAD - num_classes))).astype(jnp.bfloat16)
    bfc = jnp.pad(params["fc_b"], (0, _NC_PAD - num_classes)).reshape(1, _NC_PAD)
    bfc = bfc.astype(jnp.float32)

    out = _fused_forward(pf1, w1, b1, w2, b2, w3, b3, wfc, bfc)     # (N, 1, 128)
    return out[:, 0, :num_classes]


# ----------------------------- params / reference ---------------------------------- #
def _kaiming_uniform(key, shape, fan_in):
    # nn.init.kaiming_uniform_(mode='fan_in', nonlinearity='relu')  (init_mode='effective')
    bound = math.sqrt(2.0) * math.sqrt(3.0 / fan_in)
    return jax.random.uniform(key, shape, jnp.float32, -bound, bound)


def init_params(key, num_classes=10):
    k1, k2, k3, k4 = jax.random.split(key, 4)
    return dict(
        conv1_w=_kaiming_uniform(k1, (32, 1, 3, 3), 1 * 9),
        conv1_b=jnp.zeros((32,), jnp.float32),
        conv2_w=_kaiming_uniform(k2, (64, 32, 3, 3), 32 * 9),
        conv2_b=jnp.zeros((64,), jnp.float32),
        conv3_w=_kaiming_uniform(k3, (128, 64, 3, 3), 64 * 9),
        conv3_b=jnp.zeros((128,), jnp.float32),
        fc_w=_kaiming_uniform(k4, (num_classes, 128 * 2 * 2), 128 * 2 * 2),
        fc_b=jnp.zeros((num_classes,), jnp.float32),
    )


def reference_forward(params, x_nchw):
    """Pure-JAX (XLA) reference with the exact SimpleCNN.forward semantics."""
    def conv(x, wgt, b):
        y = jax.lax.conv_general_dilated(
            x, wgt, window_strides=(1, 1), padding=((1, 1), (1, 1)),
            dimension_numbers=("NCHW", "OIHW", "NCHW"),
            precision=jax.lax.Precision.HIGHEST)
        return y + b[None, :, None, None]

    def pool(y):
        return jax.lax.reduce_window(y, -jnp.inf, jax.lax.max,
                                     (1, 1, 2, 2), (1, 1, 2, 2), "VALID")

    y = jax.nn.relu(pool(conv(x_nchw, params["conv1_w"], params["conv1_b"])))
    y = jax.nn.relu(pool(conv(y, params["conv2_w"], params["conv2_b"])))
    y = jax.nn.sigmoid(pool(conv(y, params["conv3_w"], params["conv3_b"])))
    flat = y.reshape(y.shape[0], -1)
    return jnp.dot(flat, params["fc_w"].T,
                   precision=jax.lax.Precision.HIGHEST) + params["fc_b"]


if __name__ == "__main__":
    key = jax.random.PRNGKey(0)
    pkey, xkey = jax.random.split(key)
    params = init_params(pkey, num_classes=10)
    x = jax.random.normal(xkey, (2, 1, 16, 16), dtype=jnp.float32)

    logits = simple_cnn_forward(params, x)
    jax.block_until_ready(logits)
    assert logits.shape == (2, 10) and logits.dtype == jnp.float32

    # bf16 MXU inputs with f32 accumulation -> allow a loose tolerance vs f32 reference.
    ref = reference_forward(params, x)
    max_err = float(jnp.max(jnp.abs(logits - ref)))
    assert max_err < 1e-1, f"kernel deviates from reference: max abs err {max_err}"

    print("KERNEL_OK")
</pallas_src>

<mosaic_0001>
module attributes {stable_mosaic.version = 11 : i64} {
  func.func @_fused_cnn_kernel(%arg0: i32, %arg1: memref<1x362x1xf32, #tpu.memory_space<vmem>>, %arg2: memref<9x32xf32, #tpu.memory_space<vmem>>, %arg3: memref<1x32xf32, #tpu.memory_space<vmem>>, %arg4: memref<9x32x64xbf16, #tpu.memory_space<vmem>>, %arg5: memref<1x64xf32, #tpu.memory_space<vmem>>, %arg6: memref<9x64x128xbf16, #tpu.memory_space<vmem>>, %arg7: memref<1x128xf32, #tpu.memory_space<vmem>>, %arg8: memref<4x128x128xbf16, #tpu.memory_space<vmem>>, %arg9: memref<1x128xf32, #tpu.memory_space<vmem>>, %arg10: memref<1x1x128xf32, #tpu.memory_space<vmem>>, %arg11: memref<324x32xf32, #tpu.memory_space<vmem>>, %arg12: memref<100x64xf32, #tpu.memory_space<vmem>>, %arg13: memref<36x128xf32, #tpu.memory_space<vmem>>, %arg14: memref<122x32xf32, #tpu.memory_space<vmem>>, %arg15: memref<50x64xf32, #tpu.memory_space<vmem>>, %arg16: memref<4x128xf32, #tpu.memory_space<vmem>>) attributes {dimension_semantics = [#tpu.dimension_semantics<parallel>], iteration_bounds = array<i64: 2>, scalar_prefetch = 0 : i64, scratch_operands = 6 : i64, tpu.core_type = #tpu.core_type<tc>, window_params = [{transform_indices = @transform_0, window_bounds = array<i64: 1, 362, 1>}, {pipeline_mode = #tpu.pipeline_mode<synchronous>, transform_indices = @transform_1, window_bounds = array<i64: 9, 32>}, {pipeline_mode = #tpu.pipeline_mode<synchronous>, transform_indices = @transform_2, window_bounds = array<i64: 1, 32>}, {pipeline_mode = #tpu.pipeline_mode<synchronous>, transform_indices = @transform_3, window_bounds = array<i64: 9, 32, 64>}, {pipeline_mode = #tpu.pipeline_mode<synchronous>, transform_indices = @transform_4, window_bounds = array<i64: 1, 64>}, {pipeline_mode = #tpu.pipeline_mode<synchronous>, transform_indices = @transform_5, window_bounds = array<i64: 9, 64, 128>}, {pipeline_mode = #tpu.pipeline_mode<synchronous>, transform_indices = @transform_6, window_bounds = array<i64: 1, 128>}, {pipeline_mode = #tpu.pipeline_mode<synchronous>, transform_indices = @transform_7, window_bounds = array<i64: 4, 128, 128>}, {pipeline_mode = #tpu.pipeline_mode<synchronous>, transform_indices = @transform_8, window_bounds = array<i64: 1, 128>}, {transform_indices = @transform_9, window_bounds = array<i64: 1, 1, 128>}]} {
    %cst = arith.constant 0.000000e+00 : f32
    %0 = vector.broadcast %cst : f32 to vector<122x32xf32>
    %c0 = arith.constant 0 : index
    %c0_0 = arith.constant 0 : index
    %1 = vector.load %arg14[%c0, %c0_0] : memref<122x32xf32, #tpu.memory_space<vmem>>, vector<122x32xf32>
    tpu.vector_store %arg14[%c0, %c0_0], %0 {strides = array<i32>} : memref<122x32xf32, #tpu.memory_space<vmem>>, vector<122x32xf32>,
    %cst_1 = arith.constant 0.000000e+00 : f32
    %2 = vector.broadcast %cst_1 : f32 to vector<50x64xf32>
    %c0_2 = arith.constant 0 : index
    %c0_3 = arith.constant 0 : index
    %3 = vector.load %arg15[%c0_2, %c0_3] : memref<50x64xf32, #tpu.memory_space<vmem>>, vector<50x64xf32>
    tpu.vector_store %arg15[%c0_2, %c0_3], %2 {strides = array<i32>} : memref<50x64xf32, #tpu.memory_space<vmem>>, vector<50x64xf32>,
    %c0_4 = arith.constant 0 : index
    %c0_5 = arith.constant 0 : index
    %c0_6 = arith.constant 0 : index
    %4 = vector.load %arg1[%c0_4, %c0_5, %c0_6] : memref<1x362x1xf32, #tpu.memory_space<vmem>>, vector<1x324x1xf32>
    %5 = vector.shape_cast %4 : vector<1x324x1xf32> to vector<324x1xf32>
    %c0_7 = arith.constant 0 : index
    %c0_8 = arith.constant 0 : index
    %6 = vector.load %arg2[%c0_7, %c0_8] : memref<9x32xf32, #tpu.memory_space<vmem>>, vector<1x32xf32>
    %7 = vector.broadcast %5 : vector<324x1xf32> to vector<324x32xf32>
    %8 = vector.broadcast %6 : vector<1x32xf32> to vector<324x32xf32>
    %9 = arith.mulf %7, %8 : vector<324x32xf32>
    %c0_9 = arith.constant 0 : index
    %c0_10 = arith.constant 0 : index
    %10 = vector.load %arg3[%c0_9, %c0_10] : memref<1x32xf32, #tpu.memory_space<vmem>>, vector<1x32xf32>
    %11 = vector.broadcast %10 : vector<1x32xf32> to vector<324x32xf32>
    %12 = arith.addf %9, %11 : vector<324x32xf32>
    %c0_11 = arith.constant 0 : index
    %c0_12 = arith.constant 0 : index
    %13 = vector.load %arg11[%c0_11, %c0_12] : memref<324x32xf32, #tpu.memory_space<vmem>>, vector<324x32xf32>
    tpu.vector_store %arg11[%c0_11, %c0_12], %12 {strides = array<i32>} : memref<324x32xf32, #tpu.memory_space<vmem>>, vector<324x32xf32>,
    %c0_13 = arith.constant 0 : index
    %c1 = arith.constant 1 : index
    %c0_14 = arith.constant 0 : index
    %14 = vector.load %arg1[%c0_13, %c1, %c0_14] : memref<1x362x1xf32, #tpu.memory_space<vmem>>, vector<1x324x1xf32>
    %15 = vector.shape_cast %14 : vector<1x324x1xf32> to vector<324x1xf32>
    %c1_15 = arith.constant 1 : index
    %c0_16 = arith.constant 0 : index
    %16 = vector.load %arg2[%c1_15, %c0_16] : memref<9x32xf32, #tpu.memory_space<vmem>>, vector<1x32xf32>
    %17 = vector.broadcast %15 : vector<324x1xf32> to vector<324x32xf32>
    %18 = vector.broadcast %16 : vector<1x32xf32> to vector<324x32xf32>
    %19 = arith.mulf %17, %18 : vector<324x32xf32>
    %c0_17 = arith.constant 0 : index
    %c0_18 = arith.constant 0 : index
    %20 = vector.load %arg11[%c0_17, %c0_18] : memref<324x32xf32, #tpu.memory_space<vmem>>, vector<324x32xf32>
    %21 = arith.addf %20, %19 : vector<324x32xf32>
    %c0_19 = arith.constant 0 : index
    %c0_20 = arith.constant 0 : index
    %22 = vector.load %arg11[%c0_19, %c0_20] : memref<324x32xf32, #tpu.memory_space<vmem>>, vector<324x32xf32>
    tpu.vector_store %arg11[%c0_19, %c0_20], %21 {strides = array<i32>} : memref<324x32xf32, #tpu.memory_space<vmem>>, vector<324x32xf32>,
    %c0_21 = arith.constant 0 : index
    %c2 = arith.constant 2 : index
    %c0_22 = arith.constant 0 : index
    %23 = vector.load %arg1[%c0_21, %c2, %c0_22] : memref<1x362x1xf32, #tpu.memory_space<vmem>>, vector<1x324x1xf32>
    %24 = vector.shape_cast %23 : vector<1x324x1xf32> to vector<324x1xf32>
    %c2_23 = arith.constant 2 : index
    %c0_24 = arith.constant 0 : index
    %25 = vector.load %arg2[%c2_23, %c0_24] : memref<9x32xf32, #tpu.memory_space<vmem>>, vector<1x32xf32>
    %26 = vector.broadcast %24 : vector<324x1xf32> to vector<324x32xf32>
    %27 = vector.broadcast %25 : vector<1x32xf32> to vector<324x32xf32>
    %28 = arith.mulf %26, %27 : vector<324x32xf32>
    %c0_25 = arith.constant 0 : index
    %c0_26 = arith.constant 0 : index
    %29 = vector.load %arg11[%c0_25, %c0_26] : memref<324x32xf32, #tpu.memory_space<vmem>>, vector<324x32xf32>
    %30 = arith.addf %29, %28 : vector<324x32xf32>
    %c0_27 = arith.constant 0 : index
    %c0_28 = arith.constant 0 : index
    %31 = vector.load %arg11[%c0_27, %c0_28] : memref<324x32xf32, #tpu.memory_space<vmem>>, vector<324x32xf32>
    tpu.vector_store %arg11[%c0_27, %c0_28], %30 {strides = array<i32>} : memref<324x32xf32, #tpu.memory_space<vmem>>, vector<324x32xf32>,
    %c0_29 = arith.constant 0 : index
    %c18 = arith.constant 18 : index
    %c0_30 = arith.constant 0 : index
    %32 = vector.load %arg1[%c0_29, %c18, %c0_30] : memref<1x362x1xf32, #tpu.memory_space<vmem>>, vector<1x324x1xf32>
    %33 = vector.shape_cast %32 : vector<1x324x1xf32> to vector<324x1xf32>
    %c3 = arith.constant 3 : index
    %c0_31 = arith.constant 0 : index
    %34 = vector.load %arg2[%c3, %c0_31] : memref<9x32xf32, #tpu.memory_space<vmem>>, vector<1x32xf32>
    %35 = vector.broadcast %33 : vector<324x1xf32> to vector<324x32xf32>
    %36 = vector.broadcast %34 : vector<1x32xf32> to vector<324x32xf32>
    %37 = arith.mulf %35, %36 : vector<324x32xf32>
    %c0_32 = arith.constant 0 : index
    %c0_33 = arith.constant 0 : index
    %38 = vector.load %arg11[%c0_32, %c0_33] : memref<324x32xf32, #tpu.memory_space<vmem>>, vector<324x32xf32>
    %39 = arith.addf %38, %37 : vector<324x32xf32>
    %c0_34 = arith.constant 0 : index
    %c0_35 = arith.constant 0 : index
    %40 = vector.load %arg11[%c0_34, %c0_35] : memref<324x32xf32, #tpu.memory_space<vmem>>, vector<324x32xf32>
    tpu.vector_store %arg11[%c0_34, %c0_35], %39 {strides = array<i32>} : memref<324x32xf32, #tpu.memory_space<vmem>>, vector<324x32xf32>,
    %c0_36 = arith.constant 0 : index
    %c19 = arith.constant 19 : index
    %c0_37 = arith.constant 0 : index
    %41 = vector.load %arg1[%c0_36, %c19, %c0_37] : memref<1x362x1xf32, #tpu.memory_space<vmem>>, vector<1x324x1xf32>
    %42 = vector.shape_cast %41 : vector<1x324x1xf32> to vector<324x1xf32>
    %c4 = arith.constant 4 : index
    %c0_38 = arith.constant 0 : index
    %43 = vector.load %arg2[%c4, %c0_38] : memref<9x32xf32, #tpu.memory_space<vmem>>, vector<1x32xf32>
    %44 = vector.broadcast %42 : vector<324x1xf32> to vector<324x32xf32>
    %45 = vector.broadcast %43 : vector<1x32xf32> to vector<324x32xf32>
    %46 = arith.mulf %44, %45 : vector<324x32xf32>
    %c0_39 = arith.constant 0 : index
    %c0_40 = arith.constant 0 : index
    %47 = vector.load %arg11[%c0_39, %c0_40] : memref<324x32xf32, #tpu.memory_space<vmem>>, vector<324x32xf32>
    %48 = arith.addf %47, %46 : vector<324x32xf32>
    %c0_41 = arith.constant 0 : index
    %c0_42 = arith.constant 0 : index
    %49 = vector.load %arg11[%c0_41, %c0_42] : memref<324x32xf32, #tpu.memory_space<vmem>>, vector<324x32xf32>
    tpu.vector_store %arg11[%c0_41, %c0_42], %48 {strides = array<i32>} : memref<324x32xf32, #tpu.memory_space<vmem>>, vector<324x32xf32>,
    %c0_43 = arith.constant 0 : index
    %c20 = arith.constant 20 : index
    %c0_44 = arith.constant 0 : index
    %50 = vector.load %arg1[%c0_43, %c20, %c0_44] : memref<1x362x1xf32, #tpu.memory_space<vmem>>, vector<1x324x1xf32>
    %51 = vector.shape_cast %50 : vector<1x324x1xf32> to vector<324x1xf32>
    %c5 = arith.constant 5 : index
    %c0_45 = arith.constant 0 : index
    %52 = vector.load %arg2[%c5, %c0_45] : memref<9x32xf32, #tpu.memory_space<vmem>>, vector<1x32xf32>
    %53 = vector.broadcast %51 : vector<324x1xf32> to vector<324x32xf32>
    %54 = vector.broadcast %52 : vector<1x32xf32> to vector<324x32xf32>
    %55 = arith.mulf %53, %54 : vector<324x32xf32>
    %c0_46 = arith.constant 0 : index
    %c0_47 = arith.constant 0 : index
    %56 = vector.load %arg11[%c0_46, %c0_47] : memref<324x32xf32, #tpu.memory_space<vmem>>, vector<324x32xf32>
    %57 = arith.addf %56, %55 : vector<324x32xf32>
    %c0_48 = arith.constant 0 : index
    %c0_49 = arith.constant 0 : index
    %58 = vector.load %arg11[%c0_48, %c0_49] : memref<324x32xf32, #tpu.memory_space<vmem>>, vector<324x32xf32>
    tpu.vector_store %arg11[%c0_48, %c0_49], %57 {strides = array<i32>} : memref<324x32xf32, #tpu.memory_space<vmem>>, vector<324x32xf32>,
    %c0_50 = arith.constant 0 : index
    %c36 = arith.constant 36 : index
    %c0_51 = arith.constant 0 : index
    %59 = vector.load %arg1[%c0_50, %c36, %c0_51] : memref<1x362x1xf32, #tpu.memory_space<vmem>>, vector<1x324x1xf32>
    %60 = vector.shape_cast %59 : vector<1x324x1xf32> to vector<324x1xf32>
    %c6 = arith.constant 6 : index
    %c0_52 = arith.constant 0 : index
    %61 = vector.load %arg2[%c6, %c0_52] : memref<9x32xf32, #tpu.memory_space<vmem>>, vector<1x32xf32>
    %62 = vector.broadcast %60 : vector<324x1xf32> to vector<324x32xf32>
    %63 = vector.broadcast %61 : vector<1x32xf32> to vector<324x32xf32>
    %64 = arith.mulf %62, %63 : vector<324x32xf32>
    %c0_53 = arith.constant 0 : index
    %c0_54 = arith.constant 0 : index
    %65 = vector.load %arg11[%c0_53, %c0_54] : memref<324x32xf32, #tpu.memory_space<vmem>>, vector<324x32xf32>
    %66 = arith.addf %65, %64 : vector<324x32xf32>
    %c0_55 = arith.constant 0 : index
    %c0_56 = arith.constant 0 : index
    %67 = vector.load %arg11[%c0_55, %c0_56] : memref<324x32xf32, #tpu.memory_space<vmem>>, vector<324x32xf32>
    tpu.vector_store %arg11[%c0_55, %c0_56], %66 {strides = array<i32>} : memref<324x32xf32, #tpu.memory_space<vmem>>, vector<324x32xf32>,
    %c0_57 = arith.constant 0 : index
    %c37 = arith.constant 37 : index
    %c0_58 = arith.constant 0 : index
    %68 = vector.load %arg1[%c0_57, %c37, %c0_58] : memref<1x362x1xf32, #tpu.memory_space<vmem>>, vector<1x324x1xf32>
    %69 = vector.shape_cast %68 : vector<1x324x1xf32> to vector<324x1xf32>
    %c7 = arith.constant 7 : index
    %c0_59 = arith.constant 0 : index
    %70 = vector.load %arg2[%c7, %c0_59] : memref<9x32xf32, #tpu.memory_space<vmem>>, vector<1x32xf32>
    %71 = vector.broadcast %69 : vector<324x1xf32> to vector<324x32xf32>
    %72 = vector.broadcast %70 : vector<1x32xf32> to vector<324x32xf32>
    %73 = arith.mulf %71, %72 : vector<324x32xf32>
    %c0_60 = arith.constant 0 : index
    %c0_61 = arith.constant 0 : index
    %74 = vector.load %arg11[%c0_60, %c0_61] : memref<324x32xf32, #tpu.memory_space<vmem>>, vector<324x32xf32>
    %75 = arith.addf %74, %73 : vector<324x32xf32>
    %c0_62 = arith.constant 0 : index
    %c0_63 = arith.constant 0 : index
    %76 = vector.load %arg11[%c0_62, %c0_63] : memref<324x32xf32, #tpu.memory_space<vmem>>, vector<324x32xf32>
    tpu.vector_store %arg11[%c0_62, %c0_63], %75 {strides = array<i32>} : memref<324x32xf32, #tpu.memory_space<vmem>>, vector<324x32xf32>,
    %c0_64 = arith.constant 0 : index
    %c38 = arith.constant 38 : index
    %c0_65 = arith.constant 0 : index
    %77 = vector.load %arg1[%c0_64, %c38, %c0_65] : memref<1x362x1xf32, #tpu.memory_space<vmem>>, vector<1x324x1xf32>
    %78 = vector.shape_cast %77 : vector<1x324x1xf32> to vector<324x1xf32>
    %c8 = arith.constant 8 : index
    %c0_66 = arith.constant 0 : index
    %79 = vector.load %arg2[%c8, %c0_66] : memref<9x32xf32, #tpu.memory_space<vmem>>, vector<1x32xf32>
    %80 = vector.broadcast %78 : vector<324x1xf32> to vector<324x32xf32>
    %81 = vector.broadcast %79 : vector<1x32xf32> to vector<324x32xf32>
    %82 = arith.mulf %80, %81 : vector<324x32xf32>
    %c0_67 = arith.constant 0 : index
    %c0_68 = arith.constant 0 : index
    %83 = vector.load %arg11[%c0_67, %c0_68] : memref<324x32xf32, #tpu.memory_space<vmem>>, vector<324x32xf32>
    %84 = arith.addf %83, %82 : vector<324x32xf32>
    %c0_69 = arith.constant 0 : index
    %c0_70 = arith.constant 0 : index
    %85 = vector.load %arg11[%c0_69, %c0_70] : memref<324x32xf32, #tpu.memory_space<vmem>>, vector<324x32xf32>
    tpu.vector_store %arg11[%c0_69, %c0_70], %84 {strides = array<i32>} : memref<324x32xf32, #tpu.memory_space<vmem>>, vector<324x32xf32>,
    %c19_71 = arith.constant 19 : index
    %c0_72 = arith.constant 0 : index
    %86 = tpu.strided_load %arg11[%c19_71, %c0_72] {strides = array<i32: 2, 1>} : memref<324x32xf32, #tpu.memory_space<vmem>>, vector<8x32xf32>
    %c20_73 = arith.constant 20 : index
    %c0_74 = arith.constant 0 : index
    %87 = tpu.strided_load %arg11[%c20_73, %c0_74] {strides = array<i32: 2, 1>} : memref<324x32xf32, #tpu.memory_space<vmem>>, vector<8x32xf32>
    %c37_75 = arith.constant 37 : index
    %c0_76 = arith.constant 0 : index
    %88 = tpu.strided_load %arg11[%c37_75, %c0_76] {strides = array<i32: 2, 1>} : memref<324x32xf32, #tpu.memory_space<vmem>>, vector<8x32xf32>
    %c38_77 = arith.constant 38 : index
    %c0_78 = arith.constant 0 : index
    %89 = tpu.strided_load %arg11[%c38_77, %c0_78] {strides = array<i32: 2, 1>} : memref<324x32xf32, #tpu.memory_space<vmem>>, vector<8x32xf32>
    %90 = arith.maximumf %86, %87 : vector<8x32xf32>
    %91 = arith.maximumf %88, %89 : vector<8x32xf32>
    %92 = arith.maximumf %90, %91 : vector<8x32xf32>
    %cst_79 = arith.constant 0.000000e+00 : f32
    %93 = vector.broadcast %cst_79 : f32 to vector<8x32xf32>
    %94 = arith.maximumf %92, %93 : vector<8x32xf32>
    %c22 = arith.constant 22 : index
    %c0_80 = arith.constant 0 : index
    %95 = vector.load %arg14[%c22, %c0_80] : memref<122x32xf32, #tpu.memory_space<vmem>>, vector<8x32xf32>
    tpu.vector_store %arg14[%c22, %c0_80], %94 {strides = array<i32>} : memref<122x32xf32, #tpu.memory_space<vmem>>, vector<8x32xf32>,
    %c55 = arith.constant 55 : index
    %c0_81 = arith.constant 0 : index
    %96 = tpu.strided_load %arg11[%c55, %c0_81] {strides = array<i32: 2, 1>} : memref<324x32xf32, #tpu.memory_space<vmem>>, vector<8x32xf32>
    %c56 = arith.constant 56 : index
    %c0_82 = arith.constant 0 : index
    %97 = tpu.strided_load %arg11[%c56, %c0_82] {strides = array<i32: 2, 1>} : memref<324x32xf32, #tpu.memory_space<vmem>>, vector<8x32xf32>
    %c73 = arith.constant 73 : index
    %c0_83 = arith.constant 0 : index
    %98 = tpu.strided_load %arg11[%c73, %c0_83] {strides = array<i32: 2, 1>} : memref<324x32xf32, #tpu.memory_space<vmem>>, vector<8x32xf32>
    %c74 = arith.constant 74 : index
    %c0_84 = arith.constant 0 : index
    %99 = tpu.strided_load %arg11[%c74, %c0_84] {strides = array<i32: 2, 1>} : memref<324x32xf32, #tpu.memory_space<vmem>>, vector<8x32xf32>
    %100 = arith.maximumf %96, %97 : vector<8x32xf32>
    %101 = arith.maximumf %98, %99 : vector<8x32xf32>
    %102 = arith.maximumf %100, %101 : vector<8x32xf32>
    %cst_85 = arith.constant 0.000000e+00 : f32
    %103 = vector.broadcast %cst_85 : f32 to vector<8x32xf32>
    %104 = arith.maximumf %102, %103 : vector<8x32xf32>
    %c32 = arith.constant 32 : index
    %c0_86 = arith.constant 0 : index
    %105 = vector.load %arg14[%c32, %c0_86] : memref<122x32xf32, #tpu.memory_space<vmem>>, vector<8x32xf32>
    tpu.vector_store %arg14[%c32, %c0_86], %104 {strides = array<i32>} : memref<122x32xf32, #tpu.memory_space<vmem>>, vector<8x32xf32>,
    %c91 = arith.constant 91 : index
    %c0_87 = arith.constant 0 : index
    %106 = tpu.strided_load %arg11[%c91, %c0_87] {strides = array<i32: 2, 1>} : memref<324x32xf32, #tpu.memory_space<vmem>>, vector<8x32xf32>
    %c92 = arith.constant 92 : index
    %c0_88 = arith.constant 0 : index
    %107 = tpu.strided_load %arg11[%c92, %c0_88] {strides = array<i32: 2, 1>} : memref<324x32xf32, #tpu.memory_space<vmem>>, vector<8x32xf32>
    %c109 = arith.constant 109 : index
    %c0_89 = arith.constant 0 : index
    %108 = tpu.strided_load %arg11[%c109, %c0_89] {strides = array<i32: 2, 1>} : memref<324x32xf32, #tpu.memory_space<vmem>>, vector<8x32xf32>
    %c110 = arith.constant 110 : index
    %c0_90 = arith.constant 0 : index
    %109 = tpu.strided_load %arg11[%c110, %c0_90] {strides = array<i32: 2, 1>} : memref<324x32xf32, #tpu.memory_space<vmem>>, vector<8x32xf32>
    %110 = arith.maximumf %106, %107 : vector<8x32xf32>
    %111 = arith.maximumf %108, %109 : vector<8x32xf32>
    %112 = arith.maximumf %110, %111 : vector<8x32xf32>
    %cst_91 = arith.constant 0.000000e+00 : f32
    %113 = vector.broadcast %cst_91 : f32 to vector<8x32xf32>
    %114 = arith.maximumf %112, %113 : vector<8x32xf32>
    %c42 = arith.constant 42 : index
    %c0_92 = arith.constant 0 : index
    %115 = vector.load %arg14[%c42, %c0_92] : memref<122x32xf32, #tpu.memory_space<vmem>>, vector<8x32xf32>
    tpu.vector_store %arg14[%c42, %c0_92], %114 {strides = array<i32>} : memref<122x32xf32, #tpu.memory_space<vmem>>, vector<8x32xf32>,
    %c127 = arith.constant 127 : index
    %c0_93 = arith.constant 0 : index
    %116 = tpu.strided_load %arg11[%c127, %c0_93] {strides = array<i32: 2, 1>} : memref<324x32xf32, #tpu.memory_space<vmem>>, vector<8x32xf32>
    %c128 = arith.constant 128 : index
    %c0_94 = arith.constant 0 : index
    %117 = tpu.strided_load %arg11[%c128, %c0_94] {strides = array<i32: 2, 1>} : memref<324x32xf32, #tpu.memory_space<vmem>>, vector<8x32xf32>
    %c145 = arith.constant 145 : index
    %c0_95 = arith.constant 0 : index
    %118 = tpu.strided_load %arg11[%c145, %c0_95] {strides = array<i32: 2, 1>} : memref<324x32xf32, #tpu.memory_space<vmem>>, vector<8x32xf32>
    %c146 = arith.constant 146 : index
    %c0_96 = arith.constant 0 : index
    %119 = tpu.strided_load %arg11[%c146, %c0_96] {strides = array<i32: 2, 1>} : memref<324x32xf32, #tpu.memory_space<vmem>>, vector<8x32xf32>
    %120 = arith.maximumf %116, %117 : vector<8x32xf32>
    %121 = arith.maximumf %118, %119 : vector<8x32xf32>
    %122 = arith.maximumf %120, %121 : vector<8x32xf32>
    %cst_97 = arith.constant 0.000000e+00 : f32
    %123 = vector.broadcast %cst_97 : f32 to vector<8x32xf32>
    %124 = arith.maximumf %122, %123 : vector<8x32xf32>
    %c52 = arith.constant 52 : index
    %c0_98 = arith.constant 0 : index
    %125 = vector.load %arg14[%c52, %c0_98] : memref<122x32xf32, #tpu.memory_space<vmem>>, vector<8x32xf32>
    tpu.vector_store %arg14[%c52, %c0_98], %124 {strides = array<i32>} : memref<122x32xf32, #tpu.memory_space<vmem>>, vector<8x32xf32>,
    %c163 = arith.constant 163 : index
    %c0_99 = arith.constant 0 : index
    %126 = tpu.strided_load %arg11[%c163, %c0_99] {strides = array<i32: 2, 1>} : memref<324x32xf32, #tpu.memory_space<vmem>>, vector<8x32xf32>
    %c164 = arith.constant 164 : index
    %c0_100 = arith.constant 0 : index
    %127 = tpu.strided_load %arg11[%c164, %c0_100] {strides = array<i32: 2, 1>} : memref<324x32xf32, #tpu.memory_space<vmem>>, vector<8x32xf32>
    %c181 = arith.constant 181 : index
    %c0_101 = arith.constant 0 : index
    %128 = tpu.strided_load %arg11[%c181, %c0_101] {strides = array<i32: 2, 1>} : memref<324x32xf32, #tpu.memory_space<vmem>>, vector<8x32xf32>
    %c182 = arith.constant 182 : index
    %c0_102 = arith.constant 0 : index
    %129 = tpu.strided_load %arg11[%c182, %c0_102] {strides = array<i32: 2, 1>} : memref<324x32xf32, #tpu.memory_space<vmem>>, vector<8x32xf32>
    %130 = arith.maximumf %126, %127 : vector<8x32xf32>
    %131 = arith.maximumf %128, %129 : vector<8x32xf32>
    %132 = arith.maximumf %130, %131 : vector<8x32xf32>
    %cst_103 = arith.constant 0.000000e+00 : f32
    %133 = vector.broadcast %cst_103 : f32 to vector<8x32xf32>
    %134 = arith.maximumf %132, %133 : vector<8x32xf32>
    %c62 = arith.constant 62 : index
    %c0_104 = arith.constant 0 : index
    %135 = vector.load %arg14[%c62, %c0_104] : memref<122x32xf32, #tpu.memory_space<vmem>>, vector<8x32xf32>
    tpu.vector_store %arg14[%c62, %c0_104], %134 {strides = array<i32>} : memref<122x32xf32, #tpu.memory_space<vmem>>, vector<8x32xf32>,
    %c199 = arith.constant 199 : index
    %c0_105 = arith.constant 0 : index
    %136 = tpu.strided_load %arg11[%c199, %c0_105] {strides = array<i32: 2, 1>} : memref<324x32xf32, #tpu.memory_space<vmem>>, vector<8x32xf32>
    %c200 = arith.constant 200 : index
    %c0_106 = arith.constant 0 : index
    %137 = tpu.strided_load %arg11[%c200, %c0_106] {strides = array<i32: 2, 1>} : memref<324x32xf32, #tpu.memory_space<vmem>>, vector<8x32xf32>
    %c217 = arith.constant 217 : index
    %c0_107 = arith.constant 0 : index
    %138 = tpu.strided_load %arg11[%c217, %c0_107] {strides = array<i32: 2, 1>} : memref<324x32xf32, #tpu.memory_space<vmem>>, vector<8x32xf32>
    %c218 = arith.constant 218 : index
    %c0_108 = arith.constant 0 : index
    %139 = tpu.strided_load %arg11[%c218, %c0_108] {strides = array<i32: 2, 1>} : memref<324x32xf32, #tpu.memory_space<vmem>>, vector<8x32xf32>
    %140 = arith.maximumf %136, %137 : vector<8x32xf32>
    %141 = arith.maximumf %138, %139 : vector<8x32xf32>
    %142 = arith.maximumf %140, %141 : vector<8x32xf32>
    %cst_109 = arith.constant 0.000000e+00 : f32
    %143 = vector.broadcast %cst_109 : f32 to vector<8x32xf32>
    %144 = arith.maximumf %142, %143 : vector<8x32xf32>
    %c72 = arith.constant 72 : index
    %c0_110 = arith.constant 0 : index
    %145 = vector.load %arg14[%c72, %c0_110] : memref<122x32xf32, #tpu.memory_space<vmem>>, vector<8x32xf32>
    tpu.vector_store %arg14[%c72, %c0_110], %144 {strides = array<i32>} : memref<122x32xf32, #tpu.memory_space<vmem>>, vector<8x32xf32>,
    %c235 = arith.constant 235 : index
    %c0_111 = arith.constant 0 : index
    %146 = tpu.strided_load %arg11[%c235, %c0_111] {strides = array<i32: 2, 1>} : memref<324x32xf32, #tpu.memory_space<vmem>>, vector<8x32xf32>
    %c236 = arith.constant 236 : index
    %c0_112 = arith.constant 0 : index
    %147 = tpu.strided_load %arg11[%c236, %c0_112] {strides = array<i32: 2, 1>} : memref<324x32xf32, #tpu.memory_space<vmem>>, vector<8x32xf32>
    %c253 = arith.constant 253 : index
    %c0_113 = arith.constant 0 : index
    %148 = tpu.strided_load %arg11[%c253, %c0_113] {strides = array<i32: 2, 1>} : memref<324x32xf32, #tpu.memory_space<vmem>>, vector<8x32xf32>
    %c254 = arith.constant 254 : index
    %c0_114 = arith.constant 0 : index
    %149 = tpu.strided_load %arg11[%c254, %c0_114] {strides = array<i32: 2, 1>} : memref<324x32xf32, #tpu.memory_space<vmem>>, vector<8x32xf32>
    %150 = arith.maximumf %146, %147 : vector<8x32xf32>
    %151 = arith.maximumf %148, %149 : vector<8x32xf32>
    %152 = arith.maximumf %150, %151 : vector<8x32xf32>
    %cst_115 = arith.constant 0.000000e+00 : f32
    %153 = vector.broadcast %cst_115 : f32 to vector<8x32xf32>
    %154 = arith.maximumf %152, %153 : vector<8x32xf32>
    %c82 = arith.constant 82 : index
    %c0_116 = arith.constant 0 : index
    %155 = vector.load %arg14[%c82, %c0_116] : memref<122x32xf32, #tpu.memory_space<vmem>>, vector<8x32xf32>
    tpu.vector_store %arg14[%c82, %c0_116], %154 {strides = array<i32>} : memref<122x32xf32, #tpu.memory_space<vmem>>, vector<8x32xf32>,
    %c271 = arith.constant 271 : index
    %c0_117 = arith.constant 0 : index
    %156 = tpu.strided_load %arg11[%c271, %c0_117] {strides = array<i32: 2, 1>} : memref<324x32xf32, #tpu.memory_space<vmem>>, vector<8x32xf32>
    %c272 = arith.constant 272 : index
    %c0_118 = arith.constant 0 : index
    %157 = tpu.strided_load %arg11[%c272, %c0_118] {strides = array<i32: 2, 1>} : memref<324x32xf32, #tpu.memory_space<vmem>>, vector<8x32xf32>
    %c289 = arith.constant 289 : index
    %c0_119 = arith.constant 0 : index
    %158 = tpu.strided_load %arg11[%c289, %c0_119] {strides = array<i32: 2, 1>} : memref<324x32xf32, #tpu.memory_space<vmem>>, vector<8x32xf32>
    %c290 = arith.constant 290 : index
    %c0_120 = arith.constant 0 : index
    %159 = tpu.strided_load %arg11[%c290, %c0_120] {strides = array<i32: 2, 1>} : memref<324x32xf32, #tpu.memory_space<vmem>>, vector<8x32xf32>
    %160 = arith.maximumf %156, %157 : vector<8x32xf32>
    %161 = arith.maximumf %158, %159 : vector<8x32xf32>
    %162 = arith.maximumf %160, %161 : vector<8x32xf32>
    %cst_121 = arith.constant 0.000000e+00 : f32
    %163 = vector.broadcast %cst_121 : f32 to vector<8x32xf32>
    %164 = arith.maximumf %162, %163 : vector<8x32xf32>
    %c92_122 = arith.constant 92 : index
    %c0_123 = arith.constant 0 : index
    %165 = vector.load %arg14[%c92_122, %c0_123] : memref<122x32xf32, #tpu.memory_space<vmem>>, vector<8x32xf32>
    tpu.vector_store %arg14[%c92_122, %c0_123], %164 {strides = array<i32>} : memref<122x32xf32, #tpu.memory_space<vmem>>, vector<8x32xf32>,
    %c0_124 = arith.constant 0 : index
    %c0_125 = arith.constant 0 : index
    %166 = vector.load %arg14[%c0_124, %c0_125] : memref<122x32xf32, #tpu.memory_space<vmem>>, vector<100x32xf32>
    %167 = arith.truncf %166 : vector<100x32xf32> to vector<100x32xbf16>
    %c0_126 = arith.constant 0 : index
    %c0_127 = arith.constant 0 : index
    %c0_128 = arith.constant 0 : index
    %168 = vector.load %arg4[%c0_126, %c0_127, %c0_128] : memref<9x32x64xbf16, #tpu.memory_space<vmem>>, vector<1x32x64xbf16>
    %169 = vector.shape_cast %168 : vector<1x32x64xbf16> to vector<32x64xbf16>
    %cst_129 = arith.constant dense<0.000000e+00> : vector<100x64xf32>
    %170 = tpu.matmul %167, %169, %cst_129 {dimension_numbers = #tpu.dot_dimension_numbers<[1], [0], [0], [1], [0, 0, 1, 1], [], []>} : vector<100x32xbf16>, vector<32x64xbf16>, vector<100x64xf32> -> vector<100x64xf32>
    %c0_130 = arith.constant 0 : index
    %c0_131 = arith.constant 0 : index
    %171 = vector.load %arg5[%c0_130, %c0_131] : memref<1x64xf32, #tpu.memory_space<vmem>>, vector<1x64xf32>
    %172 = vector.broadcast %171 : vector<1x64xf32> to vector<100x64xf32>
    %173 = arith.addf %170, %172 : vector<100x64xf32>
    %c0_132 = arith.constant 0 : index
    %c0_133 = arith.constant 0 : index
    %174 = vector.load %arg12[%c0_132, %c0_133] : memref<100x64xf32, #tpu.memory_space<vmem>>, vector<100x64xf32>
    tpu.vector_store %arg12[%c0_132, %c0_133], %173 {strides = array<i32>} : memref<100x64xf32, #tpu.memory_space<vmem>>, vector<100x64xf32>,
    %c1_134 = arith.constant 1 : index
    %c0_135 = arith.constant 0 : index
    %175 = vector.load %arg14[%c1_134, %c0_135] : memref<122x32xf32, #tpu.memory_space<vmem>>, vector<100x32xf32>
    %176 = arith.truncf %175 : vector<100x32xf32> to vector<100x32xbf16>
    %c1_136 = arith.constant 1 : index
    %c0_137 = arith.constant 0 : index
    %c0_138 = arith.constant 0 : index
    %177 = vector.load %arg4[%c1_136, %c0_137, %c0_138] : memref<9x32x64xbf16, #tpu.memory_space<vmem>>, vector<1x32x64xbf16>
    %178 = vector.shape_cast %177 : vector<1x32x64xbf16> to vector<32x64xbf16>
    %cst_139 = arith.constant dense<0.000000e+00> : vector<100x64xf32>
    %179 = tpu.matmul %176, %178, %cst_139 {dimension_numbers = #tpu.dot_dimension_numbers<[1], [0], [0], [1], [0, 0, 1, 1], [], []>} : vector<100x32xbf16>, vector<32x64xbf16>, vector<100x64xf32> -> vector<100x64xf32>
    %c0_140 = arith.constant 0 : index
    %c0_141 = arith.constant 0 : index
    %180 = vector.load %arg12[%c0_140, %c0_141] : memref<100x64xf32, #tpu.memory_space<vmem>>, vector<100x64xf32>
    %181 = arith.addf %180, %179 : vector<100x64xf32>
    %c0_142 = arith.constant 0 : index
    %c0_143 = arith.constant 0 : index
    %182 = vector.load %arg12[%c0_142, %c0_143] : memref<100x64xf32, #tpu.memory_space<vmem>>, vector<100x64xf32>
    tpu.vector_store %arg12[%c0_142, %c0_143], %181 {strides = array<i32>} : memref<100x64xf32, #tpu.memory_space<vmem>>, vector<100x64xf32>,
    %c2_144 = arith.constant 2 : index
    %c0_145 = arith.constant 0 : index
    %183 = vector.load %arg14[%c2_144, %c0_145] : memref<122x32xf32, #tpu.memory_space<vmem>>, vector<100x32xf32>
    %184 = arith.truncf %183 : vector<100x32xf32> to vector<100x32xbf16>
    %c2_146 = arith.constant 2 : index
    %c0_147 = arith.constant 0 : index
    %c0_148 = arith.constant 0 : index
    %185 = vector.load %arg4[%c2_146, %c0_147, %c0_148] : memref<9x32x64xbf16, #tpu.memory_space<vmem>>, vector<1x32x64xbf16>
    %186 = vector.shape_cast %185 : vector<1x32x64xbf16> to vector<32x64xbf16>
    %cst_149 = arith.constant dense<0.000000e+00> : vector<100x64xf32>
    %187 = tpu.matmul %184, %186, %cst_149 {dimension_numbers = #tpu.dot_dimension_numbers<[1], [0], [0], [1], [0, 0, 1, 1], [], []>} : vector<100x32xbf16>, vector<32x64xbf16>, vector<100x64xf32> -> vector<100x64xf32>
    %c0_150 = arith.constant 0 : index
    %c0_151 = arith.constant 0 : index
    %188 = vector.load %arg12[%c0_150, %c0_151] : memref<100x64xf32, #tpu.memory_space<vmem>>, vector<100x64xf32>
    %189 = arith.addf %188, %187 : vector<100x64xf32>
    %c0_152 = arith.constant 0 : index
    %c0_153 = arith.constant 0 : index
    %190 = vector.load %arg12[%c0_152, %c0_153] : memref<100x64xf32, #tpu.memory_space<vmem>>, vector<100x64xf32>
    tpu.vector_store %arg12[%c0_152, %c0_153], %189 {strides = array<i32>} : memref<100x64xf32, #tpu.memory_space<vmem>>, vector<100x64xf32>,
    %c10 = arith.constant 10 : index
    %c0_154 = arith.constant 0 : index
    %191 = vector.load %arg14[%c10, %c0_154] : memref<122x32xf32, #tpu.memory_space<vmem>>, vector<100x32xf32>
    %192 = arith.truncf %191 : vector<100x32xf32> to vector<100x32xbf16>
    %c3_155 = arith.constant 3 : index
    %c0_156 = arith.constant 0 : index
    %c0_157 = arith.constant 0 : index
    %193 = vector.load %arg4[%c3_155, %c0_156, %c0_157] : memref<9x32x64xbf16, #tpu.memory_space<vmem>>, vector<1x32x64xbf16>
    %194 = vector.shape_cast %193 : vector<1x32x64xbf16> to vector<32x64xbf16>
    %cst_158 = arith.constant dense<0.000000e+00> : vector<100x64xf32>
    %195 = tpu.matmul %192, %194, %cst_158 {dimension_numbers = #tpu.dot_dimension_numbers<[1], [0], [0], [1], [0, 0, 1, 1], [], []>} : vector<100x32xbf16>, vector<32x64xbf16>, vector<100x64xf32> -> vector<100x64xf32>
    %c0_159 = arith.constant 0 : index
    %c0_160 = arith.constant 0 : index
    %196 = vector.load %arg12[%c0_159, %c0_160] : memref<100x64xf32, #tpu.memory_space<vmem>>, vector<100x64xf32>
    %197 = arith.addf %196, %195 : vector<100x64xf32>
    %c0_161 = arith.constant 0 : index
    %c0_162 = arith.constant 0 : index
    %198 = vector.load %arg12[%c0_161, %c0_162] : memref<100x64xf32, #tpu.memory_space<vmem>>, vector<100x64xf32>
    tpu.vector_store %arg12[%c0_161, %c0_162], %197 {strides = array<i32>} : memref<100x64xf32, #tpu.memory_space<vmem>>, vector<100x64xf32>,
    %c11 = arith.constant 11 : index
    %c0_163 = arith.constant 0 : index
    %199 = vector.load %arg14[%c11, %c0_163] : memref<122x32xf32, #tpu.memory_space<vmem>>, vector<100x32xf32>
    %200 = arith.truncf %199 : vector<100x32xf32> to vector<100x32xbf16>
    %c4_164 = arith.constant 4 : index
    %c0_165 = arith.constant 0 : index
    %c0_166 = arith.constant 0 : index
    %201 = vector.load %arg4[%c4_164, %c0_165, %c0_166] : memref<9x32x64xbf16, #tpu.memory_space<vmem>>, vector<1x32x64xbf16>
    %202 = vector.shape_cast %201 : vector<1x32x64xbf16> to vector<32x64xbf16>
    %cst_167 = arith.constant dense<0.000000e+00> : vector<100x64xf32>
    %203 = tpu.matmul %200, %202, %cst_167 {dimension_numbers = #tpu.dot_dimension_numbers<[1], [0], [0], [1], [0, 0, 1, 1], [], []>} : vector<100x32xbf16>, vector<32x64xbf16>, vector<100x64xf32> -> vector<100x64xf32>
    %c0_168 = arith.constant 0 : index
    %c0_169 = arith.constant 0 : index
    %204 = vector.load %arg12[%c0_168, %c0_169] : memref<100x64xf32, #tpu.memory_space<vmem>>, vector<100x64xf32>
    %205 = arith.addf %204, %203 : vector<100x64xf32>
    %c0_170 = arith.constant 0 : index
    %c0_171 = arith.constant 0 : index
    %206 = vector.load %arg12[%c0_170, %c0_171] : memref<100x64xf32, #tpu.memory_space<vmem>>, vector<100x64xf32>
    tpu.vector_store %arg12[%c0_170, %c0_171], %205 {strides = array<i32>} : memref<100x64xf32, #tpu.memory_space<vmem>>, vector<100x64xf32>,
    %c12 = arith.constant 12 : index
    %c0_172 = arith.constant 0 : index
    %207 = vector.load %arg14[%c12, %c0_172] : memref<122x32xf32, #tpu.memory_space<vmem>>, vector<100x32xf32>
    %208 = arith.truncf %207 : vector<100x32xf32> to vector<100x32xbf16>
    %c5_173 = arith.constant 5 : index
    %c0_174 = arith.constant 0 : index
    %c0_175 = arith.constant 0 : index
    %209 = vector.load %arg4[%c5_173, %c0_174, %c0_175] : memref<9x32x64xbf16, #tpu.memory_space<vmem>>, vector<1x32x64xbf16>
    %210 = vector.shape_cast %209 : vector<1x32x64xbf16> to vector<32x64xbf16>
    %cst_176 = arith.constant dense<0.000000e+00> : vector<100x64xf32>
    %211 = tpu.matmul %208, %210, %cst_176 {dimension_numbers = #tpu.dot_dimension_numbers<[1], [0], [0], [1], [0, 0, 1, 1], [], []>} : vector<100x32xbf16>, vector<32x64xbf16>, vector<100x64xf32> -> vector<100x64xf32>
    %c0_177 = arith.constant 0 : index
    %c0_178 = arith.constant 0 : index
    %212 = vector.load %arg12[%c0_177, %c0_178] : memref<100x64xf32, #tpu.memory_space<vmem>>, vector<100x64xf32>
    %213 = arith.addf %212, %211 : vector<100x64xf32>
    %c0_179 = arith.constant 0 : index
    %c0_180 = arith.constant 0 : index
    %214 = vector.load %arg12[%c0_179, %c0_180] : memref<100x64xf32, #tpu.memory_space<vmem>>, vector<100x64xf32>
    tpu.vector_store %arg12[%c0_179, %c0_180], %213 {strides = array<i32>} : memref<100x64xf32, #tpu.memory_space<vmem>>, vector<100x64xf32>,
    %c20_181 = arith.constant 20 : index
    %c0_182 = arith.constant 0 : index
    %215 = vector.load %arg14[%c20_181, %c0_182] : memref<122x32xf32, #tpu.memory_space<vmem>>, vector<100x32xf32>
    %216 = arith.truncf %215 : vector<100x32xf32> to vector<100x32xbf16>
    %c6_183 = arith.constant 6 : index
    %c0_184 = arith.constant 0 : index
    %c0_185 = arith.constant 0 : index
    %217 = vector.load %arg4[%c6_183, %c0_184, %c0_185] : memref<9x32x64xbf16, #tpu.memory_space<vmem>>, vector<1x32x64xbf16>
    %218 = vector.shape_cast %217 : vector<1x32x64xbf16> to vector<32x64xbf16>
    %cst_186 = arith.constant dense<0.000000e+00> : vector<100x64xf32>
    %219 = tpu.matmul %216, %218, %cst_186 {dimension_numbers = #tpu.dot_dimension_numbers<[1], [0], [0], [1], [0, 0, 1, 1], [], []>} : vector<100x32xbf16>, vector<32x64xbf16>, vector<100x64xf32> -> vector<100x64xf32>
    %c0_187 = arith.constant 0 : index
    %c0_188 = arith.constant 0 : index
    %220 = vector.load %arg12[%c0_187, %c0_188] : memref<100x64xf32, #tpu.memory_space<vmem>>, vector<100x64xf32>
    %221 = arith.addf %220, %219 : vector<100x64xf32>
    %c0_189 = arith.constant 0 : index
    %c0_190 = arith.constant 0 : index
    %222 = vector.load %arg12[%c0_189, %c0_190] : memref<100x64xf32, #tpu.memory_space<vmem>>, vector<100x64xf32>
    tpu.vector_store %arg12[%c0_189, %c0_190], %221 {strides = array<i32>} : memref<100x64xf32, #tpu.memory_space<vmem>>, vector<100x64xf32>,
    %c21 = arith.constant 21 : index
    %c0_191 = arith.constant 0 : index
    %223 = vector.load %arg14[%c21, %c0_191] : memref<122x32xf32, #tpu.memory_space<vmem>>, vector<100x32xf32>
    %224 = arith.truncf %223 : vector<100x32xf32> to vector<100x32xbf16>
    %c7_192 = arith.constant 7 : index
    %c0_193 = arith.constant 0 : index
    %c0_194 = arith.constant 0 : index
    %225 = vector.load %arg4[%c7_192, %c0_193, %c0_194] : memref<9x32x64xbf16, #tpu.memory_space<vmem>>, vector<1x32x64xbf16>
    %226 = vector.shape_cast %225 : vector<1x32x64xbf16> to vector<32x64xbf16>
    %cst_195 = arith.constant dense<0.000000e+00> : vector<100x64xf32>
    %227 = tpu.matmul %224, %226, %cst_195 {dimension_numbers = #tpu.dot_dimension_numbers<[1], [0], [0], [1], [0, 0, 1, 1], [], []>} : vector<100x32xbf16>, vector<32x64xbf16>, vector<100x64xf32> -> vector<100x64xf32>
    %c0_196 = arith.constant 0 : index
    %c0_197 = arith.constant 0 : index
    %228 = vector.load %arg12[%c0_196, %c0_197] : memref<100x64xf32, #tpu.memory_space<vmem>>, vector<100x64xf32>
    %229 = arith.addf %228, %227 : vector<100x64xf32>
    %c0_198 = arith.constant 0 : index
    %c0_199 = arith.constant 0 : index
    %230 = vector.load %arg12[%c0_198, %c0_199] : memref<100x64xf32, #tpu.memory_space<vmem>>, vector<100x64xf32>
    tpu.vector_store %arg12[%c0_198, %c0_199], %229 {strides = array<i32>} : memref<100x64xf32, #tpu.memory_space<vmem>>, vector<100x64xf32>,
    %c22_200 = arith.constant 22 : index
    %c0_201 = arith.constant 0 : index
    %231 = vector.load %arg14[%c22_200, %c0_201] : memref<122x32xf32, #tpu.memory_space<vmem>>, vector<100x32xf32>
    %232 = arith.truncf %231 : vector<100x32xf32> to vector<100x32xbf16>
    %c8_202 = arith.constant 8 : index
    %c0_203 = arith.constant 0 : index
    %c0_204 = arith.constant 0 : index
    %233 = vector.load %arg4[%c8_202, %c0_203, %c0_204] : memref<9x32x64xbf16, #tpu.memory_space<vmem>>, vector<1x32x64xbf16>
    %234 = vector.shape_cast %233 : vector<1x32x64xbf16> to vector<32x64xbf16>
    %cst_205 = arith.constant dense<0.000000e+00> : vector<100x64xf32>
    %235 = tpu.matmul %232, %234, %cst_205 {dimension_numbers = #tpu.dot_dimension_numbers<[1], [0], [0], [1], [0, 0, 1, 1], [], []>} : vector<100x32xbf16>, vector<32x64xbf16>, vector<100x64xf32> -> vector<100x64xf32>
    %c0_206 = arith.constant 0 : index
    %c0_207 = arith.constant 0 : index
    %236 = vector.load %arg12[%c0_206, %c0_207] : memref<100x64xf32, #tpu.memory_space<vmem>>, vector<100x64xf32>
    %237 = arith.addf %236, %235 : vector<100x64xf32>
    %c0_208 = arith.constant 0 : index
    %c0_209 = arith.constant 0 : index
    %238 = vector.load %arg12[%c0_208, %c0_209] : memref<100x64xf32, #tpu.memory_space<vmem>>, vector<100x64xf32>
    tpu.vector_store %arg12[%c0_208, %c0_209], %237 {strides = array<i32>} : memref<100x64xf32, #tpu.memory_space<vmem>>, vector<100x64xf32>,
    %c11_210 = arith.constant 11 : index
    %c0_211 = arith.constant 0 : index
    %239 = tpu.strided_load %arg12[%c11_210, %c0_211] {strides = array<i32: 2, 1>} : memref<100x64xf32, #tpu.memory_space<vmem>>, vector<4x64xf32>
    %c12_212 = arith.constant 12 : index
    %c0_213 = arith.constant 0 : index
    %240 = tpu.strided_load %arg12[%c12_212, %c0_213] {strides = array<i32: 2, 1>} : memref<100x64xf32, #tpu.memory_space<vmem>>, vector<4x64xf32>
    %c21_214 = arith.constant 21 : index
    %c0_215 = arith.constant 0 : index
    %241 = tpu.strided_load %arg12[%c21_214, %c0_215] {strides = array<i32: 2, 1>} : memref<100x64xf32, #tpu.memory_space<vmem>>, vector<4x64xf32>
    %c22_216 = arith.constant 22 : index
    %c0_217 = arith.constant 0 : index
    %242 = tpu.strided_load %arg12[%c22_216, %c0_217] {strides = array<i32: 2, 1>} : memref<100x64xf32, #tpu.memory_space<vmem>>, vector<4x64xf32>
    %243 = arith.maximumf %239, %240 : vector<4x64xf32>
    %244 = arith.maximumf %241, %242 : vector<4x64xf32>
    %245 = arith.maximumf %243, %244 : vector<4x64xf32>
    %cst_218 = arith.constant 0.000000e+00 : f32
    %246 = vector.broadcast %cst_218 : f32 to vector<4x64xf32>
    %247 = arith.maximumf %245, %246 : vector<4x64xf32>
    %c14 = arith.constant 14 : index
    %c0_219 = arith.constant 0 : index
    %248 = vector.load %arg15[%c14, %c0_219] : memref<50x64xf32, #tpu.memory_space<vmem>>, vector<4x64xf32>
    tpu.vector_store %arg15[%c14, %c0_219], %247 {strides = array<i32>} : memref<50x64xf32, #tpu.memory_space<vmem>>, vector<4x64xf32>,
    %c31 = arith.constant 31 : index
    %c0_220 = arith.constant 0 : index
    %249 = tpu.strided_load %arg12[%c31, %c0_220] {strides = array<i32: 2, 1>} : memref<100x64xf32, #tpu.memory_space<vmem>>, vector<4x64xf32>
    %c32_221 = arith.constant 32 : index
    %c0_222 = arith.constant 0 : index
    %250 = tpu.strided_load %arg12[%c32_221, %c0_222] {strides = array<i32: 2, 1>} : memref<100x64xf32, #tpu.memory_space<vmem>>, vector<4x64xf32>
    %c41 = arith.constant 41 : index
    %c0_223 = arith.constant 0 : index
    %251 = tpu.strided_load %arg12[%c41, %c0_223] {strides = array<i32: 2, 1>} : memref<100x64xf32, #tpu.memory_space<vmem>>, vector<4x64xf32>
    %c42_224 = arith.constant 42 : index
    %c0_225 = arith.constant 0 : index
    %252 = tpu.strided_load %arg12[%c42_224, %c0_225] {strides = array<i32: 2, 1>} : memref<100x64xf32, #tpu.memory_space<vmem>>, vector<4x64xf32>
    %253 = arith.maximumf %249, %250 : vector<4x64xf32>
    %254 = arith.maximumf %251, %252 : vector<4x64xf32>
    %255 = arith.maximumf %253, %254 : vector<4x64xf32>
    %cst_226 = arith.constant 0.000000e+00 : f32
    %256 = vector.broadcast %cst_226 : f32 to vector<4x64xf32>
    %257 = arith.maximumf %255, %256 : vector<4x64xf32>
    %c20_227 = arith.constant 20 : index
    %c0_228 = arith.constant 0 : index
    %258 = vector.load %arg15[%c20_227, %c0_228] : memref<50x64xf32, #tpu.memory_space<vmem>>, vector<4x64xf32>
    tpu.vector_store %arg15[%c20_227, %c0_228], %257 {strides = array<i32>} : memref<50x64xf32, #tpu.memory_space<vmem>>, vector<4x64xf32>,
    %c51 = arith.constant 51 : index
    %c0_229 = arith.constant 0 : index
    %259 = tpu.strided_load %arg12[%c51, %c0_229] {strides = array<i32: 2, 1>} : memref<100x64xf32, #tpu.memory_space<vmem>>, vector<4x64xf32>
    %c52_230 = arith.constant 52 : index
    %c0_231 = arith.constant 0 : index
    %260 = tpu.strided_load %arg12[%c52_230, %c0_231] {strides = array<i32: 2, 1>} : memref<100x64xf32, #tpu.memory_space<vmem>>, vector<4x64xf32>
    %c61 = arith.constant 61 : index
    %c0_232 = arith.constant 0 : index
    %261 = tpu.strided_load %arg12[%c61, %c0_232] {strides = array<i32: 2, 1>} : memref<100x64xf32, #tpu.memory_space<vmem>>, vector<4x64xf32>
    %c62_233 = arith.constant 62 : index
    %c0_234 = arith.constant 0 : index
    %262 = tpu.strided_load %arg12[%c62_233, %c0_234] {strides = array<i32: 2, 1>} : memref<100x64xf32, #tpu.memory_space<vmem>>, vector<4x64xf32>
    %263 = arith.maximumf %259, %260 : vector<4x64xf32>
    %264 = arith.maximumf %261, %262 : vector<4x64xf32>
    %265 = arith.maximumf %263, %264 : vector<4x64xf32>
    %cst_235 = arith.constant 0.000000e+00 : f32
    %266 = vector.broadcast %cst_235 : f32 to vector<4x64xf32>
    %267 = arith.maximumf %265, %266 : vector<4x64xf32>
    %c26 = arith.constant 26 : index
    %c0_236 = arith.constant 0 : index
    %268 = vector.load %arg15[%c26, %c0_236] : memref<50x64xf32, #tpu.memory_space<vmem>>, vector<4x64xf32>
    tpu.vector_store %arg15[%c26, %c0_236], %267 {strides = array<i32>} : memref<50x64xf32, #tpu.memory_space<vmem>>, vector<4x64xf32>,
    %c71 = arith.constant 71 : index
    %c0_237 = arith.constant 0 : index
    %269 = tpu.strided_load %arg12[%c71, %c0_237] {strides = array<i32: 2, 1>} : memref<100x64xf32, #tpu.memory_space<vmem>>, vector<4x64xf32>
    %c72_238 = arith.constant 72 : index
    %c0_239 = arith.constant 0 : index
    %270 = tpu.strided_load %arg12[%c72_238, %c0_239] {strides = array<i32: 2, 1>} : memref<100x64xf32, #tpu.memory_space<vmem>>, vector<4x64xf32>
    %c81 = arith.constant 81 : index
    %c0_240 = arith.constant 0 : index
    %271 = tpu.strided_load %arg12[%c81, %c0_240] {strides = array<i32: 2, 1>} : memref<100x64xf32, #tpu.memory_space<vmem>>, vector<4x64xf32>
    %c82_241 = arith.constant 82 : index
    %c0_242 = arith.constant 0 : index
    %272 = tpu.strided_load %arg12[%c82_241, %c0_242] {strides = array<i32: 2, 1>} : memref<100x64xf32, #tpu.memory_space<vmem>>, vector<4x64xf32>
    %273 = arith.maximumf %269, %270 : vector<4x64xf32>
    %274 = arith.maximumf %271, %272 : vector<4x64xf32>
    %275 = arith.maximumf %273, %274 : vector<4x64xf32>
    %cst_243 = arith.constant 0.000000e+00 : f32
    %276 = vector.broadcast %cst_243 : f32 to vector<4x64xf32>
    %277 = arith.maximumf %275, %276 : vector<4x64xf32>
    %c32_244 = arith.constant 32 : index
    %c0_245 = arith.constant 0 : index
    %278 = vector.load %arg15[%c32_244, %c0_245] : memref<50x64xf32, #tpu.memory_space<vmem>>, vector<4x64xf32>
    tpu.vector_store %arg15[%c32_244, %c0_245], %277 {strides = array<i32>} : memref<50x64xf32, #tpu.memory_space<vmem>>, vector<4x64xf32>,
    %c0_246 = arith.constant 0 : index
    %c0_247 = arith.constant 0 : index
    %279 = vector.load %arg15[%c0_246, %c0_247] : memref<50x64xf32, #tpu.memory_space<vmem>>, vector<36x64xf32>
    %280 = arith.truncf %279 : vector<36x64xf32> to vector<36x64xbf16>
    %c0_248 = arith.constant 0 : index
    %c0_249 = arith.constant 0 : index
    %c0_250 = arith.constant 0 : index
    %281 = vector.load %arg6[%c0_248, %c0_249, %c0_250] : memref<9x64x128xbf16, #tpu.memory_space<vmem>>, vector<1x64x128xbf16>
    %282 = vector.shape_cast %281 : vector<1x64x128xbf16> to vector<64x128xbf16>
    %cst_251 = arith.constant dense<0.000000e+00> : vector<36x128xf32>
    %283 = tpu.matmul %280, %282, %cst_251 {dimension_numbers = #tpu.dot_dimension_numbers<[1], [0], [0], [1], [0, 0, 1, 1], [], []>} : vector<36x64xbf16>, vector<64x128xbf16>, vector<36x128xf32> -> vector<36x128xf32>
    %c0_252 = arith.constant 0 : index
    %c0_253 = arith.constant 0 : index
    %284 = vector.load %arg7[%c0_252, %c0_253] : memref<1x128xf32, #tpu.memory_space<vmem>>, vector<1x128xf32>
    %285 = vector.broadcast %284 : vector<1x128xf32> to vector<36x128xf32>
    %286 = arith.addf %283, %285 : vector<36x128xf32>
    %c0_254 = arith.constant 0 : index
    %c0_255 = arith.constant 0 : index
    %287 = vector.load %arg13[%c0_254, %c0_255] : memref<36x128xf32, #tpu.memory_space<vmem>>, vector<36x128xf32>
    tpu.vector_store %arg13[%c0_254, %c0_255], %286 {strides = array<i32>} : memref<36x128xf32, #tpu.memory_space<vmem>>, vector<36x128xf32>,
    %c1_256 = arith.constant 1 : index
    %c0_257 = arith.constant 0 : index
    %288 = vector.load %arg15[%c1_256, %c0_257] : memref<50x64xf32, #tpu.memory_space<vmem>>, vector<36x64xf32>
    %289 = arith.truncf %288 : vector<36x64xf32> to vector<36x64xbf16>
    %c1_258 = arith.constant 1 : index
    %c0_259 = arith.constant 0 : index
    %c0_260 = arith.constant 0 : index
    %290 = vector.load %arg6[%c1_258, %c0_259, %c0_260] : memref<9x64x128xbf16, #tpu.memory_space<vmem>>, vector<1x64x128xbf16>
    %291 = vector.shape_cast %290 : vector<1x64x128xbf16> to vector<64x128xbf16>
    %cst_261 = arith.constant dense<0.000000e+00> : vector<36x128xf32>
    %292 = tpu.matmul %289, %291, %cst_261 {dimension_numbers = #tpu.dot_dimension_numbers<[1], [0], [0], [1], [0, 0, 1, 1], [], []>} : vector<36x64xbf16>, vector<64x128xbf16>, vector<36x128xf32> -> vector<36x128xf32>
    %c0_262 = arith.constant 0 : index
    %c0_263 = arith.constant 0 : index
    %293 = vector.load %arg13[%c0_262, %c0_263] : memref<36x128xf32, #tpu.memory_space<vmem>>, vector<36x128xf32>
    %294 = arith.addf %293, %292 : vector<36x128xf32>
    %c0_264 = arith.constant 0 : index
    %c0_265 = arith.constant 0 : index
    %295 = vector.load %arg13[%c0_264, %c0_265] : memref<36x128xf32, #tpu.memory_space<vmem>>, vector<36x128xf32>
    tpu.vector_store %arg13[%c0_264, %c0_265], %294 {strides = array<i32>} : memref<36x128xf32, #tpu.memory_space<vmem>>, vector<36x128xf32>,
    %c2_266 = arith.constant 2 : index
    %c0_267 = arith.constant 0 : index
    %296 = vector.load %arg15[%c2_266, %c0_267] : memref<50x64xf32, #tpu.memory_space<vmem>>, vector<36x64xf32>
    %297 = arith.truncf %296 : vector<36x64xf32> to vector<36x64xbf16>
    %c2_268 = arith.constant 2 : index
    %c0_269 = arith.constant 0 : index
    %c0_270 = arith.constant 0 : index
    %298 = vector.load %arg6[%c2_268, %c0_269, %c0_270] : memref<9x64x128xbf16, #tpu.memory_space<vmem>>, vector<1x64x128xbf16>
    %299 = vector.shape_cast %298 : vector<1x64x128xbf16> to vector<64x128xbf16>
    %cst_271 = arith.constant dense<0.000000e+00> : vector<36x128xf32>
    %300 = tpu.matmul %297, %299, %cst_271 {dimension_numbers = #tpu.dot_dimension_numbers<[1], [0], [0], [1], [0, 0, 1, 1], [], []>} : vector<36x64xbf16>, vector<64x128xbf16>, vector<36x128xf32> -> vector<36x128xf32>
    %c0_272 = arith.constant 0 : index
    %c0_273 = arith.constant 0 : index
    %301 = vector.load %arg13[%c0_272, %c0_273] : memref<36x128xf32, #tpu.memory_space<vmem>>, vector<36x128xf32>
    %302 = arith.addf %301, %300 : vector<36x128xf32>
    %c0_274 = arith.constant 0 : index
    %c0_275 = arith.constant 0 : index
    %303 = vector.load %arg13[%c0_274, %c0_275] : memref<36x128xf32, #tpu.memory_space<vmem>>, vector<36x128xf32>
    tpu.vector_store %arg13[%c0_274, %c0_275], %302 {strides = array<i32>} : memref<36x128xf32, #tpu.memory_space<vmem>>, vector<36x128xf32>,
    %c6_276 = arith.constant 6 : index
    %c0_277 = arith.constant 0 : index
    %304 = vector.load %arg15[%c6_276, %c0_277] : memref<50x64xf32, #tpu.memory_space<vmem>>, vector<36x64xf32>
    %305 = arith.truncf %304 : vector<36x64xf32> to vector<36x64xbf16>
    %c3_278 = arith.constant 3 : index
    %c0_279 = arith.constant 0 : index
    %c0_280 = arith.constant 0 : index
    %306 = vector.load %arg6[%c3_278, %c0_279, %c0_280] : memref<9x64x128xbf16, #tpu.memory_space<vmem>>, vector<1x64x128xbf16>
    %307 = vector.shape_cast %306 : vector<1x64x128xbf16> to vector<64x128xbf16>
    %cst_281 = arith.constant dense<0.000000e+00> : vector<36x128xf32>
    %308 = tpu.matmul %305, %307, %cst_281 {dimension_numbers = #tpu.dot_dimension_numbers<[1], [0], [0], [1], [0, 0, 1, 1], [], []>} : vector<36x64xbf16>, vector<64x128xbf16>, vector<36x128xf32> -> vector<36x128xf32>
    %c0_282 = arith.constant 0 : index
    %c0_283 = arith.constant 0 : index
    %309 = vector.load %arg13[%c0_282, %c0_283] : memref<36x128xf32, #tpu.memory_space<vmem>>, vector<36x128xf32>
    %310 = arith.addf %309, %308 : vector<36x128xf32>
    %c0_284 = arith.constant 0 : index
    %c0_285 = arith.constant 0 : index
    %311 = vector.load %arg13[%c0_284, %c0_285] : memref<36x128xf32, #tpu.memory_space<vmem>>, vector<36x128xf32>
    tpu.vector_store %arg13[%c0_284, %c0_285], %310 {strides = array<i32>} : memref<36x128xf32, #tpu.memory_space<vmem>>, vector<36x128xf32>,
    %c7_286 = arith.constant 7 : index
    %c0_287 = arith.constant 0 : index
    %312 = vector.load %arg15[%c7_286, %c0_287] : memref<50x64xf32, #tpu.memory_space<vmem>>, vector<36x64xf32>
    %313 = arith.truncf %312 : vector<36x64xf32> to vector<36x64xbf16>
    %c4_288 = arith.constant 4 : index
    %c0_289 = arith.constant 0 : index
    %c0_290 = arith.constant 0 : index
    %314 = vector.load %arg6[%c4_288, %c0_289, %c0_290] : memref<9x64x128xbf16, #tpu.memory_space<vmem>>, vector<1x64x128xbf16>
    %315 = vector.shape_cast %314 : vector<1x64x128xbf16> to vector<64x128xbf16>
    %cst_291 = arith.constant dense<0.000000e+00> : vector<36x128xf32>
    %316 = tpu.matmul %313, %315, %cst_291 {dimension_numbers = #tpu.dot_dimension_numbers<[1], [0], [0], [1], [0, 0, 1, 1], [], []>} : vector<36x64xbf16>, vector<64x128xbf16>, vector<36x128xf32> -> vector<36x128xf32>
    %c0_292 = arith.constant 0 : index
    %c0_293 = arith.constant 0 : index
    %317 = vector.load %arg13[%c0_292, %c0_293] : memref<36x128xf32, #tpu.memory_space<vmem>>, vector<36x128xf32>
    %318 = arith.addf %317, %316 : vector<36x128xf32>
    %c0_294 = arith.constant 0 : index
    %c0_295 = arith.constant 0 : index
    %319 = vector.load %arg13[%c0_294, %c0_295] : memref<36x128xf32, #tpu.memory_space<vmem>>, vector<36x128xf32>
    tpu.vector_store %arg13[%c0_294, %c0_295], %318 {strides = array<i32>} : memref<36x128xf32, #tpu.memory_space<vmem>>, vector<36x128xf32>,
    %c8_296 = arith.constant 8 : index
    %c0_297 = arith.constant 0 : index
    %320 = vector.load %arg15[%c8_296, %c0_297] : memref<50x64xf32, #tpu.memory_space<vmem>>, vector<36x64xf32>
    %321 = arith.truncf %320 : vector<36x64xf32> to vector<36x64xbf16>
    %c5_298 = arith.constant 5 : index
    %c0_299 = arith.constant 0 : index
    %c0_300 = arith.constant 0 : index
    %322 = vector.load %arg6[%c5_298, %c0_299, %c0_300] : memref<9x64x128xbf16, #tpu.memory_space<vmem>>, vector<1x64x128xbf16>
    %323 = vector.shape_cast %322 : vector<1x64x128xbf16> to vector<64x128xbf16>
    %cst_301 = arith.constant dense<0.000000e+00> : vector<36x128xf32>
    %324 = tpu.matmul %321, %323, %cst_301 {dimension_numbers = #tpu.dot_dimension_numbers<[1], [0], [0], [1], [0, 0, 1, 1], [], []>} : vector<36x64xbf16>, vector<64x128xbf16>, vector<36x128xf32> -> vector<36x128xf32>
    %c0_302 = arith.constant 0 : index
    %c0_303 = arith.constant 0 : index
    %325 = vector.load %arg13[%c0_302, %c0_303] : memref<36x128xf32, #tpu.memory_space<vmem>>, vector<36x128xf32>
    %326 = arith.addf %325, %324 : vector<36x128xf32>
    %c0_304 = arith.constant 0 : index
    %c0_305 = arith.constant 0 : index
    %327 = vector.load %arg13[%c0_304, %c0_305] : memref<36x128xf32, #tpu.memory_space<vmem>>, vector<36x128xf32>
    tpu.vector_store %arg13[%c0_304, %c0_305], %326 {strides = array<i32>} : memref<36x128xf32, #tpu.memory_space<vmem>>, vector<36x128xf32>,
    %c12_306 = arith.constant 12 : index
    %c0_307 = arith.constant 0 : index
    %328 = vector.load %arg15[%c12_306, %c0_307] : memref<50x64xf32, #tpu.memory_space<vmem>>, vector<36x64xf32>
    %329 = arith.truncf %328 : vector<36x64xf32> to vector<36x64xbf16>
    %c6_308 = arith.constant 6 : index
    %c0_309 = arith.constant 0 : index
    %c0_310 = arith.constant 0 : index
    %330 = vector.load %arg6[%c6_308, %c0_309, %c0_310] : memref<9x64x128xbf16, #tpu.memory_space<vmem>>, vector<1x64x128xbf16>
    %331 = vector.shape_cast %330 : vector<1x64x128xbf16> to vector<64x128xbf16>
    %cst_311 = arith.constant dense<0.000000e+00> : vector<36x128xf32>
    %332 = tpu.matmul %329, %331, %cst_311 {dimension_numbers = #tpu.dot_dimension_numbers<[1], [0], [0], [1], [0, 0, 1, 1], [], []>} : vector<36x64xbf16>, vector<64x128xbf16>, vector<36x128xf32> -> vector<36x128xf32>
    %c0_312 = arith.constant 0 : index
    %c0_313 = arith.constant 0 : index
    %333 = vector.load %arg13[%c0_312, %c0_313] : memref<36x128xf32, #tpu.memory_space<vmem>>, vector<36x128xf32>
    %334 = arith.addf %333, %332 : vector<36x128xf32>
    %c0_314 = arith.constant 0 : index
    %c0_315 = arith.constant 0 : index
    %335 = vector.load %arg13[%c0_314, %c0_315] : memref<36x128xf32, #tpu.memory_space<vmem>>, vector<36x128xf32>
    tpu.vector_store %arg13[%c0_314, %c0_315], %334 {strides = array<i32>} : memref<36x128xf32, #tpu.memory_space<vmem>>, vector<36x128xf32>,
    %c13 = arith.constant 13 : index
    %c0_316 = arith.constant 0 : index
    %336 = vector.load %arg15[%c13, %c0_316] : memref<50x64xf32, #tpu.memory_space<vmem>>, vector<36x64xf32>
    %337 = arith.truncf %336 : vector<36x64xf32> to vector<36x64xbf16>
    %c7_317 = arith.constant 7 : index
    %c0_318 = arith.constant 0 : index
    %c0_319 = arith.constant 0 : index
    %338 = vector.load %arg6[%c7_317, %c0_318, %c0_319] : memref<9x64x128xbf16, #tpu.memory_space<vmem>>, vector<1x64x128xbf16>
    %339 = vector.shape_cast %338 : vector<1x64x128xbf16> to vector<64x128xbf16>
    %cst_320 = arith.constant dense<0.000000e+00> : vector<36x128xf32>
    %340 = tpu.matmul %337, %339, %cst_320 {dimension_numbers = #tpu.dot_dimension_numbers<[1], [0], [0], [1], [0, 0, 1, 1], [], []>} : vector<36x64xbf16>, vector<64x128xbf16>, vector<36x128xf32> -> vector<36x128xf32>
    %c0_321 = arith.constant 0 : index
    %c0_322 = arith.constant 0 : index
    %341 = vector.load %arg13[%c0_321, %c0_322] : memref<36x128xf32, #tpu.memory_space<vmem>>, vector<36x128xf32>
    %342 = arith.addf %341, %340 : vector<36x128xf32>
    %c0_323 = arith.constant 0 : index
    %c0_324 = arith.constant 0 : index
    %343 = vector.load %arg13[%c0_323, %c0_324] : memref<36x128xf32, #tpu.memory_space<vmem>>, vector<36x128xf32>
    tpu.vector_store %arg13[%c0_323, %c0_324], %342 {strides = array<i32>} : memref<36x128xf32, #tpu.memory_space<vmem>>, vector<36x128xf32>,
    %c14_325 = arith.constant 14 : index
    %c0_326 = arith.constant 0 : index
    %344 = vector.load %arg15[%c14_325, %c0_326] : memref<50x64xf32, #tpu.memory_space<vmem>>, vector<36x64xf32>
    %345 = arith.truncf %344 : vector<36x64xf32> to vector<36x64xbf16>
    %c8_327 = arith.constant 8 : index
    %c0_328 = arith.constant 0 : index
    %c0_329 = arith.constant 0 : index
    %346 = vector.load %arg6[%c8_327, %c0_328, %c0_329] : memref<9x64x128xbf16, #tpu.memory_space<vmem>>, vector<1x64x128xbf16>
    %347 = vector.shape_cast %346 : vector<1x64x128xbf16> to vector<64x128xbf16>
    %cst_330 = arith.constant dense<0.000000e+00> : vector<36x128xf32>
    %348 = tpu.matmul %345, %347, %cst_330 {dimension_numbers = #tpu.dot_dimension_numbers<[1], [0], [0], [1], [0, 0, 1, 1], [], []>} : vector<36x64xbf16>, vector<64x128xbf16>, vector<36x128xf32> -> vector<36x128xf32>
    %c0_331 = arith.constant 0 : index
    %c0_332 = arith.constant 0 : index
    %349 = vector.load %arg13[%c0_331, %c0_332] : memref<36x128xf32, #tpu.memory_space<vmem>>, vector<36x128xf32>
    %350 = arith.addf %349, %348 : vector<36x128xf32>
    %c0_333 = arith.constant 0 : index
    %c0_334 = arith.constant 0 : index
    %351 = vector.load %arg13[%c0_333, %c0_334] : memref<36x128xf32, #tpu.memory_space<vmem>>, vector<36x128xf32>
    tpu.vector_store %arg13[%c0_333, %c0_334], %350 {strides = array<i32>} : memref<36x128xf32, #tpu.memory_space<vmem>>, vector<36x128xf32>,
    %c7_335 = arith.constant 7 : index
    %c0_336 = arith.constant 0 : index
    %352 = tpu.strided_load %arg13[%c7_335, %c0_336] {strides = array<i32: 2, 1>} : memref<36x128xf32, #tpu.memory_space<vmem>>, vector<2x128xf32>
    %c8_337 = arith.constant 8 : index
    %c0_338 = arith.constant 0 : index
    %353 = tpu.strided_load %arg13[%c8_337, %c0_338] {strides = array<i32: 2, 1>} : memref<36x128xf32, #tpu.memory_space<vmem>>, vector<2x128xf32>
    %c13_339 = arith.constant 13 : index
    %c0_340 = arith.constant 0 : index
    %354 = tpu.strided_load %arg13[%c13_339, %c0_340] {strides = array<i32: 2, 1>} : memref<36x128xf32, #tpu.memory_space<vmem>>, vector<2x128xf32>
    %c14_341 = arith.constant 14 : index
    %c0_342 = arith.constant 0 : index
    %355 = tpu.strided_load %arg13[%c14_341, %c0_342] {strides = array<i32: 2, 1>} : memref<36x128xf32, #tpu.memory_space<vmem>>, vector<2x128xf32>
    %356 = arith.maximumf %352, %353 : vector<2x128xf32>
    %357 = arith.maximumf %354, %355 : vector<2x128xf32>
    %358 = arith.maximumf %356, %357 : vector<2x128xf32>
    %359 = arith.negf %358 : vector<2x128xf32>
    %360 = math.exp %359 : vector<2x128xf32>
    %cst_343 = arith.constant 1.000000e+00 : f32
    %361 = vector.broadcast %cst_343 : f32 to vector<2x128xf32>
    %362 = arith.addf %361, %360 : vector<2x128xf32>
    %363 = arith.divf %361, %362 : vector<2x128xf32>
    %c0_344 = arith.constant 0 : index
    %c0_345 = arith.constant 0 : index
    %364 = vector.load %arg16[%c0_344, %c0_345] : memref<4x128xf32, #tpu.memory_space<vmem>>, vector<2x128xf32>
    tpu.vector_store %arg16[%c0_344, %c0_345], %363 {strides = array<i32>} : memref<4x128xf32, #tpu.memory_space<vmem>>, vector<2x128xf32>,
    %c19_346 = arith.constant 19 : index
    %c0_347 = arith.constant 0 : index
    %365 = tpu.strided_load %arg13[%c19_346, %c0_347] {strides = array<i32: 2, 1>} : memref<36x128xf32, #tpu.memory_space<vmem>>, vector<2x128xf32>
    %c20_348 = arith.constant 20 : index
    %c0_349 = arith.constant 0 : index
    %366 = tpu.strided_load %arg13[%c20_348, %c0_349] {strides = array<i32: 2, 1>} : memref<36x128xf32, #tpu.memory_space<vmem>>, vector<2x128xf32>
    %c25 = arith.constant 25 : index
    %c0_350 = arith.constant 0 : index
    %367 = tpu.strided_load %arg13[%c25, %c0_350] {strides = array<i32: 2, 1>} : memref<36x128xf32, #tpu.memory_space<vmem>>, vector<2x128xf32>
    %c26_351 = arith.constant 26 : index
    %c0_352 = arith.constant 0 : index
    %368 = tpu.strided_load %arg13[%c26_351, %c0_352] {strides = array<i32: 2, 1>} : memref<36x128xf32, #tpu.memory_space<vmem>>, vector<2x128xf32>
    %369 = arith.maximumf %365, %366 : vector<2x128xf32>
    %370 = arith.maximumf %367, %368 : vector<2x128xf32>
    %371 = arith.maximumf %369, %370 : vector<2x128xf32>
    %372 = arith.negf %371 : vector<2x128xf32>
    %373 = math.exp %372 : vector<2x128xf32>
    %cst_353 = arith.constant 1.000000e+00 : f32
    %374 = vector.broadcast %cst_353 : f32 to vector<2x128xf32>
    %375 = arith.addf %374, %373 : vector<2x128xf32>
    %376 = arith.divf %374, %375 : vector<2x128xf32>
    %c2_354 = arith.constant 2 : index
    %c0_355 = arith.constant 0 : index
    %377 = vector.load %arg16[%c2_354, %c0_355] : memref<4x128xf32, #tpu.memory_space<vmem>>, vector<2x128xf32>
    tpu.vector_store %arg16[%c2_354, %c0_355], %376 {strides = array<i32>} : memref<4x128xf32, #tpu.memory_space<vmem>>, vector<2x128xf32>,
    %c0_356 = arith.constant 0 : index
    %c0_357 = arith.constant 0 : index
    %378 = vector.load %arg9[%c0_356, %c0_357] : memref<1x128xf32, #tpu.memory_space<vmem>>, vector<1x128xf32>
    %c0_358 = arith.constant 0 : index
    %c0_359 = arith.constant 0 : index
    %379 = vector.load %arg16[%c0_358, %c0_359] : memref<4x128xf32, #tpu.memory_space<vmem>>, vector<1x128xf32>
    %380 = arith.truncf %379 : vector<1x128xf32> to vector<1x128xbf16>
    %c0_360 = arith.constant 0 : index
    %c0_361 = arith.constant 0 : index
    %c0_362 = arith.constant 0 : index
    %381 = vector.load %arg8[%c0_360, %c0_361, %c0_362] : memref<4x128x128xbf16, #tpu.memory_space<vmem>>, vector<1x128x128xbf16>
    %382 = vector.shape_cast %381 : vector<1x128x128xbf16> to vector<128x128xbf16>
    %cst_363 = arith.constant dense<0.000000e+00> : vector<1x128xf32>
    %383 = tpu.matmul %380, %382, %cst_363 {dimension_numbers = #tpu.dot_dimension_numbers<[1], [0], [0], [1], [0, 0, 1, 1], [], []>} : vector<1x128xbf16>, vector<128x128xbf16>, vector<1x128xf32> -> vector<1x128xf32>
    %384 = arith.addf %378, %383 : vector<1x128xf32>
    %c1_364 = arith.constant 1 : index
    %c0_365 = arith.constant 0 : index
    %385 = vector.load %arg16[%c1_364, %c0_365] : memref<4x128xf32, #tpu.memory_space<vmem>>, vector<1x128xf32>
    %386 = arith.truncf %385 : vector<1x128xf32> to vector<1x128xbf16>
    %c1_366 = arith.constant 1 : index
    %c0_367 = arith.constant 0 : index
    %c0_368 = arith.constant 0 : index
    %387 = vector.load %arg8[%c1_366, %c0_367, %c0_368] : memref<4x128x128xbf16, #tpu.memory_space<vmem>>, vector<1x128x128xbf16>
    %388 = vector.shape_cast %387 : vector<1x128x128xbf16> to vector<128x128xbf16>
    %cst_369 = arith.constant dense<0.000000e+00> : vector<1x128xf32>
    %389 = tpu.matmul %386, %388, %cst_369 {dimension_numbers = #tpu.dot_dimension_numbers<[1], [0], [0], [1], [0, 0, 1, 1], [], []>} : vector<1x128xbf16>, vector<128x128xbf16>, vector<1x128xf32> -> vector<1x128xf32>
    %390 = arith.addf %384, %389 : vector<1x128xf32>
    %c2_370 = arith.constant 2 : index
    %c0_371 = arith.constant 0 : index
    %391 = vector.load %arg16[%c2_370, %c0_371] : memref<4x128xf32, #tpu.memory_space<vmem>>, vector<1x128xf32>
    %392 = arith.truncf %391 : vector<1x128xf32> to vector<1x128xbf16>
    %c2_372 = arith.constant 2 : index
    %c0_373 = arith.constant 0 : index
    %c0_374 = arith.constant 0 : index
    %393 = vector.load %arg8[%c2_372, %c0_373, %c0_374] : memref<4x128x128xbf16, #tpu.memory_space<vmem>>, vector<1x128x128xbf16>
    %394 = vector.shape_cast %393 : vector<1x128x128xbf16> to vector<128x128xbf16>
    %cst_375 = arith.constant dense<0.000000e+00> : vector<1x128xf32>
    %395 = tpu.matmul %392, %394, %cst_375 {dimension_numbers = #tpu.dot_dimension_numbers<[1], [0], [0], [1], [0, 0, 1, 1], [], []>} : vector<1x128xbf16>, vector<128x128xbf16>, vector<1x128xf32> -> vector<1x128xf32>
    %396 = arith.addf %390, %395 : vector<1x128xf32>
    %c3_376 = arith.constant 3 : index
    %c0_377 = arith.constant 0 : index
    %397 = vector.load %arg16[%c3_376, %c0_377] : memref<4x128xf32, #tpu.memory_space<vmem>>, vector<1x128xf32>
    %398 = arith.truncf %397 : vector<1x128xf32> to vector<1x128xbf16>
    %c3_378 = arith.constant 3 : index
    %c0_379 = arith.constant 0 : index
    %c0_380 = arith.constant 0 : index
    %399 = vector.load %arg8[%c3_378, %c0_379, %c0_380] : memref<4x128x128xbf16, #tpu.memory_space<vmem>>, vector<1x128x128xbf16>
    %400 = vector.shape_cast %399 : vector<1x128x128xbf16> to vector<128x128xbf16>
    %cst_381 = arith.constant dense<0.000000e+00> : vector<1x128xf32>
    %401 = tpu.matmul %398, %400, %cst_381 {dimension_numbers = #tpu.dot_dimension_numbers<[1], [0], [0], [1], [0, 0, 1, 1], [], []>} : vector<1x128xbf16>, vector<128x128xbf16>, vector<1x128xf32> -> vector<1x128xf32>
    %402 = arith.addf %396, %401 : vector<1x128xf32>
    %c0_382 = arith.constant 0 : index
    %c0_383 = arith.constant 0 : index
    %c0_384 = arith.constant 0 : index
    %403 = vector.load %arg10[%c0_382, %c0_383, %c0_384] : memref<1x1x128xf32, #tpu.memory_space<vmem>>, vector<1x1x128xf32>
    %404 = vector.shape_cast %403 : vector<1x1x128xf32> to vector<1x128xf32>
    %405 = vector.shape_cast %402 : vector<1x128xf32> to vector<1x1x128xf32>
    tpu.vector_store %arg10[%c0_382, %c0_383, %c0_384], %405 {strides = array<i32>} : memref<1x1x128xf32, #tpu.memory_space<vmem>>, vector<1x1x128xf32>,
    return
  }
  func.func @transform_0(%arg0: i32) -> (i32, i32, i32) {
    %c0_i32 = arith.constant 0 : i32
    %c0_i32_0 = arith.constant 0 : i32
    %c0_i32_1 = arith.constant 0 : i32
    return %arg0, %c0_i32, %c0_i32_0 : i32, i32, i32
  }
  func.func @transform_1(%arg0: i32) -> (i32, i32) {
    %c0_i32 = arith.constant 0 : i32
    %c0_i32_0 = arith.constant 0 : i32
    %c0_i32_1 = arith.constant 0 : i32
    return %c0_i32, %c0_i32_0 : i32, i32
  }
  func.func @transform_2(%arg0: i32) -> (i32, i32) {
    %c0_i32 = arith.constant 0 : i32
    %c0_i32_0 = arith.constant 0 : i32
    %c0_i32_1 = arith.constant 0 : i32
    return %c0_i32, %c0_i32_0 : i32, i32
  }
  func.func @transform_3(%arg0: i32) -> (i32, i32, i32) {
    %c0_i32 = arith.constant 0 : i32
    %c0_i32_0 = arith.constant 0 : i32
    %c0_i32_1 = arith.constant 0 : i32
    %c0_i32_2 = arith.constant 0 : i32
    return %c0_i32, %c0_i32_0, %c0_i32_1 : i32, i32, i32
  }
  func.func @transform_4(%arg0: i32) -> (i32, i32) {
    %c0_i32 = arith.constant 0 : i32
    %c0_i32_0 = arith.constant 0 : i32
    %c0_i32_1 = arith.constant 0 : i32
    return %c0_i32, %c0_i32_0 : i32, i32
  }
  func.func @transform_5(%arg0: i32) -> (i32, i32, i32) {
    %c0_i32 = arith.constant 0 : i32
    %c0_i32_0 = arith.constant 0 : i32
    %c0_i32_1 = arith.constant 0 : i32
    %c0_i32_2 = arith.constant 0 : i32
    return %c0_i32, %c0_i32_0, %c0_i32_1 : i32, i32, i32
  }
  func.func @transform_6(%arg0: i32) -> (i32, i32) {
    %c0_i32 = arith.constant 0 : i32
    %c0_i32_0 = arith.constant 0 : i32
    %c0_i32_1 = arith.constant 0 : i32
    return %c0_i32, %c0_i32_0 : i32, i32
  }
  func.func @transform_7(%arg0: i32) -> (i32, i32, i32) {
    %c0_i32 = arith.constant 0 : i32
    %c0_i32_0 = arith.constant 0 : i32
    %c0_i32_1 = arith.constant 0 : i32
    %c0_i32_2 = arith.constant 0 : i32
    return %c0_i32, %c0_i32_0, %c0_i32_1 : i32, i32, i32
  }
  func.func @transform_8(%arg0: i32) -> (i32, i32) {
    %c0_i32 = arith.constant 0 : i32
    %c0_i32_0 = arith.constant 0 : i32
    %c0_i32_1 = arith.constant 0 : i32
    return %c0_i32, %c0_i32_0 : i32, i32
  }
  func.func @transform_9(%arg0: i32) -> (i32, i32, i32) {
    %c0_i32 = arith.constant 0 : i32
    %c0_i32_0 = arith.constant 0 : i32
    %c0_i32_1 = arith.constant 0 : i32
    return %arg0, %c0_i32, %c0_i32_0 : i32, i32, i32
  }
}

</mosaic_0001>

<bundles_post_ra>
// kernel: simple_cnn_forward.1
= control target key start
LH: loop header
LB: loop body
LE: loop exit
PB: predicated region body
PF: predicated region fallthrough
CT: control target
= control target key end

     0   :  { %14 = vsyncpa [#allocation9], 0  ;;  %s11321_s0 = inlined_call_operand.vmem [shape: f32[2,362,1], index: 0, kind: input, shape index: {}]   ;;  %s11322_s1 = inlined_call_operand.vmem [shape: f32[9,32], index: 1, kind: input, shape index: {}]   ;;  %s11323_s2 = inlined_call_operand.vmem [shape: f32[1,32], index: 2, kind: input, shape index: {}]   ;;  %s11324_s3 = inlined_call_operand.vmem [shape: bf16[9,32,64], index: 3, kind: input, shape index: {}]   ;;  %s11325_s4 = inlined_call_operand.vmem [shape: f32[1,64], index: 4, kind: input, shape index: {}]   ;;  %s11326_s5 = inlined_call_operand.vmem [shape: bf16[9,64,128], index: 5, kind: input, shape index: {}]   ;;  %s11327_s6 = inlined_call_operand.vmem [shape: f32[1,128], index: 6, kind: input, shape index: {}]   ;;  %s11328_s7 = inlined_call_operand.vmem [shape: bf16[4,128,128], index: 7, kind: input, shape index: {}]   ;;  %s11329_s8 = inlined_call_operand.vmem [shape: f32[1,128], index: 8, kind: input, shape index: {}]   ;;  %s11330_s9 = inlined_call_operand.hbm [shape: f32[2,1,128], index: 9, kind: output, shape index: {}]  }
   0x1   :  { %16 = vsyncpa [#allocation9 + $0x1], 0  ;;  %s8828_s30 = smov 0   ;;  %s8830_s10 = smov 0  }
   0x2   :  { %s8832_s11 = smov 0   ;;  %s8834_s12 = smov 0  }
   0x3 LB: > { %s8849_s13 = sadd.s32 4294967295, %s8772_s12   ;;  %s7484_s14 = sadd.s32 4294967294, %s8772_s12   ;;  %s8772_s12 = sphi %s8834_s12, %s11336_s12   ;;  %s8768_s11 = sphi %s8832_s11, %s11335_s11   ;;  %s8764_s10 = sphi %s8830_s10, %s11334_s10   ;;  %s8760_s30 = sphi %s8828_s30, %s11333_s30  }
   0x4   : > { %s8853_s15 = sadd.s32 1, %s8772_s12   ;;  %s223_s16 = sadd.s32 1, %s8768_s11 }
   0x5   : > { %s220_s17 = ssub.s32 %s8772_s12, %s8853_s15  ;;  %p233_p0 = scmp.ne.s32.totalorder %s8768_s11, %s8764_s10 }
   0x6   : > { %p221_p1 = scmp.eq.s32.totalorder %s220_s17, 0  ;;  %p234_p2 = scmp.eq.s32.totalorder %s8849_s13, 1 }
   0x7   : > { %p239_p3 = scmp.ne.s32.totalorder %s8764_s10, %s8760_s30  ;;  %p240_p4 = scmp.eq.s32.totalorder %s7484_s14, 1 }
   0x8   : > { %s8864_s18 = scalar_select %p221_p1, %s8768_s11, %s223_s16  }
   0x9   : > { %p8866_p5 = por %p234_p2, %p233_p0  ;;  %p8870_p6 = por %p240_p4, %p239_p3 }
   0xa   : > { %p7487_p7 = scmp.ge.s32.totalorder %s8772_s12, 1  ;;  %p290_p8 = scmp.lt.s32.totalorder %s8772_s12, 3 }
   0xc   : > { %p291_p9 = pnand %p7487_p7, %p290_p8 }
   0xd   : > { %p325_p10 = scmp.lt.s32.totalorder (!%p291_p9), %s8849_s13, 1  ;;  %s323_s29 = sand.u32 (!%p291_p9), 1, %s8764_s10  }
   0xe   : > { %294 = sbr.rel (%p291_p9) target bundleno = 1913 (0x779), region = 56  ;;  %s7823_s14 = sshll.u32 (!%p291_p9), %s8849_s13, 4 }
   0xf   : > { %s324_s16 = scalar_lea.vmem (!%p291_p9), [#allocation8], %s323_s29  ;;  %s11280_s23 = scalar_lea.hbm (!%p291_p9), %s11330_s9, %s7823_s14 }
  0x10   : > { %s7429_s17 = sshll.u32 (!%p291_p9), %s324_s16, 4  ;;  %s8777_s26 = smov (!%p291_p9), [#allocation8]   ;;  %s11282_s17 = int_to_ptr.vmem [resolvable:$true] %s7429_s17 }
  0x11   : > { %s8712_s24 = scalar_lea.vmem (!%p291_p9), %s11282_s17, 16  ;;  %s8716_s27 = sshll.u32 (!%p291_p9), %s8777_s26, 4  ;;  %s8717_s27 = int_to_ptr.vmem [resolvable:$false] %s8716_s27 }
  0x12   : > { %p8713_p11 = scmp.ne.s32.totalorder (!%p291_p9), %s11282_s17, %s8712_s24  ;;  %p8719_p0 = scmp.lt.s32.totalorder (!%p291_p9), %s11282_s17, %s8717_s27 }
  0x13   : > { %v8774_v0 = vmov 0   ;;  %s326_s21 = scalar_select %p325_p10, %s8849_s13, 1  ;;  %v8948_v63 = vld [vmem:[%s11322_s1] ss:$0 sm:$0xff]  ;;  %vm331_vm0 = vcmask 261120   ;;  %vm738_vm1 = vcmask 257024  }
  0x14   : > { %8602 = vset.pattern.permute.xlu1 %v8774_v0  ;;  %8601 = vset.pattern.permute.xlu0 %v8774_v0  ;;  %vm8776_vm2 = vmmov 0   ;;  %vm349_vm3 = vcmask 523264   ;;  %vm347_vm4 = vcmask 254976   ;;  %vm4328_vm5 = vcmask 519168   ;;  %s7417_s13 = scalar_lea.sflag [#allocation9], %s323_s29  ;;  %p8714_p12 = pnand %p8713_p11, %p8866_p5 }
  0x15   : > { %s8558_s22 = smul.u32 368, %s326_s21  ;;  %vm356_vm6 = vcmask 517120  }
  0x16   : > { %p8715_p13 = pneg %p8714_p12 }
  0x17   : > { %s8881_s25 = scalar_lea.vmem %s11321_s0, %s8558_s22 }
  0x18   : > { %v360_v1 = vld [vmem:[%s8881_s25 + $0x10] sm:$0xff]  ;;  %v358_v2 = vld [vmem:[%s8881_s25] sm:$0xff]  ;;  %v361_v3 = vld [vmem:[%s8881_s25 + $0x18] sm:$0xff] }
  0x19   : > { %412 = vperm.xlu1 %8602, %v360_v1   ;;  %402 = vperm.xlu0 %8601, %v358_v2   ;;  %v359_v4 = vld [vmem:[%s8881_s25 + $0x8] sm:$0xff]  ;;  %v362_v6 = vld [vmem:[%s8881_s25 + $0x20] sm:$0xff]  ;;  %v365_v7 = vld [vmem:[%s8881_s25 + $0x38] sm:$0xff] }
  0x1a   : > { %v363_v5 = vld [vmem:[%s8881_s25 + $0x28] sm:$0xff]  ;;  %v364_v8 = vld [vmem:[%s8881_s25 + $0x30] sm:$0xff]  ;;  %v366_v10 = vld [vmem:[%s8881_s25 + $0x40] sm:$0xff] }
  0x1b   : > { %v367_v9 = vld [vmem:[%s8881_s25 + $0x48] sm:$0xff]  ;;  %v369_v11 = vld [vmem:[%s8881_s25 + $0x58] sm:$0xff]  ;;  %v368_v12 = vld [vmem:[%s8881_s25 + $0x50] sm:$0xff] }
  0x1c   : > { %v371_v13 = vld [vmem:[%s8881_s25 + $0x68] sm:$0xff]  ;;  %v370_v14 = vld [vmem:[%s8881_s25 + $0x60] sm:$0xff]  ;;  %v373_v15 = vld [vmem:[%s8881_s25 + $0x78] sm:$0xff] }
  0x1d   : > { %417 = vperm.xlu1 %8602, %v361_v3   ;;  %407 = vperm.xlu0 %8601, %v359_v4   ;;  %v372_v16 = vld [vmem:[%s8881_s25 + $0x70] sm:$0xff]  ;;  %v375_v17 = vld [vmem:[%s8881_s25 + $0x88] sm:$0xff]  ;;  %v374_v18 = vld [vmem:[%s8881_s25 + $0x80] sm:$0xff] }
  0x1e   : > { %v377_v19 = vld [vmem:[%s8881_s25 + $0x98] sm:$0xff]  ;;  %v376_v20 = vld [vmem:[%s8881_s25 + $0x90] sm:$0xff]  ;;  %v379_v21 = vld [vmem:[%s8881_s25 + $0xa8] sm:$0xff] }
  0x1f   : > { %v378_v22 = vld [vmem:[%s8881_s25 + $0xa0] sm:$0xff]  ;;  %v381_v23 = vld [vmem:[%s8881_s25 + $0xb8] sm:$0xff]  ;;  %v380_v24 = vld [vmem:[%s8881_s25 + $0xb0] sm:$0xff] }
  0x20   : > { %v383_v25 = vld [vmem:[%s8881_s25 + $0xc8] sm:$0xff]  ;;  %v382_v26 = vld [vmem:[%s8881_s25 + $0xc0] sm:$0xff]  ;;  %v385_v27 = vld [vmem:[%s8881_s25 + $0xd8] sm:$0xff] }
  0x21   : > { %427 = vperm.xlu1 %8602, %v363_v5   ;;  %422 = vperm.xlu0 %8601, %v362_v6   ;;  %v384_v28 = vld [vmem:[%s8881_s25 + $0xd0] sm:$0xff]  ;;  %v387_v29 = vld [vmem:[%s8881_s25 + $0xe8] sm:$0xff]  ;;  %v386_v30 = vld [vmem:[%s8881_s25 + $0xe0] sm:$0xff] }
  0x22   : > { %v389_v31 = vld [vmem:[%s8881_s25 + $0xf8] sm:$0xff]  ;;  %v388_v32 = vld [vmem:[%s8881_s25 + $0xf0] sm:$0xff]  ;;  %v391_v33 = vld [vmem:[%s8881_s25 + $0x108] sm:$0xff] }
  0x23   : > { %v390_v34 = vld [vmem:[%s8881_s25 + $0x100] sm:$0xff]  ;;  %v393_v35 = vld [vmem:[%s8881_s25 + $0x118] sm:$0xff]  ;;  %v392_v36 = vld [vmem:[%s8881_s25 + $0x110] sm:$0xff] }
  0x24   : > { %v395_v37 = vld [vmem:[%s8881_s25 + $0x128] sm:$0xff]  ;;  %v394_v38 = vld [vmem:[%s8881_s25 + $0x120] sm:$0xff]  ;;  %v397_v39 = vld [vmem:[%s8881_s25 + $0x138] sm:$0xff] }
  0x25   : > { %437 = vperm.xlu1 %8602, %v365_v7   ;;  %432 = vperm.xlu0 %8601, %v364_v8   ;;  %v396_v40 = vld [vmem:[%s8881_s25 + $0x130] sm:$0xff]  ;;  %v740_v41 = vld [vmem:[%s8881_s25 + $0x1] sm:$0xff]  ;;  %v743_v46 = vld [vmem:[%s8881_s25 + $0x19] sm:$0xff] }
  0x26   : > { %v398_v42 = vld [vmem:[%s8881_s25 + $0x140] sm:$0xf]  ;;  %v742_v43 = vld [vmem:[%s8881_s25 + $0x11] sm:$0xff]  ;;  %v741_v44 = vld [vmem:[%s8881_s25 + $0x9] sm:$0xff] }
  0x27   : > { %v744_v45 = vld [vmem:[%s8881_s25 + $0x21] sm:$0xff]  ;;  %v746_v47 = vld [vmem:[%s8881_s25 + $0x31] sm:$0xff]  ;;  %v745_v48 = vld [vmem:[%s8881_s25 + $0x29] sm:$0xff] }
  0x28   : > { %v748_v49 = vld [vmem:[%s8881_s25 + $0x41] sm:$0xff]  ;;  %v747_v50 = vld [vmem:[%s8881_s25 + $0x39] sm:$0xff]  ;;  %v750_v51 = vld [vmem:[%s8881_s25 + $0x51] sm:$0xff] }
  0x29   : > { %447 = vperm.xlu1 %8602, %v367_v9   ;;  %442 = vperm.xlu0 %8601, %v366_v10   ;;  %v749_v52 = vld [vmem:[%s8881_s25 + $0x49] sm:$0xff]  ;;  %v752_v53 = vld [vmem:[%s8881_s25 + $0x61] sm:$0xff]  ;;  %v751_v54 = vld [vmem:[%s8881_s25 + $0x59] sm:$0xff] }
  0x2a   : > { %v754_v55 = vld [vmem:[%s8881_s25 + $0x71] sm:$0xff]  ;;  %v753_v56 = vld [vmem:[%s8881_s25 + $0x69] sm:$0xff]  ;;  %v756_v57 = vld [vmem:[%s8881_s25 + $0x81] sm:$0xff] }
  0x2b   : > { %v755_v58 = vld [vmem:[%s8881_s25 + $0x79] sm:$0xff]  ;;  %v758_v59 = vld [vmem:[%s8881_s25 + $0x91] sm:$0xff]  ;;  %v757_v60 = vld [vmem:[%s8881_s25 + $0x89] sm:$0xff] }
  0x2c   : > { %v760_v61 = vld [vmem:[%s8881_s25 + $0xa1] sm:$0xff]  ;;  %v759_v62 = vld [vmem:[%s8881_s25 + $0x99] sm:$0xff]  ;;  %v8960_v7 = vld [vmem:[%s8881_s25 + $0x2a] sm:$0xff] }
  0x2d   : > { %457 = vperm.xlu1 %8602, %v369_v11   ;;  %452 = vperm.xlu0 %8601, %v368_v12   ;;  %v1158_v0 = vld [vmem:[%s8881_s25 + $0x1a] sm:$0xff]  ;;  %v1157_v1 = vld [vmem:[%s8881_s25 + $0x12] sm:$0xff]  ;;  %v8963_v8 = vld [vmem:[%s8881_s25 + $0x22] sm:$0xff] }
  0x2e   : > { %v8955_v2 = vld [vmem:[%s11323_s2] ss:$0 sm:$0xff] }
  0x31   : > { %467 = vperm.xlu1 %8602, %v371_v13   ;;  %462 = vperm.xlu0 %8601, %v370_v14  }
  0x35   : > { %477 = vperm.xlu1 %8602, %v373_v15   ;;  %472 = vperm.xlu0 %8601, %v372_v16   ;;  %v761_v15 = vld [vmem:[%s8881_s25 + $0xa9] sm:$0xff]  ;;  %v8975_v16 = vld [vmem:[%s8881_s25 + $0x32] sm:$0xff] }
  0x39   : > { %487 = vperm.xlu1 %8602, %v375_v17   ;;  %482 = vperm.xlu0 %8601, %v374_v18  }
  0x3d   : > { %497 = vperm.xlu1 %8602, %v377_v19   ;;  %492 = vperm.xlu0 %8601, %v376_v20  }
  0x41   : > { %507 = vperm.xlu1 %8602, %v379_v21   ;;  %502 = vperm.xlu0 %8601, %v378_v22  }
  0x45   : > { %517 = vperm.xlu1 %8602, %v381_v23   ;;  %512 = vperm.xlu0 %8601, %v380_v24   ;;  %v763_v23 = vld [vmem:[%s8881_s25 + $0xb9] sm:$0xff]  ;;  %v762_v24 = vld [vmem:[%s8881_s25 + $0xb1] sm:$0xff] }
  0x49   : > { %527 = vperm.xlu1 %8602, %v383_v25   ;;  %522 = vperm.xlu0 %8601, %v382_v26  }
  0x4d   : > { %537 = vperm.xlu1 %8602, %v385_v27   ;;  %532 = vperm.xlu0 %8601, %v384_v28  }
  0x51   : > { %547 = vperm.xlu1 %8602, %v387_v29   ;;  %542 = vperm.xlu0 %8601, %v386_v30  }
  0x55   : > { %557 = vperm.xlu1 %8602, %v389_v31   ;;  %552 = vperm.xlu0 %8601, %v388_v32   ;;  %v8993_v31 = vld [vmem:[%s8881_s25 + $0x3a] sm:$0xff] }
  0x56   : > { %v764_v32 = vld [vmem:[%s8881_s25 + $0xc1] sm:$0xff] }
  0x59   : > { %567 = vperm.xlu1 %8602, %v391_v33   ;;  %562 = vperm.xlu0 %8601, %v390_v34  }
  0x5d   : > { %577 = vperm.xlu1 %8602, %v393_v35   ;;  %572 = vperm.xlu0 %8601, %v392_v36  }
  0x61   : > { %587 = vperm.xlu1 %8602, %v395_v37   ;;  %582 = vperm.xlu0 %8601, %v394_v38  }
  0x65   : > { %597 = vperm.xlu1 %8602, %v397_v39   ;;  %592 = vperm.xlu0 %8601, %v396_v40   ;;  %v9004_v39 = vld [vmem:[%s8881_s25 + $0x4a] sm:$0xff]  ;;  %v9007_v40 = vld [vmem:[%s8881_s25 + $0x42] sm:$0xff] }
  0x69   : > { %784 = vperm.xlu1 %8602, %v740_v41   ;;  %602 = vperm.xlu0 %8601, %v398_v42  }
  0x6d   : > { %794 = vperm.xlu1 %8602, %v742_v43   ;;  %789 = vperm.xlu0 %8601, %v741_v44  }
  0x71   : > { %804 = vperm.xlu1 %8602, %v744_v45   ;;  %799 = vperm.xlu0 %8601, %v743_v46  }
  0x75   : > { %814 = vperm.xlu1 %8602, %v746_v47   ;;  %809 = vperm.xlu0 %8601, %v745_v48   ;;  %v9018_v47 = vld [vmem:[%s8881_s25 + $0x5a] sm:$0xff]  ;;  %v9021_v48 = vld [vmem:[%s8881_s25 + $0x52] sm:$0xff] }
  0x79   : > { %824 = vperm.xlu1 %8602, %v748_v49   ;;  %819 = vperm.xlu0 %8601, %v747_v50  }
  0x7d   : > { %834 = vperm.xlu1 %8602, %v750_v51   ;;  %829 = vperm.xlu0 %8601, %v749_v52  }
  0x81   : > { %844 = vperm.xlu1 %8602, %v752_v53   ;;  %839 = vperm.xlu0 %8601, %v751_v54  }
  0x85   : > { %854 = vperm.xlu1 %8602, %v754_v55   ;;  %849 = vperm.xlu0 %8601, %v753_v56   ;;  %v9032_v55 = vld [vmem:[%s8881_s25 + $0x6a] sm:$0xff]  ;;  %v9035_v56 = vld [vmem:[%s8881_s25 + $0x62] sm:$0xff] }
  0x89   : > { %864 = vperm.xlu1 %8602, %v756_v57   ;;  %859 = vperm.xlu0 %8601, %v755_v58  }
  0x8d   : > { %874 = vperm.xlu1 %8602, %v758_v59   ;;  %869 = vperm.xlu0 %8601, %v757_v60  }
  0x91   : > { %884 = vperm.xlu1 %8602, %v760_v61   ;;  %879 = vperm.xlu0 %8601, %v759_v62  }
  0x94   : > { %v413_v3 = vpop.permute.xlu1 %412  ;;  %v403_v4 = vpop.permute.xlu0 %402 }
  0x95   : > { %v611_v5 = vmul.f32 %v8948_v63, %v413_v3  ;;  %v609_v6 = vmul.f32 %v8948_v63, %v403_v4  ;;  %1214 = vperm.xlu1 %8602, %v1158_v0   ;;  %1209 = vperm.xlu0 %8601, %v1157_v1   ;;  %v9046_v0 = vld [vmem:[%s8881_s25 + $0x7a] sm:$0xff]  ;;  %v9049_v1 = vld [vmem:[%s8881_s25 + $0x72] sm:$0xff] }
  0x97   : > { %v659_v9 = vadd.f32 %v8955_v2, %v611_v5  ;;  %v657_v10 = vadd.f32 %v8955_v2, %v609_v6 }
  0x98   : > { %v418_v11 = vpop.permute.xlu1 %417  ;;  %v408_v12 = vpop.permute.xlu0 %407 }
  0x99   : > { %700 = vst.msk [vmem:[#allocation2 + $0x10] sm:$0xff] %vm331_vm0, %v659_v9  ;;  %698 = vst.msk [vmem:[#allocation2] sm:$0xff] %vm331_vm0, %v657_v10  ;;  %v612_v13 = vmul.f32 %v8948_v63, %v418_v11  ;;  %v610_v14 = vmul.f32 %v8948_v63, %v408_v12  ;;  %1224 = vperm.xlu1 %8602, %v8960_v7   ;;  %1219 = vperm.xlu0 %8601, %v8963_v8  }
  0x9b   : > { %v660_v17 = vadd.f32 %v8955_v2, %v612_v13  ;;  %v658_v18 = vadd.f32 %v8955_v2, %v610_v14 }
  0x9c   : > { %v428_v19 = vpop.permute.xlu1 %427  ;;  %v423_v20 = vpop.permute.xlu0 %422 }
  0x9d   : > { %701 = vst.msk [vmem:[#allocation2 + $0x18] sm:$0xff] %vm331_vm0, %v660_v17  ;;  %699 = vst.msk [vmem:[#allocation2 + $0x8] sm:$0xff] %vm331_vm0, %v658_v18  ;;  %v614_v21 = vmul.f32 %v8948_v63, %v428_v19  ;;  %v613_v22 = vmul.f32 %v8948_v63, %v423_v20  ;;  %889 = vperm.xlu1 %8602, %v761_v15   ;;  %1229 = vperm.xlu0 %8601, %v8975_v16  }
  0x9f   : > { %v662_v25 = vadd.f32 %v8955_v2, %v614_v21  ;;  %v661_v26 = vadd.f32 %v8955_v2, %v613_v22 }
  0xa0   : > { %v438_v27 = vpop.permute.xlu1 %437  ;;  %v433_v28 = vpop.permute.xlu0 %432 }
  0xa1   : > { %703 = vst.msk [vmem:[#allocation2 + $0x28] sm:$0xff] %vm331_vm0, %v662_v25  ;;  %702 = vst.msk [vmem:[#allocation2 + $0x20] sm:$0xff] %vm331_vm0, %v661_v26  ;;  %v616_v29 = vmul.f32 %v8948_v63, %v438_v27  ;;  %v615_v30 = vmul.f32 %v8948_v63, %v433_v28  ;;  %899 = vperm.xlu1 %8602, %v763_v23   ;;  %894 = vperm.xlu0 %8601, %v762_v24  }
  0xa3   : > { %v664_v33 = vadd.f32 %v8955_v2, %v616_v29  ;;  %v663_v34 = vadd.f32 %v8955_v2, %v615_v30  ;;  %v766_v29 = vld [vmem:[%s8881_s25 + $0xd1] sm:$0xff] }
  0xa4   : > { %v448_v35 = vpop.permute.xlu1 %447  ;;  %v443_v36 = vpop.permute.xlu0 %442 }
  0xa5   : > { %705 = vst.msk [vmem:[#allocation2 + $0x38] sm:$0xff] %vm331_vm0, %v664_v33  ;;  %704 = vst.msk [vmem:[#allocation2 + $0x30] sm:$0xff] %vm331_vm0, %v663_v34  ;;  %v618_v37 = vmul.f32 %v8948_v63, %v448_v35  ;;  %v617_v38 = vmul.f32 %v8948_v63, %v443_v36  ;;  %1234 = vperm.xlu1 %8602, %v8993_v31   ;;  %904 = vperm.xlu0 %8601, %v764_v32   ;;  %v769_v36 = vld [vmem:[%s8881_s25 + $0xe9] sm:$0xff] }
  0xa7   : > { %v666_v41 = vadd.f32 %v8955_v2, %v618_v37  ;;  %v665_v42 = vadd.f32 %v8955_v2, %v617_v38  ;;  %v768_v37 = vld [vmem:[%s8881_s25 + $0xe1] sm:$0xff] }
  0xa8   : > { %v458_v43 = vpop.permute.xlu1 %457  ;;  %v453_v44 = vpop.permute.xlu0 %452 }
  0xa9   : > { %707 = vst.msk [vmem:[#allocation2 + $0x48] sm:$0xff] %vm331_vm0, %v666_v41  ;;  %706 = vst.msk [vmem:[#allocation2 + $0x40] sm:$0xff] %vm331_vm0, %v665_v42  ;;  %v620_v45 = vmul.f32 %v8948_v63, %v458_v43  ;;  %v619_v46 = vmul.f32 %v8948_v63, %v453_v44  ;;  %1244 = vperm.xlu1 %8602, %v9004_v39   ;;  %1239 = vperm.xlu0 %8601, %v9007_v40  }
  0xab   : > { %v668_v49 = vadd.f32 %v8955_v2, %v620_v45  ;;  %v667_v50 = vadd.f32 %v8955_v2, %v619_v46  ;;  %v9100_v45 = vld [vmem:[%s8881_s25 + $0x8a] sm:$0xff]  ;;  %v9103_v46 = vld [vmem:[%s8881_s25 + $0x82] sm:$0xff] }
  0xac   : > { %v468_v51 = vpop.permute.xlu1 %467  ;;  %v463_v52 = vpop.permute.xlu0 %462 }
  0xad   : > { %709 = vst.msk [vmem:[#allocation2 + $0x58] sm:$0xff] %vm331_vm0, %v668_v49  ;;  %708 = vst.msk [vmem:[#allocation2 + $0x50] sm:$0xff] %vm331_vm0, %v667_v50  ;;  %v622_v53 = vmul.f32 %v8948_v63, %v468_v51  ;;  %v621_v54 = vmul.f32 %v8948_v63, %v463_v52  ;;  %1254 = vperm.xlu1 %8602, %v9018_v47   ;;  %1249 = vperm.xlu0 %8601, %v9021_v48  }
  0xaf   : > { %v670_v57 = vadd.f32 %v8955_v2, %v622_v53  ;;  %v669_v58 = vadd.f32 %v8955_v2, %v621_v54 }
  0xb0   : > { %v478_v59 = vpop.permute.xlu1 %477  ;;  %v473_v60 = vpop.permute.xlu0 %472 }
  0xb1   : > { %711 = vst.msk [vmem:[#allocation2 + $0x68] sm:$0xff] %vm331_vm0, %v670_v57  ;;  %710 = vst.msk [vmem:[#allocation2 + $0x60] sm:$0xff] %vm331_vm0, %v669_v58  ;;  %v624_v61 = vmul.f32 %v8948_v63, %v478_v59  ;;  %v623_v62 = vmul.f32 %v8948_v63, %v473_v60  ;;  %1264 = vperm.xlu1 %8602, %v9032_v55   ;;  %1259 = vperm.xlu0 %8601, %v9035_v56   ;;  %v9114_v57 = vld [vmem:[%s8881_s25 + $0x9a] sm:$0xff]  ;;  %v9117_v58 = vld [vmem:[%s8881_s25 + $0x92] sm:$0xff] }
  0xb3   : > { %v672_v3 = vadd.f32 %v8955_v2, %v624_v61  ;;  %v671_v4 = vadd.f32 %v8955_v2, %v623_v62 }
  0xb4   : > { %v488_v5 = vpop.permute.xlu1 %487  ;;  %v483_v6 = vpop.permute.xlu0 %482 }
  0xb5   : > { %713 = vst.msk [vmem:[#allocation2 + $0x78] sm:$0xff] %vm331_vm0, %v672_v3  ;;  %712 = vst.msk [vmem:[#allocation2 + $0x70] sm:$0xff] %vm331_vm0, %v671_v4  ;;  %v626_v9 = vmul.f32 %v8948_v63, %v488_v5  ;;  %v625_v10 = vmul.f32 %v8948_v63, %v483_v6  ;;  %1274 = vperm.xlu1 %8602, %v9046_v0   ;;  %1269 = vperm.xlu0 %8601, %v9049_v1   ;;  %v9128_v5 = vld [vmem:[%s8881_s25 + $0xaa] sm:$0xff]  ;;  %v9131_v6 = vld [vmem:[%s8881_s25 + $0xa2] sm:$0xff] }
  0xb7   : > { %v674_v11 = vadd.f32 %v8955_v2, %v626_v9  ;;  %v673_v12 = vadd.f32 %v8955_v2, %v625_v10 }
  0xb8   : > { %v498_v13 = vpop.permute.xlu1 %497  ;;  %v493_v14 = vpop.permute.xlu0 %492 }
  0xb9   : > { %715 = vst.msk [vmem:[#allocation2 + $0x88] sm:$0xff] %vm331_vm0, %v674_v11  ;;  %714 = vst.msk [vmem:[#allocation2 + $0x80] sm:$0xff] %vm331_vm0, %v673_v12  ;;  %v628_v15 = vmul.f32 %v8948_v63, %v498_v13  ;;  %v627_v17 = vmul.f32 %v8948_v63, %v493_v14  ;;  %1629 = vperm.xlu1 %8602, %v8960_v7   ;;  %1624 = vperm.xlu0 %8601, %v8963_v8   ;;  %v765_v7 = vld [vmem:[%s8881_s25 + $0xc9] sm:$0xff] }
  0xbb   : > { %v676_v18 = vadd.f32 %v8955_v2, %v628_v15  ;;  %v675_v19 = vadd.f32 %v8955_v2, %v627_v17  ;;  %v9142_v15 = vld [vmem:[%s8881_s25 + $0xba] sm:$0xff]  ;;  %v9145_v17 = vld [vmem:[%s8881_s25 + $0xb2] sm:$0xff] }
  0xbc   : > { %v508_v20 = vpop.permute.xlu1 %507  ;;  %v503_v21 = vpop.permute.xlu0 %502 }
  0xbd   : > { %717 = vst.msk [vmem:[#allocation2 + $0x98] sm:$0xff] %vm331_vm0, %v676_v18  ;;  %716 = vst.msk [vmem:[#allocation2 + $0x90] sm:$0xff] %vm331_vm0, %v675_v19  ;;  %v630_v22 = vmul.f32 %v8948_v63, %v508_v20  ;;  %v629_v23 = vmul.f32 %v8948_v63, %v503_v21  ;;  %1639 = vperm.xlu1 %8602, %v8993_v31   ;;  %1634 = vperm.xlu0 %8601, %v8975_v16   ;;  %v767_v16 = vld [vmem:[%s8881_s25 + $0xd9] sm:$0xff] }
  0xbf   : > { %v678_v8 = vadd.f32 %v8955_v2, %v630_v22  ;;  %v677_v24 = vadd.f32 %v8955_v2, %v629_v23 }
  0xc0   : > { %v518_v25 = vpop.permute.xlu1 %517  ;;  %v513_v26 = vpop.permute.xlu0 %512 }
  0xc1   : > { %719 = vst.msk [vmem:[#allocation2 + $0xa8] sm:$0xff] %vm331_vm0, %v678_v8  ;;  %718 = vst.msk [vmem:[#allocation2 + $0xa0] sm:$0xff] %vm331_vm0, %v677_v24  ;;  %v632_v27 = vmul.f32 %v8948_v63, %v518_v25  ;;  %v631_v28 = vmul.f32 %v8948_v63, %v513_v26  ;;  %909 = vperm.xlu1 %8602, %v765_v7   ;;  %1644 = vperm.xlu0 %8601, %v9007_v40   ;;  %v9156_v7 = vld [vmem:[%s8881_s25 + $0xc2] sm:$0xff] }
  0xc3   : > { %v680_v30 = vadd.f32 %v8955_v2, %v632_v27  ;;  %v679_v31 = vadd.f32 %v8955_v2, %v631_v28 }
  0xc4   : > { %v528_v32 = vpop.permute.xlu1 %527  ;;  %v523_v33 = vpop.permute.xlu0 %522 }
  0xc5   : > { %721 = vst.msk [vmem:[#allocation2 + $0xb8] sm:$0xff] %vm331_vm0, %v680_v30  ;;  %720 = vst.msk [vmem:[#allocation2 + $0xb0] sm:$0xff] %vm331_vm0, %v679_v31  ;;  %v634_v34 = vmul.f32 %v8948_v63, %v528_v32  ;;  %v633_v35 = vmul.f32 %v8948_v63, %v523_v33  ;;  %919 = vperm.xlu1 %8602, %v767_v16   ;;  %914 = vperm.xlu0 %8601, %v766_v29  }
  0xc7   : > { %v682_v38 = vadd.f32 %v8955_v2, %v634_v34  ;;  %v681_v40 = vadd.f32 %v8955_v2, %v633_v35 }
  0xc8   : > { %v538_v41 = vpop.permute.xlu1 %537  ;;  %v533_v42 = vpop.permute.xlu0 %532 }
  0xc9   : > { %723 = vst.msk [vmem:[#allocation2 + $0xc8] sm:$0xff] %vm331_vm0, %v682_v38  ;;  %722 = vst.msk [vmem:[#allocation2 + $0xc0] sm:$0xff] %vm331_vm0, %v681_v40  ;;  %v636_v43 = vmul.f32 %v8948_v63, %v538_v41  ;;  %v635_v44 = vmul.f32 %v8948_v63, %v533_v42  ;;  %929 = vperm.xlu1 %8602, %v769_v36   ;;  %924 = vperm.xlu0 %8601, %v768_v37  }
  0xcb   : > { %v684_v49 = vadd.f32 %v8955_v2, %v636_v43  ;;  %v683_v50 = vadd.f32 %v8955_v2, %v635_v44 }
  0xcc   : > { %v548_v51 = vpop.permute.xlu1 %547  ;;  %v543_v52 = vpop.permute.xlu0 %542 }
  0xcd   : > { %725 = vst.msk [vmem:[#allocation2 + $0xd8] sm:$0xff] %vm331_vm0, %v684_v49  ;;  %724 = vst.msk [vmem:[#allocation2 + $0xd0] sm:$0xff] %vm331_vm0, %v683_v50  ;;  %v638_v53 = vmul.f32 %v8948_v63, %v548_v51  ;;  %v637_v54 = vmul.f32 %v8948_v63, %v543_v52  ;;  %1284 = vperm.xlu1 %8602, %v9100_v45   ;;  %1279 = vperm.xlu0 %8601, %v9103_v46  }
  0xcf   : > { %v686_v59 = vadd.f32 %v8955_v2, %v638_v53  ;;  %v685_v60 = vadd.f32 %v8955_v2, %v637_v54  ;;  %v1035_v54 = vld [vmem:[#allocation2 + $0x18] sm:$0xff] }
  0xd0   : > { %v558_v61 = vpop.permute.xlu1 %557  ;;  %v553_v62 = vpop.permute.xlu0 %552 }
  0xd1   : > { %727 = vst.msk [vmem:[#allocation2 + $0xe8] sm:$0xff] %vm331_vm0, %v686_v59  ;;  %726 = vst.msk [vmem:[#allocation2 + $0xe0] sm:$0xff] %vm331_vm0, %v685_v60  ;;  %v640_v3 = vmul.f32 %v8948_v63, %v558_v61  ;;  %v639_v4 = vmul.f32 %v8948_v63, %v553_v62  ;;  %1294 = vperm.xlu1 %8602, %v9114_v57   ;;  %1289 = vperm.xlu0 %8601, %v9117_v58   ;;  %v1987_v59 = vld [vmem:[%s8881_s25 + $0x23] sm:$0xff] }
  0xd3   : > { %v688_v9 = vadd.f32 %v8955_v2, %v640_v3  ;;  %v687_v10 = vadd.f32 %v8955_v2, %v639_v4 }
  0xd4   : > { %v568_v11 = vpop.permute.xlu1 %567  ;;  %v563_v12 = vpop.permute.xlu0 %562 }
  0xd5   : > { %729 = vst.msk [vmem:[#allocation2 + $0xf8] sm:$0xff] %vm331_vm0, %v688_v9  ;;  %728 = vst.msk [vmem:[#allocation2 + $0xf0] sm:$0xff] %vm331_vm0, %v687_v10  ;;  %v642_v13 = vmul.f32 %v8948_v63, %v568_v11  ;;  %v641_v14 = vmul.f32 %v8948_v63, %v563_v12  ;;  %1304 = vperm.xlu1 %8602, %v9128_v5   ;;  %1299 = vperm.xlu0 %8601, %v9131_v6   ;;  %v1038_v9 = vld [vmem:[#allocation2 + $0x30] sm:$0xff]  ;;  %v1037_v10 = vld [vmem:[#allocation2 + $0x28] sm:$0xff] }
  0xd6   : > { %v1989_v11 = vld [vmem:[%s8881_s25 + $0x33] sm:$0xff] }
  0xd7   : > { %v690_v18 = vadd.f32 %v8955_v2, %v642_v13  ;;  %v689_v19 = vadd.f32 %v8955_v2, %v641_v14 }
  0xd8   : > { %v578_v20 = vpop.permute.xlu1 %577  ;;  %v573_v21 = vpop.permute.xlu0 %572 }
  0xd9   : > { %731 = vst.msk [vmem:[#allocation2 + $0x108] sm:$0xff] %vm331_vm0, %v690_v18  ;;  %730 = vst.msk [vmem:[#allocation2 + $0x100] sm:$0xff] %vm331_vm0, %v689_v19  ;;  %v644_v22 = vmul.f32 %v8948_v63, %v578_v20  ;;  %v643_v23 = vmul.f32 %v8948_v63, %v573_v21  ;;  %1314 = vperm.xlu1 %8602, %v9142_v15   ;;  %1309 = vperm.xlu0 %8601, %v9145_v17   ;;  %v770_v21 = vld [vmem:[%s8881_s25 + $0xf1] sm:$0xff] }
  0xdb   : > { %v692_v8 = vadd.f32 %v8955_v2, %v644_v22  ;;  %v691_v24 = vadd.f32 %v8955_v2, %v643_v23  ;;  %v1040_v22 = vld [vmem:[#allocation2 + $0x40] sm:$0xff]  ;;  %v1039_v23 = vld [vmem:[#allocation2 + $0x38] sm:$0xff] }
  0xdc   : > { %v588_v25 = vpop.permute.xlu1 %587  ;;  %v583_v26 = vpop.permute.xlu0 %582 }
  0xdd   : > { %733 = vst.msk [vmem:[#allocation2 + $0x118] sm:$0xff] %vm331_vm0, %v692_v8  ;;  %732 = vst.msk [vmem:[#allocation2 + $0x110] sm:$0xff] %vm331_vm0, %v691_v24  ;;  %v646_v27 = vmul.f32 %v8948_v63, %v588_v25  ;;  %v645_v28 = vmul.f32 %v8948_v63, %v583_v26  ;;  %1649 = vperm.xlu1 %8602, %v9004_v39   ;;  %1319 = vperm.xlu0 %8601, %v9156_v7   ;;  %v9177_v39 = vld [vmem:[%s11322_s1 + $0x1] ss:$0 sm:$0xff]  ;;  %v1991_v8 = vld [vmem:[%s8881_s25 + $0x43] sm:$0xff] }
  0xdf   : > { %v694_v16 = vadd.f32 %v8955_v2, %v646_v27  ;;  %v693_v29 = vadd.f32 %v8955_v2, %v645_v28 }
  0xe0   : > { %v598_v30 = vpop.permute.xlu1 %597  ;;  %v593_v31 = vpop.permute.xlu0 %592 }
  0xe1   : > { %735 = vst.msk [vmem:[#allocation2 + $0x128] sm:$0xff] %vm331_vm0, %v694_v16  ;;  %734 = vst.msk [vmem:[#allocation2 + $0x120] sm:$0xff] %vm331_vm0, %v693_v29  ;;  %v648_v32 = vmul.f32 %v8948_v63, %v598_v30  ;;  %v647_v33 = vmul.f32 %v8948_v63, %v593_v31  ;;  %1659 = vperm.xlu1 %8602, %v9018_v47   ;;  %1654 = vperm.xlu0 %8601, %v9021_v48   ;;  %v1032_v48 = vld [vmem:[#allocation2] sm:$0xff]  ;;  %v1042_v30 = vld [vmem:[#allocation2 + $0x50] sm:$0xff] }
  0xe2   : > { %v772_v29 = vld [vmem:[%s8881_s25 + $0x101] sm:$0xff] }
  0xe3   : > { %v696_v34 = vadd.f32 %v8955_v2, %v648_v32  ;;  %v695_v35 = vadd.f32 %v8955_v2, %v647_v33  ;;  %v1041_v31 = vld [vmem:[#allocation2 + $0x48] sm:$0xff]  ;;  %v771_v32 = vld [vmem:[%s8881_s25 + $0xf9] sm:$0xff] }
  0xe4   : > { %v785_v36 = vpop.permute.xlu1 %784  ;;  %v603_v37 = vpop.permute.xlu0 %602 }
  0xe5   : > { %737 = vst.msk [vmem:[#allocation2 + $0x138] sm:$0xff] %vm331_vm0, %v696_v34  ;;  %736 = vst.msk [vmem:[#allocation2 + $0x130] sm:$0xff] %vm331_vm0, %v695_v35  ;;  %v991_v38 = vmul.f32 %v9177_v39, %v785_v36  ;;  %v649_v47 = vmul.f32 %v8948_v63, %v603_v37  ;;  %1669 = vperm.xlu1 %8602, %v9032_v55   ;;  %1664 = vperm.xlu0 %8601, %v9035_v56   ;;  %v1034_v55 = vld [vmem:[#allocation2 + $0x10] sm:$0xff]  ;;  %v1033_v56 = vld [vmem:[#allocation2 + $0x8] sm:$0xff] }
  0xe7   : > { %v1073_v40 = vadd.f32 %v1032_v48, %v991_v38  ;;  %v697_v41 = vadd.f32 %v8955_v2, %v649_v47  ;;  %v774_v47 = vld [vmem:[%s8881_s25 + $0x111] sm:$0xff]  ;;  %v1044_v48 = vld [vmem:[#allocation2 + $0x60] sm:$0xff] }
  0xe8   : > { %v795_v42 = vpop.permute.xlu1 %794  ;;  %v790_v43 = vpop.permute.xlu0 %789 }
  0xe9   : > { %1114 = vst.msk [vmem:[#allocation2] sm:$0xff] %vm331_vm0, %v1073_v40  ;;  %v993_v44 = vmul.f32 %v9177_v39, %v795_v42  ;;  %v992_v63 = vmul.f32 %v9177_v39, %v790_v43  ;;  %1679 = vperm.xlu1 %8602, %v9046_v0   ;;  %1674 = vperm.xlu0 %8601, %v9049_v1   ;;  %v1988_v0 = vld [vmem:[%s8881_s25 + $0x2b] sm:$0xff]  ;;  %v1036_v1 = vld [vmem:[#allocation2 + $0x20] sm:$0xff]  ;;  %v1043_v40 = vld [vmem:[#allocation2 + $0x58] sm:$0xff] }
  0xea   : > { %739 = vst.msk [vmem:[#allocation2 + $0x140] sm:$0xf] %vm738_vm1, %v697_v41  ;;  %v773_v41 = vld [vmem:[%s8881_s25 + $0x109] sm:$0xff] }
  0xeb   : > { %v1075_v49 = vadd.f32 %v1034_v55, %v993_v44  ;;  %v1074_v2 = vadd.f32 %v1033_v56, %v992_v63 }
  0xec   : > { %v805_v50 = vpop.permute.xlu1 %804  ;;  %v800_v51 = vpop.permute.xlu0 %799 }
  0xed   : > { %1116 = vst.msk [vmem:[#allocation2 + $0x10] sm:$0xff] %vm331_vm0, %v1075_v49  ;;  %1115 = vst.msk [vmem:[#allocation2 + $0x8] sm:$0xff] %vm331_vm0, %v1074_v2  ;;  %v995_v52 = vmul.f32 %v9177_v39, %v805_v50  ;;  %v994_v53 = vmul.f32 %v9177_v39, %v800_v51  ;;  %1689 = vperm.xlu1 %8602, %v9100_v45   ;;  %1684 = vperm.xlu0 %8601, %v9103_v46   ;;  %v1990_v46 = vld [vmem:[%s8881_s25 + $0x3b] sm:$0xff]  ;;  %v1046_v2 = vld [vmem:[#allocation2 + $0x70] sm:$0xff] }
  0xee   : > { %v776_v49 = vld [vmem:[%s8881_s25 + $0x121] sm:$0xff]  ;;  %v775_v51 = vld [vmem:[%s8881_s25 + $0x119] sm:$0xff] }
  0xef   : > { %v1077_v60 = vadd.f32 %v1036_v1, %v995_v52  ;;  %v1076_v61 = vadd.f32 %v1035_v54, %v994_v53  ;;  %v1045_v50 = vld [vmem:[#allocation2 + $0x68] sm:$0xff] }
  0xf0   : > { %v815_v62 = vpop.permute.xlu1 %814  ;;  %v810_v3 = vpop.permute.xlu0 %809 }
  0xf1   : > { %1118 = vst.msk [vmem:[#allocation2 + $0x20] sm:$0xff] %vm331_vm0, %v1077_v60  ;;  %1117 = vst.msk [vmem:[#allocation2 + $0x18] sm:$0xff] %vm331_vm0, %v1076_v61  ;;  %v997_v4 = vmul.f32 %v9177_v39, %v815_v62  ;;  %v996_v45 = vmul.f32 %v9177_v39, %v810_v3  ;;  %2044 = vperm.xlu1 %8602, %v1988_v0   ;;  %2039 = vperm.xlu0 %8601, %v1987_v59   ;;  %v778_v60 = vld [vmem:[%s8881_s25 + $0x131] sm:$0xff]  ;;  %v1048_v61 = vld [vmem:[#allocation2 + $0x80] sm:$0xff] }
  0xf2   : > { %v1047_v62 = vld [vmem:[#allocation2 + $0x78] sm:$0xff]  ;;  %v777_v3 = vld [vmem:[%s8881_s25 + $0x129] sm:$0xff] }
  0xf3   : > { %v1079_v12 = vadd.f32 %v1038_v9, %v997_v4  ;;  %v1078_v13 = vadd.f32 %v1037_v10, %v996_v45 }
  0xf4   : > { %v825_v14 = vpop.permute.xlu1 %824  ;;  %v820_v18 = vpop.permute.xlu0 %819 }
  0xf5   : > { %1120 = vst.msk [vmem:[#allocation2 + $0x30] sm:$0xff] %vm331_vm0, %v1079_v12  ;;  %1119 = vst.msk [vmem:[#allocation2 + $0x28] sm:$0xff] %vm331_vm0, %v1078_v13  ;;  %v999_v19 = vmul.f32 %v9177_v39, %v825_v14  ;;  %v998_v20 = vmul.f32 %v9177_v39, %v820_v18  ;;  %2054 = vperm.xlu1 %8602, %v1990_v46   ;;  %2049 = vperm.xlu0 %8601, %v1989_v11   ;;  %v9243_v12 = vld [vmem:[%s8881_s25 + $0xd2] sm:$0xff]  ;;  %v1049_v14 = vld [vmem:[#allocation2 + $0x88] sm:$0xff] }
  0xf6   : > { %v1050_v13 = vld [vmem:[#allocation2 + $0x90] sm:$0xff] }
  0xf7   : > { %v1081_v24 = vadd.f32 %v1040_v22, %v999_v19  ;;  %v1080_v25 = vadd.f32 %v1039_v23, %v998_v20  ;;  %v9246_v18 = vld [vmem:[%s8881_s25 + $0xca] sm:$0xff] }
  0xf8   : > { %v835_v26 = vpop.permute.xlu1 %834  ;;  %v830_v27 = vpop.permute.xlu0 %829 }
  0xf9   : > { %1122 = vst.msk [vmem:[#allocation2 + $0x40] sm:$0xff] %vm331_vm0, %v1081_v24  ;;  %1121 = vst.msk [vmem:[#allocation2 + $0x38] sm:$0xff] %vm331_vm0, %v1080_v25  ;;  %v1001_v28 = vmul.f32 %v9177_v39, %v835_v26  ;;  %v1000_v16 = vmul.f32 %v9177_v39, %v830_v27  ;;  %934 = vperm.xlu1 %8602, %v770_v21   ;;  %2059 = vperm.xlu0 %8601, %v1991_v8   ;;  %v9257_v24 = vld [vmem:[%s11322_s1 + $0x2] ss:$0 sm:$0xff]  ;;  %v1051_v27 = vld [vmem:[#allocation2 + $0x98] sm:$0xff] }
  0xfa   : > { %v9260_v25 = vld [vmem:[%s8881_s25 + $0xe2] sm:$0xff] }
  0xfb   : > { %v1083_v33 = vadd.f32 %v1042_v30, %v1001_v28  ;;  %v1082_v34 = vadd.f32 %v1041_v31, %v1000_v16  ;;  %v1052_v26 = vld [vmem:[#allocation2 + $0xa0] sm:$0xff] }
  0xfc   : > { %v845_v35 = vpop.permute.xlu1 %844  ;;  %v840_v36 = vpop.permute.xlu0 %839  ;;  %v9263_v28 = vld [vmem:[%s8881_s25 + $0xda] sm:$0xff] }
  0xfd   : > { %1124 = vst.msk [vmem:[#allocation2 + $0x50] sm:$0xff] %vm331_vm0, %v1083_v33  ;;  %1123 = vst.msk [vmem:[#allocation2 + $0x48] sm:$0xff] %vm331_vm0, %v1082_v34  ;;  %v1003_v37 = vmul.f32 %v9177_v39, %v845_v35  ;;  %v1002_v38 = vmul.f32 %v9177_v39, %v840_v36  ;;  %944 = vperm.xlu1 %8602, %v772_v29   ;;  %939 = vperm.xlu0 %8601, %v771_v32   ;;  %v1450_v34 = vld [vmem:[#allocation2 + $0x18] sm:$0xff]  ;;  %v1449_v35 = vld [vmem:[#allocation2 + $0x10] sm:$0xff] }
  0xfe   : > { %v9272_v36 = vld [vmem:[%s8881_s25 + $0xea] sm:$0xff] }
  0xff   : > { %v1085_v42 = vadd.f32 %v1044_v48, %v1003_v37  ;;  %v1084_v43 = vadd.f32 %v1043_v40, %v1002_v38 }
 0x100   : > { %v855_v44 = vpop.permute.xlu1 %854  ;;  %v850_v63 = vpop.permute.xlu0 %849 }
 0x101   : > { %1126 = vst.msk [vmem:[#allocation2 + $0x60] sm:$0xff] %vm331_vm0, %v1085_v42  ;;  %1125 = vst.msk [vmem:[#allocation2 + $0x58] sm:$0xff] %vm331_vm0, %v1084_v43  ;;  %v1005_v55 = vmul.f32 %v9177_v39, %v855_v44  ;;  %v1004_v56 = vmul.f32 %v9177_v39, %v850_v63  ;;  %954 = vperm.xlu1 %8602, %v774_v47   ;;  %949 = vperm.xlu0 %8601, %v773_v41   ;;  %v1452_v42 = vld [vmem:[#allocation2 + $0x28] sm:$0xff]  ;;  %v1451_v43 = vld [vmem:[#allocation2 + $0x20] sm:$0xff] }
 0x103   : > { %v1087_v52 = vadd.f32 %v1046_v2, %v1005_v55  ;;  %v1086_v53 = vadd.f32 %v1045_v50, %v1004_v56  ;;  %v1453_v50 = vld [vmem:[#allocation2 + $0x30] sm:$0xff] }
 0x104   : > { %v865_v0 = vpop.permute.xlu1 %864  ;;  %v860_v1 = vpop.permute.xlu0 %859 }
 0x105   : > { %1128 = vst.msk [vmem:[#allocation2 + $0x70] sm:$0xff] %vm331_vm0, %v1087_v52  ;;  %1127 = vst.msk [vmem:[#allocation2 + $0x68] sm:$0xff] %vm331_vm0, %v1086_v53  ;;  %v1007_v54 = vmul.f32 %v9177_v39, %v865_v0  ;;  %v1006_v59 = vmul.f32 %v9177_v39, %v860_v1  ;;  %964 = vperm.xlu1 %8602, %v776_v49   ;;  %959 = vperm.xlu0 %8601, %v775_v51  }
 0x107   : > { %v1089_v4 = vadd.f32 %v1048_v61, %v1007_v54  ;;  %v1088_v45 = vadd.f32 %v1047_v62, %v1006_v59 }
 0x108   : > { %v875_v46 = vpop.permute.xlu1 %874  ;;  %v870_v9 = vpop.permute.xlu0 %869 }
 0x109   : > { %1130 = vst.msk [vmem:[#allocation2 + $0x80] sm:$0xff] %vm331_vm0, %v1089_v4  ;;  %1129 = vst.msk [vmem:[#allocation2 + $0x78] sm:$0xff] %vm331_vm0, %v1088_v45  ;;  %v1009_v10 = vmul.f32 %v9177_v39, %v875_v46  ;;  %v1008_v11 = vmul.f32 %v9177_v39, %v870_v9  ;;  %974 = vperm.xlu1 %8602, %v778_v60   ;;  %969 = vperm.xlu0 %8601, %v777_v3  }
 0x10b   : > { %v1091_v19 = vadd.f32 %v1050_v13, %v1009_v10  ;;  %v1090_v20 = vadd.f32 %v1049_v14, %v1008_v11  ;;  %v1455_v14 = vld [vmem:[#allocation2 + $0x40] sm:$0xff] }
 0x10c   : > { %v885_v21 = vpop.permute.xlu1 %884  ;;  %v880_v22 = vpop.permute.xlu0 %879 }
 0x10d   : > { %1132 = vst.msk [vmem:[#allocation2 + $0x90] sm:$0xff] %vm331_vm0, %v1091_v19  ;;  %1131 = vst.msk [vmem:[#allocation2 + $0x88] sm:$0xff] %vm331_vm0, %v1090_v20  ;;  %v1011_v23 = vmul.f32 %v9177_v39, %v885_v21  ;;  %v1010_v8 = vmul.f32 %v9177_v39, %v880_v22  ;;  %1329 = vperm.xlu1 %8602, %v9243_v12   ;;  %1324 = vperm.xlu0 %8601, %v9246_v18   ;;  %v1992_v19 = vld [vmem:[%s8881_s25 + $0x4b] sm:$0xff] }
 0x10f   : > { %v1093_v16 = vadd.f32 %v1052_v26, %v1011_v23  ;;  %v1092_v29 = vadd.f32 %v1051_v27, %v1010_v8  ;;  %v1458_v26 = vld [vmem:[#allocation2 + $0x58] sm:$0xff]  ;;  %v1457_v27 = vld [vmem:[#allocation2 + $0x50] sm:$0xff] }
 0x110   : > { %v1215_v30 = vpop.permute.xlu1 %1214  ;;  %v1210_v31 = vpop.permute.xlu0 %1209 }
 0x111   : > { %1134 = vst.msk [vmem:[#allocation2 + $0xa0] sm:$0xff] %vm331_vm0, %v1093_v16  ;;  %1133 = vst.msk [vmem:[#allocation2 + $0x98] sm:$0xff] %vm331_vm0, %v1092_v29  ;;  %v1409_v32 = vmul.f32 %v9257_v24, %v1215_v30  ;;  %v1408_v33 = vmul.f32 %v9257_v24, %v1210_v31  ;;  %1339 = vperm.xlu1 %8602, %v9260_v25   ;;  %1334 = vperm.xlu0 %8601, %v9263_v28   ;;  %v1994_v16 = vld [vmem:[%s8881_s25 + $0x5b] sm:$0xff] }
 0x113   : > { %v1491_v37 = vadd.f32 %v1450_v34, %v1409_v32  ;;  %v1490_v38 = vadd.f32 %v1449_v35, %v1408_v33  ;;  %v1997_v35 = vld [vmem:[%s8881_s25 + $0x73] sm:$0xff] }
 0x114   : > { %v1225_v47 = vpop.permute.xlu1 %1224  ;;  %v1220_v48 = vpop.permute.xlu0 %1219 }
 0x115   : > { %1532 = vst.msk [vmem:[#allocation2 + $0x18] sm:$0xff] %vm331_vm0, %v1491_v37  ;;  %1531 = vst.msk [vmem:[#allocation2 + $0x10] sm:$0xff] %vm331_vm0, %v1490_v38  ;;  %v1411_v40 = vmul.f32 %v9257_v24, %v1225_v47  ;;  %v1410_v41 = vmul.f32 %v9257_v24, %v1220_v48  ;;  %1694 = vperm.xlu1 %8602, %v9117_v58   ;;  %1344 = vperm.xlu0 %8601, %v9272_v36   ;;  %v1053_v58 = vld [vmem:[#allocation2 + $0xa8] sm:$0xff]  ;;  %v1459_v38 = vld [vmem:[#allocation2 + $0x60] sm:$0xff] }
 0x116   : > { %v1460_v37 = vld [vmem:[#allocation2 + $0x68] sm:$0xff] }
 0x117   : > { %v1493_v44 = vadd.f32 %v1452_v42, %v1411_v40  ;;  %v1492_v63 = vadd.f32 %v1451_v43, %v1410_v41  ;;  %v1996_v47 = vld [vmem:[%s8881_s25 + $0x6b] sm:$0xff] }
 0x118   : > { %v890_v55 = vpop.permute.xlu1 %889  ;;  %v1230_v56 = vpop.permute.xlu0 %1229 }
 0x119   : > { %1534 = vst.msk [vmem:[#allocation2 + $0x28] sm:$0xff] %vm331_vm0, %v1493_v44  ;;  %1533 = vst.msk [vmem:[#allocation2 + $0x20] sm:$0xff] %vm331_vm0, %v1492_v63  ;;  %v1012_v49 = vmul.f32 %v9177_v39, %v890_v55  ;;  %v1412_v2 = vmul.f32 %v9257_v24, %v1230_v56  ;;  %1704 = vperm.xlu1 %8602, %v9131_v6   ;;  %1699 = vperm.xlu0 %8601, %v9114_v57   ;;  %v1055_v6 = vld [vmem:[#allocation2 + $0xb8] sm:$0xff]  ;;  %v1054_v57 = vld [vmem:[#allocation2 + $0xb0] sm:$0xff] }
 0x11a   : > { %v9325_v63 = vld [vmem:[%s11322_s1 + $0x3] ss:$0 sm:$0xff]  ;;  %v1462_v56 = vld [vmem:[#allocation2 + $0x78] sm:$0xff] }
 0x11b   : > { %v1094_v51 = vadd.f32 %v1053_v58, %v1012_v49  ;;  %v1494_v52 = vadd.f32 %v1453_v50, %v1412_v2  ;;  %v1999_v55 = vld [vmem:[%s8881_s25 + $0x83] sm:$0xff]  ;;  %v1461_v49 = vld [vmem:[#allocation2 + $0x70] sm:$0xff]  ;;  %v1998_v2 = vld [vmem:[%s8881_s25 + $0x7b] sm:$0xff] }
 0x11c   : > { %v900_v53 = vpop.permute.xlu1 %899  ;;  %v895_v0 = vpop.permute.xlu0 %894 }
 0x11d   : > { %1135 = vst.msk [vmem:[#allocation2 + $0xa8] sm:$0xff] %vm331_vm0, %v1094_v51  ;;  %1535 = vst.msk [vmem:[#allocation2 + $0x30] sm:$0xff] %vm331_vm0, %v1494_v52  ;;  %v1014_v1 = vmul.f32 %v9177_v39, %v900_v53  ;;  %v1013_v54 = vmul.f32 %v9177_v39, %v895_v0  ;;  %1714 = vperm.xlu1 %8602, %v9145_v17   ;;  %1709 = vperm.xlu0 %8601, %v9128_v5   ;;  %v1454_v5 = vld [vmem:[#allocation2 + $0x38] sm:$0xff]  ;;  %v1056_v17 = vld [vmem:[#allocation2 + $0xc0] sm:$0xff] }
 0x11f   : > { %v1096_v59 = vadd.f32 %v1055_v6, %v1014_v1  ;;  %v1095_v60 = vadd.f32 %v1054_v57, %v1013_v54  ;;  %v2402_v1 = vld [vmem:[%s8881_s25 + $0x24] sm:$0xff]  ;;  %v1865_v54 = vld [vmem:[#allocation2 + $0x18] sm:$0xff]  ;;  %v1864_v6 = vld [vmem:[#allocation2 + $0x10] sm:$0xff] }
 0x120   : > { %v1235_v61 = vpop.permute.xlu1 %1234  ;;  %v905_v62 = vpop.permute.xlu0 %904  ;;  %v2000_v57 = vld [vmem:[%s8881_s25 + $0x8b] sm:$0xff] }
 0x121   : > { %1137 = vst.msk [vmem:[#allocation2 + $0xb8] sm:$0xff] %vm331_vm0, %v1096_v59  ;;  %1136 = vst.msk [vmem:[#allocation2 + $0xb0] sm:$0xff] %vm331_vm0, %v1095_v60  ;;  %v1413_v3 = vmul.f32 %v9257_v24, %v1235_v61  ;;  %v1015_v4 = vmul.f32 %v9177_v39, %v905_v62  ;;  %1724 = vperm.xlu1 %8602, %v9156_v7   ;;  %1719 = vperm.xlu0 %8601, %v9142_v15   ;;  %v1993_v15 = vld [vmem:[%s8881_s25 + $0x53] sm:$0xff]  ;;  %v1456_v7 = vld [vmem:[#allocation2 + $0x48] sm:$0xff] }
 0x123   : > { %v1495_v45 = vadd.f32 %v1454_v5, %v1413_v3  ;;  %v1097_v46 = vadd.f32 %v1056_v17, %v1015_v4  ;;  %v9340_v5 = vld [vmem:[%s8881_s25 + $0x34] sm:$0xff]  ;;  %v1867_v17 = vld [vmem:[#allocation2 + $0x28] sm:$0xff] }
 0x124   : > { %v1245_v9 = vpop.permute.xlu1 %1244  ;;  %v1240_v10 = vpop.permute.xlu0 %1239 }
 0x125   : > { %1536 = vst.msk [vmem:[#allocation2 + $0x38] sm:$0xff] %vm331_vm0, %v1495_v45  ;;  %1138 = vst.msk [vmem:[#allocation2 + $0xc0] sm:$0xff] %vm331_vm0, %v1097_v46  ;;  %v1415_v11 = vmul.f32 %v9257_v24, %v1245_v9  ;;  %v1414_v13 = vmul.f32 %v9257_v24, %v1240_v10  ;;  %1734 = vperm.xlu1 %8602, %v9243_v12   ;;  %1729 = vperm.xlu0 %8601, %v9246_v18   ;;  %v1995_v18 = vld [vmem:[%s8881_s25 + $0x63] sm:$0xff]  ;;  %v2403_v46 = vld [vmem:[%s8881_s25 + $0x2c] sm:$0xff] }
 0x126   : > { %v1866_v45 = vld [vmem:[#allocation2 + $0x20] sm:$0xff] }
 0x127   : > { %v1497_v20 = vadd.f32 %v1456_v7, %v1415_v11  ;;  %v1496_v21 = vadd.f32 %v1455_v14, %v1414_v13  ;;  %v9349_v14 = vld [vmem:[%s8881_s25 + $0x44] sm:$0xff] }
 0x128   : > { %v1255_v22 = vpop.permute.xlu1 %1254  ;;  %v1250_v23 = vpop.permute.xlu0 %1249 }
 0x129   : > { %1538 = vst.msk [vmem:[#allocation2 + $0x48] sm:$0xff] %vm331_vm0, %v1497_v20  ;;  %1537 = vst.msk [vmem:[#allocation2 + $0x40] sm:$0xff] %vm331_vm0, %v1496_v21  ;;  %v1417_v8 = vmul.f32 %v9257_v24, %v1255_v22  ;;  %v1416_v12 = vmul.f32 %v9257_v24, %v1250_v23  ;;  %2069 = vperm.xlu1 %8602, %v1993_v15   ;;  %2064 = vperm.xlu0 %8601, %v1992_v19   ;;  %v1057_v19 = vld [vmem:[#allocation2 + $0xc8] sm:$0xff]  ;;  %v1868_v20 = vld [vmem:[#allocation2 + $0x30] sm:$0xff] }
 0x12a   : > { %v9352_v21 = vld [vmem:[%s8881_s25 + $0x3c] sm:$0xff] }
 0x12b   : > { %v1499_v29 = vadd.f32 %v1458_v26, %v1417_v8  ;;  %v1498_v30 = vadd.f32 %v1457_v27, %v1416_v12  ;;  %v9361_v27 = vld [vmem:[%s8881_s25 + $0xfa] sm:$0xff] }
 0x12c   : > { %v1265_v31 = vpop.permute.xlu1 %1264  ;;  %v1260_v32 = vpop.permute.xlu0 %1259 }
 0x12d   : > { %1540 = vst.msk [vmem:[#allocation2 + $0x58] sm:$0xff] %vm331_vm0, %v1499_v29  ;;  %1539 = vst.msk [vmem:[#allocation2 + $0x50] sm:$0xff] %vm331_vm0, %v1498_v30  ;;  %v1419_v33 = vmul.f32 %v9257_v24, %v1265_v31  ;;  %v1418_v34 = vmul.f32 %v9257_v24, %v1260_v32  ;;  %2079 = vperm.xlu1 %8602, %v1995_v18   ;;  %2074 = vperm.xlu0 %8601, %v1994_v16   ;;  %v1059_v16 = vld [vmem:[#allocation2 + $0xd8] sm:$0xff]  ;;  %v1058_v29 = vld [vmem:[#allocation2 + $0xd0] sm:$0xff] }
 0x12e   : > { %v9364_v30 = vld [vmem:[%s8881_s25 + $0xf2] sm:$0xff] }
 0x12f   : > { %v1501_v48 = vadd.f32 %v1460_v37, %v1419_v33  ;;  %v1500_v40 = vadd.f32 %v1459_v38, %v1418_v34  ;;  %v9373_v38 = vld [vmem:[%s8881_s25 + $0x10a] sm:$0xff] }
 0x130   : > { %v1275_v41 = vpop.permute.xlu1 %1274  ;;  %v1270_v42 = vpop.permute.xlu0 %1269 }
 0x131   : > { %1542 = vst.msk [vmem:[#allocation2 + $0x68] sm:$0xff] %vm331_vm0, %v1501_v48  ;;  %1541 = vst.msk [vmem:[#allocation2 + $0x60] sm:$0xff] %vm331_vm0, %v1500_v40  ;;  %v1421_v43 = vmul.f32 %v9257_v24, %v1275_v41  ;;  %v1420_v44 = vmul.f32 %v9257_v24, %v1270_v42  ;;  %2089 = vperm.xlu1 %8602, %v1997_v35   ;;  %2084 = vperm.xlu0 %8601, %v1996_v47   ;;  %v1061_v47 = vld [vmem:[#allocation2 + $0xe8] sm:$0xff]  ;;  %v1060_v48 = vld [vmem:[#allocation2 + $0xe0] sm:$0xff] }
 0x132   : > { %v9376_v40 = vld [vmem:[%s8881_s25 + $0x102] sm:$0xff] }
 0x133   : > { %v1503_v58 = vadd.f32 %v1462_v56, %v1421_v43  ;;  %v1502_v50 = vadd.f32 %v1461_v49, %v1420_v44  ;;  %v9385_v49 = vld [vmem:[%s8881_s25 + $0x11a] sm:$0xff] }
 0x134   : > { %v1630_v51 = vpop.permute.xlu1 %1629  ;;  %v1625_v52 = vpop.permute.xlu0 %1624 }
 0x135   : > { %1544 = vst.msk [vmem:[#allocation2 + $0x78] sm:$0xff] %vm331_vm0, %v1503_v58  ;;  %1543 = vst.msk [vmem:[#allocation2 + $0x70] sm:$0xff] %vm331_vm0, %v1502_v50  ;;  %v1824_v53 = vmul.f32 %v9325_v63, %v1630_v51  ;;  %v1823_v0 = vmul.f32 %v9325_v63, %v1625_v52  ;;  %2099 = vperm.xlu1 %8602, %v1999_v55   ;;  %2094 = vperm.xlu0 %8601, %v1998_v2   ;;  %v1464_v2 = vld [vmem:[#allocation2 + $0x88] sm:$0xff]  ;;  %v1463_v58 = vld [vmem:[#allocation2 + $0x80] sm:$0xff] }
 0x136   : > { %v9388_v50 = vld [vmem:[%s8881_s25 + $0x112] sm:$0xff] }
 0x137   : > { %v1906_v59 = vadd.f32 %v1865_v54, %v1824_v53  ;;  %v1905_v60 = vadd.f32 %v1864_v6, %v1823_v0  ;;  %v9397_v6 = vld [vmem:[%s8881_s25 + $0x12a] sm:$0xff] }
 0x138   : > { %v1640_v61 = vpop.permute.xlu1 %1639  ;;  %v1635_v62 = vpop.permute.xlu0 %1634 }
 0x139   : > { %1947 = vst.msk [vmem:[#allocation2 + $0x18] sm:$0xff] %vm331_vm0, %v1906_v59  ;;  %1946 = vst.msk [vmem:[#allocation2 + $0x10] sm:$0xff] %vm331_vm0, %v1905_v60  ;;  %v1826_v3 = vmul.f32 %v9325_v63, %v1640_v61  ;;  %v1825_v4 = vmul.f32 %v9325_v63, %v1635_v62  ;;  %2454 = vperm.xlu1 %8602, %v2402_v1   ;;  %2104 = vperm.xlu0 %8601, %v2000_v57   ;;  %v1466_v57 = vld [vmem:[#allocation2 + $0x98] sm:$0xff]  ;;  %v1465_v59 = vld [vmem:[#allocation2 + $0x90] sm:$0xff] }
 0x13a   : > { %v9400_v60 = vld [vmem:[%s8881_s25 + $0x122] sm:$0xff] }
 0x13b   : > { %v1908_v9 = vadd.f32 %v1867_v17, %v1826_v3  ;;  %v1907_v10 = vadd.f32 %v1866_v45, %v1825_v4 }
 0x13c   : > { %v910_v11 = vpop.permute.xlu1 %909  ;;  %v1645_v13 = vpop.permute.xlu0 %1644 }
 0x13d   : > { %1949 = vst.msk [vmem:[#allocation2 + $0x28] sm:$0xff] %vm331_vm0, %v1908_v9  ;;  %1948 = vst.msk [vmem:[#allocation2 + $0x20] sm:$0xff] %vm331_vm0, %v1907_v10  ;;  %v1016_v15 = vmul.f32 %v9177_v39, %v910_v11  ;;  %v1827_v7 = vmul.f32 %v9325_v63, %v1645_v13  ;;  %2464 = vperm.xlu1 %8602, %v9340_v5   ;;  %2459 = vperm.xlu0 %8601, %v2403_v46   ;;  %v1468_v46 = vld [vmem:[#allocation2 + $0xa8] sm:$0xff]  ;;  %v1467_v9 = vld [vmem:[#allocation2 + $0xa0] sm:$0xff] }
 0x13e   : > { %v9409_v10 = vld [vmem:[%s8881_s25 + $0x132] sm:$0xff] }
 0x13f   : > { %v1098_v22 = vadd.f32 %v1057_v19, %v1016_v15  ;;  %v1909_v23 = vadd.f32 %v1868_v20, %v1827_v7 }
 0x140   : > { %v920_v8 = vpop.permute.xlu1 %919  ;;  %v915_v12 = vpop.permute.xlu0 %914 }
 0x141   : > { %1139 = vst.msk [vmem:[#allocation2 + $0xc8] sm:$0xff] %vm331_vm0, %v1098_v22  ;;  %1950 = vst.msk [vmem:[#allocation2 + $0x30] sm:$0xff] %vm331_vm0, %v1909_v23  ;;  %v1018_v18 = vmul.f32 %v9177_v39, %v920_v8  ;;  %v1017_v26 = vmul.f32 %v9177_v39, %v915_v12  ;;  %2474 = vperm.xlu1 %8602, %v9349_v14   ;;  %2469 = vperm.xlu0 %8601, %v9352_v21   ;;  %v1470_v22 = vld [vmem:[#allocation2 + $0xb8] sm:$0xff]  ;;  %v1469_v23 = vld [vmem:[#allocation2 + $0xb0] sm:$0xff] }
 0x143   : > { %v1100_v31 = vadd.f32 %v1059_v16, %v1018_v18  ;;  %v1099_v32 = vadd.f32 %v1058_v29, %v1017_v26 }
 0x144   : > { %v930_v33 = vpop.permute.xlu1 %929  ;;  %v925_v34 = vpop.permute.xlu0 %924 }
 0x145   : > { %1141 = vst.msk [vmem:[#allocation2 + $0xd8] sm:$0xff] %vm331_vm0, %v1100_v31  ;;  %1140 = vst.msk [vmem:[#allocation2 + $0xd0] sm:$0xff] %vm331_vm0, %v1099_v32  ;;  %v1020_v35 = vmul.f32 %v9177_v39, %v930_v33  ;;  %v1019_v37 = vmul.f32 %v9177_v39, %v925_v34  ;;  %1354 = vperm.xlu1 %8602, %v9361_v27   ;;  %1349 = vperm.xlu0 %8601, %v9364_v30   ;;  %v1471_v31 = vld [vmem:[#allocation2 + $0xc0] sm:$0xff] }
 0x147   : > { %v1102_v41 = vadd.f32 %v1061_v47, %v1020_v35  ;;  %v1101_v42 = vadd.f32 %v1060_v48, %v1019_v37  ;;  %v1870_v48 = vld [vmem:[#allocation2 + $0x40] sm:$0xff] }
 0x148   : > { %v1285_v43 = vpop.permute.xlu1 %1284  ;;  %v1280_v44 = vpop.permute.xlu0 %1279 }
 0x149   : > { %1143 = vst.msk [vmem:[#allocation2 + $0xe8] sm:$0xff] %vm331_vm0, %v1102_v41  ;;  %1142 = vst.msk [vmem:[#allocation2 + $0xe0] sm:$0xff] %vm331_vm0, %v1101_v42  ;;  %v1423_v55 = vmul.f32 %v9257_v24, %v1285_v43  ;;  %v1422_v56 = vmul.f32 %v9257_v24, %v1280_v44  ;;  %1364 = vperm.xlu1 %8602, %v9373_v38   ;;  %1359 = vperm.xlu0 %8601, %v9376_v40   ;;  %v2001_v41 = vld [vmem:[%s8881_s25 + $0x93] sm:$0xff] }
 0x14b   : > { %v1505_v51 = vadd.f32 %v1464_v2, %v1423_v55  ;;  %v1504_v52 = vadd.f32 %v1463_v58, %v1422_v56  ;;  %v1873_v2 = vld [vmem:[#allocation2 + $0x58] sm:$0xff]  ;;  %v1872_v58 = vld [vmem:[#allocation2 + $0x50] sm:$0xff] }
 0x14c   : > { %v1295_v53 = vpop.permute.xlu1 %1294  ;;  %v1290_v0 = vpop.permute.xlu0 %1289 }
 0x14d   : > { %1546 = vst.msk [vmem:[#allocation2 + $0x88] sm:$0xff] %vm331_vm0, %v1505_v51  ;;  %1545 = vst.msk [vmem:[#allocation2 + $0x80] sm:$0xff] %vm331_vm0, %v1504_v52  ;;  %v1425_v1 = vmul.f32 %v9257_v24, %v1295_v53  ;;  %v1424_v54 = vmul.f32 %v9257_v24, %v1290_v0  ;;  %1374 = vperm.xlu1 %8602, %v9385_v49   ;;  %1369 = vperm.xlu0 %8601, %v9388_v50   ;;  %v2003_v51 = vld [vmem:[%s8881_s25 + $0xa3] sm:$0xff] }
 0x14f   : > { %v1507_v61 = vadd.f32 %v1466_v57, %v1425_v1  ;;  %v1506_v62 = vadd.f32 %v1465_v59, %v1424_v54  ;;  %v2006_v59 = vld [vmem:[%s8881_s25 + $0xbb] sm:$0xff] }
 0x150   : > { %v1305_v3 = vpop.permute.xlu1 %1304  ;;  %v1300_v4 = vpop.permute.xlu0 %1299 }
 0x151   : > { %1548 = vst.msk [vmem:[#allocation2 + $0x98] sm:$0xff] %vm331_vm0, %v1507_v61  ;;  %1547 = vst.msk [vmem:[#allocation2 + $0x90] sm:$0xff] %vm331_vm0, %v1506_v62  ;;  %v1427_v17 = vmul.f32 %v9257_v24, %v1305_v3  ;;  %v1426_v45 = vmul.f32 %v9257_v24, %v1300_v4  ;;  %1384 = vperm.xlu1 %8602, %v9397_v6   ;;  %1379 = vperm.xlu0 %8601, %v9400_v60   ;;  %v1875_v61 = vld [vmem:[#allocation2 + $0x68] sm:$0xff]  ;;  %v1874_v62 = vld [vmem:[#allocation2 + $0x60] sm:$0xff] }
 0x152   : > { %v2005_v3 = vld [vmem:[%s8881_s25 + $0xb3] sm:$0xff] }
 0x153   : > { %v1509_v11 = vadd.f32 %v1468_v46, %v1427_v17  ;;  %v1508_v13 = vadd.f32 %v1467_v9, %v1426_v45 }
 0x154   : > { %v1315_v15 = vpop.permute.xlu1 %1314  ;;  %v1310_v7 = vpop.permute.xlu0 %1309 }
 0x155   : > { %1550 = vst.msk [vmem:[#allocation2 + $0xa8] sm:$0xff] %vm331_vm0, %v1509_v11  ;;  %1549 = vst.msk [vmem:[#allocation2 + $0xa0] sm:$0xff] %vm331_vm0, %v1508_v13  ;;  %v1429_v19 = vmul.f32 %v9257_v24, %v1315_v15  ;;  %v1428_v20 = vmul.f32 %v9257_v24, %v1310_v7  ;;  %1739 = vperm.xlu1 %8602, %v9263_v28   ;;  %1389 = vperm.xlu0 %8601, %v9409_v10   ;;  %v1869_v28 = vld [vmem:[#allocation2 + $0x38] sm:$0xff]  ;;  %v9450_v13 = vld [vmem:[%s11322_s1 + $0x4] ss:$0 sm:$0xff] }
 0x156   : > { %v2008_v15 = vld [vmem:[%s8881_s25 + $0xcb] sm:$0xff]  ;;  %v1877_v7 = vld [vmem:[#allocation2 + $0x78] sm:$0xff] }
 0x157   : > { %v1511_v8 = vadd.f32 %v1470_v22, %v1429_v19  ;;  %v1510_v12 = vadd.f32 %v1469_v23, %v1428_v20  ;;  %v1876_v19 = vld [vmem:[#allocation2 + $0x70] sm:$0xff]  ;;  %v2007_v20 = vld [vmem:[%s8881_s25 + $0xc3] sm:$0xff] }
 0x158   : > { %v1650_v18 = vpop.permute.xlu1 %1649  ;;  %v1320_v26 = vpop.permute.xlu0 %1319 }
 0x159   : > { %1552 = vst.msk [vmem:[#allocation2 + $0xb8] sm:$0xff] %vm331_vm0, %v1511_v8  ;;  %1551 = vst.msk [vmem:[#allocation2 + $0xb0] sm:$0xff] %vm331_vm0, %v1510_v12  ;;  %v1828_v16 = vmul.f32 %v9325_v63, %v1650_v18  ;;  %v1430_v29 = vmul.f32 %v9257_v24, %v1320_v26  ;;  %1749 = vperm.xlu1 %8602, %v9272_v36   ;;  %1744 = vperm.xlu0 %8601, %v9260_v25   ;;  %v2002_v25 = vld [vmem:[%s8881_s25 + $0x9b] sm:$0xff]  ;;  %v1871_v36 = vld [vmem:[#allocation2 + $0x48] sm:$0xff] }
 0x15b   : > { %v1910_v32 = vadd.f32 %v1869_v28, %v1828_v16  ;;  %v1512_v33 = vadd.f32 %v1471_v31, %v1430_v29  ;;  %v9459_v16 = vld [vmem:[%s8881_s25 + $0x4c] sm:$0xff]  ;;  %v2280_v29 = vld [vmem:[#allocation2 + $0x18] sm:$0xff] }
 0x15c   : > { %v1660_v34 = vpop.permute.xlu1 %1659  ;;  %v1655_v35 = vpop.permute.xlu0 %1654  ;;  %v2279_v28 = vld [vmem:[#allocation2 + $0x10] sm:$0xff] }
 0x15d   : > { %1951 = vst.msk [vmem:[#allocation2 + $0x38] sm:$0xff] %vm331_vm0, %v1910_v32  ;;  %1553 = vst.msk [vmem:[#allocation2 + $0xc0] sm:$0xff] %vm331_vm0, %v1512_v33  ;;  %v1830_v37 = vmul.f32 %v9325_v63, %v1660_v34  ;;  %v1829_v47 = vmul.f32 %v9325_v63, %v1655_v35  ;;  %1759 = vperm.xlu1 %8602, %v9361_v27   ;;  %1754 = vperm.xlu0 %8601, %v9364_v30   ;;  %v2004_v30 = vld [vmem:[%s8881_s25 + $0xab] sm:$0xff]  ;;  %v2009_v31 = vld [vmem:[%s8881_s25 + $0xd3] sm:$0xff] }
 0x15f   : > { %v1912_v42 = vadd.f32 %v1871_v36, %v1830_v37  ;;  %v1911_v43 = vadd.f32 %v1870_v48, %v1829_v47  ;;  %v2282_v36 = vld [vmem:[#allocation2 + $0x28] sm:$0xff]  ;;  %v2281_v48 = vld [vmem:[#allocation2 + $0x20] sm:$0xff] }
 0x160   : > { %v1670_v44 = vpop.permute.xlu1 %1669  ;;  %v1665_v55 = vpop.permute.xlu0 %1664 }
 0x161   : > { %1953 = vst.msk [vmem:[#allocation2 + $0x48] sm:$0xff] %vm331_vm0, %v1912_v42  ;;  %1952 = vst.msk [vmem:[#allocation2 + $0x40] sm:$0xff] %vm331_vm0, %v1911_v43  ;;  %v1832_v56 = vmul.f32 %v9325_v63, %v1670_v44  ;;  %v1831_v27 = vmul.f32 %v9325_v63, %v1665_v55  ;;  %2114 = vperm.xlu1 %8602, %v2002_v25   ;;  %2109 = vperm.xlu0 %8601, %v2001_v41   ;;  %v9468_v25 = vld [vmem:[%s8881_s25 + $0x5c] sm:$0xff]  ;;  %v9471_v41 = vld [vmem:[%s8881_s25 + $0x54] sm:$0xff] }
 0x163   : > { %v1914_v52 = vadd.f32 %v1873_v2, %v1832_v56  ;;  %v1913_v53 = vadd.f32 %v1872_v58, %v1831_v27  ;;  %v1062_v27 = vld [vmem:[#allocation2 + $0xf0] sm:$0xff] }
 0x164   : > { %v1680_v0 = vpop.permute.xlu1 %1679  ;;  %v1675_v1 = vpop.permute.xlu0 %1674  ;;  %v2283_v2 = vld [vmem:[#allocation2 + $0x30] sm:$0xff] }
 0x165   : > { %1955 = vst.msk [vmem:[#allocation2 + $0x58] sm:$0xff] %vm331_vm0, %v1914_v52  ;;  %1954 = vst.msk [vmem:[#allocation2 + $0x50] sm:$0xff] %vm331_vm0, %v1913_v53  ;;  %v1834_v54 = vmul.f32 %v9325_v63, %v1680_v0  ;;  %v1833_v57 = vmul.f32 %v9325_v63, %v1675_v1  ;;  %2124 = vperm.xlu1 %8602, %v2004_v30   ;;  %2119 = vperm.xlu0 %8601, %v2003_v51   ;;  %v9480_v58 = vld [vmem:[%s8881_s25 + $0x6c] sm:$0xff]  ;;  %v9483_v51 = vld [vmem:[%s8881_s25 + $0x64] sm:$0xff] }
 0x167   : > { %v1916_v4 = vadd.f32 %v1875_v61, %v1834_v54  ;;  %v1915_v17 = vadd.f32 %v1874_v62, %v1833_v57  ;;  %v1063_v57 = vld [vmem:[#allocation2 + $0xf8] sm:$0xff]  ;;  %v1064_v62 = vld [vmem:[#allocation2 + $0x100] sm:$0xff] }
 0x168   : > { %v1690_v45 = vpop.permute.xlu1 %1689  ;;  %v1685_v46 = vpop.permute.xlu0 %1684 }
 0x169   : > { %1957 = vst.msk [vmem:[#allocation2 + $0x68] sm:$0xff] %vm331_vm0, %v1916_v4  ;;  %1956 = vst.msk [vmem:[#allocation2 + $0x60] sm:$0xff] %vm331_vm0, %v1915_v17  ;;  %v1836_v9 = vmul.f32 %v9325_v63, %v1690_v45  ;;  %v1835_v11 = vmul.f32 %v9325_v63, %v1685_v46  ;;  %2134 = vperm.xlu1 %8602, %v2006_v59   ;;  %2129 = vperm.xlu0 %8601, %v2005_v3   ;;  %v8697_v59 = vld [vmem:[%s11322_s1 + $0x1] ss:$0 sm:$0xff]  ;;  %v9497_v4 = vld [vmem:[%s8881_s25 + $0x74] sm:$0xff] }
 0x16a   : > { %v9494_v3 = vld [vmem:[%s8881_s25 + $0x7c] sm:$0xff] }
 0x16b   : > { %v1918_v22 = vadd.f32 %v1877_v7, %v1836_v9  ;;  %v1917_v23 = vadd.f32 %v1876_v19, %v1835_v11  ;;  %v1065_v11 = vld [vmem:[#allocation2 + $0x108] sm:$0xff]  ;;  %v1066_v7 = vld [vmem:[#allocation2 + $0x110] sm:$0xff] }
 0x16c   : > { %v2045_v8 = vpop.permute.xlu1 %2044  ;;  %v2040_v12 = vpop.permute.xlu0 %2039  ;;  %v9504_v19 = vld [vmem:[%s8881_s25 + $0x8c] sm:$0xff] }
 0x16d   : > { %1959 = vst.msk [vmem:[#allocation2 + $0x78] sm:$0xff] %vm331_vm0, %v1918_v22  ;;  %1958 = vst.msk [vmem:[#allocation2 + $0x70] sm:$0xff] %vm331_vm0, %v1917_v23  ;;  %v2239_v18 = vmul.f32 %v9450_v13, %v2045_v8  ;;  %v2238_v26 = vmul.f32 %v9450_v13, %v2040_v12  ;;  %2144 = vperm.xlu1 %8602, %v2008_v15   ;;  %2139 = vperm.xlu0 %8601, %v2007_v20   ;;  %v9507_v20 = vld [vmem:[%s8881_s25 + $0x84] sm:$0xff] }
 0x16f   : > { %v2321_v32 = vadd.f32 %v2280_v29, %v2239_v18  ;;  %v2320_v33 = vadd.f32 %v2279_v28, %v2238_v26  ;;  %v1068_v29 = vld [vmem:[#allocation2 + $0x120] sm:$0xff]  ;;  %v1067_v28 = vld [vmem:[#allocation2 + $0x118] sm:$0xff] }
 0x170   : > { %v2055_v34 = vpop.permute.xlu1 %2054  ;;  %v2050_v35 = vpop.permute.xlu0 %2049 }
 0x171   : > { %2362 = vst.msk [vmem:[#allocation2 + $0x18] sm:$0xff] %vm331_vm0, %v2321_v32  ;;  %2361 = vst.msk [vmem:[#allocation2 + $0x10] sm:$0xff] %vm331_vm0, %v2320_v33  ;;  %v2241_v37 = vmul.f32 %v9450_v13, %v2055_v34  ;;  %v2240_v47 = vmul.f32 %v9450_v13, %v2050_v35  ;;  %2479 = vperm.xlu1 %8602, %v9459_v16   ;;  %2149 = vperm.xlu0 %8601, %v2009_v31  }
 0x173   : > { %v2323_v42 = vadd.f32 %v2282_v36, %v2241_v37  ;;  %v2322_v43 = vadd.f32 %v2281_v48, %v2240_v47  ;;  %v1070_v47 = vld [vmem:[#allocation2 + $0x130] sm:$0xff]  ;;  %v1069_v36 = vld [vmem:[#allocation2 + $0x128] sm:$0xff] }
 0x174   : > { %v935_v44 = vpop.permute.xlu1 %934  ;;  %v2060_v55 = vpop.permute.xlu0 %2059 }
 0x175   : > { %2364 = vst.msk [vmem:[#allocation2 + $0x28] sm:$0xff] %vm331_vm0, %v2323_v42  ;;  %2363 = vst.msk [vmem:[#allocation2 + $0x20] sm:$0xff] %vm331_vm0, %v2322_v43  ;;  %v1021_v56 = vmul.f32 %v9177_v39, %v935_v44  ;;  %v2242_v30 = vmul.f32 %v9450_v13, %v2060_v55  ;;  %2489 = vperm.xlu1 %8602, %v9468_v25   ;;  %2484 = vperm.xlu0 %8601, %v9471_v41  }
 0x177   : > { %v1103_v52 = vadd.f32 %v1062_v27, %v1021_v56  ;;  %v2324_v53 = vadd.f32 %v2283_v2, %v2242_v30 }
 0x178   : > { %v945_v0 = vpop.permute.xlu1 %944  ;;  %v940_v1 = vpop.permute.xlu0 %939 }
 0x179   : > { %1144 = vst.msk [vmem:[#allocation2 + $0xf0] sm:$0xff] %vm331_vm0, %v1103_v52  ;;  %2365 = vst.msk [vmem:[#allocation2 + $0x30] sm:$0xff] %vm331_vm0, %v2324_v53  ;;  %v1023_v54 = vmul.f32 %v9177_v39, %v945_v0  ;;  %v1022_v61 = vmul.f32 %v8697_v59, %v940_v1  ;;  %2499 = vperm.xlu1 %8602, %v9480_v58   ;;  %2494 = vperm.xlu0 %8601, %v9483_v51  }
 0x17b   : > { %v1105_v17 = vadd.f32 %v1064_v62, %v1023_v54  ;;  %v1104_v45 = vadd.f32 %v1063_v57, %v1022_v61 }
 0x17c   : > { %v955_v39 = vpop.permute.xlu1 %954  ;;  %v950_v46 = vpop.permute.xlu0 %949 }
 0x17d   : > { %1146 = vst.msk [vmem:[#allocation2 + $0x100] sm:$0xff] %vm331_vm0, %v1105_v17  ;;  %1145 = vst.msk [vmem:[#allocation2 + $0xf8] sm:$0xff] %vm331_vm0, %v1104_v45  ;;  %v1025_v9 = vmul.f32 %v8697_v59, %v955_v39  ;;  %v1024_v15 = vmul.f32 %v8697_v59, %v950_v46  ;;  %2509 = vperm.xlu1 %8602, %v9494_v3   ;;  %2504 = vperm.xlu0 %8601, %v9497_v4  }
 0x17f   : > { %v1107_v22 = vadd.f32 %v1066_v7, %v1025_v9  ;;  %v1106_v23 = vadd.f32 %v1065_v11, %v1024_v15 }
 0x180   : > { %v965_v8 = vpop.permute.xlu1 %964  ;;  %v960_v12 = vpop.permute.xlu0 %959 }
 0x181   : > { %1148 = vst.msk [vmem:[#allocation2 + $0x110] sm:$0xff] %vm331_vm0, %v1107_v22  ;;  %1147 = vst.msk [vmem:[#allocation2 + $0x108] sm:$0xff] %vm331_vm0, %v1106_v23  ;;  %v1027_v18 = vmul.f32 %v8697_v59, %v965_v8  ;;  %v1026_v26 = vmul.f32 %v8697_v59, %v960_v12  ;;  %2519 = vperm.xlu1 %8602, %v9504_v19   ;;  %2514 = vperm.xlu0 %8601, %v9507_v20   ;;  %v1881_v12 = vld [vmem:[#allocation2 + $0x98] sm:$0xff] }
 0x183   : > { %v1109_v31 = vadd.f32 %v1068_v29, %v1027_v18  ;;  %v1108_v32 = vadd.f32 %v1067_v28, %v1026_v26  ;;  %v1607_v18 = vld [vmem:[%s8881_s25 + $0x13a] sm:$0xff] }
 0x184   : > { %v975_v33 = vpop.permute.xlu1 %974  ;;  %v970_v34 = vpop.permute.xlu0 %969 }
 0x185   : > { %1150 = vst.msk [vmem:[#allocation2 + $0x120] sm:$0xff] %vm331_vm0, %v1109_v31  ;;  %1149 = vst.msk [vmem:[#allocation2 + $0x118] sm:$0xff] %vm331_vm0, %v1108_v32  ;;  %v1029_v35 = vmul.f32 %v8697_v59, %v975_v33  ;;  %v1028_v37 = vmul.f32 %v8697_v59, %v970_v34  ;;  %2874 = vperm.xlu1 %8602, %v9352_v21   ;;  %2869 = vperm.xlu0 %8601, %v9340_v5   ;;  %v1473_v21 = vld [vmem:[#allocation2 + $0xd0] sm:$0xff]  ;;  %v1472_v5 = vld [vmem:[#allocation2 + $0xc8] sm:$0xff] }
 0x186   : > { %v1884_v33 = vld [vmem:[#allocation2 + $0xb0] sm:$0xff]  ;;  %v1883_v34 = vld [vmem:[#allocation2 + $0xa8] sm:$0xff] }
 0x187   : > { %v1111_v48 = vadd.f32 %v1070_v47, %v1029_v35  ;;  %v1110_v42 = vadd.f32 %v1069_v36, %v1028_v37  ;;  %v2010_v35 = vld [vmem:[%s8881_s25 + $0xdb] sm:$0xff] }
 0x188   : > { %v1330_v43 = vpop.permute.xlu1 %1329  ;;  %v1325_v44 = vpop.permute.xlu0 %1324 }
 0x189   : > { %1152 = vst.msk [vmem:[#allocation2 + $0x130] sm:$0xff] %vm331_vm0, %v1111_v48  ;;  %1151 = vst.msk [vmem:[#allocation2 + $0x128] sm:$0xff] %vm331_vm0, %v1110_v42  ;;  %v1432_v55 = vmul.f32 %v9257_v24, %v1330_v43  ;;  %v1431_v56 = vmul.f32 %v9257_v24, %v1325_v44  ;;  %2884 = vperm.xlu1 %8602, %v9459_v16   ;;  %2879 = vperm.xlu0 %8601, %v9349_v14   ;;  %v1475_v16 = vld [vmem:[#allocation2 + $0xe0] sm:$0xff]  ;;  %v1474_v14 = vld [vmem:[#allocation2 + $0xd8] sm:$0xff] }
 0x18a   : > { %v2013_v44 = vld [vmem:[%s8881_s25 + $0xf3] sm:$0xff] }
 0x18b   : > { %v1514_v27 = vadd.f32 %v1473_v21, %v1432_v55  ;;  %v1513_v30 = vadd.f32 %v1472_v5, %v1431_v56  ;;  %v1886_v55 = vld [vmem:[#allocation2 + $0xc0] sm:$0xff]  ;;  %v1885_v56 = vld [vmem:[#allocation2 + $0xb8] sm:$0xff]  ;;  %v2012_v21 = vld [vmem:[%s8881_s25 + $0xeb] sm:$0xff] }
 0x18c   : > { %v1340_v2 = vpop.permute.xlu1 %1339  ;;  %v1335_v52 = vpop.permute.xlu0 %1334 }
 0x18d   : > { %1555 = vst.msk [vmem:[#allocation2 + $0xd0] sm:$0xff] %vm331_vm0, %v1514_v27  ;;  %1554 = vst.msk [vmem:[#allocation2 + $0xc8] sm:$0xff] %vm331_vm0, %v1513_v30  ;;  %v1434_v53 = vmul.f32 %v9257_v24, %v1340_v2  ;;  %v1433_v0 = vmul.f32 %v9257_v24, %v1335_v52  ;;  %1764 = vperm.xlu1 %8602, %v9376_v40   ;;  %2889 = vperm.xlu0 %8601, %v9471_v41   ;;  %v1878_v40 = vld [vmem:[#allocation2 + $0x80] sm:$0xff]  ;;  %v1476_v41 = vld [vmem:[#allocation2 + $0xe8] sm:$0xff] }
 0x18f   : > { %v1516_v1 = vadd.f32 %v1475_v16, %v1434_v53  ;;  %v1515_v54 = vadd.f32 %v1474_v14, %v1433_v0  ;;  %v9566_v53 = vld [vmem:[%s8881_s25 + $0x94] sm:$0xff]  ;;  %v2285_v0 = vld [vmem:[#allocation2 + $0x40] sm:$0xff] }
 0x190   : > { %v1695_v57 = vpop.permute.xlu1 %1694  ;;  %v1345_v59 = vpop.permute.xlu0 %1344  ;;  %v2284_v16 = vld [vmem:[#allocation2 + $0x38] sm:$0xff] }
 0x191   : > { %1557 = vst.msk [vmem:[#allocation2 + $0xe0] sm:$0xff] %vm331_vm0, %v1516_v1  ;;  %1556 = vst.msk [vmem:[#allocation2 + $0xd8] sm:$0xff] %vm331_vm0, %v1515_v54  ;;  %v1837_v61 = vmul.f32 %v9325_v63, %v1695_v57  ;;  %v1435_v62 = vmul.f32 %v9257_v24, %v1345_v59  ;;  %1774 = vperm.xlu1 %8602, %v9388_v50   ;;  %1769 = vperm.xlu0 %8601, %v9373_v38   ;;  %v1880_v24 = vld [vmem:[#allocation2 + $0x90] sm:$0xff]  ;;  %v1879_v38 = vld [vmem:[#allocation2 + $0x88] sm:$0xff] }
 0x192   : > { %v2014_v14 = vld [vmem:[%s8881_s25 + $0xfb] sm:$0xff] }
 0x193   : > { %v1919_v17 = vadd.f32 %v1878_v40, %v1837_v61  ;;  %v1517_v45 = vadd.f32 %v1476_v41, %v1435_v62  ;;  %v9575_v40 = vld [vmem:[%s8881_s25 + $0xa4] sm:$0xff]  ;;  %v2287_v41 = vld [vmem:[#allocation2 + $0x50] sm:$0xff] }
 0x194   : > { %v1705_v39 = vpop.permute.xlu1 %1704  ;;  %v1700_v46 = vpop.permute.xlu0 %1699 }
 0x195   : > { %1960 = vst.msk [vmem:[#allocation2 + $0x80] sm:$0xff] %vm331_vm0, %v1919_v17  ;;  %1558 = vst.msk [vmem:[#allocation2 + $0xe8] sm:$0xff] %vm331_vm0, %v1517_v45  ;;  %v1839_v9 = vmul.f32 %v9325_v63, %v1705_v39  ;;  %v1838_v11 = vmul.f32 %v9325_v63, %v1700_v46  ;;  %1784 = vperm.xlu1 %8602, %v9400_v60   ;;  %1779 = vperm.xlu0 %8601, %v9385_v49   ;;  %v1608_v49 = vld [vmem:[%s8881_s25 + $0x142] sm:$0xff] }
 0x196   : > { %v1882_v60 = vld [vmem:[#allocation2 + $0xa0] sm:$0xff]  ;;  %v2286_v17 = vld [vmem:[#allocation2 + $0x48] sm:$0xff] }
 0x197   : > { %v1921_v50 = vadd.f32 %v1880_v24, %v1839_v9  ;;  %v1920_v15 = vadd.f32 %v1879_v38, %v1838_v11  ;;  %v9578_v45 = vld [vmem:[%s8881_s25 + $0x9c] sm:$0xff] }
 0x198   : > { %v1715_v7 = vpop.permute.xlu1 %1714  ;;  %v1710_v22 = vpop.permute.xlu0 %1709 }
 0x199   : > { %1962 = vst.msk [vmem:[#allocation2 + $0x90] sm:$0xff] %vm331_vm0, %v1921_v50  ;;  %1961 = vst.msk [vmem:[#allocation2 + $0x88] sm:$0xff] %vm331_vm0, %v1920_v15  ;;  %v1841_v23 = vmul.f32 %v9325_v63, %v1715_v7  ;;  %v1840_v8 = vmul.f32 %v9325_v63, %v1710_v22  ;;  %1794 = vperm.xlu1 %8602, %v9409_v10   ;;  %1789 = vperm.xlu0 %8601, %v9397_v6   ;;  %v2011_v6 = vld [vmem:[%s8881_s25 + $0xe3] sm:$0xff]  ;;  %v9587_v50 = vld [vmem:[%s8881_s25 + $0xb4] sm:$0xff] }
 0x19a   : > { %v2289_v15 = vld [vmem:[#allocation2 + $0x60] sm:$0xff]  ;;  %v2288_v7 = vld [vmem:[#allocation2 + $0x58] sm:$0xff]  ;;  %v9590_v22 = vld [vmem:[%s8881_s25 + $0xac] sm:$0xff] }
 0x19b   : > { %v1923_v26 = vadd.f32 %v1882_v60, %v1841_v23  ;;  %v1922_v29 = vadd.f32 %v1881_v12, %v1840_v8 }
 0x19c   : > { %v1725_v28 = vpop.permute.xlu1 %1724  ;;  %v1720_v31 = vpop.permute.xlu0 %1719 }
 0x19d   : > { %1964 = vst.msk [vmem:[#allocation2 + $0xa0] sm:$0xff] %vm331_vm0, %v1923_v26  ;;  %1963 = vst.msk [vmem:[#allocation2 + $0x98] sm:$0xff] %vm331_vm0, %v1922_v29  ;;  %v1843_v32 = vmul.f32 %v9325_v63, %v1725_v28  ;;  %v1842_v10 = vmul.f32 %v9325_v63, %v1720_v31  ;;  %1804 = vperm.xlu1 %8602, %v1608_v49   ;;  %1799 = vperm.xlu0 %8601, %v1607_v18   ;;  %v9601_v26 = vld [vmem:[%s11322_s1 + $0x5] ss:$0 sm:$0xff]  ;;  %v2291_v28 = vld [vmem:[#allocation2 + $0x70] sm:$0xff] }
 0x19e   : > { %v9604_v29 = vld [vmem:[%s8881_s25 + $0xc4] sm:$0xff] }
 0x19f   : > { %v1925_v37 = vadd.f32 %v1884_v33, %v1843_v32  ;;  %v1924_v47 = vadd.f32 %v1883_v34, %v1842_v10  ;;  %v2290_v31 = vld [vmem:[#allocation2 + $0x68] sm:$0xff]  ;;  %v9607_v32 = vld [vmem:[%s8881_s25 + $0xbc] sm:$0xff] }
 0x1a0   : > { %v1735_v36 = vpop.permute.xlu1 %1734  ;;  %v1730_v48 = vpop.permute.xlu0 %1729 }
 0x1a1   : > { %1966 = vst.msk [vmem:[#allocation2 + $0xb0] sm:$0xff] %vm331_vm0, %v1925_v37  ;;  %1965 = vst.msk [vmem:[#allocation2 + $0xa8] sm:$0xff] %vm331_vm0, %v1924_v47  ;;  %v1845_v42 = vmul.f32 %v9325_v63, %v1735_v36  ;;  %v1844_v43 = vmul.f32 %v9325_v63, %v1730_v48  ;;  %2159 = vperm.xlu1 %8602, %v2011_v6   ;;  %2154 = vperm.xlu0 %8601, %v2010_v35   ;;  %v9616_v47 = vld [vmem:[%s8881_s25 + $0xd4] sm:$0xff] }
 0x1a2   : > { %v2694_v36 = vld [vmem:[#allocation2 + $0x10] sm:$0xff]  ;;  %v2292_v48 = vld [vmem:[#allocation2 + $0x78] sm:$0xff] }
 0x1a3   : > { %v1927_v5 = vadd.f32 %v1886_v55, %v1845_v42  ;;  %v1926_v27 = vadd.f32 %v1885_v56, %v1844_v43  ;;  %v9619_v42 = vld [vmem:[%s8881_s25 + $0xcc] sm:$0xff] }
 0x1a4   : > { %v2070_v30 = vpop.permute.xlu1 %2069  ;;  %v2065_v2 = vpop.permute.xlu0 %2064 }
 0x1a5   : > { %1968 = vst.msk [vmem:[#allocation2 + $0xc0] sm:$0xff] %vm331_vm0, %v1927_v5  ;;  %1967 = vst.msk [vmem:[#allocation2 + $0xb8] sm:$0xff] %vm331_vm0, %v1926_v27  ;;  %v2244_v52 = vmul.f32 %v9450_v13, %v2070_v30  ;;  %v2243_v63 = vmul.f32 %v9450_v13, %v2065_v2  ;;  %2169 = vperm.xlu1 %8602, %v2013_v44   ;;  %2164 = vperm.xlu0 %8601, %v2012_v21   ;;  %v2696_v27 = vld [vmem:[#allocation2 + $0x20] sm:$0xff]  ;;  %v2695_v30 = vld [vmem:[#allocation2 + $0x18] sm:$0xff] }
 0x1a7   : > { %v2326_v1 = vadd.f32 %v2285_v0, %v2244_v52  ;;  %v2325_v54 = vadd.f32 %v2284_v16, %v2243_v63 }
 0x1a8   : > { %v2080_v57 = vpop.permute.xlu1 %2079  ;;  %v2075_v59 = vpop.permute.xlu0 %2074 }
 0x1a9   : > { %2367 = vst.msk [vmem:[#allocation2 + $0x40] sm:$0xff] %vm331_vm0, %v2326_v1  ;;  %2366 = vst.msk [vmem:[#allocation2 + $0x38] sm:$0xff] %vm331_vm0, %v2325_v54  ;;  %v2246_v61 = vmul.f32 %v9450_v13, %v2080_v57  ;;  %v2245_v62 = vmul.f32 %v9450_v13, %v2075_v59  ;;  %2524 = vperm.xlu1 %8602, %v9566_v53   ;;  %2174 = vperm.xlu0 %8601, %v2014_v14   ;;  %v2698_v1 = vld [vmem:[#allocation2 + $0x30] sm:$0xff]  ;;  %v2697_v54 = vld [vmem:[#allocation2 + $0x28] sm:$0xff] }
 0x1ab   : > { %v2328_v39 = vadd.f32 %v2287_v41, %v2246_v61  ;;  %v2327_v46 = vadd.f32 %v2286_v17, %v2245_v62  ;;  %v8698_v41 = vld [vmem:[%s11322_s1 + $0x2] ss:$0 sm:$0xff] }
 0x1ac   : > { %v2090_v9 = vpop.permute.xlu1 %2089  ;;  %v2085_v11 = vpop.permute.xlu0 %2084 }
 0x1ad   : > { %2369 = vst.msk [vmem:[#allocation2 + $0x50] sm:$0xff] %vm331_vm0, %v2328_v39  ;;  %2368 = vst.msk [vmem:[#allocation2 + $0x48] sm:$0xff] %vm331_vm0, %v2327_v46  ;;  %v2248_v24 = vmul.f32 %v9450_v13, %v2090_v9  ;;  %v2247_v38 = vmul.f32 %v9450_v13, %v2085_v11  ;;  %2534 = vperm.xlu1 %8602, %v9575_v40   ;;  %2529 = vperm.xlu0 %8601, %v9578_v45  }
 0x1af   : > { %v2330_v23 = vadd.f32 %v2289_v15, %v2248_v24  ;;  %v2329_v8 = vadd.f32 %v2288_v7, %v2247_v38  ;;  %v1479_v7 = vld [vmem:[#allocation2 + $0x100] sm:$0xff] }
 0x1b0   : > { %v2100_v49 = vpop.permute.xlu1 %2099  ;;  %v2095_v60 = vpop.permute.xlu0 %2094 }
 0x1b1   : > { %2371 = vst.msk [vmem:[#allocation2 + $0x60] sm:$0xff] %vm331_vm0, %v2330_v23  ;;  %2370 = vst.msk [vmem:[#allocation2 + $0x58] sm:$0xff] %vm331_vm0, %v2329_v8  ;;  %v2250_v12 = vmul.f32 %v9450_v13, %v2100_v49  ;;  %v2249_v18 = vmul.f32 %v9450_v13, %v2095_v60  ;;  %2544 = vperm.xlu1 %8602, %v9587_v50   ;;  %2539 = vperm.xlu0 %8601, %v9590_v22  }
 0x1b3   : > { %v2332_v10 = vadd.f32 %v2291_v28, %v2250_v12  ;;  %v2331_v6 = vadd.f32 %v2290_v31, %v2249_v18  ;;  %v3232_v18 = vld [vmem:[%s8881_s25 + $0x35] sm:$0xff] }
 0x1b4   : > { %v2455_v33 = vpop.permute.xlu1 %2454  ;;  %v2105_v34 = vpop.permute.xlu0 %2104 }
 0x1b5   : > { %2373 = vst.msk [vmem:[#allocation2 + $0x70] sm:$0xff] %vm331_vm0, %v2332_v10  ;;  %2372 = vst.msk [vmem:[#allocation2 + $0x68] sm:$0xff] %vm331_vm0, %v2331_v6  ;;  %v2653_v35 = vmul.f32 %v9601_v26, %v2455_v33  ;;  %v2251_v37 = vmul.f32 %v9450_v13, %v2105_v34  ;;  %2554 = vperm.xlu1 %8602, %v9604_v29   ;;  %2549 = vperm.xlu0 %8601, %v9607_v32  }
 0x1b7   : > { %v2735_v43 = vadd.f32 %v2694_v36, %v2653_v35  ;;  %v2333_v44 = vadd.f32 %v2292_v48, %v2251_v37  ;;  %v1483_v35 = vld [vmem:[#allocation2 + $0x120] sm:$0xff] }
 0x1b8   : > { %v2465_v55 = vpop.permute.xlu1 %2464  ;;  %v2460_v56 = vpop.permute.xlu0 %2459  ;;  %v3233_v37 = vld [vmem:[%s8881_s25 + $0x3d] sm:$0xff] }
 0x1b9   : > { %2776 = vst.msk [vmem:[#allocation2 + $0x10] sm:$0xff] %vm331_vm0, %v2735_v43  ;;  %2374 = vst.msk [vmem:[#allocation2 + $0x78] sm:$0xff] %vm331_vm0, %v2333_v44  ;;  %v2655_v21 = vmul.f32 %v9601_v26, %v2465_v55  ;;  %v2654_v5 = vmul.f32 %v9601_v26, %v2460_v56  ;;  %2564 = vperm.xlu1 %8602, %v9616_v47   ;;  %2559 = vperm.xlu0 %8601, %v9619_v42   ;;  %v9659_v55 = vld [vmem:[%s11322_s1 + $0x3] ss:$0 sm:$0xff] }
 0x1bb   : > { %v2737_v2 = vadd.f32 %v2696_v27, %v2655_v21  ;;  %v2736_v52 = vadd.f32 %v2695_v30, %v2654_v5  ;;  %v3236_v21 = vld [vmem:[%s8881_s25 + $0x55] sm:$0xff]  ;;  %v1887_v5 = vld [vmem:[#allocation2 + $0xc8] sm:$0xff] }
 0x1bc   : > { %v2475_v63 = vpop.permute.xlu1 %2474  ;;  %v2470_v0 = vpop.permute.xlu0 %2469  ;;  %v1485_v27 = vld [vmem:[#allocation2 + $0x130] sm:$0xff] }
 0x1bd   : > { %2778 = vst.msk [vmem:[#allocation2 + $0x20] sm:$0xff] %vm331_vm0, %v2737_v2  ;;  %2777 = vst.msk [vmem:[#allocation2 + $0x18] sm:$0xff] %vm331_vm0, %v2736_v52  ;;  %v2657_v16 = vmul.f32 %v9601_v26, %v2475_v63  ;;  %v2656_v14 = vmul.f32 %v9601_v26, %v2470_v0  ;;  %2899 = vperm.xlu1 %8602, %v9483_v51   ;;  %2894 = vperm.xlu0 %8601, %v9468_v25   ;;  %v1478_v25 = vld [vmem:[#allocation2 + $0xf8] sm:$0xff]  ;;  %v1477_v51 = vld [vmem:[#allocation2 + $0xf0] sm:$0xff] }
 0x1be   : > { %v3235_v30 = vld [vmem:[%s8881_s25 + $0x4d] sm:$0xff] }
 0x1bf   : > { %v2739_v57 = vadd.f32 %v2698_v1, %v2657_v16  ;;  %v2738_v59 = vadd.f32 %v2697_v54, %v2656_v14  ;;  %v2016_v1 = vld [vmem:[%s8881_s25 + $0x10b] sm:$0xff]  ;;  %v1889_v54 = vld [vmem:[#allocation2 + $0xd8] sm:$0xff] }
 0x1c0   : > { %v1355_v61 = vpop.permute.xlu1 %1354  ;;  %v1350_v62 = vpop.permute.xlu0 %1349 }
 0x1c1   : > { %2780 = vst.msk [vmem:[#allocation2 + $0x30] sm:$0xff] %vm331_vm0, %v2739_v57  ;;  %2779 = vst.msk [vmem:[#allocation2 + $0x28] sm:$0xff] %vm331_vm0, %v2738_v59  ;;  %v1437_v17 = vmul.f32 %v8698_v41, %v1355_v61  ;;  %v1436_v39 = vmul.f32 %v8698_v41, %v1350_v62  ;;  %2909 = vperm.xlu1 %8602, %v9497_v4   ;;  %2904 = vperm.xlu0 %8601, %v9480_v58   ;;  %v1480_v4 = vld [vmem:[#allocation2 + $0x108] sm:$0xff]  ;;  %v1888_v57 = vld [vmem:[#allocation2 + $0xd0] sm:$0xff] }
 0x1c2   : > { %v2015_v59 = vld [vmem:[%s8881_s25 + $0x103] sm:$0xff] }
 0x1c3   : > { %v1519_v46 = vadd.f32 %v1478_v25, %v1437_v17  ;;  %v1518_v9 = vadd.f32 %v1477_v51, %v1436_v39  ;;  %v2018_v51 = vld [vmem:[%s8881_s25 + $0x11b] sm:$0xff] }
 0x1c4   : > { %v1365_v11 = vpop.permute.xlu1 %1364  ;;  %v1360_v24 = vpop.permute.xlu0 %1359 }
 0x1c5   : > { %1560 = vst.msk [vmem:[#allocation2 + $0xf8] sm:$0xff] %vm331_vm0, %v1519_v46  ;;  %1559 = vst.msk [vmem:[#allocation2 + $0xf0] sm:$0xff] %vm331_vm0, %v1518_v9  ;;  %v1439_v38 = vmul.f32 %v8698_v41, %v1365_v11  ;;  %v1438_v15 = vmul.f32 %v8698_v41, %v1360_v24  ;;  %2919 = vperm.xlu1 %8602, %v9507_v20   ;;  %2914 = vperm.xlu0 %8601, %v9494_v3   ;;  %v1482_v20 = vld [vmem:[#allocation2 + $0x118] sm:$0xff]  ;;  %v1481_v3 = vld [vmem:[#allocation2 + $0x110] sm:$0xff] }
 0x1c6   : > { %v1891_v46 = vld [vmem:[#allocation2 + $0xe8] sm:$0xff]  ;;  %v1890_v9 = vld [vmem:[#allocation2 + $0xe0] sm:$0xff]  ;;  %v2017_v11 = vld [vmem:[%s8881_s25 + $0x113] sm:$0xff] }
 0x1c7   : > { %v1521_v58 = vadd.f32 %v1480_v4, %v1439_v38  ;;  %v1520_v23 = vadd.f32 %v1479_v7, %v1438_v15 }
 0x1c8   : > { %v1375_v8 = vpop.permute.xlu1 %1374  ;;  %v1370_v49 = vpop.permute.xlu0 %1369 }
 0x1c9   : > { %1562 = vst.msk [vmem:[#allocation2 + $0x108] sm:$0xff] %vm331_vm0, %v1521_v58  ;;  %1561 = vst.msk [vmem:[#allocation2 + $0x100] sm:$0xff] %vm331_vm0, %v1520_v23  ;;  %v1441_v60 = vmul.f32 %v8698_v41, %v1375_v8  ;;  %v1440_v12 = vmul.f32 %v8698_v41, %v1370_v49  ;;  %2929 = vperm.xlu1 %8602, %v9566_v53   ;;  %2924 = vperm.xlu0 %8601, %v9504_v19   ;;  %v3234_v53 = vld [vmem:[%s8881_s25 + $0x45] sm:$0xff] }
 0x1ca   : > { %v1484_v19 = vld [vmem:[#allocation2 + $0x128] sm:$0xff]  ;;  %v2293_v49 = vld [vmem:[#allocation2 + $0x80] sm:$0xff] }
 0x1cb   : > { %v1523_v28 = vadd.f32 %v1482_v20, %v1441_v60  ;;  %v1522_v31 = vadd.f32 %v1481_v3, %v1440_v12  ;;  %v2020_v23 = vld [vmem:[%s8881_s25 + $0x12b] sm:$0xff]  ;;  %v2019_v60 = vld [vmem:[%s8881_s25 + $0x123] sm:$0xff] }
 0x1cc   : > { %v1385_v10 = vpop.permute.xlu1 %1384  ;;  %v1380_v6 = vpop.permute.xlu0 %1379  ;;  %v2294_v8 = vld [vmem:[#allocation2 + $0x88] sm:$0xff] }
 0x1cd   : > { %1564 = vst.msk [vmem:[#allocation2 + $0x118] sm:$0xff] %vm331_vm0, %v1523_v28  ;;  %1563 = vst.msk [vmem:[#allocation2 + $0x110] sm:$0xff] %vm331_vm0, %v1522_v31  ;;  %v1443_v33 = vmul.f32 %v8698_v41, %v1385_v10  ;;  %v1442_v34 = vmul.f32 %v8698_v41, %v1380_v6  ;;  %3284 = vperm.xlu1 %8602, %v3232_v18   ;;  %2934 = vperm.xlu0 %8601, %v9578_v45   ;;  %v2022_v10 = vld [vmem:[%s8881_s25 + $0x13b] sm:$0xff] }
 0x1ce   : > { %v2296_v6 = vld [vmem:[#allocation2 + $0x98] sm:$0xff] }
 0x1cf   : > { %v1525_v36 = vadd.f32 %v1484_v19, %v1443_v33  ;;  %v1524_v48 = vadd.f32 %v1483_v35, %v1442_v34  ;;  %v2295_v33 = vld [vmem:[#allocation2 + $0x90] sm:$0xff] }
 0x1d0   : > { %v1740_v43 = vpop.permute.xlu1 %1739  ;;  %v1390_v44 = vpop.permute.xlu0 %1389  ;;  %v2021_v34 = vld [vmem:[%s8881_s25 + $0x133] sm:$0xff] }
 0x1d1   : > { %1566 = vst.msk [vmem:[#allocation2 + $0x128] sm:$0xff] %vm331_vm0, %v1525_v36  ;;  %1565 = vst.msk [vmem:[#allocation2 + $0x120] sm:$0xff] %vm331_vm0, %v1524_v48  ;;  %v1846_v45 = vmul.f32 %v9659_v55, %v1740_v43  ;;  %v1444_v56 = vmul.f32 %v8698_v41, %v1390_v44  ;;  %3294 = vperm.xlu1 %8602, %v3234_v53   ;;  %3289 = vperm.xlu0 %8601, %v3233_v37   ;;  %v9693_v43 = vld [vmem:[%s8881_s25 + $0xdc] sm:$0xff]  ;;  %v2298_v44 = vld [vmem:[#allocation2 + $0xa8] sm:$0xff] }
 0x1d3   : > { %v1928_v2 = vadd.f32 %v1887_v5, %v1846_v45  ;;  %v1526_v52 = vadd.f32 %v1485_v27, %v1444_v56  ;;  %v2297_v45 = vld [vmem:[#allocation2 + $0xa0] sm:$0xff] }
 0x1d4   : > { %v1750_v63 = vpop.permute.xlu1 %1749  ;;  %v1745_v0 = vpop.permute.xlu0 %1744  ;;  %v2023_v56 = vld [vmem:[%s8881_s25 + $0x143] sm:$0xff] }
 0x1d5   : > { %1969 = vst.msk [vmem:[#allocation2 + $0xc8] sm:$0xff] %vm331_vm0, %v1928_v2  ;;  %1567 = vst.msk [vmem:[#allocation2 + $0x130] sm:$0xff] %vm331_vm0, %v1526_v52  ;;  %v1848_v16 = vmul.f32 %v9659_v55, %v1750_v63  ;;  %v1847_v14 = vmul.f32 %v9659_v55, %v1745_v0  ;;  %3304 = vperm.xlu1 %8602, %v3236_v21   ;;  %3299 = vperm.xlu0 %8601, %v3235_v30   ;;  %v9702_v63 = vld [vmem:[%s8881_s25 + $0xec] sm:$0xff]  ;;  %v2300_v0 = vld [vmem:[#allocation2 + $0xb8] sm:$0xff] }
 0x1d7   : > { %v1930_v61 = vadd.f32 %v1889_v54, %v1848_v16  ;;  %v1929_v62 = vadd.f32 %v1888_v57, %v1847_v14  ;;  %v2299_v16 = vld [vmem:[#allocation2 + $0xb0] sm:$0xff]  ;;  %v9705_v14 = vld [vmem:[%s8881_s25 + $0xe4] sm:$0xff] }
 0x1d8   : > { %v1760_v41 = vpop.permute.xlu1 %1759  ;;  %v1755_v17 = vpop.permute.xlu0 %1754 }
 0x1d9   : > { %1971 = vst.msk [vmem:[#allocation2 + $0xd8] sm:$0xff] %vm331_vm0, %v1930_v61  ;;  %1970 = vst.msk [vmem:[#allocation2 + $0xd0] sm:$0xff] %vm331_vm0, %v1929_v62  ;;  %v1850_v39 = vmul.f32 %v9659_v55, %v1760_v41  ;;  %v1849_v25 = vmul.f32 %v9659_v55, %v1755_v17  ;;  %2184 = vperm.xlu1 %8602, %v2016_v1   ;;  %2179 = vperm.xlu0 %8601, %v2015_v59   ;;  %v9714_v41 = vld [vmem:[%s8881_s25 + $0xfc] sm:$0xff] }
 0x1da   : > { %v2699_v17 = vld [vmem:[#allocation2 + $0x38] sm:$0xff] }
 0x1db   : > { %v1932_v24 = vadd.f32 %v1891_v46, %v1850_v39  ;;  %v1931_v38 = vadd.f32 %v1890_v9, %v1849_v25  ;;  %v2301_v39 = vld [vmem:[#allocation2 + $0xc0] sm:$0xff]  ;;  %v9717_v25 = vld [vmem:[%s8881_s25 + $0xf4] sm:$0xff] }
 0x1dc   : > { %v2115_v15 = vpop.permute.xlu1 %2114  ;;  %v2110_v4 = vpop.permute.xlu0 %2109 }
 0x1dd   : > { %1973 = vst.msk [vmem:[#allocation2 + $0xe8] sm:$0xff] %vm331_vm0, %v1932_v24  ;;  %1972 = vst.msk [vmem:[#allocation2 + $0xe0] sm:$0xff] %vm331_vm0, %v1931_v38  ;;  %v2253_v7 = vmul.f32 %v9450_v13, %v2115_v15  ;;  %v2252_v58 = vmul.f32 %v9450_v13, %v2110_v4  ;;  %2194 = vperm.xlu1 %8602, %v2018_v51   ;;  %2189 = vperm.xlu0 %8601, %v2017_v11   ;;  %v2701_v38 = vld [vmem:[#allocation2 + $0x48] sm:$0xff]  ;;  %v2700_v15 = vld [vmem:[#allocation2 + $0x40] sm:$0xff] }
 0x1df   : > { %v2335_v12 = vadd.f32 %v2294_v8, %v2253_v7  ;;  %v2334_v20 = vadd.f32 %v2293_v49, %v2252_v58 }
 0x1e0   : > { %v2125_v3 = vpop.permute.xlu1 %2124  ;;  %v2120_v18 = vpop.permute.xlu0 %2119 }
 0x1e1   : > { %2376 = vst.msk [vmem:[#allocation2 + $0x88] sm:$0xff] %vm331_vm0, %v2335_v12  ;;  %2375 = vst.msk [vmem:[#allocation2 + $0x80] sm:$0xff] %vm331_vm0, %v2334_v20  ;;  %v2255_v28 = vmul.f32 %v9450_v13, %v2125_v3  ;;  %v2254_v31 = vmul.f32 %v9450_v13, %v2120_v18  ;;  %2204 = vperm.xlu1 %8602, %v2020_v23   ;;  %2199 = vperm.xlu0 %8601, %v2019_v60   ;;  %v2703_v60 = vld [vmem:[#allocation2 + $0x58] sm:$0xff]  ;;  %v2702_v12 = vld [vmem:[#allocation2 + $0x50] sm:$0xff] }
 0x1e3   : > { %v2337_v53 = vadd.f32 %v2296_v6, %v2255_v28  ;;  %v2336_v19 = vadd.f32 %v2295_v33, %v2254_v31 }
 0x1e4   : > { %v2135_v35 = vpop.permute.xlu1 %2134  ;;  %v2130_v37 = vpop.permute.xlu0 %2129 }
 0x1e5   : > { %2378 = vst.msk [vmem:[#allocation2 + $0x98] sm:$0xff] %vm331_vm0, %v2337_v53  ;;  %2377 = vst.msk [vmem:[#allocation2 + $0x90] sm:$0xff] %vm331_vm0, %v2336_v19  ;;  %v2257_v36 = vmul.f32 %v9450_v13, %v2135_v35  ;;  %v2256_v48 = vmul.f32 %v9450_v13, %v2130_v37  ;;  %2214 = vperm.xlu1 %8602, %v2022_v10   ;;  %2209 = vperm.xlu0 %8601, %v2021_v34   ;;  %v9746_v37 = vld [vmem:[%s11322_s1 + $0x6] ss:$0 sm:$0xff] }
 0x1e7   : > { %v2339_v21 = vadd.f32 %v2298_v44, %v2257_v36  ;;  %v2338_v5 = vadd.f32 %v2297_v45, %v2256_v48 }
 0x1e8   : > { %v2145_v27 = vpop.permute.xlu1 %2144  ;;  %v2140_v30 = vpop.permute.xlu0 %2139 }
 0x1e9   : > { %2380 = vst.msk [vmem:[#allocation2 + $0xa8] sm:$0xff] %vm331_vm0, %v2339_v21  ;;  %2379 = vst.msk [vmem:[#allocation2 + $0xa0] sm:$0xff] %vm331_vm0, %v2338_v5  ;;  %v2259_v2 = vmul.f32 %v9450_v13, %v2145_v27  ;;  %v2258_v52 = vmul.f32 %v9450_v13, %v2140_v30  ;;  %2569 = vperm.xlu1 %8602, %v9693_v43   ;;  %2219 = vperm.xlu0 %8601, %v2023_v56   ;;  %v3110_v56 = vld [vmem:[#allocation2 + $0x18] sm:$0xff]  ;;  %v3109_v21 = vld [vmem:[#allocation2 + $0x10] sm:$0xff] }
 0x1ea   : > { %v3237_v5 = vld [vmem:[%s8881_s25 + $0x5d] sm:$0xff] }
 0x1eb   : > { %v2341_v1 = vadd.f32 %v2300_v0, %v2259_v2  ;;  %v2340_v54 = vadd.f32 %v2299_v16, %v2258_v52 }
 0x1ec   : > { %v2480_v57 = vpop.permute.xlu1 %2479  ;;  %v2150_v59 = vpop.permute.xlu0 %2149 }
 0x1ed   : > { %2382 = vst.msk [vmem:[#allocation2 + $0xb8] sm:$0xff] %vm331_vm0, %v2341_v1  ;;  %2381 = vst.msk [vmem:[#allocation2 + $0xb0] sm:$0xff] %vm331_vm0, %v2340_v54  ;;  %v2658_v61 = vmul.f32 %v9601_v26, %v2480_v57  ;;  %v2260_v62 = vmul.f32 %v9450_v13, %v2150_v59  ;;  %2579 = vperm.xlu1 %8602, %v9702_v63   ;;  %2574 = vperm.xlu0 %8601, %v9705_v14   ;;  %v3111_v1 = vld [vmem:[#allocation2 + $0x20] sm:$0xff] }
 0x1ee   : > { %v3238_v54 = vld [vmem:[%s8881_s25 + $0x65] sm:$0xff] }
 0x1ef   : > { %v2740_v51 = vadd.f32 %v2699_v17, %v2658_v61  ;;  %v2342_v46 = vadd.f32 %v2301_v39, %v2260_v62 }
 0x1f0   : > { %v2490_v9 = vpop.permute.xlu1 %2489  ;;  %v2485_v11 = vpop.permute.xlu0 %2484 }
 0x1f1   : > { %2781 = vst.msk [vmem:[#allocation2 + $0x38] sm:$0xff] %vm331_vm0, %v2740_v51  ;;  %2383 = vst.msk [vmem:[#allocation2 + $0xc0] sm:$0xff] %vm331_vm0, %v2342_v46  ;;  %v2660_v13 = vmul.f32 %v9601_v26, %v2490_v9  ;;  %v2659_v24 = vmul.f32 %v9601_v26, %v2485_v11  ;;  %2589 = vperm.xlu1 %8602, %v9714_v41   ;;  %2584 = vperm.xlu0 %8601, %v9717_v25   ;;  %v1892_v51 = vld [vmem:[#allocation2 + $0xf0] sm:$0xff] }
 0x1f2   : > { %v3113_v46 = vld [vmem:[#allocation2 + $0x30] sm:$0xff] }
 0x1f3   : > { %v2742_v4 = vadd.f32 %v2701_v38, %v2660_v13  ;;  %v2741_v7 = vadd.f32 %v2700_v15, %v2659_v24  ;;  %v3240_v9 = vld [vmem:[%s8881_s25 + $0x75] sm:$0xff] }
 0x1f4   : > { %v2500_v58 = vpop.permute.xlu1 %2499  ;;  %v2495_v23 = vpop.permute.xlu0 %2494 }
 0x1f5   : > { %2783 = vst.msk [vmem:[#allocation2 + $0x48] sm:$0xff] %vm331_vm0, %v2742_v4  ;;  %2782 = vst.msk [vmem:[#allocation2 + $0x40] sm:$0xff] %vm331_vm0, %v2741_v7  ;;  %v2662_v8 = vmul.f32 %v9601_v26, %v2500_v58  ;;  %v2661_v49 = vmul.f32 %v9601_v26, %v2495_v23  ;;  %2944 = vperm.xlu1 %8602, %v9590_v22   ;;  %2939 = vperm.xlu0 %8601, %v9575_v40   ;;  %v2705_v22 = vld [vmem:[#allocation2 + $0x68] sm:$0xff]  ;;  %v2704_v40 = vld [vmem:[#allocation2 + $0x60] sm:$0xff] }
 0x1f6   : > { %v3243_v7 = vld [vmem:[%s8881_s25 + $0x8d] sm:$0xff]  ;;  %v1894_v58 = vld [vmem:[#allocation2 + $0x100] sm:$0xff]  ;;  %v1893_v23 = vld [vmem:[#allocation2 + $0xf8] sm:$0xff] }
 0x1f7   : > { %v2744_v20 = vadd.f32 %v2703_v60, %v2662_v8  ;;  %v2743_v3 = vadd.f32 %v2702_v12, %v2661_v49  ;;  %v3242_v8 = vld [vmem:[%s8881_s25 + $0x85] sm:$0xff] }
 0x1f8   : > { %v2510_v18 = vpop.permute.xlu1 %2509  ;;  %v2505_v28 = vpop.permute.xlu0 %2504 }
 0x1f9   : > { %2785 = vst.msk [vmem:[#allocation2 + $0x58] sm:$0xff] %vm331_vm0, %v2744_v20  ;;  %2784 = vst.msk [vmem:[#allocation2 + $0x50] sm:$0xff] %vm331_vm0, %v2743_v3  ;;  %v2664_v31 = vmul.f32 %v9601_v26, %v2510_v18  ;;  %v2663_v10 = vmul.f32 %v9601_v26, %v2505_v28  ;;  %2954 = vperm.xlu1 %8602, %v9607_v32   ;;  %2949 = vperm.xlu0 %8601, %v9587_v50   ;;  %v2707_v50 = vld [vmem:[#allocation2 + $0x78] sm:$0xff]  ;;  %v2706_v32 = vld [vmem:[#allocation2 + $0x70] sm:$0xff] }
 0x1fa   : > { %v3245_v28 = vld [vmem:[%s8881_s25 + $0x9d] sm:$0xff] }
 0x1fb   : > { %v2746_v6 = vadd.f32 %v2705_v22, %v2664_v31  ;;  %v2745_v33 = vadd.f32 %v2704_v40, %v2663_v10  ;;  %v1896_v31 = vld [vmem:[#allocation2 + $0x110] sm:$0xff]  ;;  %v1895_v10 = vld [vmem:[#allocation2 + $0x108] sm:$0xff] }
 0x1fc   : > { %v2520_v34 = vpop.permute.xlu1 %2519  ;;  %v2515_v53 = vpop.permute.xlu0 %2514  ;;  %v3244_v22 = vld [vmem:[%s8881_s25 + $0x95] sm:$0xff] }
 0x1fd   : > { %2787 = vst.msk [vmem:[#allocation2 + $0x68] sm:$0xff] %vm331_vm0, %v2746_v6  ;;  %2786 = vst.msk [vmem:[#allocation2 + $0x60] sm:$0xff] %vm331_vm0, %v2745_v33  ;;  %v2666_v19 = vmul.f32 %v9601_v26, %v2520_v34  ;;  %v2665_v35 = vmul.f32 %v9601_v26, %v2515_v53  ;;  %2964 = vperm.xlu1 %8602, %v9619_v42   ;;  %2959 = vperm.xlu0 %8601, %v9604_v29  }
 0x1ff   : > { %v2748_v36 = vadd.f32 %v2707_v50, %v2666_v19  ;;  %v2747_v48 = vadd.f32 %v2706_v32, %v2665_v35  ;;  %v3648_v35 = vld [vmem:[%s8881_s25 + $0x3e] sm:$0xff] }
 0x200   : > { %v2875_v44 = vpop.permute.xlu1 %2874  ;;  %v2870_v45 = vpop.permute.xlu0 %2869  ;;  %v1898_v50 = vld [vmem:[#allocation2 + $0x120] sm:$0xff]  ;;  %v1897_v32 = vld [vmem:[#allocation2 + $0x118] sm:$0xff] }
 0x201   : > { %2789 = vst.msk [vmem:[#allocation2 + $0x78] sm:$0xff] %vm331_vm0, %v2748_v36  ;;  %2788 = vst.msk [vmem:[#allocation2 + $0x70] sm:$0xff] %vm331_vm0, %v2747_v48  ;;  %v3069_v42 = vmul.f32 %v9746_v37, %v2875_v44  ;;  %v3068_v29 = vmul.f32 %v9746_v37, %v2870_v45  ;;  %2974 = vperm.xlu1 %8602, %v9693_v43   ;;  %2969 = vperm.xlu0 %8601, %v9616_v47   ;;  %v3239_v47 = vld [vmem:[%s8881_s25 + $0x6d] sm:$0xff]  ;;  %v3647_v36 = vld [vmem:[%s8881_s25 + $0x36] sm:$0xff] }
 0x202   : > { %v3112_v43 = vld [vmem:[#allocation2 + $0x28] sm:$0xff] }
 0x203   : > { %v3151_v27 = vadd.f32 %v3110_v56, %v3069_v42  ;;  %v3150_v30 = vadd.f32 %v3109_v21, %v3068_v29  ;;  %v3650_v21 = vld [vmem:[%s8881_s25 + $0x4e] sm:$0xff] }
 0x204   : > { %v2885_v2 = vpop.permute.xlu1 %2884  ;;  %v2880_v52 = vpop.permute.xlu0 %2879 }
 0x205   : > { %3192 = vst.msk [vmem:[#allocation2 + $0x18] sm:$0xff] %vm331_vm0, %v3151_v27  ;;  %3191 = vst.msk [vmem:[#allocation2 + $0x10] sm:$0xff] %vm331_vm0, %v3150_v30  ;;  %v3071_v0 = vmul.f32 %v9746_v37, %v2885_v2  ;;  %v3070_v16 = vmul.f32 %v9746_v37, %v2880_v52  ;;  %3309 = vperm.xlu1 %8602, %v3237_v5   ;;  %2979 = vperm.xlu0 %8601, %v9705_v14   ;;  %v3241_v14 = vld [vmem:[%s8881_s25 + $0x7d] sm:$0xff]  ;;  %v1900_v5 = vld [vmem:[#allocation2 + $0x130] sm:$0xff] }
 0x206   : > { %v1899_v27 = vld [vmem:[#allocation2 + $0x128] sm:$0xff] }
 0x207   : > { %v3153_v57 = vadd.f32 %v3112_v43, %v3071_v0  ;;  %v3152_v59 = vadd.f32 %v3111_v1, %v3070_v16  ;;  %v3649_v30 = vld [vmem:[%s8881_s25 + $0x46] sm:$0xff] }
 0x208   : > { %v1765_v61 = vpop.permute.xlu1 %1764  ;;  %v2890_v62 = vpop.permute.xlu0 %2889  ;;  %v9802_v1 = vld [vmem:[%s8881_s25 + $0x104] sm:$0xff] }
 0x209   : > { %3194 = vst.msk [vmem:[#allocation2 + $0x28] sm:$0xff] %vm331_vm0, %v3153_v57  ;;  %3193 = vst.msk [vmem:[#allocation2 + $0x20] sm:$0xff] %vm331_vm0, %v3152_v59  ;;  %v1851_v17 = vmul.f32 %v9659_v55, %v1765_v61  ;;  %v3072_v39 = vmul.f32 %v9746_v37, %v2890_v62  ;;  %3319 = vperm.xlu1 %8602, %v3239_v47   ;;  %3314 = vperm.xlu0 %8601, %v3238_v54   ;;  %v2303_v54 = vld [vmem:[#allocation2 + $0xd0] sm:$0xff]  ;;  %v2302_v57 = vld [vmem:[#allocation2 + $0xc8] sm:$0xff] }
 0x20a   : > { %v3651_v59 = vld [vmem:[%s8881_s25 + $0x56] sm:$0xff] }
 0x20b   : > { %v1933_v11 = vadd.f32 %v1892_v51, %v1851_v17  ;;  %v3154_v13 = vadd.f32 %v3113_v46, %v3072_v39  ;;  %v9811_v46 = vld [vmem:[%s8881_s25 + $0x114] sm:$0xff] }
 0x20c   : > { %v1775_v24 = vpop.permute.xlu1 %1774  ;;  %v1770_v38 = vpop.permute.xlu0 %1769 }
 0x20d   : > { %1974 = vst.msk [vmem:[#allocation2 + $0xf0] sm:$0xff] %vm331_vm0, %v1933_v11  ;;  %3195 = vst.msk [vmem:[#allocation2 + $0x30] sm:$0xff] %vm331_vm0, %v3154_v13  ;;  %v1853_v15 = vmul.f32 %v9659_v55, %v1775_v24  ;;  %v1852_v4 = vmul.f32 %v9659_v55, %v1770_v38  ;;  %3329 = vperm.xlu1 %8602, %v3241_v14   ;;  %3324 = vperm.xlu0 %8601, %v3240_v9   ;;  %v2305_v9 = vld [vmem:[#allocation2 + $0xe0] sm:$0xff]  ;;  %v2304_v11 = vld [vmem:[#allocation2 + $0xd8] sm:$0xff] }
 0x20e   : > { %v9814_v13 = vld [vmem:[%s8881_s25 + $0x10c] sm:$0xff] }
 0x20f   : > { %v1935_v49 = vadd.f32 %v1894_v58, %v1853_v15  ;;  %v1934_v60 = vadd.f32 %v1893_v23, %v1852_v4  ;;  %v9823_v23 = vld [vmem:[%s8881_s25 + $0x124] sm:$0xff] }
 0x210   : > { %v1785_v12 = vpop.permute.xlu1 %1784  ;;  %v1780_v20 = vpop.permute.xlu0 %1779 }
 0x211   : > { %1976 = vst.msk [vmem:[#allocation2 + $0x100] sm:$0xff] %vm331_vm0, %v1935_v49  ;;  %1975 = vst.msk [vmem:[#allocation2 + $0xf8] sm:$0xff] %vm331_vm0, %v1934_v60  ;;  %v1855_v3 = vmul.f32 %v9659_v55, %v1785_v12  ;;  %v1854_v18 = vmul.f32 %v9659_v55, %v1780_v20  ;;  %3339 = vperm.xlu1 %8602, %v3243_v7   ;;  %3334 = vperm.xlu0 %8601, %v3242_v8   ;;  %v2708_v8 = vld [vmem:[#allocation2 + $0x80] sm:$0xff]  ;;  %v2306_v49 = vld [vmem:[#allocation2 + $0xe8] sm:$0xff] }
 0x212   : > { %v9826_v60 = vld [vmem:[%s8881_s25 + $0x11c] sm:$0xff] }
 0x213   : > { %v1937_v40 = vadd.f32 %v1896_v31, %v1855_v3  ;;  %v1936_v6 = vadd.f32 %v1895_v10, %v1854_v18 }
 0x214   : > { %v1795_v33 = vpop.permute.xlu1 %1794  ;;  %v1790_v34 = vpop.permute.xlu0 %1789 }
 0x215   : > { %1978 = vst.msk [vmem:[#allocation2 + $0x110] sm:$0xff] %vm331_vm0, %v1937_v40  ;;  %1977 = vst.msk [vmem:[#allocation2 + $0x108] sm:$0xff] %vm331_vm0, %v1936_v6  ;;  %v1857_v53 = vmul.f32 %v9659_v55, %v1795_v33  ;;  %v1856_v19 = vmul.f32 %v9659_v55, %v1790_v34  ;;  %3349 = vperm.xlu1 %8602, %v3245_v28   ;;  %3344 = vperm.xlu0 %8601, %v3244_v22   ;;  %v8775_v28 = vmov 0.0   ;;  %v9867_v22 = vld [vmem:[%s8881_s25 + $0x134] sm:$0xff]  ;;  %v8603_v40 = vld [vmem:[%s11324_s3 + $0x8] sm:$0xff]  }
 0x216   : > { %8006 = vmatprep.subr.bf16.mxu0 %v8775_v28  ;;  %332 = vst.msk [vmem:[#allocation5] sm:$0xff] %vm331_vm0, %v8775_v28  ;;  %333 = vst.msk [vmem:[#allocation5 + $0x8] sm:$0xff] %vm331_vm0, %v8775_v28  ;;  %8554 = vmatprep.subr.bf16.mxu1 %v8775_v28  ;;  %v2710_v6 = vld [vmem:[#allocation2 + $0x90] sm:$0xff]  ;;  %v2709_v33 = vld [vmem:[#allocation2 + $0x88] sm:$0xff] }
 0x217   : > { %v1939_v48 = vadd.f32 %v1898_v50, %v1857_v53  ;;  %v1938_v44 = vadd.f32 %v1897_v32, %v1856_v19  ;;  %334 = vst.msk [vmem:[#allocation5 + $0x10] sm:$0xff] %vm331_vm0, %v8775_v28  ;;  %335 = vst.msk [vmem:[#allocation5 + $0x18] sm:$0xff] %vm331_vm0, %v8775_v28  ;;  %v9873_v34 = vld [vmem:[%s8881_s25 + $0x12c] sm:$0xff]  ;;  %8007 = vmatpush3.bf16.msra.mxu0 %v8603_v40  ;;  %8010 = vmatprep.mubr.msk.bf16.mxu0 %vm8776_vm2, %v8775_v28 }
 0x218   : > { %v1805_v45 = vpop.permute.xlu1 %1804  ;;  %v1800_v42 = vpop.permute.xlu0 %1799  ;;  %336 = vst.msk [vmem:[#allocation5 + $0x20] sm:$0xff] %vm331_vm0, %v8775_v28  ;;  %337 = vst.msk [vmem:[#allocation5 + $0x28] sm:$0xff] %vm331_vm0, %v8775_v28  ;;  %8008 = vmatprep.subr.bf16.mxu0 %v8775_v28  ;;  %8046 = vmatprep.mubr.msk.bf16.mxu1 %vm8776_vm2, %v8775_v28 }
 0x219   : > { %1980 = vst.msk [vmem:[#allocation2 + $0x120] sm:$0xff] %vm331_vm0, %v1939_v48  ;;  %1979 = vst.msk [vmem:[#allocation2 + $0x118] sm:$0xff] %vm331_vm0, %v1938_v44  ;;  %v1859_v29 = vmul.f32 %v9659_v55, %v1805_v45  ;;  %v1858_v56 = vmul.f32 %v9659_v55, %v1800_v42  ;;  %3704 = vperm.xlu1 %8602, %v3648_v35   ;;  %3699 = vperm.xlu0 %8601, %v3647_v36   ;;  %v9797_v55 = vld [vmem:[%s11322_s1 + $0x4] ss:$0 sm:$0xff]  ;;  %v2711_v42 = vld [vmem:[#allocation2 + $0x98] sm:$0xff] }
 0x21a   : > { %338 = vst.msk [vmem:[#allocation5 + $0x30] sm:$0xff] %vm331_vm0, %v8775_v28  ;;  %339 = vst.msk [vmem:[#allocation5 + $0x38] sm:$0xff] %vm331_vm0, %v8775_v28  ;;  %v9883_v48 = vld [vmem:[%s8881_s25 + $0x144] sm:$0xff] }
 0x21b   : > { %v1941_v2 = vadd.f32 %v1900_v5, %v1859_v29  ;;  %v1940_v52 = vadd.f32 %v1899_v27, %v1858_v56  ;;  %340 = vst.msk [vmem:[#allocation5 + $0x40] sm:$0xff] %vm331_vm0, %v8775_v28  ;;  %341 = vst.msk [vmem:[#allocation5 + $0x48] sm:$0xff] %vm331_vm0, %v8775_v28  ;;  %v8604_v44 = vld [vmem:[%s11324_s3] sm:$0xff]  }
 0x21c   : > { %v2160_v0 = vpop.permute.xlu1 %2159  ;;  %v2155_v16 = vpop.permute.xlu0 %2154  ;;  %342 = vst.msk [vmem:[#allocation5 + $0x50] sm:$0xff] %vm331_vm0, %v8775_v28  ;;  %343 = vst.msk [vmem:[#allocation5 + $0x58] sm:$0xff] %vm331_vm0, %v8775_v28  ;;  %v2712_v45 = vld [vmem:[#allocation2 + $0xa0] sm:$0xff]  ;;  %8009 = vmatpush3.bf16.msra.mxu0 %v8604_v44 }
 0x21d   : > { %1982 = vst.msk [vmem:[#allocation2 + $0x130] sm:$0xff] %vm331_vm0, %v1941_v2  ;;  %1981 = vst.msk [vmem:[#allocation2 + $0x128] sm:$0xff] %vm331_vm0, %v1940_v52  ;;  %v2262_v47 = vmul.f32 %v9797_v55, %v2160_v0  ;;  %v2261_v43 = vmul.f32 %v9797_v55, %v2155_v16  ;;  %3714 = vperm.xlu1 %8602, %v3650_v21   ;;  %3709 = vperm.xlu0 %8601, %v3649_v30   ;;  %v9889_v29 = vld [vmem:[%s8881_s25 + $0x13c] sm:$0xff] }
 0x21e   : > { %344 = vst.msk [vmem:[#allocation5 + $0x60] sm:$0xff] %vm331_vm0, %v8775_v28  ;;  %345 = vst.msk [vmem:[#allocation5 + $0x68] sm:$0xff] %vm331_vm0, %v8775_v28  ;;  %v4164_v5 = vld [vmem:[#allocation5] sm:$0xff]  ;;  %v4165_v27 = vld [vmem:[#allocation5 + $0x8] sm:$0xff]  ;;  %8038 = vmatprep.subr.bf16.mxu0 %v8775_v28 }
 0x21f   : > { %v2344_v61 = vadd.f32 %v2303_v54, %v2262_v47  ;;  %v2343_v62 = vadd.f32 %v2302_v57, %v2261_v43  ;;  %346 = vst.msk [vmem:[#allocation5 + $0x70] sm:$0xff] %vm331_vm0, %v8775_v28  ;;  %v4177_v52 = vpack.c.bf16 %v4165_v27, %v4164_v5  ;;  %v2714_v47 = vld [vmem:[#allocation2 + $0xb0] sm:$0xff]  ;;  %v2713_v43 = vld [vmem:[#allocation2 + $0xa8] sm:$0xff] }
 0x220   : > { %v2170_v17 = vpop.permute.xlu1 %2169  ;;  %v2165_v39 = vpop.permute.xlu0 %2164  ;;  %v3121_v5 = vld [vmem:[#allocation2 + $0x70] sm:$0xff]  ;;  %v3120_v27 = vld [vmem:[#allocation2 + $0x68] sm:$0xff]  ;;  %350 = vst.msk [vmem:[#allocation6] sm:$0xff] %vm349_vm3, %v8775_v28  ;;  %351 = vst.msk [vmem:[#allocation6 + $0x8] sm:$0xff] %vm349_vm3, %v8775_v28 }
 0x221   : > { %2385 = vst.msk [vmem:[#allocation2 + $0xd0] sm:$0xff] %vm331_vm0, %v2344_v61  ;;  %2384 = vst.msk [vmem:[#allocation2 + $0xc8] sm:$0xff] %vm331_vm0, %v2343_v62  ;;  %v2264_v14 = vmul.f32 %v9797_v55, %v2170_v17  ;;  %v2263_v51 = vmul.f32 %v9797_v55, %v2165_v39  ;;  %2594 = vperm.xlu1 %8602, %v9802_v1   ;;  %3719 = vperm.xlu0 %8601, %v3651_v59   ;;  %v2716_v39 = vld [vmem:[#allocation2 + $0xc0] sm:$0xff] }
 0x222   : > { %8011 = vmatmul.mubr.msk.bf16.vlgmr.msra.gmra.mxu0 %vm331_vm0, %v4177_v52  ;;  %352 = vst.msk [vmem:[#allocation6 + $0x10] sm:$0xff] %vm349_vm3, %v8775_v28  ;;  %353 = vst.msk [vmem:[#allocation6 + $0x18] sm:$0xff] %vm349_vm3, %v8775_v28 }
 0x223   : > { %v2346_v24 = vadd.f32 %v2305_v9, %v2264_v14  ;;  %v2345_v38 = vadd.f32 %v2304_v11, %v2263_v51  ;;  %8014 = vmatprep.mubr.msk.bf16.mxu0 %vm8776_vm2, %v8775_v28  ;;  %v2715_v14 = vld [vmem:[#allocation2 + $0xb8] sm:$0xff]  ;;  %354 = vst.msk [vmem:[#allocation6 + $0x20] sm:$0xff] %vm349_vm3, %v8775_v28  ;;  %355 = vst.msk [vmem:[#allocation6 + $0x28] sm:$0xff] %vm349_vm3, %v8775_v28 }
 0x224   : > { %v2525_v15 = vpop.permute.xlu1 %2524  ;;  %v2175_v4 = vpop.permute.xlu0 %2174  ;;  %348 = vst.msk [vmem:[#allocation5 + $0x78] sm:$0x3] %vm347_vm4, %v8775_v28 }
 0x225   : > { %2387 = vst.msk [vmem:[#allocation2 + $0xe0] sm:$0xff] %vm331_vm0, %v2346_v24  ;;  %2386 = vst.msk [vmem:[#allocation2 + $0xd8] sm:$0xff] %vm331_vm0, %v2345_v38  ;;  %v2667_v7 = vmul.f32 %v9601_v26, %v2525_v15  ;;  %v2265_v58 = vmul.f32 %v9797_v55, %v2175_v4  ;;  %2604 = vperm.xlu1 %8602, %v9811_v46   ;;  %2599 = vperm.xlu0 %8601, %v9814_v13  }
 0x226   : > { %357 = vst.msk [vmem:[#allocation6 + $0x30] sm:$0x3] %vm356_vm6, %v8775_v28 }
 0x227   : > { %v2749_v12 = vadd.f32 %v2708_v8, %v2667_v7  ;;  %v2347_v20 = vadd.f32 %v2306_v49, %v2265_v58 }
 0x228   : > { %v2535_v3 = vpop.permute.xlu1 %2534  ;;  %v2530_v18 = vpop.permute.xlu0 %2529 }
 0x229   : > { %2790 = vst.msk [vmem:[#allocation2 + $0x80] sm:$0xff] %vm331_vm0, %v2749_v12  ;;  %2388 = vst.msk [vmem:[#allocation2 + $0xe8] sm:$0xff] %vm331_vm0, %v2347_v20  ;;  %v2669_v31 = vmul.f32 %v9601_v26, %v2535_v3  ;;  %v2668_v10 = vmul.f32 %v9601_v26, %v2530_v18  ;;  %2614 = vperm.xlu1 %8602, %v9823_v23   ;;  %2609 = vperm.xlu0 %8601, %v9826_v60   ;;  %v3116_v20 = vld [vmem:[#allocation2 + $0x48] sm:$0xff] }
 0x22a   : > { %v3247_v3 = vld [vmem:[%s8881_s25 + $0xad] sm:$0xff] }
 0x22b   : > { %v2751_v53 = vadd.f32 %v2710_v6, %v2669_v31  ;;  %v2750_v19 = vadd.f32 %v2709_v33, %v2668_v10 }
 0x22c   : > { %v2545_v35 = vpop.permute.xlu1 %2544  ;;  %v2540_v50 = vpop.permute.xlu0 %2539 }
 0x22d   : > { %2792 = vst.msk [vmem:[#allocation2 + $0x90] sm:$0xff] %vm331_vm0, %v2751_v53  ;;  %2791 = vst.msk [vmem:[#allocation2 + $0x88] sm:$0xff] %vm331_vm0, %v2750_v19  ;;  %v2671_v32 = vmul.f32 %v9601_v26, %v2545_v35  ;;  %v2670_v36 = vmul.f32 %v9601_v26, %v2540_v50  ;;  %2624 = vperm.xlu1 %8602, %v9867_v22   ;;  %2619 = vperm.xlu0 %8601, %v9873_v34   ;;  %v3119_v53 = vld [vmem:[#allocation2 + $0x60] sm:$0xff]  ;;  %v3118_v19 = vld [vmem:[#allocation2 + $0x58] sm:$0xff] }
 0x22e   : > { %v3249_v35 = vld [vmem:[%s8881_s25 + $0xbd] sm:$0xff] }
 0x22f   : > { %v2753_v56 = vadd.f32 %v2712_v45, %v2671_v32  ;;  %v2752_v21 = vadd.f32 %v2711_v42, %v2670_v36 }
 0x230   : > { %v2555_v30 = vpop.permute.xlu1 %2554  ;;  %v2550_v2 = vpop.permute.xlu0 %2549 }
 0x231   : > { %2794 = vst.msk [vmem:[#allocation2 + $0xa0] sm:$0xff] %vm331_vm0, %v2753_v56  ;;  %2793 = vst.msk [vmem:[#allocation2 + $0x98] sm:$0xff] %vm331_vm0, %v2752_v21  ;;  %v2673_v0 = vmul.f32 %v9601_v26, %v2555_v30  ;;  %v2672_v16 = vmul.f32 %v9601_v26, %v2550_v2  ;;  %2634 = vperm.xlu1 %8602, %v9883_v48   ;;  %2629 = vperm.xlu0 %8601, %v9889_v29   ;;  %v9938_v56 = vld [vmem:[%s11322_s1 + $0x7] ss:$0 sm:$0xff]  ;;  %v3252_v21 = vld [vmem:[%s8881_s25 + $0xd5] sm:$0xff] }
 0x232   : > { %v3251_v30 = vld [vmem:[%s8881_s25 + $0xcd] sm:$0xff] }
 0x233   : > { %v2755_v54 = vadd.f32 %v2714_v47, %v2673_v0  ;;  %v2754_v57 = vadd.f32 %v2713_v43, %v2672_v16 }
 0x234   : > { %v2565_v59 = vpop.permute.xlu1 %2564  ;;  %v2560_v61 = vpop.permute.xlu0 %2559 }
 0x235   : > { %2796 = vst.msk [vmem:[#allocation2 + $0xb0] sm:$0xff] %vm331_vm0, %v2755_v54  ;;  %2795 = vst.msk [vmem:[#allocation2 + $0xa8] sm:$0xff] %vm331_vm0, %v2754_v57  ;;  %v2675_v62 = vmul.f32 %v9601_v26, %v2565_v59  ;;  %v2674_v17 = vmul.f32 %v9601_v26, %v2560_v61  ;;  %2989 = vperm.xlu1 %8602, %v9717_v25   ;;  %2984 = vperm.xlu0 %8601, %v9702_v63   ;;  %v3115_v26 = vld [vmem:[#allocation2 + $0x40] sm:$0xff]  ;;  %v3114_v63 = vld [vmem:[#allocation2 + $0x38] sm:$0xff] }
 0x236   : > { %v3246_v25 = vld [vmem:[%s8881_s25 + $0xa5] sm:$0xff]  ;;  %v3524_v57 = vld [vmem:[#allocation2 + $0x10] sm:$0xff]  ;;  %v3122_v59 = vld [vmem:[#allocation2 + $0x78] sm:$0xff] }
 0x237   : > { %v2757_v51 = vadd.f32 %v2716_v39, %v2675_v62  ;;  %v2756_v9 = vadd.f32 %v2715_v14, %v2674_v17  ;;  %v3254_v54 = vld [vmem:[%s8881_s25 + $0xe5] sm:$0xff]  ;;  %v3253_v61 = vld [vmem:[%s8881_s25 + $0xdd] sm:$0xff] }
 0x238   : > { %v2900_v11 = vpop.permute.xlu1 %2899  ;;  %v2895_v24 = vpop.permute.xlu0 %2894 }
 0x239   : > { %2798 = vst.msk [vmem:[#allocation2 + $0xc0] sm:$0xff] %vm331_vm0, %v2757_v51  ;;  %2797 = vst.msk [vmem:[#allocation2 + $0xb8] sm:$0xff] %vm331_vm0, %v2756_v9  ;;  %v3074_v38 = vmul.f32 %v9746_v37, %v2900_v11  ;;  %v3073_v15 = vmul.f32 %v9746_v37, %v2895_v24  ;;  %2999 = vperm.xlu1 %8602, %v9802_v1   ;;  %2994 = vperm.xlu0 %8601, %v9714_v41   ;;  %v3248_v41 = vld [vmem:[%s8881_s25 + $0xb5] sm:$0xff]  ;;  %v3653_v11 = vld [vmem:[%s8881_s25 + $0x66] sm:$0xff] }
 0x23a   : > { %v3117_v1 = vld [vmem:[#allocation2 + $0x50] sm:$0xff]  ;;  %v3526_v24 = vld [vmem:[#allocation2 + $0x20] sm:$0xff] }
 0x23b   : > { %v3156_v4 = vadd.f32 %v3115_v26, %v3074_v38  ;;  %v3155_v7 = vadd.f32 %v3114_v63, %v3073_v15  ;;  %v3525_v38 = vld [vmem:[#allocation2 + $0x18] sm:$0xff] }
 0x23c   : > { %v2910_v58 = vpop.permute.xlu1 %2909  ;;  %v2905_v8 = vpop.permute.xlu0 %2904  ;;  %v3652_v15 = vld [vmem:[%s8881_s25 + $0x5e] sm:$0xff] }
 0x23d   : > { %3197 = vst.msk [vmem:[#allocation2 + $0x40] sm:$0xff] %vm331_vm0, %v3156_v4  ;;  %3196 = vst.msk [vmem:[#allocation2 + $0x38] sm:$0xff] %vm331_vm0, %v3155_v7  ;;  %v3076_v49 = vmul.f32 %v9746_v37, %v2910_v58  ;;  %v3075_v12 = vmul.f32 %v9746_v37, %v2905_v8  ;;  %3354 = vperm.xlu1 %8602, %v3246_v25   ;;  %3004 = vperm.xlu0 %8601, %v9814_v13   ;;  %v3250_v13 = vld [vmem:[%s8881_s25 + $0xc5] sm:$0xff]  ;;  %v3655_v8 = vld [vmem:[%s8881_s25 + $0x76] sm:$0xff] }
 0x23f   : > { %v3158_v18 = vadd.f32 %v3117_v1, %v3076_v49  ;;  %v3157_v31 = vadd.f32 %v3116_v20, %v3075_v12  ;;  %v3528_v49 = vld [vmem:[#allocation2 + $0x30] sm:$0xff]  ;;  %v3527_v12 = vld [vmem:[#allocation2 + $0x28] sm:$0xff] }
 0x240   : > { %v2920_v10 = vpop.permute.xlu1 %2919  ;;  %v2915_v40 = vpop.permute.xlu0 %2914 }
 0x241   : > { %3199 = vst.msk [vmem:[#allocation2 + $0x50] sm:$0xff] %vm331_vm0, %v3158_v18  ;;  %3198 = vst.msk [vmem:[#allocation2 + $0x48] sm:$0xff] %vm331_vm0, %v3157_v31  ;;  %v3078_v6 = vmul.f32 %v9746_v37, %v2920_v10  ;;  %v3077_v33 = vmul.f32 %v9746_v37, %v2915_v40  ;;  %3364 = vperm.xlu1 %8602, %v3248_v41   ;;  %3359 = vperm.xlu0 %8601, %v3247_v3   ;;  %v3654_v41 = vld [vmem:[%s8881_s25 + $0x6e] sm:$0xff]  ;;  %v3657_v40 = vld [vmem:[%s8881_s25 + $0x86] sm:$0xff] }
 0x243   : > { %v3160_v50 = vadd.f32 %v3119_v53, %v3078_v6  ;;  %v3159_v32 = vadd.f32 %v3118_v19, %v3077_v33  ;;  %v2308_v6 = vld [vmem:[#allocation2 + $0xf8] sm:$0xff]  ;;  %v2307_v33 = vld [vmem:[#allocation2 + $0xf0] sm:$0xff] }
 0x244   : > { %v2930_v36 = vpop.permute.xlu1 %2929  ;;  %v2925_v44 = vpop.permute.xlu0 %2924 }
 0x245   : > { %3201 = vst.msk [vmem:[#allocation2 + $0x60] sm:$0xff] %vm331_vm0, %v3160_v50  ;;  %3200 = vst.msk [vmem:[#allocation2 + $0x58] sm:$0xff] %vm331_vm0, %v3159_v32  ;;  %v3080_v45 = vmul.f32 %v9746_v37, %v2930_v36  ;;  %v3079_v42 = vmul.f32 %v9746_v37, %v2925_v44  ;;  %3374 = vperm.xlu1 %8602, %v3250_v13   ;;  %3369 = vperm.xlu0 %8601, %v3249_v35   ;;  %v3656_v13 = vld [vmem:[%s8881_s25 + $0x7e] sm:$0xff]  ;;  %v3659_v44 = vld [vmem:[%s8881_s25 + $0x96] sm:$0xff] }
 0x247   : > { %v3162_v2 = vadd.f32 %v3121_v5, %v3080_v45  ;;  %v3161_v52 = vadd.f32 %v3120_v27, %v3079_v42  ;;  %v2310_v45 = vld [vmem:[#allocation2 + $0x108] sm:$0xff]  ;;  %v2309_v42 = vld [vmem:[#allocation2 + $0x100] sm:$0xff] }
 0x248   : > { %v3285_v0 = vpop.permute.xlu1 %3284  ;;  %v2935_v16 = vpop.permute.xlu0 %2934 }
 0x249   : > { %3203 = vst.msk [vmem:[#allocation2 + $0x70] sm:$0xff] %vm331_vm0, %v3162_v2  ;;  %3202 = vst.msk [vmem:[#allocation2 + $0x68] sm:$0xff] %vm331_vm0, %v3161_v52  ;;  %v3483_v47 = vmul.f32 %v9938_v56, %v3285_v0  ;;  %v3081_v43 = vmul.f32 %v9746_v37, %v2935_v16  ;;  %3384 = vperm.xlu1 %8602, %v3252_v21   ;;  %3379 = vperm.xlu0 %8601, %v3251_v30   ;;  %v3658_v21 = vld [vmem:[%s8881_s25 + $0x8e] sm:$0xff]  ;;  %v2312_v16 = vld [vmem:[#allocation2 + $0x118] sm:$0xff] }
 0x24b   : > { %v3565_v62 = vadd.f32 %v3524_v57, %v3483_v47  ;;  %v3163_v17 = vadd.f32 %v3122_v59, %v3081_v43  ;;  %v2311_v47 = vld [vmem:[#allocation2 + $0x110] sm:$0xff]  ;;  %v3660_v43 = vld [vmem:[%s8881_s25 + $0x9e] sm:$0xff] }
 0x24c   : > { %v3295_v39 = vpop.permute.xlu1 %3294  ;;  %v3290_v14 = vpop.permute.xlu0 %3289 }
 0x24d   : > { %3606 = vst.msk [vmem:[#allocation2 + $0x10] sm:$0xff] %vm331_vm0, %v3565_v62  ;;  %3204 = vst.msk [vmem:[#allocation2 + $0x78] sm:$0xff] %vm331_vm0, %v3163_v17  ;;  %v3485_v51 = vmul.f32 %v9938_v56, %v3295_v39  ;;  %v3484_v9 = vmul.f32 %v9938_v56, %v3290_v14  ;;  %3394 = vperm.xlu1 %8602, %v3254_v54   ;;  %3389 = vperm.xlu0 %8601, %v3253_v61   ;;  %v2314_v39 = vld [vmem:[#allocation2 + $0x128] sm:$0xff]  ;;  %v2313_v14 = vld [vmem:[#allocation2 + $0x120] sm:$0xff] }
 0x24f   : > { %v3567_v26 = vadd.f32 %v3526_v24, %v3485_v51  ;;  %v3566_v63 = vadd.f32 %v3525_v38, %v3484_v9  ;;  %v9987_v38 = vld [vmem:[%s11322_s1 + $0x5] ss:$0 sm:$0xff] }
 0x250   : > { %v3305_v25 = vpop.permute.xlu1 %3304  ;;  %v3300_v4 = vpop.permute.xlu0 %3299 }
 0x251   : > { %3608 = vst.msk [vmem:[#allocation2 + $0x20] sm:$0xff] %vm331_vm0, %v3567_v26  ;;  %3607 = vst.msk [vmem:[#allocation2 + $0x18] sm:$0xff] %vm331_vm0, %v3566_v63  ;;  %v3487_v7 = vmul.f32 %v9938_v56, %v3305_v25  ;;  %v3486_v58 = vmul.f32 %v9938_v56, %v3300_v4  ;;  %3729 = vperm.xlu1 %8602, %v3653_v11   ;;  %3724 = vperm.xlu0 %8601, %v3652_v15   ;;  %v2717_v26 = vld [vmem:[#allocation2 + $0xc8] sm:$0xff]  ;;  %v2315_v63 = vld [vmem:[#allocation2 + $0x130] sm:$0xff] }
 0x253   : > { %v3569_v1 = vadd.f32 %v3528_v49, %v3487_v7  ;;  %v3568_v20 = vadd.f32 %v3527_v12, %v3486_v58 }
 0x254   : > { %v2185_v3 = vpop.permute.xlu1 %2184  ;;  %v2180_v18 = vpop.permute.xlu0 %2179 }
 0x255   : > { %3610 = vst.msk [vmem:[#allocation2 + $0x30] sm:$0xff] %vm331_vm0, %v3569_v1  ;;  %3609 = vst.msk [vmem:[#allocation2 + $0x28] sm:$0xff] %vm331_vm0, %v3568_v20  ;;  %v2267_v31 = vmul.f32 %v9797_v55, %v2185_v3  ;;  %v2266_v10 = vmul.f32 %v9797_v55, %v2180_v18  ;;  %3739 = vperm.xlu1 %8602, %v3655_v8   ;;  %3734 = vperm.xlu0 %8601, %v3654_v41   ;;  %v2853_v3 = vld [vmem:[%s8881_s25 + $0x154] sm:$0xff] }
 0x256   : > { %v8606_v18 = vld [vmem:[%s11324_s3 + $0x10] sm:$0xff]  }
 0x257   : > { %v2349_v53 = vadd.f32 %v2308_v6, %v2267_v31  ;;  %v2348_v19 = vadd.f32 %v2307_v33, %v2266_v10  ;;  %v2721_v31 = vld [vmem:[#allocation2 + $0xe8] sm:$0xff]  ;;  %v2720_v10 = vld [vmem:[#allocation2 + $0xe0] sm:$0xff] }
 0x258   : > { %v2195_v35 = vpop.permute.xlu1 %2194  ;;  %v2190_v50 = vpop.permute.xlu0 %2189 }
 0x259   : > { %2390 = vst.msk [vmem:[#allocation2 + $0xf8] sm:$0xff] %vm331_vm0, %v2349_v53  ;;  %2389 = vst.msk [vmem:[#allocation2 + $0xf0] sm:$0xff] %vm331_vm0, %v2348_v19  ;;  %v2269_v32 = vmul.f32 %v9797_v55, %v2195_v35  ;;  %v2268_v36 = vmul.f32 %v9797_v55, %v2190_v50  ;;  %3749 = vperm.xlu1 %8602, %v3657_v40   ;;  %3744 = vperm.xlu0 %8601, %v3656_v13   ;;  %v10015_v40 = vld [vmem:[%s8881_s25 + $0x14c] sm:$0xff]  ;;  %v3256_v19 = vld [vmem:[%s8881_s25 + $0xf5] sm:$0xff] }
 0x25a   : > { %v3124_v35 = vld [vmem:[#allocation2 + $0x88] sm:$0xff]  ;;  %v3123_v50 = vld [vmem:[#allocation2 + $0x80] sm:$0xff] }
 0x25b   : > { %v2351_v5 = vadd.f32 %v2310_v45, %v2269_v32  ;;  %v2350_v27 = vadd.f32 %v2309_v42, %v2268_v36  ;;  %v3255_v32 = vld [vmem:[%s8881_s25 + $0xed] sm:$0xff] }
 0x25c   : > { %v2205_v30 = vpop.permute.xlu1 %2204  ;;  %v2200_v2 = vpop.permute.xlu0 %2199 }
 0x25d   : > { %2392 = vst.msk [vmem:[#allocation2 + $0x108] sm:$0xff] %vm331_vm0, %v2351_v5  ;;  %2391 = vst.msk [vmem:[#allocation2 + $0x100] sm:$0xff] %vm331_vm0, %v2350_v27  ;;  %v2271_v52 = vmul.f32 %v9797_v55, %v2205_v30  ;;  %v2270_v0 = vmul.f32 %v9797_v55, %v2200_v2  ;;  %3759 = vperm.xlu1 %8602, %v3659_v44   ;;  %3754 = vperm.xlu0 %8601, %v3658_v21   ;;  %v3258_v27 = vld [vmem:[%s8881_s25 + $0x105] sm:$0xff]  ;;  %v3126_v30 = vld [vmem:[#allocation2 + $0x98] sm:$0xff] }
 0x25e   : > { %v3125_v2 = vld [vmem:[#allocation2 + $0x90] sm:$0xff] }
 0x25f   : > { %v2353_v54 = vadd.f32 %v2312_v16, %v2271_v52  ;;  %v2352_v57 = vadd.f32 %v2311_v47, %v2270_v0  ;;  %v3257_v52 = vld [vmem:[%s8881_s25 + $0xfd] sm:$0xff] }
 0x260   : > { %v2215_v59 = vpop.permute.xlu1 %2214  ;;  %v2210_v61 = vpop.permute.xlu0 %2209 }
 0x261   : > { %2394 = vst.msk [vmem:[#allocation2 + $0x118] sm:$0xff] %vm331_vm0, %v2353_v54  ;;  %2393 = vst.msk [vmem:[#allocation2 + $0x110] sm:$0xff] %vm331_vm0, %v2352_v57  ;;  %v2273_v62 = vmul.f32 %v9797_v55, %v2215_v59  ;;  %v2272_v17 = vmul.f32 %v9797_v55, %v2210_v61  ;;  %3009 = vperm.xlu1 %8602, %v9811_v46   ;;  %3764 = vperm.xlu0 %8601, %v3660_v43   ;;  %v3661_v59 = vld [vmem:[%s8881_s25 + $0xa6] sm:$0xff] }
 0x262   : > { %v3128_v61 = vld [vmem:[#allocation2 + $0xa8] sm:$0xff] }
 0x263   : > { %v2355_v51 = vadd.f32 %v2314_v39, %v2273_v62  ;;  %v2354_v9 = vadd.f32 %v2313_v14, %v2272_v17  ;;  %v3127_v62 = vld [vmem:[#allocation2 + $0xa0] sm:$0xff]  ;;  %v3259_v17 = vld [vmem:[%s8881_s25 + $0x10d] sm:$0xff] }
 0x264   : > { %v2570_v11 = vpop.permute.xlu1 %2569  ;;  %v2220_v24 = vpop.permute.xlu0 %2219 }
 0x265   : > { %2396 = vst.msk [vmem:[#allocation2 + $0x128] sm:$0xff] %vm331_vm0, %v2355_v51  ;;  %2395 = vst.msk [vmem:[#allocation2 + $0x120] sm:$0xff] %vm331_vm0, %v2354_v9  ;;  %v2676_v15 = vmul.f32 %v9987_v38, %v2570_v11  ;;  %v2274_v46 = vmul.f32 %v9797_v55, %v2220_v24  ;;  %3019 = vperm.xlu1 %8602, %v9823_v23   ;;  %3014 = vperm.xlu0 %8601, %v9826_v60   ;;  %v8605_v55 = vld [vmem:[%s11324_s3 + $0x18] sm:$0xff]   ;;  %v2718_v60 = vld [vmem:[#allocation2 + $0xd0] sm:$0xff] }
 0x266   : > { %v2719_v23 = vld [vmem:[#allocation2 + $0xd8] sm:$0xff]  ;;  %8556 = vmatpush3.bf16.msra.mxu1 %v8605_v55  ;;  %8039 = vmatpush3.bf16.msra.mxu0 %v8605_v55  ;;  %v3665_v55 = vld [vmem:[%s8881_s25 + $0xc6] sm:$0xff] }
 0x267   : > { %v2758_v25 = vadd.f32 %v2717_v26, %v2676_v15  ;;  %v2356_v4 = vadd.f32 %v2315_v63, %v2274_v46  ;;  %8555 = vmatprep.subr.bf16.mxu1 %v8775_v28  ;;  %8040 = vmatprep.subr.bf16.mxu0 %v8775_v28  ;;  %v3663_v15 = vld [vmem:[%s8881_s25 + $0xb6] sm:$0xff]  ;;  %v3662_v63 = vld [vmem:[%s8881_s25 + $0xae] sm:$0xff] }
 0x268   : > { %v2580_v7 = vpop.permute.xlu1 %2579  ;;  %v2575_v58 = vpop.permute.xlu0 %2574  ;;  %v3130_v46 = vld [vmem:[#allocation2 + $0xb8] sm:$0xff]  ;;  %v3129_v26 = vld [vmem:[#allocation2 + $0xb0] sm:$0xff] }
 0x269   : > { %2799 = vst.msk [vmem:[#allocation2 + $0xc8] sm:$0xff] %vm331_vm0, %v2758_v25  ;;  %2397 = vst.msk [vmem:[#allocation2 + $0x130] sm:$0xff] %vm331_vm0, %v2356_v4  ;;  %v2678_v8 = vmul.f32 %v9987_v38, %v2580_v7  ;;  %v2677_v49 = vmul.f32 %v9987_v38, %v2575_v58  ;;  %3029 = vperm.xlu1 %8602, %v9867_v22   ;;  %3024 = vperm.xlu0 %8601, %v9873_v34  }
 0x26a   : > { %8557 = vmatpush3.bf16.msra.mxu1 %v8606_v18  ;;  %8041 = vmatpush3.bf16.msra.mxu0 %v8606_v18  ;;  %v3531_v18 = vld [vmem:[#allocation2 + $0x48] sm:$0xff] }
 0x26b   : > { %v2760_v12 = vadd.f32 %v2719_v23, %v2678_v8  ;;  %v2759_v41 = vadd.f32 %v2718_v60, %v2677_v49  ;;  %8102 = vmatprep.subr.bf16.mxu1 %v8775_v28  ;;  %8070 = vmatprep.subr.bf16.mxu0 %v8775_v28  ;;  %v3529_v23 = vld [vmem:[#allocation2 + $0x38] sm:$0xff]  ;;  %v3131_v60 = vld [vmem:[#allocation2 + $0xc0] sm:$0xff] }
 0x26c   : > { %v2590_v1 = vpop.permute.xlu1 %2589  ;;  %v2585_v20 = vpop.permute.xlu0 %2584 }
 0x26d   : > { %2801 = vst.msk [vmem:[#allocation2 + $0xd8] sm:$0xff] %vm331_vm0, %v2760_v12  ;;  %2800 = vst.msk [vmem:[#allocation2 + $0xd0] sm:$0xff] %vm331_vm0, %v2759_v41  ;;  %v2680_v22 = vmul.f32 %v9987_v38, %v2590_v1  ;;  %v2679_v34 = vmul.f32 %v9987_v38, %v2585_v20  ;;  %3039 = vperm.xlu1 %8602, %v9883_v48   ;;  %3034 = vperm.xlu0 %8601, %v9889_v29   ;;  %v3664_v12 = vld [vmem:[%s8881_s25 + $0xbe] sm:$0xff] }
 0x26f   : > { %v2762_v6 = vadd.f32 %v2721_v31, %v2680_v22  ;;  %v2761_v33 = vadd.f32 %v2720_v10, %v2679_v34  ;;  %v3530_v31 = vld [vmem:[#allocation2 + $0x40] sm:$0xff]  ;;  %v3666_v10 = vld [vmem:[%s8881_s25 + $0xce] sm:$0xff] }
 0x270   : > { %v2945_v13 = vpop.permute.xlu1 %2944  ;;  %v2940_v53 = vpop.permute.xlu0 %2939 }
 0x271   : > { %2803 = vst.msk [vmem:[#allocation2 + $0xe8] sm:$0xff] %vm331_vm0, %v2762_v6  ;;  %2802 = vst.msk [vmem:[#allocation2 + $0xe0] sm:$0xff] %vm331_vm0, %v2761_v33  ;;  %v3083_v48 = vmul.f32 %v9746_v37, %v2945_v13  ;;  %v3082_v29 = vmul.f32 %v9746_v37, %v2940_v53  ;;  %3049 = vperm.xlu1 %8602, %v2853_v3   ;;  %3044 = vperm.xlu0 %8601, %v10015_v40   ;;  %v3667_v3 = vld [vmem:[%s8881_s25 + $0xd6] sm:$0xff] }
 0x273   : > { %v3165_v36 = vadd.f32 %v3124_v35, %v3083_v48  ;;  %v3164_v44 = vadd.f32 %v3123_v50, %v3082_v29  ;;  %v3533_v35 = vld [vmem:[#allocation2 + $0x58] sm:$0xff]  ;;  %v3532_v50 = vld [vmem:[#allocation2 + $0x50] sm:$0xff] }
 0x274   : > { %v2955_v45 = vpop.permute.xlu1 %2954  ;;  %v2950_v42 = vpop.permute.xlu0 %2949 }
 0x275   : > { %3206 = vst.msk [vmem:[#allocation2 + $0x88] sm:$0xff] %vm331_vm0, %v3165_v36  ;;  %3205 = vst.msk [vmem:[#allocation2 + $0x80] sm:$0xff] %vm331_vm0, %v3164_v44  ;;  %v3085_v21 = vmul.f32 %v9746_v37, %v2955_v45  ;;  %v3084_v5 = vmul.f32 %v9746_v37, %v2950_v42  ;;  %3404 = vperm.xlu1 %8602, %v3256_v19   ;;  %3399 = vperm.xlu0 %8601, %v3255_v32   ;;  %v3669_v19 = vld [vmem:[%s8881_s25 + $0xe6] sm:$0xff]  ;;  %v3668_v32 = vld [vmem:[%s8881_s25 + $0xde] sm:$0xff] }
 0x277   : > { %v3167_v0 = vadd.f32 %v3126_v30, %v3085_v21  ;;  %v3166_v16 = vadd.f32 %v3125_v2, %v3084_v5  ;;  %v3535_v30 = vld [vmem:[#allocation2 + $0x68] sm:$0xff]  ;;  %v3534_v2 = vld [vmem:[#allocation2 + $0x60] sm:$0xff] }
 0x278   : > { %v2965_v47 = vpop.permute.xlu1 %2964  ;;  %v2960_v43 = vpop.permute.xlu0 %2959 }
 0x279   : > { %3208 = vst.msk [vmem:[#allocation2 + $0x98] sm:$0xff] %vm331_vm0, %v3167_v0  ;;  %3207 = vst.msk [vmem:[#allocation2 + $0x90] sm:$0xff] %vm331_vm0, %v3166_v16  ;;  %v3087_v54 = vmul.f32 %v9746_v37, %v2965_v47  ;;  %v3086_v57 = vmul.f32 %v9746_v37, %v2960_v43  ;;  %3414 = vperm.xlu1 %8602, %v3258_v27   ;;  %3409 = vperm.xlu0 %8601, %v3257_v52   ;;  %v3261_v27 = vld [vmem:[%s8881_s25 + $0x11d] sm:$0xff]  ;;  %v3260_v52 = vld [vmem:[%s8881_s25 + $0x115] sm:$0xff] }
 0x27b   : > { %v3169_v39 = vadd.f32 %v3128_v61, %v3087_v54  ;;  %v3168_v14 = vadd.f32 %v3127_v62, %v3086_v57  ;;  %v3263_v61 = vld [vmem:[%s8881_s25 + $0x12d] sm:$0xff]  ;;  %v3537_v62 = vld [vmem:[#allocation2 + $0x78] sm:$0xff] }
 0x27c   : > { %v2975_v51 = vpop.permute.xlu1 %2974  ;;  %v2970_v9 = vpop.permute.xlu0 %2969 }
 0x27d   : > { %3210 = vst.msk [vmem:[#allocation2 + $0xa8] sm:$0xff] %vm331_vm0, %v3169_v39  ;;  %3209 = vst.msk [vmem:[#allocation2 + $0xa0] sm:$0xff] %vm331_vm0, %v3168_v14  ;;  %v3089_v11 = vmul.f32 %v9746_v37, %v2975_v51  ;;  %v3088_v24 = vmul.f32 %v9746_v37, %v2970_v9  ;;  %3769 = vperm.xlu1 %8602, %v3661_v59   ;;  %3419 = vperm.xlu0 %8601, %v3259_v17   ;;  %v10075_v59 = vld [vmem:[%s11322_s1 + $0x8] ss:$0 sm:$0xff]  ;;  %v3536_v17 = vld [vmem:[#allocation2 + $0x70] sm:$0xff] }
 0x27e   : > { %v3262_v39 = vld [vmem:[%s8881_s25 + $0x125] sm:$0xff] }
 0x27f   : > { %v3171_v25 = vadd.f32 %v3130_v46, %v3089_v11  ;;  %v3170_v4 = vadd.f32 %v3129_v26, %v3088_v24  ;;  %v3265_v46 = vld [vmem:[%s8881_s25 + $0x13d] sm:$0xff] }
 0x280   : > { %v3310_v7 = vpop.permute.xlu1 %3309  ;;  %v2980_v58 = vpop.permute.xlu0 %2979  ;;  %v3940_v26 = vld [vmem:[#allocation2 + $0x18] sm:$0xff] }
 0x281   : > { %3212 = vst.msk [vmem:[#allocation2 + $0xb8] sm:$0xff] %vm331_vm0, %v3171_v25  ;;  %3211 = vst.msk [vmem:[#allocation2 + $0xb0] sm:$0xff] %vm331_vm0, %v3170_v4  ;;  %v3488_v8 = vmul.f32 %v9938_v56, %v3310_v7  ;;  %v3090_v49 = vmul.f32 %v9746_v37, %v2980_v58  ;;  %3779 = vperm.xlu1 %8602, %v3663_v15   ;;  %3774 = vperm.xlu0 %8601, %v3662_v63   ;;  %v3939_v63 = vld [vmem:[#allocation2 + $0x10] sm:$0xff] }
 0x282   : > { %v3264_v25 = vld [vmem:[%s8881_s25 + $0x135] sm:$0xff] }
 0x283   : > { %v3570_v41 = vadd.f32 %v3529_v23, %v3488_v8  ;;  %v3172_v1 = vadd.f32 %v3131_v60, %v3090_v49  ;;  %v3267_v23 = vld [vmem:[%s8881_s25 + $0x14d] sm:$0xff] }
 0x284   : > { %v3320_v20 = vpop.permute.xlu1 %3319  ;;  %v3315_v22 = vpop.permute.xlu0 %3314  ;;  %v3942_v60 = vld [vmem:[#allocation2 + $0x28] sm:$0xff] }
 0x285   : > { %3611 = vst.msk [vmem:[#allocation2 + $0x38] sm:$0xff] %vm331_vm0, %v3570_v41  ;;  %3213 = vst.msk [vmem:[#allocation2 + $0xc0] sm:$0xff] %vm331_vm0, %v3172_v1  ;;  %v3490_v34 = vmul.f32 %v9938_v56, %v3320_v20  ;;  %v3489_v37 = vmul.f32 %v9938_v56, %v3315_v22  ;;  %3789 = vperm.xlu1 %8602, %v3665_v55   ;;  %3784 = vperm.xlu0 %8601, %v3664_v12   ;;  %v3941_v12 = vld [vmem:[#allocation2 + $0x20] sm:$0xff] }
 0x286   : > { %v3266_v41 = vld [vmem:[%s8881_s25 + $0x145] sm:$0xff] }
 0x287   : > { %v3572_v6 = vadd.f32 %v3531_v18, %v3490_v34  ;;  %v3571_v33 = vadd.f32 %v3530_v31, %v3489_v37  ;;  %v3670_v18 = vld [vmem:[%s8881_s25 + $0xee] sm:$0xff] }
 0x288   : > { %v3330_v13 = vpop.permute.xlu1 %3329  ;;  %v3325_v53 = vpop.permute.xlu0 %3324  ;;  %v2722_v31 = vld [vmem:[#allocation2 + $0xf0] sm:$0xff] }
 0x289   : > { %3613 = vst.msk [vmem:[#allocation2 + $0x48] sm:$0xff] %vm331_vm0, %v3572_v6  ;;  %3612 = vst.msk [vmem:[#allocation2 + $0x40] sm:$0xff] %vm331_vm0, %v3571_v33  ;;  %v3492_v48 = vmul.f32 %v9938_v56, %v3330_v13  ;;  %v3491_v29 = vmul.f32 %v9938_v56, %v3325_v53  ;;  %3799 = vperm.xlu1 %8602, %v3667_v3   ;;  %3794 = vperm.xlu0 %8601, %v3666_v10   ;;  %v3943_v10 = vld [vmem:[#allocation2 + $0x30] sm:$0xff] }
 0x28a   : > { %v3268_v6 = vld [vmem:[%s8881_s25 + $0x155] sm:$0xff] }
 0x28b   : > { %v3574_v36 = vadd.f32 %v3533_v35, %v3492_v48  ;;  %v3573_v44 = vadd.f32 %v3532_v50, %v3491_v29  ;;  %v3672_v35 = vld [vmem:[%s8881_s25 + $0xfe] sm:$0xff] }
 0x28c   : > { %v3340_v45 = vpop.permute.xlu1 %3339  ;;  %v3335_v42 = vpop.permute.xlu0 %3334  ;;  %v2724_v50 = vld [vmem:[#allocation2 + $0x100] sm:$0xff] }
 0x28d   : > { %3615 = vst.msk [vmem:[#allocation2 + $0x58] sm:$0xff] %vm331_vm0, %v3574_v36  ;;  %3614 = vst.msk [vmem:[#allocation2 + $0x50] sm:$0xff] %vm331_vm0, %v3573_v44  ;;  %v3494_v21 = vmul.f32 %v9938_v56, %v3340_v45  ;;  %v3493_v5 = vmul.f32 %v9938_v56, %v3335_v42  ;;  %3809 = vperm.xlu1 %8602, %v3669_v19   ;;  %3804 = vperm.xlu0 %8601, %v3668_v32   ;;  %v2723_v32 = vld [vmem:[#allocation2 + $0xf8] sm:$0xff] }
 0x28e   : > { %v3671_v36 = vld [vmem:[%s8881_s25 + $0xf6] sm:$0xff] }
 0x28f   : > { %v3576_v0 = vadd.f32 %v3535_v30, %v3494_v21  ;;  %v3575_v16 = vadd.f32 %v3534_v2, %v3493_v5 }
 0x290   : > { %v3350_v47 = vpop.permute.xlu1 %3349  ;;  %v3345_v43 = vpop.permute.xlu0 %3344 }
 0x291   : > { %3617 = vst.msk [vmem:[#allocation2 + $0x68] sm:$0xff] %vm331_vm0, %v3576_v0  ;;  %3616 = vst.msk [vmem:[#allocation2 + $0x60] sm:$0xff] %vm331_vm0, %v3575_v16  ;;  %v3496_v54 = vmul.f32 %v9938_v56, %v3350_v47  ;;  %v3495_v57 = vmul.f32 %v9938_v56, %v3345_v43  ;;  %3429 = vperm.xlu1 %8602, %v3261_v27   ;;  %3424 = vperm.xlu0 %8601, %v3260_v52   ;;  %v3674_v52 = vld [vmem:[%s8881_s25 + $0x10e] sm:$0xff]  ;;  %v3673_v47 = vld [vmem:[%s8881_s25 + $0x106] sm:$0xff] }
 0x292   : > { %v2726_v0 = vld [vmem:[#allocation2 + $0x110] sm:$0xff]  ;;  %v2725_v16 = vld [vmem:[#allocation2 + $0x108] sm:$0xff] }
 0x293   : > { %v3578_v14 = vadd.f32 %v3537_v62, %v3496_v54  ;;  %v3577_v51 = vadd.f32 %v3536_v17, %v3495_v57 }
 0x294   : > { %v3705_v9 = vpop.permute.xlu1 %3704  ;;  %v3700_v11 = vpop.permute.xlu0 %3699 }
 0x295   : > { %3619 = vst.msk [vmem:[#allocation2 + $0x78] sm:$0xff] %vm331_vm0, %v3578_v14  ;;  %3618 = vst.msk [vmem:[#allocation2 + $0x70] sm:$0xff] %vm331_vm0, %v3577_v51  ;;  %v3899_v24 = vmul.f32 %v10075_v59, %v3705_v9  ;;  %v3898_v15 = vmul.f32 %v10075_v59, %v3700_v11  ;;  %3439 = vperm.xlu1 %8602, %v3263_v61   ;;  %3434 = vperm.xlu0 %8601, %v3262_v39   ;;  %v3676_v11 = vld [vmem:[%s8881_s25 + $0x11e] sm:$0xff] }
 0x297   : > { %v3981_v4 = vadd.f32 %v3940_v26, %v3899_v24  ;;  %v3980_v7 = vadd.f32 %v3939_v63, %v3898_v15  ;;  %v2728_v24 = vld [vmem:[#allocation2 + $0x120] sm:$0xff]  ;;  %v2727_v15 = vld [vmem:[#allocation2 + $0x118] sm:$0xff] }
 0x298   : > { %v3715_v58 = vpop.permute.xlu1 %3714  ;;  %v3710_v8 = vpop.permute.xlu0 %3709 }
 0x299   : > { %4022 = vst.msk [vmem:[#allocation2 + $0x18] sm:$0xff] %vm331_vm0, %v3981_v4  ;;  %4021 = vst.msk [vmem:[#allocation2 + $0x10] sm:$0xff] %vm331_vm0, %v3980_v7  ;;  %v3901_v49 = vmul.f32 %v10075_v59, %v3715_v58  ;;  %v3900_v55 = vmul.f32 %v10075_v59, %v3710_v8  ;;  %3449 = vperm.xlu1 %8602, %v3265_v46   ;;  %3444 = vperm.xlu0 %8601, %v3264_v25   ;;  %v3675_v46 = vld [vmem:[%s8881_s25 + $0x116] sm:$0xff] }
 0x29b   : > { %v3983_v1 = vadd.f32 %v3942_v60, %v3901_v49  ;;  %v3982_v20 = vadd.f32 %v3941_v12, %v3900_v55  ;;  %v3678_v55 = vld [vmem:[%s8881_s25 + $0x12e] sm:$0xff]  ;;  %v3677_v12 = vld [vmem:[%s8881_s25 + $0x126] sm:$0xff] }
 0x29c   : > { %v2595_v22 = vpop.permute.xlu1 %2594  ;;  %v3720_v34 = vpop.permute.xlu0 %3719  ;;  %v2729_v60 = vld [vmem:[#allocation2 + $0x128] sm:$0xff] }
 0x29d   : > { %4024 = vst.msk [vmem:[#allocation2 + $0x28] sm:$0xff] %vm331_vm0, %v3983_v1  ;;  %4023 = vst.msk [vmem:[#allocation2 + $0x20] sm:$0xff] %vm331_vm0, %v3982_v20  ;;  %v2681_v37 = vmul.f32 %v9987_v38, %v2595_v22  ;;  %v3902_v3 = vmul.f32 %v10075_v59, %v3720_v34  ;;  %3459 = vperm.xlu1 %8602, %v3267_v23   ;;  %3454 = vperm.xlu0 %8601, %v3266_v41   ;;  %v2730_v23 = vld [vmem:[#allocation2 + $0x130] sm:$0xff] }
 0x29f   : > { %v2763_v33 = vadd.f32 %v2722_v31, %v2681_v37  ;;  %v3984_v13 = vadd.f32 %v3943_v10, %v3902_v3  ;;  %v3680_v3 = vld [vmem:[%s8881_s25 + $0x13e] sm:$0xff]  ;;  %v3132_v31 = vld [vmem:[#allocation2 + $0xc8] sm:$0xff]  ;;  %v3679_v10 = vld [vmem:[%s8881_s25 + $0x136] sm:$0xff] }
 0x2a0   : > { %v2605_v53 = vpop.permute.xlu1 %2604  ;;  %v2600_v48 = vpop.permute.xlu0 %2599 }
 0x2a1   : > { %2804 = vst.msk [vmem:[#allocation2 + $0xf0] sm:$0xff] %vm331_vm0, %v2763_v33  ;;  %4025 = vst.msk [vmem:[#allocation2 + $0x30] sm:$0xff] %vm331_vm0, %v3984_v13  ;;  %v2683_v29 = vmul.f32 %v9987_v38, %v2605_v53  ;;  %v2682_v19 = vmul.f32 %v9987_v38, %v2600_v48  ;;  %3814 = vperm.xlu1 %8602, %v3670_v18   ;;  %3464 = vperm.xlu0 %8601, %v3268_v6   ;;  %v3133_v18 = vld [vmem:[#allocation2 + $0xd0] sm:$0xff] }
 0x2a3   : > { %v2765_v44 = vadd.f32 %v2724_v50, %v2683_v29  ;;  %v2764_v45 = vadd.f32 %v2723_v32, %v2682_v19  ;;  %v3134_v29 = vld [vmem:[#allocation2 + $0xd8] sm:$0xff]  ;;  %v3681_v50 = vld [vmem:[%s8881_s25 + $0x146] sm:$0xff] }
 0x2a4   : > { %v2615_v42 = vpop.permute.xlu1 %2614  ;;  %v2610_v21 = vpop.permute.xlu0 %2609  ;;  %v4061_v5 = vld [vmem:[#allocation2 + $0x13] ss:$2 sm:$0xff]  ;;  %v4063_v27 = vld [vmem:[#allocation2 + $0x14] ss:$2 sm:$0xff] }
 0x2a5   : > { %2806 = vst.msk [vmem:[#allocation2 + $0x100] sm:$0xff] %vm331_vm0, %v2765_v44  ;;  %2805 = vst.msk [vmem:[#allocation2 + $0xf8] sm:$0xff] %vm331_vm0, %v2764_v45  ;;  %v2685_v30 = vmul.f32 %v9987_v38, %v2615_v42  ;;  %v2684_v2 = vmul.f32 %v9987_v38, %v2610_v21  ;;  %3824 = vperm.xlu1 %8602, %v3672_v35   ;;  %3819 = vperm.xlu0 %8601, %v3671_v36   ;;  %v3682_v35 = vld [vmem:[%s8881_s25 + $0x14e] sm:$0xff]  ;;  %v3135_v32 = vld [vmem:[#allocation2 + $0xe0] sm:$0xff] }
 0x2a6   : > { %v4068_v57 = vmax.f32 %v4061_v5, %v4063_v27 }
 0x2a7   : > { %v2767_v43 = vadd.f32 %v2726_v0, %v2685_v30  ;;  %v2766_v54 = vadd.f32 %v2725_v16, %v2684_v2  ;;  %v3538_v0 = vld [vmem:[#allocation2 + $0x80] sm:$0xff]  ;;  %v3136_v16 = vld [vmem:[#allocation2 + $0xe8] sm:$0xff] }
 0x2a8   : > { %v4065_v61 = vld [vmem:[#allocation2 + $0x25] ss:$2 sm:$0xff]  ;;  %v4067_v62 = vld [vmem:[#allocation2 + $0x26] ss:$2 sm:$0xff]  ;;  %v2625_v17 = vpop.permute.xlu1 %2624  ;;  %v2620_v39 = vpop.permute.xlu0 %2619 }
 0x2a9   : > { %v4069_v14 = vmax.f32 %v4065_v61, %v4067_v62  ;;  %2808 = vst.msk [vmem:[#allocation2 + $0x110] sm:$0xff] %vm331_vm0, %v2767_v43  ;;  %2807 = vst.msk [vmem:[#allocation2 + $0x108] sm:$0xff] %vm331_vm0, %v2766_v54  ;;  %v2687_v51 = vmul.f32 %v9987_v38, %v2625_v17  ;;  %v2686_v9 = vmul.f32 %v9987_v38, %v2620_v39  ;;  %3834 = vperm.xlu1 %8602, %v3674_v52   ;;  %v779_v52 = vld [vmem:[%s8881_s25 + $0x139] sm:$0xff]  ;;  %v1155_v39 = vld [vmem:[%s8881_s25 + $0x2] sm:$0xff] }
 0x2aa   : > { %3829 = vperm.xlu0 %8601, %v3673_v47   ;;  %v3683_v47 = vld [vmem:[%s8881_s25 + $0x156] sm:$0xff] }
 0x2ab   : > { %v4070_v26 = vmax.f32 %v4068_v57, %v4069_v14  ;;  %v2769_v63 = vadd.f32 %v2728_v24, %v2687_v51  ;;  %v2768_v25 = vadd.f32 %v2727_v15, %v2686_v9  ;;  %v3540_v14 = vld [vmem:[#allocation2 + $0x90] sm:$0xff]  ;;  %v3539_v51 = vld [vmem:[#allocation2 + $0x88] sm:$0xff]  ;;  %v780_v9 = vld [vmem:[%s8881_s25 + $0x141] sm:$0xf] }
 0x2ac   : > { %v2635_v4 = vpop.permute.xlu1 %2634  ;;  %v2630_v7 = vpop.permute.xlu0 %2629 }
 0x2ad   : > { %v4071_v58 = vmax.f32 %v4070_v26, 0.0  ;;  %2810 = vst.msk [vmem:[#allocation2 + $0x120] sm:$0xff] %vm331_vm0, %v2769_v63  ;;  %2809 = vst.msk [vmem:[#allocation2 + $0x118] sm:$0xff] %vm331_vm0, %v2768_v25  ;;  %v2689_v8 = vmul.f32 %v9987_v38, %v2635_v4  ;;  %v2688_v49 = vmul.f32 %v9987_v38, %v2630_v7  ;;  %3844 = vperm.xlu1 %8602, %v3676_v11   ;;  %v10127_v38 = vld [vmem:[%s11322_s1 + $0x6] ss:$0 sm:$0xff]  ;;  %v1194_v25 = vld [vmem:[%s8881_s25 + $0x13a] sm:$0xff] }
 0x2ae   : > { %3839 = vperm.xlu0 %8601, %v3675_v46   ;;  %v3542_v4 = vld [vmem:[#allocation2 + $0xa0] sm:$0xff]  ;;  %v3541_v7 = vld [vmem:[#allocation2 + $0x98] sm:$0xff] }
 0x2af   : > { %4072 = vst.msk [vmem:[#allocation5 + $0x16] sm:$0xff] %vm331_vm0, %v4071_v58  ;;  %v2771_v41 = vadd.f32 %v2730_v23, %v2689_v8  ;;  %v2770_v1 = vadd.f32 %v2729_v60, %v2688_v49  ;;  %v1156_v58 = vld [vmem:[%s8881_s25 + $0xa] sm:$0xff] }
 0x2b0   : > { %v2990_v20 = vpop.permute.xlu1 %2989  ;;  %v2985_v22 = vpop.permute.xlu0 %2984 }
 0x2b1   : > { %2812 = vst.msk [vmem:[#allocation2 + $0x130] sm:$0xff] %vm331_vm0, %v2771_v41  ;;  %2811 = vst.msk [vmem:[#allocation2 + $0x128] sm:$0xff] %vm331_vm0, %v2770_v1  ;;  %v3092_v34 = vmul.f32 %v10127_v38, %v2990_v20  ;;  %v3091_v37 = vmul.f32 %v10127_v38, %v2985_v22  ;;  %3854 = vperm.xlu1 %8602, %v3678_v55   ;;  %v1570_v41 = vld [vmem:[%s8881_s25 + $0x12] sm:$0xff]  ;;  %v3543_v20 = vld [vmem:[#allocation2 + $0xa8] sm:$0xff] }
 0x2b2   : > { %3849 = vperm.xlu0 %8601, %v3677_v12   ;;  %v3544_v1 = vld [vmem:[#allocation2 + $0xb0] sm:$0xff]  ;;  %v1195_v22 = vld [vmem:[%s8881_s25 + $0x142] sm:$0xf] }
 0x2b3   : > { %v3174_v6 = vadd.f32 %v3133_v18, %v3092_v34  ;;  %v3173_v33 = vadd.f32 %v3132_v31, %v3091_v37 }
 0x2b4   : > { %v3000_v13 = vpop.permute.xlu1 %2999  ;;  %v2995_v53 = vpop.permute.xlu0 %2994 }
 0x2b5   : > { %3215 = vst.msk [vmem:[#allocation2 + $0xd0] sm:$0xff] %vm331_vm0, %v3174_v6  ;;  %3214 = vst.msk [vmem:[#allocation2 + $0xc8] sm:$0xff] %vm331_vm0, %v3173_v33  ;;  %v3094_v48 = vmul.f32 %v10127_v38, %v3000_v13  ;;  %v3093_v19 = vmul.f32 %v10127_v38, %v2995_v53  ;;  %3864 = vperm.xlu1 %8602, %v3680_v3   ;;  %v1609_v6 = vld [vmem:[%s8881_s25 + $0x14a] sm:$0xff]  ;;  %v3546_v33 = vld [vmem:[#allocation2 + $0xc0] sm:$0xff] }
 0x2b6   : > { %3859 = vperm.xlu0 %8601, %v3679_v10   ;;  %v4166_v36 = vld [vmem:[#allocation5 + $0x10] sm:$0xff]  ;;  %v4167_v44 = vld [vmem:[#allocation5 + $0x18] sm:$0xff]  ;;  %v3545_v13 = vld [vmem:[#allocation2 + $0xb8] sm:$0xff] }
 0x2b7   : > { %v3176_v45 = vadd.f32 %v3135_v32, %v3094_v48  ;;  %v3175_v42 = vadd.f32 %v3134_v29, %v3093_v19  ;;  %v4178_v21 = vpack.c.bf16 %v4167_v44, %v4166_v36  ;;  %v1571_v53 = vld [vmem:[%s8881_s25 + $0x1a] sm:$0xff] }
 0x2b8   : > { %v3355_v5 = vpop.permute.xlu1 %3354  ;;  %v3005_v27 = vpop.permute.xlu0 %3004  ;;  %v1985_v32 = vld [vmem:[%s8881_s25 + $0x13] sm:$0xff]  ;;  %v3945_v36 = vld [vmem:[#allocation2 + $0x40] sm:$0xff] }
 0x2b9   : > { %3217 = vst.msk [vmem:[#allocation2 + $0xe0] sm:$0xff] %vm331_vm0, %v3176_v45  ;;  %3216 = vst.msk [vmem:[#allocation2 + $0xd8] sm:$0xff] %vm331_vm0, %v3175_v42  ;;  %v3497_v30 = vmul.f32 %v9938_v56, %v3355_v5  ;;  %v3095_v2 = vmul.f32 %v10127_v38, %v3005_v27  ;;  %3874 = vperm.xlu1 %8602, %v3682_v35   ;;  %8015 = vmatmul.mubr.msk.bf16.gmra.mxu0 %vm331_vm0, %v4178_v21  ;;  %v3944_v44 = vld [vmem:[#allocation2 + $0x38] sm:$0xff]  ;;  %v1610_v45 = vld [vmem:[%s8881_s25 + $0x152] sm:$0xf] }
 0x2ba   : > { %3869 = vperm.xlu0 %8601, %v3681_v50   ;;  %8018 = vmatprep.mubr.msk.bf16.mxu0 %vm8776_vm2, %v8775_v28 }
 0x2bb   : > { %v3579_v43 = vadd.f32 %v3538_v0, %v3497_v30  ;;  %v3177_v54 = vadd.f32 %v3136_v16, %v3095_v2  ;;  %v3947_v0 = vld [vmem:[#allocation2 + $0x50] sm:$0xff]  ;;  %v3946_v16 = vld [vmem:[#allocation2 + $0x48] sm:$0xff] }
 0x2bc   : > { %v3365_v57 = vpop.permute.xlu1 %3364  ;;  %v3360_v61 = vpop.permute.xlu0 %3359 }
 0x2bd   : > { %3620 = vst.msk [vmem:[#allocation2 + $0x80] sm:$0xff] %vm331_vm0, %v3579_v43  ;;  %3218 = vst.msk [vmem:[#allocation2 + $0xe8] sm:$0xff] %vm331_vm0, %v3177_v54  ;;  %v3499_v62 = vmul.f32 %v9938_v56, %v3365_v57  ;;  %v3498_v17 = vmul.f32 %v9938_v56, %v3360_v61  ;;  %979 = vperm.xlu1 %8602, %v779_v52   ;;  %v2024_v52 = vld [vmem:[%s8881_s25 + $0x14b] sm:$0xff] }
 0x2be   : > { %3879 = vperm.xlu0 %8601, %v3683_v47   ;;  %v1986_v47 = vld [vmem:[%s8881_s25 + $0x1b] sm:$0xff] }
 0x2bf   : > { %v3581_v11 = vadd.f32 %v3540_v14, %v3499_v62  ;;  %v3580_v24 = vadd.f32 %v3539_v51, %v3498_v17  ;;  %v3949_v14 = vld [vmem:[#allocation2 + $0x60] sm:$0xff]  ;;  %v3948_v51 = vld [vmem:[#allocation2 + $0x58] sm:$0xff] }
 0x2c0   : > { %v3375_v15 = vpop.permute.xlu1 %3374  ;;  %v3370_v46 = vpop.permute.xlu0 %3369 }
 0x2c1   : > { %3622 = vst.msk [vmem:[#allocation2 + $0x90] sm:$0xff] %vm331_vm0, %v3581_v11  ;;  %3621 = vst.msk [vmem:[#allocation2 + $0x88] sm:$0xff] %vm331_vm0, %v3580_v24  ;;  %v3501_v26 = vmul.f32 %v9938_v56, %v3375_v15  ;;  %v3500_v63 = vmul.f32 %v9938_v56, %v3370_v46  ;;  %1199 = vperm.xlu1 %8602, %v1155_v39   ;;  %v2400_v39 = vld [vmem:[%s8881_s25 + $0x14] sm:$0xff] }
 0x2c2   : > { %984 = vperm.xlu0 %8601, %v780_v9   ;;  %v2025_v9 = vld [vmem:[%s8881_s25 + $0x153] sm:$0xf] }
 0x2c3   : > { %v3583_v8 = vadd.f32 %v3542_v4, %v3501_v26  ;;  %v3582_v49 = vadd.f32 %v3541_v7, %v3500_v63  ;;  %v3950_v4 = vld [vmem:[#allocation2 + $0x68] sm:$0xff]  ;;  %v2401_v7 = vld [vmem:[%s8881_s25 + $0x1c] sm:$0xff] }
 0x2c4   : > { %v3385_v55 = vpop.permute.xlu1 %3384  ;;  %v3380_v23 = vpop.permute.xlu0 %3379 }
 0x2c5   : > { %3624 = vst.msk [vmem:[#allocation2 + $0xa0] sm:$0xff] %vm331_vm0, %v3583_v8  ;;  %3623 = vst.msk [vmem:[#allocation2 + $0x98] sm:$0xff] %vm331_vm0, %v3582_v49  ;;  %v3503_v60 = vmul.f32 %v9938_v56, %v3385_v55  ;;  %v3502_v12 = vmul.f32 %v9938_v56, %v3380_v23  ;;  %1394 = vperm.xlu1 %8602, %v1194_v25   ;;  %v3951_v25 = vld [vmem:[#allocation2 + $0x70] sm:$0xff] }
 0x2c6   : > { %1204 = vperm.xlu0 %8601, %v1156_v58  }
 0x2c7   : > { %v3585_v34 = vadd.f32 %v3544_v1, %v3503_v60  ;;  %v3584_v37 = vadd.f32 %v3543_v20, %v3502_v12  ;;  %v2815_v1 = vld [vmem:[%s8881_s25 + $0x24] sm:$0xff]  ;;  %v3137_v20 = vld [vmem:[#allocation2 + $0xf0] sm:$0xff] }
 0x2c8   : > { %v3395_v3 = vpop.permute.xlu1 %3394  ;;  %v3390_v18 = vpop.permute.xlu0 %3389 }
 0x2c9   : > { %3626 = vst.msk [vmem:[#allocation2 + $0xb0] sm:$0xff] %vm331_vm0, %v3585_v34  ;;  %3625 = vst.msk [vmem:[#allocation2 + $0xa8] sm:$0xff] %vm331_vm0, %v3584_v37  ;;  %v3505_v31 = vmul.f32 %v9938_v56, %v3395_v3  ;;  %v3504_v10 = vmul.f32 %v9938_v56, %v3390_v18  ;;  %1614 = vperm.xlu1 %8602, %v1570_v41   ;;  %v2440_v34 = vld [vmem:[%s8881_s25 + $0x154] sm:$0xf] }
 0x2ca   : > { %1399 = vperm.xlu0 %8601, %v1195_v22   ;;  %v3952_v22 = vld [vmem:[#allocation2 + $0x78] sm:$0xff] }
 0x2cb   : > { %v3587_v48 = vadd.f32 %v3546_v33, %v3505_v31  ;;  %v3586_v29 = vadd.f32 %v3545_v13, %v3504_v10 }
 0x2cc   : > { %v3730_v19 = vpop.permute.xlu1 %3729  ;;  %v3725_v35 = vpop.permute.xlu0 %3724 }
 0x2cd   : > { %3628 = vst.msk [vmem:[#allocation2 + $0xc0] sm:$0xff] %vm331_vm0, %v3587_v48  ;;  %3627 = vst.msk [vmem:[#allocation2 + $0xb8] sm:$0xff] %vm331_vm0, %v3586_v29  ;;  %v3904_v50 = vmul.f32 %v10075_v59, %v3730_v19  ;;  %v3903_v56 = vmul.f32 %v10075_v59, %v3725_v35  ;;  %1809 = vperm.xlu1 %8602, %v1609_v6   ;;  %v2854_v48 = vld [vmem:[%s8881_s25 + $0x15c] sm:$0xff]  ;;  %v2816_v35 = vld [vmem:[%s8881_s25 + $0x2c] sm:$0xff] }
 0x2ce   : > { %1619 = vperm.xlu0 %8601, %v1571_v53   ;;  %v3139_v29 = vld [vmem:[#allocation2 + $0x100] sm:$0xff]  ;;  %v3138_v19 = vld [vmem:[#allocation2 + $0xf8] sm:$0xff] }
 0x2cf   : > { %v3986_v42 = vadd.f32 %v3945_v36, %v3904_v50  ;;  %v3985_v21 = vadd.f32 %v3944_v44, %v3903_v56 }
 0x2d0   : > { %v3740_v5 = vpop.permute.xlu1 %3739  ;;  %v3735_v27 = vpop.permute.xlu0 %3734 }
 0x2d1   : > { %4027 = vst.msk [vmem:[#allocation2 + $0x40] sm:$0xff] %vm331_vm0, %v3986_v42  ;;  %4026 = vst.msk [vmem:[#allocation2 + $0x38] sm:$0xff] %vm331_vm0, %v3985_v21  ;;  %v3906_v30 = vmul.f32 %v10075_v59, %v3740_v5  ;;  %v3905_v2 = vmul.f32 %v10075_v59, %v3735_v27  ;;  %2029 = vperm.xlu1 %8602, %v1985_v32  }
 0x2d2   : > { %1814 = vperm.xlu0 %8601, %v1610_v45  }
 0x2d3   : > { %v3988_v43 = vadd.f32 %v3947_v0, %v3906_v30  ;;  %v3987_v54 = vadd.f32 %v3946_v16, %v3905_v2  ;;  %v3230_v30 = vld [vmem:[%s8881_s25 + $0x25] sm:$0xff]  ;;  %v3141_v2 = vld [vmem:[#allocation2 + $0x110] sm:$0xff] }
 0x2d4   : > { %v3750_v57 = vpop.permute.xlu1 %3749  ;;  %v3745_v61 = vpop.permute.xlu0 %3744  ;;  %v2855_v0 = vld [vmem:[%s8881_s25 + $0x164] sm:$0xf] }
 0x2d5   : > { %4029 = vst.msk [vmem:[#allocation2 + $0x50] sm:$0xff] %vm331_vm0, %v3988_v43  ;;  %4028 = vst.msk [vmem:[#allocation2 + $0x48] sm:$0xff] %vm331_vm0, %v3987_v54  ;;  %v3908_v62 = vmul.f32 %v10075_v59, %v3750_v57  ;;  %v3907_v17 = vmul.f32 %v10075_v59, %v3745_v61  ;;  %2224 = vperm.xlu1 %8602, %v2024_v52   ;;  %v3140_v52 = vld [vmem:[#allocation2 + $0x108] sm:$0xff] }
 0x2d6   : > { %2034 = vperm.xlu0 %8601, %v1986_v47  }
 0x2d7   : > { %v3990_v11 = vadd.f32 %v3949_v14, %v3908_v62  ;;  %v3989_v24 = vadd.f32 %v3948_v51, %v3907_v17  ;;  %v3269_v51 = vld [vmem:[%s8881_s25 + $0x15d] sm:$0xff] }
 0x2d8   : > { %v3760_v15 = vpop.permute.xlu1 %3759  ;;  %v3755_v46 = vpop.permute.xlu0 %3754  ;;  %v4074_v23 = vld [vmem:[#allocation2 + $0x37] ss:$2 sm:$0xff]  ;;  %v4076_v60 = vld [vmem:[#allocation2 + $0x38] ss:$2 sm:$0xff] }
 0x2d9   : > { %4031 = vst.msk [vmem:[#allocation2 + $0x60] sm:$0xff] %vm331_vm0, %v3990_v11  ;;  %4030 = vst.msk [vmem:[#allocation2 + $0x58] sm:$0xff] %vm331_vm0, %v3989_v24  ;;  %v3910_v26 = vmul.f32 %v10075_v59, %v3760_v15  ;;  %v3909_v63 = vmul.f32 %v10075_v59, %v3755_v46  ;;  %2444 = vperm.xlu1 %8602, %v2400_v39   ;;  %v4081_v18 = vmax.f32 %v4074_v23, %v4076_v60  ;;  %v3142_v11 = vld [vmem:[#allocation2 + $0x118] sm:$0xff]  ;;  %v3231_v24 = vld [vmem:[%s8881_s25 + $0x2d] sm:$0xff] }
 0x2da   : > { %2229 = vperm.xlu0 %8601, %v2025_v9   ;;  %v3143_v9 = vld [vmem:[#allocation2 + $0x120] sm:$0xff]  ;;  %v3145_v23 = vld [vmem:[#allocation2 + $0x130] sm:$0xff]  ;;  %v3144_v60 = vld [vmem:[#allocation2 + $0x128] sm:$0xff] }
 0x2db   : > { %v3992_v58 = vadd.f32 %v3951_v25, %v3910_v26  ;;  %v3991_v8 = vadd.f32 %v3950_v4, %v3909_v63 }
 0x2dc   : > { %v3010_v49 = vpop.permute.xlu1 %3009  ;;  %v3765_v55 = vpop.permute.xlu0 %3764  ;;  %v4078_v31 = vld [vmem:[#allocation2 + $0x49] ss:$2 sm:$0xff] }
 0x2dd   : > { %4033 = vst.msk [vmem:[#allocation2 + $0x70] sm:$0xff] %vm331_vm0, %v3992_v58  ;;  %4032 = vst.msk [vmem:[#allocation2 + $0x68] sm:$0xff] %vm331_vm0, %v3991_v8  ;;  %v3096_v12 = vmul.f32 %v10127_v38, %v3010_v49  ;;  %v3911_v41 = vmul.f32 %v10075_v59, %v3765_v55  ;;  %2639 = vperm.xlu1 %8602, %v10015_v40   ;;  %v3645_v8 = vld [vmem:[%s8881_s25 + $0x26] sm:$0xff] }
 0x2de   : > { %2449 = vperm.xlu0 %8601, %v2401_v7   ;;  %v3270_v49 = vld [vmem:[%s8881_s25 + $0x165] sm:$0xf]  ;;  %v4332_v55 = vld [vmem:[#allocation5 + $0x11] sm:$0xff] }
 0x2df   : > { %v3178_v37 = vadd.f32 %v3137_v20, %v3096_v12  ;;  %v3993_v3 = vadd.f32 %v3952_v22, %v3911_v41  ;;  %v8607_v22 = vld [vmem:[%s11324_s3 + $0x38] sm:$0xff]  }
 0x2e0   : > { %v4080_v10 = vld [vmem:[#allocation2 + $0x4a] ss:$2 sm:$0xff]  ;;  %v3020_v6 = vpop.permute.xlu1 %3019  ;;  %v3015_v33 = vpop.permute.xlu0 %3014 }
 0x2e1   : > { %v4082_v13 = vmax.f32 %v4078_v31, %v4080_v10  ;;  %3219 = vst.msk [vmem:[#allocation2 + $0xf0] sm:$0xff] %vm331_vm0, %v3178_v37  ;;  %4034 = vst.msk [vmem:[#allocation2 + $0x78] sm:$0xff] %vm331_vm0, %v3993_v3  ;;  %v3098_v40 = vmul.f32 %v10127_v38, %v3020_v6  ;;  %v3097_v53 = vmul.f32 %v10127_v38, %v3015_v33  ;;  %2859 = vperm.xlu1 %8602, %v2815_v1   ;;  %v10236_v37 = vld [vmem:[%s11322_s1 + $0x7] ss:$0 sm:$0xff]  ;;  %v3684_v31 = vld [vmem:[%s8881_s25 + $0x15e] sm:$0xff] }
 0x2e2   : > { %2644 = vperm.xlu0 %8601, %v2440_v34   ;;  %v3548_v10 = vld [vmem:[#allocation2 + $0xd0] sm:$0xff]  ;;  %v3547_v6 = vld [vmem:[#allocation2 + $0xc8] sm:$0xff] }
 0x2e3   : > { %v4083_v50 = vmax.f32 %v4081_v18, %v4082_v13  ;;  %v3180_v56 = vadd.f32 %v3139_v29, %v3098_v40  ;;  %v3179_v32 = vadd.f32 %v3138_v19, %v3097_v53  ;;  %v3646_v33 = vld [vmem:[%s8881_s25 + $0x2e] sm:$0xff] }
 0x2e4   : > { %v3030_v36 = vpop.permute.xlu1 %3029  ;;  %v3025_v44 = vpop.permute.xlu0 %3024  ;;  %v4087_v42 = vld [vmem:[#allocation2 + $0x5b] ss:$2 sm:$0xff]  ;;  %v4089_v21 = vld [vmem:[#allocation2 + $0x5c] ss:$2 sm:$0xff]  ;;  %v8608_v53 = vld [vmem:[%s11324_s3 + $0x30] sm:$0xff]  }
 0x2e5   : > { %v4084_v45 = vmax.f32 %v4083_v50, 0.0  ;;  %3221 = vst.msk [vmem:[#allocation2 + $0x100] sm:$0xff] %vm331_vm0, %v3180_v56  ;;  %3220 = vst.msk [vmem:[#allocation2 + $0xf8] sm:$0xff] %vm331_vm0, %v3179_v32  ;;  %v3100_v5 = vmul.f32 %v10127_v38, %v3030_v36  ;;  %v3099_v27 = vmul.f32 %v10127_v38, %v3025_v44  ;;  %3054 = vperm.xlu1 %8602, %v2854_v48   ;;  %v10248_v48 = vpop.f32.mrf.mxu0  ;;  %v3550_v56 = vld [vmem:[#allocation2 + $0xe0] sm:$0xff]  ;;  %v3549_v32 = vld [vmem:[#allocation2 + $0xd8] sm:$0xff] }
 0x2e6   : > { %2864 = vperm.xlu0 %8601, %v2816_v35   ;;  %v4094_v43 = vmax.f32 %v4087_v42, %v4089_v21  ;;  %v3685_v35 = vld [vmem:[%s8881_s25 + $0x166] sm:$0xf]  ;;  %s8718_s25 = scalar_lea.vmem %s8717_s27, 32 }
 0x2e7   : > { %4085 = vst.msk [vmem:[#allocation5 + $0x20] sm:$0xff] %vm331_vm0, %v4084_v45  ;;  %v3182_v16 = vadd.f32 %v3141_v2, %v3100_v5  ;;  %v3181_v47 = vadd.f32 %v3140_v52, %v3099_v27  ;;  %v8012_v45 = vpop.f32.mrf.mxu0  ;;  %p8720_p1 = scmp.lt.s32.totalorder %s8718_s25, %s8712_s24 }
 0x2e8   : > { %v4091_v54 = vld [vmem:[#allocation2 + $0x6d] ss:$2 sm:$0xff]  ;;  %v4093_v57 = vld [vmem:[#allocation2 + $0x6e] ss:$2 sm:$0xff]  ;;  %v3040_v61 = vpop.permute.xlu1 %3039  ;;  %v3035_v62 = vpop.permute.xlu0 %3034 }
 0x2e9   : > { %v4095_v17 = vmax.f32 %v4091_v54, %v4093_v57  ;;  %3223 = vst.msk [vmem:[#allocation2 + $0x110] sm:$0xff] %vm331_vm0, %v3182_v16  ;;  %3222 = vst.msk [vmem:[#allocation2 + $0x108] sm:$0xff] %vm331_vm0, %v3181_v47  ;;  %v3102_v39 = vmul.f32 %v10127_v38, %v3040_v61  ;;  %v3101_v14 = vmul.f32 %v10127_v38, %v3035_v62  ;;  %3274 = vperm.xlu1 %8602, %v3230_v30   ;;  %v3953_v61 = vld [vmem:[#allocation2 + $0x80] sm:$0xff]  ;;  %v3551_v62 = vld [vmem:[#allocation2 + $0xe8] sm:$0xff]  ;;  %p8721_p2 = por %p8720_p1, %p8719_p0 }
 0x2ea   : > { %3059 = vperm.xlu0 %8601, %v2855_v0   ;;  %v4265_v0 = vpop.f32.mrf.mxu0 }
 0x2eb   : > { %v4096_v15 = vmax.f32 %v4094_v43, %v4095_v17  ;;  %v3184_v46 = vadd.f32 %v3143_v9, %v3102_v39  ;;  %v3183_v26 = vadd.f32 %v3142_v11, %v3101_v14  ;;  %p8722_p3 = pnand %p8721_p2, %p8715_p13 }
 0x2ec   : > { %v3050_v63 = vpop.permute.xlu1 %3049  ;;  %v3045_v25 = vpop.permute.xlu0 %3044 }
 0x2ed   : > { %v4097_v4 = vmax.f32 %v4096_v15, 0.0  ;;  %3225 = vst.msk [vmem:[#allocation2 + $0x120] sm:$0xff] %vm331_vm0, %v3184_v46  ;;  %3224 = vst.msk [vmem:[#allocation2 + $0x118] sm:$0xff] %vm331_vm0, %v3183_v26  ;;  %v3104_v7 = vmul.f32 %v10127_v38, %v3050_v63  ;;  %v3103_v58 = vmul.f32 %v10127_v38, %v3045_v25  ;;  %3469 = vperm.xlu1 %8602, %v3269_v51   ;;  %v8013_v57 = vpop.f32.mrf.mxu0  ;;  %v3954_v15 = vld [vmem:[#allocation2 + $0x88] sm:$0xff] }
 0x2ee   : > { %3279 = vperm.xlu0 %8601, %v3231_v24   ;;  %v4333_v12 = vld [vmem:[#allocation5 + $0x19] sm:$0xff]  ;;  %v4334_v21 = vld [vmem:[#allocation5 + $0x21] sm:$0xff] }
 0x2ef   : > { %4098 = vst.msk [vmem:[#allocation5 + $0x2a] sm:$0xff] %vm331_vm0, %v4097_v4  ;;  %v3186_v41 = vadd.f32 %v3145_v23, %v3104_v7  ;;  %v3185_v1 = vadd.f32 %v3144_v60, %v3103_v58  ;;  %v4344_v20 = vpack.c.bf16 %v4333_v12, %v4332_v55  ;;  %v4168_v44 = vld [vmem:[#allocation5 + $0x20] sm:$0xff]  ;;  %v3955_v24 = vld [vmem:[#allocation2 + $0x90] sm:$0xff]  ;;  %v3957_v58 = vld [vmem:[#allocation2 + $0xa0] sm:$0xff] }
 0x2f0   : > { %v3405_v38 = vpop.permute.xlu1 %3404  ;;  %v3400_v34 = vpop.permute.xlu0 %3399 }
 0x2f1   : > { %3227 = vst.msk [vmem:[#allocation2 + $0x130] sm:$0xff] %vm331_vm0, %v3186_v41  ;;  %3226 = vst.msk [vmem:[#allocation2 + $0x128] sm:$0xff] %vm331_vm0, %v3185_v1  ;;  %v3507_v3 = vmul.f32 %v10236_v37, %v3405_v38  ;;  %v3506_v18 = vmul.f32 %v10236_v37, %v3400_v34  ;;  %3689 = vperm.xlu1 %8602, %v3645_v8   ;;  %8047 = vmatmul.mubr.msk.bf16.vlgmr.msra.gmra.mxu1 %vm331_vm0, %v4344_v20  ;;  %v3956_v8 = vld [vmem:[#allocation2 + $0x98] sm:$0xff]  ;;  %v3958_v38 = vld [vmem:[#allocation2 + $0xa8] sm:$0xff] }
 0x2f2   : > { %3474 = vperm.xlu0 %8601, %v3270_v49   ;;  %8050 = vmatprep.mubr.msk.bf16.mxu1 %vm8776_vm2, %v8775_v28  ;;  %v10290_v49 = vld [vmem:[%s11325_s4] ss:$0 sm:$0xff] }
 0x2f3   : > { %v3589_v13 = vadd.f32 %v3548_v10, %v3507_v3  ;;  %v3588_v40 = vadd.f32 %v3547_v6, %v3506_v18  ;;  %8103 = vmatpush3.bf16.msra.mxu1 %v8607_v22  ;;  %v4263_v60 = vadd.f32 %v10290_v49, %v10248_v48  ;;  %v3959_v22 = vld [vmem:[#allocation2 + $0xb0] sm:$0xff]  ;;  %v4266_v18 = vadd.f32 %v10290_v49, %v4265_v0  ;;  %v3960_v48 = vld [vmem:[#allocation2 + $0xb8] sm:$0xff] }
 0x2f4   : > { %v3415_v29 = vpop.permute.xlu1 %3414  ;;  %v3410_v19 = vpop.permute.xlu0 %3409  ;;  %8104 = vmatprep.subr.bf16.mxu1 %v8775_v28 }
 0x2f5   : > { %3630 = vst.msk [vmem:[#allocation2 + $0xd0] sm:$0xff] %vm331_vm0, %v3589_v13  ;;  %3629 = vst.msk [vmem:[#allocation2 + $0xc8] sm:$0xff] %vm331_vm0, %v3588_v40  ;;  %v3509_v50 = vmul.f32 %v10236_v37, %v3415_v29  ;;  %v3508_v36 = vmul.f32 %v10236_v37, %v3410_v19  ;;  %3884 = vperm.xlu1 %8602, %v3684_v31  }
 0x2f6   : > { %3694 = vperm.xlu0 %8601, %v3646_v33   ;;  %v4169_v42 = vld [vmem:[#allocation5 + $0x28] sm:$0xff]  ;;  %4316 = vst.msk [vmem:[#allocation3] sm:$0xff] %vm349_vm3, %v4263_v60  ;;  %4317 = vst.msk [vmem:[#allocation3 + $0x8] sm:$0xff] %vm349_vm3, %v4266_v18 }
 0x2f7   : > { %v4335_v5 = vld [vmem:[#allocation5 + $0x29] sm:$0xff]  ;;  %v3591_v27 = vadd.f32 %v3550_v56, %v3509_v50  ;;  %v3590_v30 = vadd.f32 %v3549_v32, %v3508_v36  ;;  %v4179_v2 = vpack.c.bf16 %v4169_v42, %v4168_v44  ;;  %8105 = vmatpush3.bf16.msra.mxu1 %v8608_v53  ;;  %v3553_v42 = vld [vmem:[#allocation2 + $0xf8] sm:$0xff] }
 0x2f8   : > { %v4345_v52 = vpack.c.bf16 %v4335_v5, %v4334_v21  ;;  %v3770_v16 = vpop.permute.xlu1 %3769  ;;  %v3420_v47 = vpop.permute.xlu0 %3419  ;;  %8166 = vmatprep.subr.bf16.mxu1 %v8775_v28  ;;  %v3961_v33 = vld [vmem:[#allocation2 + $0xc0] sm:$0xff]  ;;  %v3552_v21 = vld [vmem:[#allocation2 + $0xf0] sm:$0xff] }
 0x2f9   : > { %3632 = vst.msk [vmem:[#allocation2 + $0xe0] sm:$0xff] %vm331_vm0, %v3591_v27  ;;  %3631 = vst.msk [vmem:[#allocation2 + $0xd8] sm:$0xff] %vm331_vm0, %v3590_v30  ;;  %v3912_v43 = vmul.f32 %v10075_v59, %v3770_v16  ;;  %v3510_v54 = vmul.f32 %v10236_v37, %v3420_v47  ;;  %8019 = vmatmul.mubr.msk.bf16.gmra.mxu0 %vm331_vm0, %v4179_v2  ;;  %v3554_v47 = vld [vmem:[#allocation2 + $0x100] sm:$0xff] }
 0x2fa   : > { %3889 = vperm.xlu0 %8601, %v3685_v35   ;;  %8051 = vmatmul.mubr.msk.bf16.gmra.mxu1 %vm331_vm0, %v4345_v52 }
 0x2fb   : > { %8022 = vmatprep.mubr.msk.bf16.mxu0 %vm8776_vm2, %v8775_v28  ;;  %v3994_v17 = vadd.f32 %v3953_v61, %v3912_v43  ;;  %v3592_v39 = vadd.f32 %v3551_v62, %v3510_v54  ;;  %8054 = vmatprep.mubr.msk.bf16.mxu1 %vm8776_vm2, %v8775_v28  ;;  %v3555_v61 = vld [vmem:[#allocation2 + $0x108] sm:$0xff] }
 0x2fc   : > { %v3780_v14 = vpop.permute.xlu1 %3779  ;;  %v3775_v51 = vpop.permute.xlu0 %3774 }
 0x2fd   : > { %4035 = vst.msk [vmem:[#allocation2 + $0x80] sm:$0xff] %vm331_vm0, %v3994_v17  ;;  %3633 = vst.msk [vmem:[#allocation2 + $0xe8] sm:$0xff] %vm331_vm0, %v3592_v39  ;;  %v3914_v9 = vmul.f32 %v10075_v59, %v3780_v14  ;;  %v3913_v11 = vmul.f32 %v10075_v59, %v3775_v51 }
 0x2ff   : > { %v3996_v46 = vadd.f32 %v3955_v24, %v3914_v9  ;;  %v3995_v26 = vadd.f32 %v3954_v15, %v3913_v11 }
 0x300   : > { %v3790_v63 = vpop.permute.xlu1 %3789  ;;  %v3785_v25 = vpop.permute.xlu0 %3784 }
 0x301   : > { %4037 = vst.msk [vmem:[#allocation2 + $0x90] sm:$0xff] %vm331_vm0, %v3996_v46  ;;  %4036 = vst.msk [vmem:[#allocation2 + $0x88] sm:$0xff] %vm331_vm0, %v3995_v26  ;;  %v3916_v4 = vmul.f32 %v10075_v59, %v3790_v63  ;;  %v3915_v7 = vmul.f32 %v10075_v59, %v3785_v25  ;;  %v3557_v26 = vld [vmem:[#allocation2 + $0x118] sm:$0xff]  ;;  %v3556_v63 = vld [vmem:[#allocation2 + $0x110] sm:$0xff] }
 0x303   : > { %v3998_v55 = vadd.f32 %v3957_v58, %v3916_v4  ;;  %v3997_v23 = vadd.f32 %v3956_v8, %v3915_v7 }
 0x304   : > { %v3800_v12 = vpop.permute.xlu1 %3799  ;;  %v3795_v41 = vpop.permute.xlu0 %3794 }
 0x305   : > { %4039 = vst.msk [vmem:[#allocation2 + $0xa0] sm:$0xff] %vm331_vm0, %v3998_v55  ;;  %4038 = vst.msk [vmem:[#allocation2 + $0x98] sm:$0xff] %vm331_vm0, %v3997_v23  ;;  %v3918_v1 = vmul.f32 %v10075_v59, %v3800_v12  ;;  %v3917_v20 = vmul.f32 %v10075_v59, %v3795_v41  ;;  %v3559_v12 = vld [vmem:[#allocation2 + $0x128] sm:$0xff]  ;;  %v3558_v41 = vld [vmem:[#allocation2 + $0x120] sm:$0xff] }
 0x307   : > { %v4000_v34 = vadd.f32 %v3959_v22, %v3918_v1  ;;  %v3999_v3 = vadd.f32 %v3958_v38, %v3917_v20 }
 0x308   : > { %v3810_v31 = vpop.permute.xlu1 %3809  ;;  %v3805_v10 = vpop.permute.xlu0 %3804  ;;  %v4100_v40 = vld [vmem:[#allocation2 + $0x7f] ss:$2 sm:$0xff]  ;;  %v4102_v53 = vld [vmem:[#allocation2 + $0x80] ss:$2 sm:$0xff] }
 0x309   : > { %4041 = vst.msk [vmem:[#allocation2 + $0xb0] sm:$0xff] %vm331_vm0, %v4000_v34  ;;  %4040 = vst.msk [vmem:[#allocation2 + $0xa8] sm:$0xff] %vm331_vm0, %v3999_v3  ;;  %v3920_v6 = vmul.f32 %v10075_v59, %v3810_v31  ;;  %v3919_v13 = vmul.f32 %v10075_v59, %v3805_v10  ;;  %v4107_v36 = vmax.f32 %v4100_v40, %v4102_v53  ;;  %v10328_v34 = vld [vmem:[%s11322_s1 + $0x8] ss:$0 sm:$0xff]  ;;  %v3560_v10 = vld [vmem:[#allocation2 + $0x130] sm:$0xff] }
 0x30a   : > { %v3962_v31 = vld [vmem:[#allocation2 + $0xc8] sm:$0xff] }
 0x30b   : > { %v4002_v29 = vadd.f32 %v3961_v33, %v3920_v6  ;;  %v4001_v19 = vadd.f32 %v3960_v48, %v3919_v13  ;;  %v3964_v48 = vld [vmem:[#allocation2 + $0xd8] sm:$0xff] }
 0x30c   : > { %v4104_v35 = vld [vmem:[#allocation2 + $0x91] ss:$2 sm:$0xff]  ;;  %v4106_v50 = vld [vmem:[#allocation2 + $0x92] ss:$2 sm:$0xff]  ;;  %v3430_v56 = vpop.permute.xlu1 %3429  ;;  %v3425_v32 = vpop.permute.xlu0 %3424 }
 0x30d   : > { %v4108_v44 = vmax.f32 %v4104_v35, %v4106_v50  ;;  %4043 = vst.msk [vmem:[#allocation2 + $0xc0] sm:$0xff] %vm331_vm0, %v4002_v29  ;;  %4042 = vst.msk [vmem:[#allocation2 + $0xb8] sm:$0xff] %vm331_vm0, %v4001_v19  ;;  %v3512_v45 = vmul.f32 %v10236_v37, %v3430_v56  ;;  %v3511_v59 = vmul.f32 %v10236_v37, %v3425_v32  ;;  %v3963_v29 = vld [vmem:[#allocation2 + $0xd0] sm:$0xff] }
 0x30f   : > { %v4109_v5 = vmax.f32 %v4107_v36, %v4108_v44  ;;  %v3594_v27 = vadd.f32 %v3553_v42, %v3512_v45  ;;  %v3593_v30 = vadd.f32 %v3552_v21, %v3511_v59 }
 0x310   : > { %v3440_v2 = vpop.permute.xlu1 %3439  ;;  %v3435_v52 = vpop.permute.xlu0 %3434  ;;  %v4113_v54 = vld [vmem:[#allocation2 + $0xa3] ss:$2 sm:$0xff]  ;;  %v4115_v57 = vld [vmem:[#allocation2 + $0xa4] ss:$2 sm:$0xff] }
 0x311   : > { %v4110_v0 = vmax.f32 %v4109_v5, 0.0  ;;  %3635 = vst.msk [vmem:[#allocation2 + $0xf8] sm:$0xff] %vm331_vm0, %v3594_v27  ;;  %3634 = vst.msk [vmem:[#allocation2 + $0xf0] sm:$0xff] %vm331_vm0, %v3593_v30  ;;  %v3514_v16 = vmul.f32 %v10236_v37, %v3440_v2  ;;  %v3513_v43 = vmul.f32 %v10236_v37, %v3435_v52  ;;  %v4120_v11 = vmax.f32 %v4113_v54, %v4115_v57  ;;  %v3966_v30 = vld [vmem:[#allocation2 + $0xe8] sm:$0xff]  ;;  %v3965_v2 = vld [vmem:[#allocation2 + $0xe0] sm:$0xff] }
 0x313   : > { %4111 = vst.msk [vmem:[#allocation5 + $0x34] sm:$0xff] %vm331_vm0, %v4110_v0  ;;  %v3596_v62 = vadd.f32 %v3555_v61, %v3514_v16  ;;  %v3595_v17 = vadd.f32 %v3554_v47, %v3513_v43 }
 0x314   : > { %v4117_v39 = vld [vmem:[#allocation2 + $0xb5] ss:$2 sm:$0xff]  ;;  %v4119_v14 = vld [vmem:[#allocation2 + $0xb6] ss:$2 sm:$0xff]  ;;  %v3450_v51 = vpop.permute.xlu1 %3449  ;;  %v3445_v9 = vpop.permute.xlu0 %3444 }
 0x315   : > { %v4121_v24 = vmax.f32 %v4117_v39, %v4119_v14  ;;  %3637 = vst.msk [vmem:[#allocation2 + $0x108] sm:$0xff] %vm331_vm0, %v3596_v62  ;;  %3636 = vst.msk [vmem:[#allocation2 + $0x100] sm:$0xff] %vm331_vm0, %v3595_v17  ;;  %v3516_v15 = vmul.f32 %v10236_v37, %v3450_v51  ;;  %v3515_v46 = vmul.f32 %v10236_v37, %v3445_v9 }
 0x317   : > { %v4122_v25 = vmax.f32 %v4120_v11, %v4121_v24  ;;  %v3598_v4 = vadd.f32 %v3557_v26, %v3516_v15  ;;  %v3597_v7 = vadd.f32 %v3556_v63, %v3515_v46 }
 0x318   : > { %v3460_v58 = vpop.permute.xlu1 %3459  ;;  %v3455_v8 = vpop.permute.xlu0 %3454  ;;  %v3968_v57 = vld [vmem:[#allocation2 + $0xf8] sm:$0xff]  ;;  %v3967_v61 = vld [vmem:[#allocation2 + $0xf0] sm:$0xff] }
 0x319   : > { %v4123_v55 = vmax.f32 %v4122_v25, 0.0  ;;  %3639 = vst.msk [vmem:[#allocation2 + $0x118] sm:$0xff] %vm331_vm0, %v3598_v4  ;;  %3638 = vst.msk [vmem:[#allocation2 + $0x110] sm:$0xff] %vm331_vm0, %v3597_v7  ;;  %v3518_v23 = vmul.f32 %v10236_v37, %v3460_v58  ;;  %v3517_v60 = vmul.f32 %v10236_v37, %v3455_v8 }
 0x31a   : > { %v4170_v35 = vld [vmem:[#allocation5 + $0x30] sm:$0xff] }
 0x31b   : > { %4124 = vst.msk [vmem:[#allocation5 + $0x3e] sm:$0xff] %vm331_vm0, %v4123_v55  ;;  %v3600_v1 = vadd.f32 %v3559_v12, %v3518_v23  ;;  %v3599_v20 = vadd.f32 %v3558_v41, %v3517_v60  ;;  %v4336_v56 = vld [vmem:[#allocation5 + $0x31] sm:$0xff] }
 0x31c   : > { %v3815_v22 = vpop.permute.xlu1 %3814  ;;  %v3465_v38 = vpop.permute.xlu0 %3464  ;;  %v3970_v9 = vld [vmem:[#allocation2 + $0x108] sm:$0xff]  ;;  %v3969_v46 = vld [vmem:[#allocation2 + $0x100] sm:$0xff] }
 0x31d   : > { %3641 = vst.msk [vmem:[#allocation2 + $0x128] sm:$0xff] %vm331_vm0, %v3600_v1  ;;  %3640 = vst.msk [vmem:[#allocation2 + $0x120] sm:$0xff] %vm331_vm0, %v3599_v20  ;;  %v3921_v3 = vmul.f32 %v10328_v34, %v3815_v22  ;;  %v3519_v18 = vmul.f32 %v10236_v37, %v3465_v38 }
 0x31f   : > { %v4003_v6 = vadd.f32 %v3962_v31, %v3921_v3  ;;  %v3601_v33 = vadd.f32 %v3560_v10, %v3519_v18 }
 0x320   : > { %v3825_v13 = vpop.permute.xlu1 %3824  ;;  %v3820_v40 = vpop.permute.xlu0 %3819  ;;  %v3972_v12 = vld [vmem:[#allocation2 + $0x118] sm:$0xff]  ;;  %v3971_v41 = vld [vmem:[#allocation2 + $0x110] sm:$0xff] }
 0x321   : > { %4044 = vst.msk [vmem:[#allocation2 + $0xc8] sm:$0xff] %vm331_vm0, %v4003_v6  ;;  %3642 = vst.msk [vmem:[#allocation2 + $0x130] sm:$0xff] %vm331_vm0, %v3601_v33  ;;  %v3923_v53 = vmul.f32 %v10328_v34, %v3825_v13  ;;  %v3922_v19 = vmul.f32 %v10328_v34, %v3820_v40 }
 0x322   : > { %v4171_v50 = vld [vmem:[#allocation5 + $0x38] sm:$0xff] }
 0x323   : > { %v4337_v32 = vld [vmem:[#allocation5 + $0x39] sm:$0xff]  ;;  %v4005_v36 = vadd.f32 %v3964_v48, %v3923_v53  ;;  %v4004_v44 = vadd.f32 %v3963_v29, %v3922_v19  ;;  %v4180_v45 = vpack.c.bf16 %v4171_v50, %v4170_v35 }
 0x324   : > { %v4346_v59 = vpack.c.bf16 %v4337_v32, %v4336_v56  ;;  %v3835_v42 = vpop.permute.xlu1 %3834  ;;  %v3974_v10 = vld [vmem:[#allocation2 + $0x128] sm:$0xff]  ;;  %v3973_v40 = vld [vmem:[#allocation2 + $0x120] sm:$0xff] }
 0x325   : > { %v3830_v21 = vpop.permute.xlu0 %3829  ;;  %4046 = vst.msk [vmem:[#allocation2 + $0xd8] sm:$0xff] %vm331_vm0, %v4005_v36  ;;  %4045 = vst.msk [vmem:[#allocation2 + $0xd0] sm:$0xff] %vm331_vm0, %v4004_v44  ;;  %v3925_v5 = vmul.f32 %v10328_v34, %v3835_v42  ;;  %8023 = vmatmul.mubr.msk.bf16.gmra.mxu0 %vm331_vm0, %v4180_v45  ;;  %v8705_v36 = vld [vmem:[%s11322_s1 + $0x1] ss:$0 sm:$0xff] }
 0x326   : > { %v3924_v27 = vmul.f32 %v10328_v34, %v3830_v21  ;;  %8055 = vmatmul.mubr.msk.bf16.gmra.mxu1 %vm331_vm0, %v4346_v59  ;;  %8026 = vmatprep.mubr.msk.bf16.mxu0 %vm8776_vm2, %v8775_v28  ;;  %v1071_v59 = vld [vmem:[#allocation2 + $0x138] sm:$0xff] }
 0x327   : > { %8058 = vmatprep.mubr.msk.bf16.mxu1 %vm8776_vm2, %v8775_v28  ;;  %v4007_v52 = vadd.f32 %v3966_v30, %v3925_v5 }
 0x328   : > { %v4006_v0 = vadd.f32 %v3965_v2, %v3924_v27  ;;  %v3845_v16 = vpop.permute.xlu1 %3844  ;;  %v3975_v42 = vld [vmem:[#allocation2 + $0x130] sm:$0xff] }
 0x329   : > { %v3840_v47 = vpop.permute.xlu0 %3839  ;;  %4048 = vst.msk [vmem:[#allocation2 + $0xe8] sm:$0xff] %vm331_vm0, %v4007_v52  ;;  %v3927_v43 = vmul.f32 %v10328_v34, %v3845_v16 }
 0x32a   : > { %4047 = vst.msk [vmem:[#allocation2 + $0xe0] sm:$0xff] %vm331_vm0, %v4006_v0  ;;  %v3926_v54 = vmul.f32 %v10328_v34, %v3840_v47  ;;  %v8706_v0 = vld [vmem:[%s11322_s1 + $0x2] ss:$0 sm:$0xff] }
 0x32b   : > { %v4009_v62 = vadd.f32 %v3968_v57, %v3927_v43  ;;  %v1447_v47 = vld [vmem:[#allocation2] sm:$0xff]  ;;  %v4172_v57 = vld [vmem:[#allocation5 + $0x40] sm:$0xff] }
 0x32c   : > { %v4008_v17 = vadd.f32 %v3967_v61, %v3926_v54  ;;  %v3855_v39 = vpop.permute.xlu1 %3854  ;;  %v4126_v24 = vld [vmem:[#allocation2 + $0xc7] ss:$2 sm:$0xff]  ;;  %v4128_v15 = vld [vmem:[#allocation2 + $0xc8] ss:$2 sm:$0xff]  ;;  %v1072_v43 = vld [vmem:[#allocation2 + $0x140] sm:$0xf] }
 0x32d   : > { %v3850_v14 = vpop.permute.xlu0 %3849  ;;  %4050 = vst.msk [vmem:[#allocation2 + $0xf8] sm:$0xff] %vm331_vm0, %v4009_v62  ;;  %v3929_v51 = vmul.f32 %v10328_v34, %v3855_v39  ;;  %v4133_v8 = vmax.f32 %v4126_v24, %v4128_v15 }
 0x32e   : > { %4049 = vst.msk [vmem:[#allocation2 + $0xf0] sm:$0xff] %vm331_vm0, %v4008_v17  ;;  %v3928_v11 = vmul.f32 %v10328_v34, %v3850_v14 }
 0x32f   : > { %v4011_v26 = vadd.f32 %v3970_v9, %v3929_v51 }
 0x330   : > { %v4010_v63 = vadd.f32 %v3969_v46, %v3928_v11  ;;  %v3865_v7 = vpop.permute.xlu1 %3864 }
 0x331   : > { %v4130_v25 = vld [vmem:[#allocation2 + $0xd9] ss:$2 sm:$0xff]  ;;  %v4132_v4 = vld [vmem:[#allocation2 + $0xda] ss:$2 sm:$0xff]  ;;  %v3860_v58 = vpop.permute.xlu0 %3859  ;;  %4052 = vst.msk [vmem:[#allocation2 + $0x108] sm:$0xff] %vm331_vm0, %v4011_v26  ;;  %v3931_v23 = vmul.f32 %v10328_v34, %v3865_v7 }
 0x332   : > { %v4134_v55 = vmax.f32 %v4130_v25, %v4132_v4  ;;  %4051 = vst.msk [vmem:[#allocation2 + $0x100] sm:$0xff] %vm331_vm0, %v4010_v63  ;;  %v3930_v60 = vmul.f32 %v10328_v34, %v3860_v58  ;;  %v1448_v63 = vld [vmem:[#allocation2 + $0x8] sm:$0xff] }
 0x333   : > { %v4013_v20 = vadd.f32 %v3972_v12, %v3931_v23 }
 0x334   : > { %v4135_v1 = vmax.f32 %v4133_v8, %v4134_v55  ;;  %v4012_v22 = vadd.f32 %v3971_v41, %v3930_v60  ;;  %v3875_v38 = vpop.permute.xlu1 %3874 }
 0x335   : > { %v3870_v3 = vpop.permute.xlu0 %3869  ;;  %4054 = vst.msk [vmem:[#allocation2 + $0x118] sm:$0xff] %vm331_vm0, %v4013_v20  ;;  %v3933_v31 = vmul.f32 %v10328_v34, %v3875_v38  ;;  %v4139_v33 = vld [vmem:[#allocation2 + $0xeb] ss:$2 sm:$0xff]  ;;  %v4141_v13 = vld [vmem:[#allocation2 + $0xec] ss:$2 sm:$0xff] }
 0x336   : > { %v4136_v18 = vmax.f32 %v4135_v1, 0.0  ;;  %4053 = vst.msk [vmem:[#allocation2 + $0x110] sm:$0xff] %vm331_vm0, %v4012_v22  ;;  %v3932_v6 = vmul.f32 %v10328_v34, %v3870_v3  ;;  %v4146_v56 = vmax.f32 %v4139_v33, %v4141_v13  ;;  %v8707_v20 = vld [vmem:[%s11322_s1 + $0x3] ss:$0 sm:$0xff] }
 0x337   : > { %v4015_v53 = vadd.f32 %v3974_v10, %v3933_v31 }
 0x338   : > { %4137 = vst.msk [vmem:[#allocation5 + $0x48] sm:$0xff] %vm331_vm0, %v4136_v18  ;;  %v4014_v48 = vadd.f32 %v3973_v40, %v3932_v6  ;;  %v980_v35 = vpop.permute.xlu1 %979 }
 0x339   : > { %v4143_v29 = vld [vmem:[#allocation2 + $0xfd] ss:$2 sm:$0xff]  ;;  %v4145_v19 = vld [vmem:[#allocation2 + $0xfe] ss:$2 sm:$0xff]  ;;  %v3880_v50 = vpop.permute.xlu0 %3879  ;;  %4056 = vst.msk [vmem:[#allocation2 + $0x128] sm:$0xff] %vm331_vm0, %v4015_v53  ;;  %v1030_v44 = vmul.f32 %v8705_v36, %v980_v35 }
 0x33a   : > { %v4147_v32 = vmax.f32 %v4143_v29, %v4145_v19  ;;  %4055 = vst.msk [vmem:[#allocation2 + $0x120] sm:$0xff] %vm331_vm0, %v4014_v48  ;;  %v3934_v45 = vmul.f32 %v10328_v34, %v3880_v50 }
 0x33b   : > { %v1112_v5 = vadd.f32 %v1071_v59, %v1030_v44  ;;  %v8708_v44 = vld [vmem:[%s11322_s1 + $0x4] ss:$0 sm:$0xff] }
 0x33c   : > { %v4148_v21 = vmax.f32 %v4146_v56, %v4147_v32  ;;  %v4016_v27 = vadd.f32 %v3975_v42, %v3934_v45  ;;  %v1200_v30 = vpop.permute.xlu1 %1199 }
 0x33d   : > { %v985_v2 = vpop.permute.xlu0 %984  ;;  %1153 = vst.msk [vmem:[#allocation2 + $0x138] sm:$0xff] %vm331_vm0, %v1112_v5  ;;  %v1406_v16 = vmul.f32 %v8706_v0, %v1200_v30  ;;  %v4152_v46 = vld [vmem:[#allocation2 + $0x10f] ss:$2 sm:$0xff]  ;;  %v4154_v26 = vld [vmem:[#allocation2 + $0x110] ss:$2 sm:$0xff] }
 0x33e   : > { %v4149_v52 = vmax.f32 %v4148_v21, 0.0  ;;  %4057 = vst.msk [vmem:[#allocation2 + $0x130] sm:$0xff] %vm331_vm0, %v4016_v27  ;;  %v1031_v54 = vmul.f32 %v8705_v36, %v985_v2  ;;  %v4159_v60 = vmax.f32 %v4152_v46, %v4154_v26 }
 0x33f   : > { %v4173_v61 = vld [vmem:[#allocation5 + $0x48] sm:$0xff]  ;;  %v1488_v39 = vadd.f32 %v1447_v47, %v1406_v16 }
 0x340   : > { %v4338_v62 = vld [vmem:[#allocation5 + $0x41] sm:$0xff]  ;;  %v4339_v17 = vld [vmem:[#allocation5 + $0x49] sm:$0xff]  ;;  %4150 = vst.msk [vmem:[#allocation5 + $0x52] sm:$0xff] %vm331_vm0, %v4149_v52  ;;  %v1113_v14 = vadd.f32 %v1072_v43, %v1031_v54  ;;  %v4181_v51 = vpack.c.bf16 %v4173_v61, %v4172_v57  ;;  %v1395_v11 = vpop.permute.xlu1 %1394 }
 0x341   : > { %v4347_v9 = vpack.c.bf16 %v4339_v17, %v4338_v62  ;;  %v1205_v24 = vpop.permute.xlu0 %1204  ;;  %1529 = vst.msk [vmem:[#allocation2] sm:$0xff] %vm331_vm0, %v1488_v39  ;;  %v1445_v25 = vmul.f32 %v8706_v0, %v1395_v11  ;;  %v4156_v7 = vld [vmem:[#allocation2 + $0x121] ss:$2 sm:$0xff] }
 0x342   : > { %1154 = vst.msk [vmem:[#allocation2 + $0x140] sm:$0xf] %vm738_vm1, %v1113_v14  ;;  %v1407_v15 = vmul.f32 %v8706_v0, %v1205_v24  ;;  %8027 = vmatmul.mubr.msk.bf16.gmra.mxu0 %vm331_vm0, %v4181_v51 }
 0x343   : > { %8059 = vmatmul.mubr.msk.bf16.gmra.mxu1 %vm331_vm0, %v4347_v9  ;;  %8030 = vmatprep.mubr.msk.bf16.mxu0 %vm8776_vm2, %v8775_v28 }
 0x344   : > { %8062 = vmatprep.mubr.msk.bf16.mxu1 %vm8776_vm2, %v8775_v28  ;;  %v1489_v4 = vadd.f32 %v1448_v63, %v1407_v15  ;;  %v1486_v8 = vld [vmem:[#allocation2 + $0x138] sm:$0xff]  ;;  %v1615_v55 = vpop.permute.xlu1 %1614  ;;  %v8709_v15 = vld [vmem:[%s11322_s1 + $0x5] ss:$0 sm:$0xff] }
 0x345   : > { %v4158_v58 = vld [vmem:[#allocation2 + $0x122] ss:$2 sm:$0xff]  ;;  %v1400_v23 = vpop.permute.xlu0 %1399  ;;  %v1527_v41 = vadd.f32 %v1486_v8, %v1445_v25  ;;  %v1821_v22 = vmul.f32 %v8707_v20, %v1615_v55 }
 0x346   : > { %v4160_v12 = vmax.f32 %v4156_v7, %v4158_v58  ;;  %1530 = vst.msk [vmem:[#allocation2 + $0x8] sm:$0xff] %vm331_vm0, %v1489_v4  ;;  %v1446_v38 = vmul.f32 %v8706_v0, %v1400_v23 }
 0x347   : > { %1568 = vst.msk [vmem:[#allocation2 + $0x138] sm:$0xff] %vm331_vm0, %v1527_v41  ;;  %v4174_v42 = vld [vmem:[#allocation5 + $0x50] sm:$0xff] }
 0x348   : > { %v4161_v1 = vmax.f32 %v4159_v60, %v4160_v12  ;;  %v1862_v3 = vld [vmem:[#allocation2] sm:$0xff]  ;;  %v1810_v31 = vpop.permute.xlu1 %1809  ;;  %v4340_v0 = vld [vmem:[#allocation5 + $0x51] sm:$0xff] }
 0x349   : > { %v1487_v18 = vld [vmem:[#allocation2 + $0x140] sm:$0xf]  ;;  %v1620_v10 = vpop.permute.xlu0 %1619  ;;  %v1903_v33 = vadd.f32 %v1862_v3, %v1821_v22  ;;  %v1860_v19 = vmul.f32 %v8707_v20, %v1810_v31 }
 0x34a   : > { %v4162_v6 = vmax.f32 %v4161_v1, 0.0  ;;  %v1528_v13 = vadd.f32 %v1487_v18, %v1446_v38  ;;  %v1822_v40 = vmul.f32 %v8707_v20, %v1620_v10  ;;  %v4330_v60 = vld [vmem:[#allocation5 + $0x1] sm:$0xff]  ;;  %v4331_v12 = vld [vmem:[#allocation5 + $0x9] sm:$0xff]  ;;  %v10417_v18 = vld [vmem:[#allocation5 + $0x12] sm:$0xff] }
 0x34b   : > { %1944 = vst.msk [vmem:[#allocation2] sm:$0xff] %vm331_vm0, %v1903_v33  ;;  %v4343_v38 = vpack.c.bf16 %v4331_v12, %v4330_v60  ;;  %v4700_v3 = vld [vmem:[#allocation5 + $0xa] sm:$0xff] }
 0x34c   : > { %4163 = vst.msk [vmem:[#allocation5 + $0x5c] sm:$0xff] %vm331_vm0, %v4162_v6  ;;  %v2030_v48 = vpop.permute.xlu1 %2029  ;;  %v8609_v6 = vld [vmem:[%s11324_s3 + $0x28] sm:$0xff]  }
 0x34d   : > { %1569 = vst.msk [vmem:[#allocation2 + $0x140] sm:$0xf] %vm738_vm1, %v1528_v13  ;;  %v1863_v53 = vld [vmem:[#allocation2 + $0x8] sm:$0xff]  ;;  %v1815_v29 = vpop.permute.xlu0 %1814  ;;  %v2236_v45 = vmul.f32 %v8708_v44, %v2030_v48  ;;  %v8710_v48 = vld [vmem:[%s11322_s1 + $0x6] ss:$0 sm:$0xff] }
 0x34e   : > { %v1904_v35 = vadd.f32 %v1863_v53, %v1822_v40  ;;  %v1901_v50 = vld [vmem:[#allocation2 + $0x138] sm:$0xff]  ;;  %v1861_v59 = vmul.f32 %v8707_v20, %v1815_v29  ;;  %v4713_v40 = vpack.c.bf16 %v10417_v18, %v4700_v3 }
 0x34f   : > { %v1942_v56 = vadd.f32 %v1901_v50, %v1860_v19  ;;  %v8613_v53 = vld [vmem:[%s11324_s3 + $0x58] sm:$0xff]  }
 0x350   : > { %1945 = vst.msk [vmem:[#allocation2 + $0x8] sm:$0xff] %vm331_vm0, %v1904_v35  ;;  %v2225_v32 = vpop.permute.xlu1 %2224  ;;  %v8610_v35 = vld [vmem:[%s11324_s3 + $0x20] sm:$0xff]  }
 0x351   : > { %v2035_v36 = vpop.permute.xlu0 %2034  ;;  %1983 = vst.msk [vmem:[#allocation2 + $0x138] sm:$0xff] %vm331_vm0, %v1942_v56  ;;  %v2275_v62 = vmul.f32 %v8708_v44, %v2225_v32  ;;  %v4515_v32 = vld [vmem:[#allocation5 + $0x2] sm:$0xff] }
 0x352   : > { %v2277_v21 = vld [vmem:[#allocation2] sm:$0xff]  ;;  %v2237_v57 = vmul.f32 %v8708_v44, %v2035_v36 }
 0x353   : > { %v4175_v27 = vld [vmem:[#allocation5 + $0x58] sm:$0xff]  ;;  %v2318_v30 = vadd.f32 %v2277_v21, %v2236_v45  ;;  %v4176_v9 = vld [vmem:[#allocation5 + $0x60] sm:$0xf]  ;;  %v4528_v21 = vpack.c.bf16 %v4700_v3, %v4515_v32 }
 0x354   : > { %v1902_v5 = vld [vmem:[#allocation2 + $0x140] sm:$0xf]  ;;  %v4182_v52 = vpack.c.bf16 %v4175_v27, %v4174_v42  ;;  %v4341_v16 = vld [vmem:[#allocation5 + $0x59] sm:$0xff]  ;;  %v2445_v47 = vpop.permute.xlu1 %2444  ;;  %v4342_v24 = vld [vmem:[#allocation5 + $0x61] sm:$0xf]  ;;  %v4183_v63 = vpack.c.bf16 %v4176_v9, %v4176_v9 }
 0x355   : > { %v1943_v2 = vadd.f32 %v1902_v5, %v1861_v59  ;;  %v2230_v43 = vpop.permute.xlu0 %2229  ;;  %v4348_v54 = vpack.c.bf16 %v4341_v16, %v4340_v0  ;;  %2359 = vst.msk [vmem:[#allocation2] sm:$0xff] %vm331_vm0, %v2318_v30  ;;  %v2651_v46 = vmul.f32 %v8709_v15, %v2445_v47  ;;  %v4349_v58 = vpack.c.bf16 %v4342_v24, %v4342_v24  ;;  %v8614_v59 = vld [vmem:[%s11324_s3 + $0x50] sm:$0xff]   ;;  %v10446_v27 = vld [vmem:[#allocation5 + $0x22] sm:$0xff] }
 0x356   : > { %8031 = vmatmul.mubr.msk.bf16.gmra.mxu0 %vm331_vm0, %v4182_v52  ;;  %v2276_v26 = vmul.f32 %v8708_v44, %v2230_v43  ;;  %v4702_v5 = vld [vmem:[#allocation5 + $0x1a] sm:$0xff]  ;;  %v8611_v52 = vld [vmem:[%s11324_s3 + $0x48] sm:$0xff]  }
 0x357   : > { %1984 = vst.msk [vmem:[#allocation2 + $0x140] sm:$0xf] %vm738_vm1, %v1943_v2  ;;  %v2278_v61 = vld [vmem:[#allocation2 + $0x8] sm:$0xff]  ;;  %8063 = vmatmul.mubr.msk.bf16.gmra.mxu1 %vm331_vm0, %v4348_v54  ;;  %8034 = vmatprep.mubr.msk.bf16.mxu0 %vm8776_vm2, %v8775_v28  ;;  %v4714_v43 = vpack.c.bf16 %v10446_v27, %v4702_v5 }
 0x358   : > { %v2319_v17 = vadd.f32 %v2278_v61, %v2237_v57  ;;  %8066 = vmatprep.mubr.msk.bf16.mxu1 %vm8776_vm2, %v8775_v28  ;;  %v2316_v39 = vld [vmem:[#allocation2 + $0x138] sm:$0xff]  ;;  %v2640_v14 = vpop.permute.xlu1 %2639  ;;  %v8612_v61 = vld [vmem:[%s11324_s3 + $0x40] sm:$0xff]   ;;  %v10468_v24 = vld [vmem:[#allocation5 + $0x32] sm:$0xff] }
 0x359   : > { %v2450_v51 = vpop.permute.xlu0 %2449  ;;  %v2357_v11 = vadd.f32 %v2316_v39, %v2275_v62  ;;  %v2690_v20 = vmul.f32 %v8709_v15, %v2640_v14 }
 0x35a   : > { %2360 = vst.msk [vmem:[#allocation2 + $0x8] sm:$0xff] %vm331_vm0, %v2319_v17  ;;  %v2652_v41 = vmul.f32 %v8709_v15, %v2450_v51 }
 0x35b   : > { %2398 = vst.msk [vmem:[#allocation2 + $0x138] sm:$0xff] %vm331_vm0, %v2357_v11 }
 0x35c   : > { %v2692_v25 = vld [vmem:[#allocation2] sm:$0xff]  ;;  %v2860_v23 = vpop.permute.xlu1 %2859 }
 0x35d   : > { %v2645_v7 = vpop.permute.xlu0 %2644  ;;  %v2733_v8 = vadd.f32 %v2692_v25, %v2651_v46  ;;  %v3066_v29 = vmul.f32 %v8710_v48, %v2860_v23  ;;  %v4529_v46 = vpack.c.bf16 %v4702_v5, %v10417_v18 }
 0x35e   : > { %v2317_v4 = vld [vmem:[#allocation2 + $0x140] sm:$0xf]  ;;  %8035 = vmatmul.mubr.msk.bf16.gmra.mxu0 %vm331_vm0, %v4183_v63  ;;  %v2691_v19 = vmul.f32 %v8709_v15, %v2645_v7 }
 0x35f   : > { %v2358_v55 = vadd.f32 %v2317_v4, %v2276_v26  ;;  %8067 = vmatmul.mubr.msk.bf16.gmra.mxu1 %vm331_vm0, %v4349_v58  ;;  %8042 = vmatprep.mubr.msk.bf16.mxu0 %vm8776_vm2, %v8775_v28  ;;  %2774 = vst.msk [vmem:[#allocation2] sm:$0xff] %vm331_vm0, %v2733_v8  ;;  %v4704_v26 = vld [vmem:[#allocation5 + $0x2a] sm:$0xff] }
 0x360   : > { %8106 = vmatprep.mubr.msk.bf16.mxu1 %vm8776_vm2, %v8775_v28  ;;  %v3055_v13 = vpop.permute.xlu1 %3054  ;;  %v4715_v4 = vpack.c.bf16 %v10468_v24, %v4704_v26 }
 0x361   : > { %2399 = vst.msk [vmem:[#allocation2 + $0x140] sm:$0xf] %vm738_vm1, %v2358_v55  ;;  %v2693_v1 = vld [vmem:[#allocation2 + $0x8] sm:$0xff]  ;;  %v2865_v10 = vpop.permute.xlu0 %2864  ;;  %v3105_v0 = vmul.f32 %v8710_v48, %v3055_v13 }
 0x362   : > { %v2734_v22 = vadd.f32 %v2693_v1, %v2652_v41  ;;  %v2731_v31 = vld [vmem:[#allocation2 + $0x138] sm:$0xff]  ;;  %v3067_v42 = vmul.f32 %v8710_v48, %v2865_v10  ;;  %v4530_v10 = vpack.c.bf16 %v4704_v26, %v10446_v27 }
 0x363   : > { %v2772_v33 = vadd.f32 %v2731_v31, %v2690_v20  ;;  %v4707_v41 = vld [vmem:[#allocation5 + $0x42] sm:$0xff]  ;;  %v4710_v27 = vld [vmem:[#allocation5 + $0x5a] sm:$0xff] }
 0x364   : > { %2775 = vst.msk [vmem:[#allocation2 + $0x8] sm:$0xff] %vm331_vm0, %v2734_v22  ;;  %v3275_v2 = vpop.permute.xlu1 %3274  ;;  %v4888_v26 = vld [vmem:[#allocation5 + $0x23] sm:$0xff] }
 0x365   : > { %2813 = vst.msk [vmem:[#allocation2 + $0x138] sm:$0xff] %vm331_vm0, %v2772_v33  ;;  %v3060_v45 = vpop.permute.xlu0 %3059  ;;  %v3481_v62 = vmul.f32 %v10236_v37, %v3275_v2 }
 0x366   : > { %8043 = vmatmul.mubr.msk.bf16.vlgmr.msra.gmra.mxu0 %vm331_vm0, %v4343_v38  ;;  %v3107_v50 = vld [vmem:[#allocation2] sm:$0xff]  ;;  %v3106_v17 = vmul.f32 %v8710_v48, %v3060_v45 }
 0x367   : > { %8071 = vmatpush3.bf16.msra.mxu0 %v8609_v6  ;;  %8107 = vmatmul.mubr.msk.bf16.vlgmr.msra.gmra.mxu1 %vm331_vm0, %v4713_v40  ;;  %v3148_v36 = vadd.f32 %v3107_v50, %v3066_v29  ;;  %v4706_v6 = vld [vmem:[#allocation5 + $0x3a] sm:$0xff] }
 0x368   : > { %v2732_v56 = vld [vmem:[#allocation2 + $0x140] sm:$0xf]  ;;  %8072 = vmatprep.subr.bf16.mxu0 %v8775_v28  ;;  %8074 = vmatprep.mubr.msk.bf16.mxu0 %vm8776_vm2, %v8775_v28  ;;  %v3470_v51 = vpop.permute.xlu1 %3469  ;;  %v4716_v40 = vpack.c.bf16 %v4707_v41, %v4706_v6 }
 0x369   : > { %v2773_v44 = vadd.f32 %v2732_v56, %v2691_v19  ;;  %8110 = vmatprep.mubr.msk.bf16.mxu1 %vm8776_vm2, %v8775_v28  ;;  %8167 = vmatpush3.bf16.msra.mxu1 %v8613_v53  ;;  %3189 = vst.msk [vmem:[#allocation2] sm:$0xff] %vm331_vm0, %v3148_v36  ;;  %v3280_v57 = vpop.permute.xlu0 %3279  ;;  %v3520_v7 = vmul.f32 %v10236_v37, %v3470_v51  ;;  %v10542_v51 = vld [vmem:[#allocation5 + $0x24] sm:$0xff] }
 0x36a   : > { %8168 = vmatprep.subr.bf16.mxu1 %v8775_v28  ;;  %v3482_v15 = vmul.f32 %v10236_v37, %v3280_v57 }
 0x36b   : > { %2814 = vst.msk [vmem:[#allocation2 + $0x140] sm:$0xf] %vm738_vm1, %v2773_v44  ;;  %v3108_v30 = vld [vmem:[#allocation2 + $0x8] sm:$0xff]  ;;  %8073 = vmatpush3.bf16.msra.mxu0 %v8610_v35 }
 0x36c   : > { %v3149_v16 = vadd.f32 %v3108_v30, %v3067_v42  ;;  %8134 = vmatprep.subr.bf16.mxu0 %v8775_v28  ;;  %v3146_v47 = vld [vmem:[#allocation2 + $0x138] sm:$0xff]  ;;  %v3690_v55 = vpop.permute.xlu1 %3689  ;;  %v4709_v44 = vld [vmem:[#allocation5 + $0x52] sm:$0xff]  ;;  %v4708_v42 = vld [vmem:[#allocation5 + $0x4a] sm:$0xff] }
 0x36d   : > { %8169 = vmatpush3.bf16.msra.mxu1 %v8614_v59  ;;  %v3187_v54 = vadd.f32 %v3146_v47, %v3105_v0  ;;  %v3475_v25 = vpop.permute.xlu0 %3474  ;;  %v3896_v60 = vmul.f32 %v10328_v34, %v3690_v55  ;;  %v4531_v59 = vpack.c.bf16 %v4706_v6, %v10468_v24  ;;  %v4532_v30 = vpack.c.bf16 %v4708_v42, %v4707_v41  ;;  %v4527_v47 = vld [vmem:[#allocation5 + $0x62] sm:$0xf] }
 0x36e   : > { %3190 = vst.msk [vmem:[#allocation2 + $0x8] sm:$0xff] %vm331_vm0, %v3149_v16  ;;  %8075 = vmatmul.mubr.msk.bf16.vlgmr.msra.gmra.mxu0 %vm331_vm0, %v4528_v21  ;;  %8230 = vmatprep.subr.bf16.mxu1 %v8775_v28  ;;  %v3521_v12 = vmul.f32 %v10236_v37, %v3475_v25  ;;  %v4717_v21 = vpack.c.bf16 %v4709_v44, %v4708_v42  ;;  %v10547_v24 = vld [vmem:[#allocation5 + $0x1c] sm:$0xff]  ;;  %v10575_v55 = vld [vmem:[#allocation5 + $0x44] sm:$0xff] }
 0x36f   : > { %8111 = vmatmul.mubr.msk.bf16.gmra.mxu1 %vm331_vm0, %v4714_v43  ;;  %8135 = vmatpush3.bf16.msra.mxu0 %v8611_v52  ;;  %3228 = vst.msk [vmem:[#allocation2 + $0x138] sm:$0xff] %vm331_vm0, %v3187_v54  ;;  %v4712_v52 = vld [vmem:[#allocation5 + $0x6a] sm:$0xf]  ;;  %v4533_v16 = vpack.c.bf16 %v4710_v27, %v4709_v44  ;;  %v10526_v54 = vld [vmem:[#allocation5 + $0x14] sm:$0xff]  ;;  %v4534_v57 = vpack.c.bf16 %v4527_v47, %v4527_v47 }
 0x370   : > { %8078 = vmatprep.mubr.msk.bf16.mxu0 %vm8776_vm2, %v8775_v28  ;;  %8114 = vmatprep.mubr.msk.bf16.mxu1 %vm8776_vm2, %v8775_v28  ;;  %v3522_v39 = vld [vmem:[#allocation2] sm:$0xff]  ;;  %v3885_v33 = vpop.permute.xlu1 %3884  ;;  %v4719_v0 = vpack.c.bf16 %v4712_v52, %v4712_v52  ;;  %v4887_v25 = vld [vmem:[#allocation5 + $0x1b] sm:$0xff] }
 0x371   : > { %8136 = vmatprep.subr.bf16.mxu0 %v8775_v28  ;;  %v3563_v9 = vadd.f32 %v3522_v39, %v3481_v62  ;;  %v3695_v22 = vpop.permute.xlu0 %3694  ;;  %v3935_v29 = vmul.f32 %v10328_v34, %v3885_v33  ;;  %v5070_v43 = vld [vmem:[#allocation5 + $0xc] sm:$0xff]  ;;  %v4892_v6 = vld [vmem:[#allocation5 + $0x43] sm:$0xff]  ;;  %v4895_v47 = vld [vmem:[#allocation5 + $0x5b] sm:$0xff] }
 0x372   : > { %v3147_v14 = vld [vmem:[#allocation2 + $0x140] sm:$0xf]  ;;  %v3897_v37 = vmul.f32 %v10328_v34, %v3695_v22  ;;  %v5083_v62 = vpack.c.bf16 %v10526_v54, %v5070_v43 }
 0x373   : > { %v3188_v11 = vadd.f32 %v3147_v14, %v3106_v17  ;;  %8137 = vmatpush3.bf16.msra.mxu0 %v8612_v61  ;;  %3604 = vst.msk [vmem:[#allocation2] sm:$0xff] %vm331_vm0, %v3563_v9  ;;  %v8617_v61 = vld [vmem:[%s11324_s3 + $0x78] sm:$0xff]   ;;  %v8618_v17 = vld [vmem:[%s11324_s3 + $0x70] sm:$0xff]   ;;  %v4885_v39 = vld [vmem:[#allocation5 + $0xb] sm:$0xff] }
 0x374   : > { %8198 = vmatprep.subr.bf16.mxu0 %v8775_v28  ;;  %v4886_v14 = vld [vmem:[#allocation5 + $0x13] sm:$0xff]  ;;  %v4893_v42 = vld [vmem:[#allocation5 + $0x4b] sm:$0xff]  ;;  %v4896_v43 = vld [vmem:[#allocation5 + $0x63] sm:$0xff] }
 0x375   : > { %3229 = vst.msk [vmem:[#allocation2 + $0x140] sm:$0xf] %vm738_vm1, %v3188_v11  ;;  %v3523_v63 = vld [vmem:[#allocation2 + $0x8] sm:$0xff]  ;;  %v3890_v56 = vpop.permute.xlu0 %3889  ;;  %v4898_v11 = vpack.c.bf16 %v4886_v14, %v4885_v39  ;;  %v5441_v39 = vld [vmem:[#allocation5 + $0x1d] sm:$0xff] }
 0x376   : > { %v3564_v58 = vadd.f32 %v3523_v63, %v3482_v15  ;;  %8079 = vmatmul.mubr.msk.bf16.gmra.mxu0 %vm331_vm0, %v4529_v46  ;;  %v3561_v8 = vld [vmem:[#allocation2 + $0x138] sm:$0xff]  ;;  %v3936_v45 = vmul.f32 %v10328_v34, %v3890_v56  ;;  %v8615_v9 = vld [vmem:[%s11324_s3 + $0x68] sm:$0xff]   ;;  %v5084_v15 = vpack.c.bf16 %v10542_v51, %v10547_v24  ;;  %v8616_v46 = vld [vmem:[%s11324_s3 + $0x60] sm:$0xff]  }
 0x377   : > { %8115 = vmatmul.mubr.msk.bf16.gmra.mxu1 %vm331_vm0, %v4715_v4  ;;  %8082 = vmatprep.mubr.msk.bf16.mxu0 %vm8776_vm2, %v8775_v28  ;;  %v3602_v23 = vadd.f32 %v3561_v8, %v3520_v7  ;;  %v4711_v34 = vld [vmem:[#allocation5 + $0x62] sm:$0xff]  ;;  %v10562_v63 = vld [vmem:[#allocation5 + $0x34] sm:$0xff]  ;;  %v4899_v4 = vpack.c.bf16 %v4888_v26, %v4887_v25  ;;  %v10564_v7 = vld [vmem:[#allocation5 + $0x2c] sm:$0xff] }
 0x378   : > { %3605 = vst.msk [vmem:[#allocation2 + $0x8] sm:$0xff] %vm331_vm0, %v3564_v58  ;;  %8118 = vmatprep.mubr.msk.bf16.mxu1 %vm8776_vm2, %v8775_v28  ;;  %v4718_v2 = vpack.c.bf16 %v4711_v34, %v4710_v27  ;;  %v5085_v58 = vpack.c.bf16 %v10562_v63, %v10564_v7  ;;  %v4890_v8 = vld [vmem:[#allocation5 + $0x33] sm:$0xff]  ;;  %v5442_v26 = vld [vmem:[#allocation5 + $0x25] sm:$0xff] }
 0x379   : > { %3643 = vst.msk [vmem:[#allocation2 + $0x138] sm:$0xff] %vm331_vm0, %v3602_v23  ;;  %v4270_v38 = vpop.f32.mrf.mxu0  ;;  %v5440_v14 = vld [vmem:[#allocation5 + $0x15] sm:$0xff] }
 0x37a   : > { %v3937_v1 = vld [vmem:[#allocation2] sm:$0xff]  ;;  %v4271_v31 = vadd.f32 %v10290_v49, %v4270_v38 }
 0x37b   : > { %v3978_v3 = vadd.f32 %v3937_v1, %v3896_v60  ;;  %v8016_v13 = vpop.f32.mrf.mxu0 }
 0x37c   : > { %v3562_v20 = vld [vmem:[#allocation2 + $0x140] sm:$0xf]  ;;  %4318 = vst.msk [vmem:[#allocation3 + $0x10] sm:$0xff] %vm349_vm3, %v4271_v31  ;;  %v10589_v13 = vld [vmem:[#allocation5 + $0x4c] sm:$0xff] }
 0x37d   : > { %v3603_v18 = vadd.f32 %v3562_v20, %v3521_v12  ;;  %4019 = vst.msk [vmem:[#allocation2] sm:$0xff] %vm331_vm0, %v3978_v3  ;;  %v4273_v48 = vpop.f32.mrf.mxu0  ;;  %v4889_v12 = vld [vmem:[#allocation5 + $0x2b] sm:$0xff]  ;;  %v10577_v20 = vld [vmem:[#allocation5 + $0x3c] sm:$0xff] }
 0x37e   : > { %8083 = vmatmul.mubr.msk.bf16.gmra.mxu0 %vm331_vm0, %v4530_v10  ;;  %v4274_v35 = vadd.f32 %v10290_v49, %v4273_v48  ;;  %v4900_v1 = vpack.c.bf16 %v4890_v8, %v4889_v12  ;;  %v5086_v38 = vpack.c.bf16 %v10575_v55, %v10577_v20 }
 0x37f   : > { %3644 = vst.msk [vmem:[#allocation2 + $0x140] sm:$0xf] %vm738_vm1, %v3603_v18  ;;  %v3938_v53 = vld [vmem:[#allocation2 + $0x8] sm:$0xff]  ;;  %8119 = vmatmul.mubr.msk.bf16.gmra.mxu1 %vm331_vm0, %v4716_v40  ;;  %8086 = vmatprep.mubr.msk.bf16.mxu0 %vm8776_vm2, %v8775_v28  ;;  %v8017_v32 = vpop.f32.mrf.mxu0 }
 0x380   : > { %v3979_v19 = vadd.f32 %v3938_v53, %v3897_v37  ;;  %8122 = vmatprep.mubr.msk.bf16.mxu1 %vm8776_vm2, %v8775_v28  ;;  %v3976_v50 = vld [vmem:[#allocation2 + $0x138] sm:$0xff]  ;;  %4319 = vst.msk [vmem:[#allocation3 + $0x18] sm:$0xff] %vm349_vm3, %v4274_v35  ;;  %v10591_v40 = vld [vmem:[#allocation5 + $0x54] sm:$0xff]  ;;  %v10596_v37 = vld [vmem:[%s11325_s4] ss:$0 sm:$0xff] }
 0x381   : > { %v4017_v36 = vadd.f32 %v3976_v50, %v3935_v29  ;;  %v4891_v29 = vld [vmem:[#allocation5 + $0x3b] sm:$0xff]  ;;  %v5087_v56 = vpack.c.bf16 %v10591_v40, %v10589_v13 }
 0x382   : > { %4020 = vst.msk [vmem:[#allocation2 + $0x8] sm:$0xff] %vm331_vm0, %v3979_v19  ;;  %v4901_v35 = vpack.c.bf16 %v4892_v6, %v4891_v29  ;;  %v5449_v29 = vld [vmem:[#allocation5 + $0x5d] sm:$0xff] }
 0x383   : > { %4058 = vst.msk [vmem:[#allocation2 + $0x138] sm:$0xff] %vm331_vm0, %v4017_v36  ;;  %v4478_v60 = vld [vmem:[#allocation3 + $0x10] sm:$0xff] }
 0x386   : > { %v3977_v49 = vld [vmem:[#allocation2 + $0x140] sm:$0xf]  ;;  %8087 = vmatmul.mubr.msk.bf16.gmra.mxu0 %vm331_vm0, %v4531_v59 }
 0x387   : > { %v4018_v5 = vadd.f32 %v3977_v49, %v3936_v45  ;;  %8123 = vmatmul.mubr.msk.bf16.gmra.mxu1 %vm331_vm0, %v4717_v21  ;;  %8090 = vmatprep.mubr.msk.bf16.mxu0 %vm8776_vm2, %v8775_v28  ;;  %v4479_v18 = vld [vmem:[#allocation3 + $0x18] sm:$0xff]  ;;  %v4894_v49 = vld [vmem:[#allocation5 + $0x53] sm:$0xff]  ;;  %v10610_v21 = vld [vmem:[#allocation5 + $0x5c] sm:$0xff] }
 0x388   : > { %8126 = vmatprep.mubr.msk.bf16.mxu1 %vm8776_vm2, %v8775_v28  ;;  %v4902_v34 = vpack.c.bf16 %v4894_v49, %v4893_v42 }
 0x389   : > { %4059 = vst.msk [vmem:[#allocation2 + $0x140] sm:$0xf] %vm738_vm1, %v4018_v5  ;;  %v10612_v5 = vld [vmem:[#allocation5 + $0x64] sm:$0xff] }
 0x38e   : > { %8091 = vmatmul.mubr.msk.bf16.gmra.mxu0 %vm331_vm0, %v4532_v30 }
 0x38f   : > { %8127 = vmatmul.mubr.msk.bf16.gmra.mxu1 %vm331_vm0, %v4718_v2  ;;  %8094 = vmatprep.mubr.msk.bf16.mxu0 %vm8776_vm2, %v8775_v28  ;;  %v5088_v2 = vpack.c.bf16 %v10612_v5, %v10610_v21 }
 0x390   : > { %8130 = vmatprep.mubr.msk.bf16.mxu1 %vm8776_vm2, %v8775_v28 }
 0x396   : > { %8095 = vmatmul.mubr.msk.bf16.gmra.mxu0 %vm331_vm0, %v4533_v16 }
 0x397   : > { %8131 = vmatmul.mubr.msk.bf16.gmra.mxu1 %vm331_vm0, %v4719_v0  ;;  %8098 = vmatprep.mubr.msk.bf16.mxu0 %vm8776_vm2, %v8775_v28  ;;  %v5082_v0 = vld [vmem:[#allocation5 + $0x6c] sm:$0xf] }
 0x398   : > { %8170 = vmatprep.mubr.msk.bf16.mxu1 %vm8776_vm2, %v8775_v28 }
 0x39e   : > { %8099 = vmatmul.mubr.msk.bf16.gmra.mxu0 %vm331_vm0, %v4534_v57  ;;  %v5089_v57 = vpack.c.bf16 %v5082_v0, %v5082_v0 }
 0x39f   : > { %8171 = vmatmul.mubr.msk.bf16.vlgmr.msra.gmra.mxu1 %vm331_vm0, %v5083_v62  ;;  %8138 = vmatprep.mubr.msk.bf16.mxu0 %vm8776_vm2, %v8775_v28  ;;  %v4897_v62 = vld [vmem:[#allocation5 + $0x6b] sm:$0xf] }
 0x3a0   : > { %8174 = vmatprep.mubr.msk.bf16.mxu1 %vm8776_vm2, %v8775_v28  ;;  %8231 = vmatpush3.bf16.msra.mxu1 %v8617_v61  ;;  %v4903_v61 = vpack.c.bf16 %v4896_v43, %v4895_v47 }
 0x3a1   : > { %8232 = vmatprep.subr.bf16.mxu1 %v8775_v28 }
 0x3a4   : > { %8233 = vmatpush3.bf16.msra.mxu1 %v8618_v17  ;;  %v4904_v17 = vpack.c.bf16 %v4897_v62, %v4897_v62  ;;  %v5625_v62 = vld [vmem:[#allocation5 + $0x16] sm:$0xff] }
 0x3a5   : > { %8294 = vmatprep.subr.bf16.mxu1 %v8775_v28 }
 0x3a6   : > { %8139 = vmatmul.mubr.msk.bf16.vlgmr.msra.gmra.mxu0 %vm331_vm0, %v4898_v11  ;;  %v5443_v11 = vld [vmem:[#allocation5 + $0x2d] sm:$0xff] }
 0x3a7   : > { %8175 = vmatmul.mubr.msk.bf16.gmra.mxu1 %vm331_vm0, %v5084_v15  ;;  %8199 = vmatpush3.bf16.msra.mxu0 %v8615_v9  ;;  %v5453_v9 = vpack.c.bf16 %v5441_v39, %v5440_v14  ;;  %v8619_v15 = vld [vmem:[%s11324_s3 + $0x88] sm:$0xff]   ;;  %v5454_v25 = vpack.c.bf16 %v5443_v11, %v5442_v26 }
 0x3a8   : > { %8142 = vmatprep.mubr.msk.bf16.mxu0 %vm8776_vm2, %v8775_v28  ;;  %8178 = vmatprep.mubr.msk.bf16.mxu1 %vm8776_vm2, %v8775_v28 }
 0x3a9   : > { %8200 = vmatprep.subr.bf16.mxu0 %v8775_v28 }
 0x3ab   : > { %8201 = vmatpush3.bf16.msra.mxu0 %v8616_v46  ;;  %v5268_v46 = vpack.c.bf16 %v10547_v24, %v10526_v54  ;;  %v5445_v54 = vld [vmem:[#allocation5 + $0x3d] sm:$0xff]  ;;  %v5269_v24 = vpack.c.bf16 %v10564_v7, %v10542_v51 }
 0x3ac   : > { %8262 = vmatprep.subr.bf16.mxu0 %v8775_v28 }
 0x3ae   : > { %8143 = vmatmul.mubr.msk.bf16.gmra.mxu0 %vm331_vm0, %v4899_v4  ;;  %v8620_v4 = vld [vmem:[%s11324_s3 + $0x80] sm:$0xff]  }
 0x3af   : > { %8179 = vmatmul.mubr.msk.bf16.gmra.mxu1 %vm331_vm0, %v5085_v58  ;;  %8146 = vmatprep.mubr.msk.bf16.mxu0 %vm8776_vm2, %v8775_v28  ;;  %v5444_v58 = vld [vmem:[#allocation5 + $0x35] sm:$0xff] }
 0x3b0   : > { %8182 = vmatprep.mubr.msk.bf16.mxu1 %vm8776_vm2, %v8775_v28  ;;  %v5455_v8 = vpack.c.bf16 %v5445_v54, %v5444_v58  ;;  %v5627_v54 = vld [vmem:[#allocation5 + $0x26] sm:$0xff] }
 0x3b1   : > { %v4430_v23 = vpop.f32.mrf.mxu1 }
 0x3b2   : > { %v4491_v41 = vadd.f32 %v4478_v60, %v4430_v23 }
 0x3b3   : > { %v8048_v22 = vpop.f32.mrf.mxu1 }
 0x3b4   : > { %4504 = vst.msk [vmem:[#allocation3 + $0x10] sm:$0xff] %vm349_vm3, %v4491_v41  ;;  %v5447_v22 = vld [vmem:[#allocation5 + $0x4d] sm:$0xff] }
 0x3b5   : > { %v4433_v3 = vpop.f32.mrf.mxu1 }
 0x3b6   : > { %8147 = vmatmul.mubr.msk.bf16.gmra.mxu0 %vm331_vm0, %v4900_v1  ;;  %v4492_v31 = vadd.f32 %v4479_v18, %v4433_v3 }
 0x3b7   : > { %8183 = vmatmul.mubr.msk.bf16.gmra.mxu1 %vm331_vm0, %v5086_v38  ;;  %8150 = vmatprep.mubr.msk.bf16.mxu0 %vm8776_vm2, %v8775_v28  ;;  %v8049_v10 = vpop.f32.mrf.mxu1 }
 0x3b8   : > { %8186 = vmatprep.mubr.msk.bf16.mxu1 %vm8776_vm2, %v8775_v28  ;;  %4505 = vst.msk [vmem:[#allocation3 + $0x18] sm:$0xff] %vm349_vm3, %v4492_v31  ;;  %v5270_v31 = vpack.c.bf16 %v10577_v20, %v10562_v63  ;;  %v5446_v10 = vld [vmem:[#allocation5 + $0x45] sm:$0xff]  ;;  %v5271_v20 = vpack.c.bf16 %v10589_v13, %v10575_v55  ;;  %v5272_v55 = vpack.c.bf16 %v10610_v21, %v10591_v40 }
 0x3b9   : > { %v4278_v33 = vpop.f32.mrf.mxu0  ;;  %v5456_v6 = vpack.c.bf16 %v5447_v22, %v5446_v10  ;;  %v5266_v13 = vld [vmem:[#allocation5 + $0x6c] sm:$0xff]  ;;  %v5630_v22 = vld [vmem:[#allocation5 + $0x3e] sm:$0xff] }
 0x3ba   : > { %v4279_v53 = vadd.f32 %v10596_v37, %v4278_v33  ;;  %v4438_v48 = vpop.f32.mrf.mxu1 }
 0x3bb   : > { %v8020_v19 = vpop.f32.mrf.mxu0 }
 0x3bc   : > { %4320 = vst.msk [vmem:[#allocation3 + $0x20] sm:$0xff] %vm349_vm3, %v4279_v53  ;;  %v8052_v50 = vpop.f32.mrf.mxu1 }
 0x3bd   : > { %v4281_v32 = vpop.f32.mrf.mxu0  ;;  %v5450_v50 = vld [vmem:[#allocation5 + $0x65] sm:$0xff] }
 0x3be   : > { %8151 = vmatmul.mubr.msk.bf16.gmra.mxu0 %vm331_vm0, %v4901_v35  ;;  %v4282_v36 = vadd.f32 %v10596_v37, %v4281_v32  ;;  %v4441_v44 = vpop.f32.mrf.mxu1 }
 0x3bf   : > { %8187 = vmatmul.mubr.msk.bf16.gmra.mxu1 %vm331_vm0, %v5087_v56  ;;  %8154 = vmatprep.mubr.msk.bf16.mxu0 %vm8776_vm2, %v8775_v28  ;;  %v8021_v45 = vpop.f32.mrf.mxu0  ;;  %v5451_v56 = vld [vmem:[#allocation5 + $0x6d] sm:$0xff] }
 0x3c0   : > { %8190 = vmatprep.mubr.msk.bf16.mxu1 %vm8776_vm2, %v8775_v28  ;;  %4321 = vst.msk [vmem:[#allocation3 + $0x28] sm:$0xff] %vm349_vm3, %v4282_v36  ;;  %v8053_v59 = vpop.f32.mrf.mxu1  ;;  %v5458_v32 = vpack.c.bf16 %v5451_v56, %v5450_v50  ;;  %v5452_v36 = vld [vmem:[#allocation5 + $0x75] sm:$0xf] }
 0x3c1   : > { %v5273_v59 = vpack.c.bf16 %v5266_v13, %v10612_v5  ;;  %v5459_v49 = vpack.c.bf16 %v5452_v36, %v5452_v36  ;;  %v5632_v56 = vld [vmem:[#allocation5 + $0x4e] sm:$0xff] }
 0x3c3   : > { %v4480_v27 = vld [vmem:[#allocation3 + $0x20] sm:$0xff] }
 0x3c4   : > { %v4493_v30 = vadd.f32 %v4480_v27, %v4438_v48  ;;  %v5448_v48 = vld [vmem:[#allocation5 + $0x55] sm:$0xff] }
 0x3c5   : > { %v5457_v35 = vpack.c.bf16 %v5449_v29, %v5448_v48  ;;  %v4476_v48 = vld [vmem:[#allocation3] sm:$0xff] }
 0x3c6   : > { %8155 = vmatmul.mubr.msk.bf16.gmra.mxu0 %vm331_vm0, %v4902_v34  ;;  %4506 = vst.msk [vmem:[#allocation3 + $0x20] sm:$0xff] %vm349_vm3, %v4493_v30 }
 0x3c7   : > { %8191 = vmatmul.mubr.msk.bf16.gmra.mxu1 %vm331_vm0, %v5088_v2  ;;  %8158 = vmatprep.mubr.msk.bf16.mxu0 %vm8776_vm2, %v8775_v28  ;;  %v4481_v52 = vld [vmem:[#allocation3 + $0x28] sm:$0xff]  ;;  %v5267_v2 = vld [vmem:[#allocation5 + $0x74] sm:$0xf] }
 0x3c8   : > { %8194 = vmatprep.mubr.msk.bf16.mxu1 %vm8776_vm2, %v8775_v28  ;;  %v4494_v16 = vadd.f32 %v4481_v52, %v4441_v44  ;;  %v5274_v0 = vpack.c.bf16 %v5267_v2, %v5267_v2  ;;  %v5633_v2 = vld [vmem:[#allocation5 + $0x56] sm:$0xff] }
 0x3ca   : > { %4507 = vst.msk [vmem:[#allocation3 + $0x28] sm:$0xff] %vm349_vm3, %v4494_v16 }
 0x3ce   : > { %8159 = vmatmul.mubr.msk.bf16.gmra.mxu0 %vm331_vm0, %v4903_v61  ;;  %v5626_v61 = vld [vmem:[#allocation5 + $0x1e] sm:$0xff] }
 0x3cf   : > { %8195 = vmatmul.mubr.msk.bf16.gmra.mxu1 %vm331_vm0, %v5089_v57  ;;  %8162 = vmatprep.mubr.msk.bf16.mxu0 %vm8776_vm2, %v8775_v28 }
 0x3d0   : > { %8234 = vmatprep.mubr.msk.bf16.mxu1 %vm8776_vm2, %v8775_v28 }
 0x3d6   : > { %8163 = vmatmul.mubr.msk.bf16.gmra.mxu0 %vm331_vm0, %v4904_v17  ;;  %v5638_v17 = vpack.c.bf16 %v5626_v61, %v5625_v62 }
 0x3d7   : > { %8235 = vmatmul.mubr.msk.bf16.vlgmr.msra.gmra.mxu1 %vm331_vm0, %v5453_v9  ;;  %8202 = vmatprep.mubr.msk.bf16.mxu0 %vm8776_vm2, %v8775_v28 }
 0x3d8   : > { %8238 = vmatprep.mubr.msk.bf16.mxu1 %vm8776_vm2, %v8775_v28 }
 0x3de   : > { %8203 = vmatmul.mubr.msk.bf16.vlgmr.msra.gmra.mxu0 %vm331_vm0, %v5268_v46  ;;  %v5628_v46 = vld [vmem:[#allocation5 + $0x2e] sm:$0xff] }
 0x3df   : > { %8239 = vmatmul.mubr.msk.bf16.gmra.mxu1 %vm331_vm0, %v5454_v25  ;;  %8263 = vmatpush3.bf16.msra.mxu0 %v8619_v15  ;;  %v5639_v58 = vpack.c.bf16 %v5628_v46, %v5627_v54 }
 0x3e0   : > { %8206 = vmatprep.mubr.msk.bf16.mxu0 %vm8776_vm2, %v8775_v28  ;;  %8242 = vmatprep.mubr.msk.bf16.mxu1 %vm8776_vm2, %v8775_v28 }
 0x3e1   : > { %8264 = vmatprep.subr.bf16.mxu0 %v8775_v28 }
 0x3e3   : > { %8265 = vmatpush3.bf16.msra.mxu0 %v8620_v4 }
 0x3e4   : > { %8354 = vmatprep.subr.bf16.mxu0 %v8775_v28 }
 0x3e5   : > { %v4286_v23 = vpop.f32.mrf.mxu0 }
 0x3e6   : > { %v4446_v60 = vpop.f32.mrf.mxu1  ;;  %8207 = vmatmul.mubr.msk.bf16.gmra.mxu0 %vm331_vm0, %v5269_v24  ;;  %v4287_v12 = vadd.f32 %v10596_v37, %v4286_v23 }
 0x3e7   : > { %8243 = vmatmul.mubr.msk.bf16.gmra.mxu1 %vm331_vm0, %v5455_v8  ;;  %8210 = vmatprep.mubr.msk.bf16.mxu0 %vm8776_vm2, %v8775_v28  ;;  %v8024_v41 = vpop.f32.mrf.mxu0 }
 0x3e8   : > { %v8056_v1 = vpop.f32.mrf.mxu1  ;;  %8246 = vmatprep.mubr.msk.bf16.mxu1 %vm8776_vm2, %v8775_v28  ;;  %4322 = vst.msk [vmem:[#allocation3 + $0x30] sm:$0xff] %vm349_vm3, %v4287_v12 }
 0x3e9   : > { %v4289_v51 = vpop.f32.mrf.mxu0 }
 0x3ea   : > { %v4449_v7 = vpop.f32.mrf.mxu1  ;;  %v4290_v38 = vadd.f32 %v10596_v37, %v4289_v51 }
 0x3eb   : > { %v8025_v3 = vpop.f32.mrf.mxu0 }
 0x3ec   : > { %v8057_v18 = vpop.f32.mrf.mxu1  ;;  %4323 = vst.msk [vmem:[#allocation3 + $0x38] sm:$0xff] %vm349_vm3, %v4290_v38 }
 0x3ed   : > { %v5629_v18 = vld [vmem:[#allocation5 + $0x36] sm:$0xff] }
 0x3ee   : > { %8211 = vmatmul.mubr.msk.bf16.gmra.mxu0 %vm331_vm0, %v5270_v31 }
 0x3ef   : > { %8247 = vmatmul.mubr.msk.bf16.gmra.mxu1 %vm331_vm0, %v5456_v6  ;;  %8214 = vmatprep.mubr.msk.bf16.mxu0 %vm8776_vm2, %v8775_v28  ;;  %v4482_v33 = vld [vmem:[#allocation3 + $0x30] sm:$0xff]  ;;  %v5640_v6 = vpack.c.bf16 %v5630_v22, %v5629_v18  ;;  %v5637_v22 = vld [vmem:[#allocation5 + $0x76] sm:$0xf] }
 0x3f0   : > { %8250 = vmatprep.mubr.msk.bf16.mxu1 %vm8776_vm2, %v8775_v28  ;;  %v4495_v53 = vadd.f32 %v4482_v33, %v4446_v60 }
 0x3f2   : > { %4508 = vst.msk [vmem:[#allocation3 + $0x30] sm:$0xff] %vm349_vm3, %v4495_v53 }
 0x3f3   : > { %v4483_v63 = vld [vmem:[#allocation3 + $0x38] sm:$0xff] }
 0x3f4   : > { %v4496_v19 = vadd.f32 %v4483_v63, %v4449_v7 }
 0x3f6   : > { %8215 = vmatmul.mubr.msk.bf16.gmra.mxu0 %vm331_vm0, %v5271_v20  ;;  %4509 = vst.msk [vmem:[#allocation3 + $0x38] sm:$0xff] %vm349_vm3, %v4496_v19 }
 0x3f7   : > { %8251 = vmatmul.mubr.msk.bf16.gmra.mxu1 %vm331_vm0, %v5457_v35  ;;  %8218 = vmatprep.mubr.msk.bf16.mxu0 %vm8776_vm2, %v8775_v28 }
 0x3f8   : > { %8254 = vmatprep.mubr.msk.bf16.mxu1 %vm8776_vm2, %v8775_v28 }
 0x3fe   : > { %8219 = vmatmul.mubr.msk.bf16.gmra.mxu0 %vm331_vm0, %v5272_v55  ;;  %v4477_v55 = vld [vmem:[#allocation3 + $0x8] sm:$0xff] }
 0x3ff   : > { %8222 = vmatprep.mubr.msk.bf16.mxu0 %vm8776_vm2, %v8775_v28  ;;  %8255 = vmatmul.mubr.msk.bf16.gmra.mxu1 %vm331_vm0, %v5458_v32 }
 0x400   : > { %8258 = vmatprep.mubr.msk.bf16.mxu1 %vm8776_vm2, %v8775_v28 }
 0x402   : > { %v4294_v44 = vpop.f32.mrf.mxu0 }
 0x403   : > { %v4454_v45 = vpop.f32.mrf.mxu1  ;;  %v4295_v42 = vadd.f32 %v10596_v37, %v4294_v44  ;;  %v5631_v44 = vld [vmem:[#allocation5 + $0x46] sm:$0xff] }
 0x404   : > { %v8028_v40 = vpop.f32.mrf.mxu0 }
 0x405   : > { %v8060_v21 = vpop.f32.mrf.mxu1  ;;  %4324 = vst.msk [vmem:[#allocation3 + $0x40] sm:$0xff] %vm349_vm3, %v4295_v42 }
 0x406   : > { %v4297_v27 = vpop.f32.mrf.mxu0  ;;  %8223 = vmatmul.mubr.msk.bf16.gmra.mxu0 %vm331_vm0, %v5273_v59  ;;  %v5641_v59 = vpack.c.bf16 %v5632_v56, %v5631_v44 }
 0x407   : > { %v4457_v34 = vpop.f32.mrf.mxu1  ;;  %v4298_v30 = vadd.f32 %v10596_v37, %v4297_v27  ;;  %8226 = vmatprep.mubr.msk.bf16.mxu0 %vm8776_vm2, %v8775_v28  ;;  %8259 = vmatmul.mubr.msk.bf16.gmra.mxu1 %vm331_vm0, %v5459_v49 }
 0x408   : > { %v8029_v5 = vpop.f32.mrf.mxu0  ;;  %8302 = vmatprep.mubr.msk.bf16.mxu1 %vm8776_vm2, %v8775_v28 }
 0x409   : > { %v8061_v52 = vpop.f32.mrf.mxu1  ;;  %4325 = vst.msk [vmem:[#allocation3 + $0x48] sm:$0xff] %vm349_vm3, %v4298_v30  ;;  %v5634_v5 = vld [vmem:[#allocation5 + $0x5e] sm:$0xff] }
 0x40c   : > { %v4484_v16 = vld [vmem:[#allocation3 + $0x40] sm:$0xff] }
 0x40d   : > { %v4497_v47 = vadd.f32 %v4484_v16, %v4454_v45 }
 0x40e   : > { %8227 = vmatmul.mubr.msk.bf16.gmra.mxu0 %vm331_vm0, %v5274_v0 }
 0x40f   : > { %4510 = vst.msk [vmem:[#allocation3 + $0x40] sm:$0xff] %vm349_vm3, %v4497_v47  ;;  %8266 = vmatprep.mubr.msk.bf16.mxu0 %vm8776_vm2, %v8775_v28 }
 0x410   : > { %v4485_v43 = vld [vmem:[#allocation3 + $0x48] sm:$0xff] }
 0x411   : > { %v4498_v57 = vadd.f32 %v4485_v43, %v4457_v34  ;;  %v5642_v43 = vpack.c.bf16 %v5634_v5, %v5633_v2 }
 0x413   : > { %4511 = vst.msk [vmem:[#allocation3 + $0x48] sm:$0xff] %vm349_vm3, %v4498_v57 }
 0x416   : > { %v4302_v39 = vpop.f32.mrf.mxu0  ;;  %8267 = vmatmul.mubr.msk.bf16.vlgmr.msra.gmra.mxu0 %vm331_vm0, %v5638_v17  ;;  %v4663_v17 = vld [vmem:[#allocation3 + $0x10] sm:$0xff]  ;;  %v4669_v2 = vld [vmem:[#allocation3 + $0x40] sm:$0xff] }
 0x417   : > { %v4303_v14 = vadd.f32 %v10596_v37, %v4302_v39  ;;  %v4462_v9 = vpop.f32.mrf.mxu1  ;;  %8270 = vmatprep.mubr.msk.bf16.mxu0 %vm8776_vm2, %v8775_v28 }
 0x418   : > { %v8032_v11 = vpop.f32.mrf.mxu0 }
 0x419   : > { %4326 = vst.msk [vmem:[#allocation3 + $0x50] sm:$0xff] %vm349_vm3, %v4303_v14  ;;  %v8064_v15 = vpop.f32.mrf.mxu1  ;;  %v5636_v11 = vld [vmem:[#allocation5 + $0x6e] sm:$0xff] }
 0x41a   : > { %v4305_v26 = vpop.f32.mrf.mxu0 }
 0x41b   : > { %v4306_v25 = vadd.f32 %v10596_v37, %v4305_v26  ;;  %v4465_v4 = vpop.f32.mrf.mxu1 }
 0x41c   : > { %v8033_v24 = vpop.f32.mrf.mxu0 }
 0x41d   : > { %4327 = vst.msk [vmem:[#allocation3 + $0x58] sm:$0xff] %vm349_vm3, %v4306_v25  ;;  %v8065_v8 = vpop.f32.mrf.mxu1  ;;  %v4664_v25 = vld [vmem:[#allocation3 + $0x18] sm:$0xff] }
 0x41e   : > { %v4310_v23 = vpop.f32.mrf.mxu0  ;;  %8271 = vmatmul.mubr.msk.bf16.gmra.mxu0 %vm331_vm0, %v5639_v58 }
 0x41f   : > { %v4311_v60 = vadd.f32 %v10596_v37, %v4310_v23  ;;  %v4470_v12 = vpop.f32.mrf.mxu1  ;;  %8274 = vmatprep.mubr.msk.bf16.mxu0 %vm8776_vm2, %v8775_v28 }
 0x420   : > { %v4486_v41 = vld [vmem:[#allocation3 + $0x50] sm:$0xff]  ;;  %v8036_v1 = vpop.f32.mrf.mxu0 }
 0x421   : > { %v4499_v51 = vadd.f32 %v4486_v41, %v4462_v9  ;;  %4329 = vst.msk [vmem:[#allocation3 + $0x60] sm:$0xf] %vm4328_vm5, %v4311_v60  ;;  %v8068_v7 = vpop.f32.mrf.mxu1  ;;  %v5635_v9 = vld [vmem:[#allocation5 + $0x66] sm:$0xff]  ;;  %v4665_v41 = vld [vmem:[#allocation3 + $0x20] sm:$0xff] }
 0x422   : > { %v4313_v38 = vpop.f32.mrf.mxu0 }
 0x423   : > { %4512 = vst.msk [vmem:[#allocation3 + $0x50] sm:$0xff] %vm349_vm3, %v4499_v51  ;;  %v4473_v3 = vpop.f32.mrf.mxu1 }
 0x424   : > { %v4487_v31 = vld [vmem:[#allocation3 + $0x58] sm:$0xff]  ;;  %v8037_v10 = vpop.f32.mrf.mxu0 }
 0x425   : > { %v4500_v37 = vadd.f32 %v4487_v31, %v4465_v4  ;;  %v8069_v33 = vpop.f32.mrf.mxu1  ;;  %v5643_v4 = vpack.c.bf16 %v5636_v11, %v5635_v9 }
 0x426   : > { %v4422_v53 = vpop.f32.mrf.mxu0  ;;  %8275 = vmatmul.mubr.msk.bf16.gmra.mxu0 %vm331_vm0, %v5640_v6  ;;  %v5644_v33 = vpack.c.bf16 %v5637_v22, %v5637_v22 }
 0x427   : > { %4513 = vst.msk [vmem:[#allocation3 + $0x58] sm:$0xff] %vm349_vm3, %v4500_v37  ;;  %v4489_v29 = vadd.f32 %v4476_v48, %v4422_v53  ;;  %v4792_v63 = vpop.f32.mrf.mxu1  ;;  %8278 = vmatprep.mubr.msk.bf16.mxu0 %vm8776_vm2, %v8775_v28  ;;  %v4666_v37 = vld [vmem:[#allocation3 + $0x28] sm:$0xff] }
 0x428   : > { %v4488_v20 = vld [vmem:[#allocation3 + $0x60] sm:$0xf]  ;;  %v8044_v19 = vpop.f32.mrf.mxu0 }
 0x429   : > { %v4501_v35 = vadd.f32 %v4488_v20, %v4470_v12  ;;  %4502 = vst.msk [vmem:[#allocation3] sm:$0xff] %vm349_vm3, %v4489_v29  ;;  %v8108_v50 = vpop.f32.mrf.mxu1 }
 0x42a   : > { %v4425_v32 = vpop.f32.mrf.mxu0  ;;  %v4667_v50 = vld [vmem:[#allocation3 + $0x30] sm:$0xff] }
 0x42b   : > { %4514 = vst.msk [vmem:[#allocation3 + $0x60] sm:$0xf] %vm4328_vm5, %v4501_v35  ;;  %v4490_v13 = vadd.f32 %v4477_v55, %v4425_v32  ;;  %v4795_v36 = vpop.f32.mrf.mxu1 }
 0x42c   : > { %v8045_v45 = vpop.f32.mrf.mxu0 }
 0x42d   : > { %4503 = vst.msk [vmem:[#allocation3 + $0x8] sm:$0xff] %vm349_vm3, %v4490_v13  ;;  %v8109_v42 = vpop.f32.mrf.mxu1 }
 0x42e   : > { %v4607_v49 = vpop.f32.mrf.mxu0  ;;  %8279 = vmatmul.mubr.msk.bf16.gmra.mxu0 %vm331_vm0, %v5641_v59  ;;  %v4668_v59 = vld [vmem:[#allocation3 + $0x38] sm:$0xff] }
 0x42f   : > { %v4800_v40 = vpop.f32.mrf.mxu1  ;;  %8282 = vmatprep.mubr.msk.bf16.mxu0 %vm8776_vm2, %v8775_v28 }
 0x430   : > { %v4661_v21 = vld [vmem:[#allocation3] sm:$0xff]  ;;  %v8076_v27 = vpop.f32.mrf.mxu0 }
 0x431   : > { %v4674_v34 = vadd.f32 %v4661_v21, %v4607_v49  ;;  %v8112_v30 = vpop.f32.mrf.mxu1 }
 0x432   : > { %v4610_v52 = vpop.f32.mrf.mxu0 }
 0x433   : > { %4687 = vst.msk [vmem:[#allocation3] sm:$0xff] %vm349_vm3, %v4674_v34  ;;  %v4803_v0 = vpop.f32.mrf.mxu1 }
 0x434   : > { %v4662_v16 = vld [vmem:[#allocation3 + $0x8] sm:$0xff]  ;;  %v8077_v47 = vpop.f32.mrf.mxu0 }
 0x435   : > { %v4675_v57 = vadd.f32 %v4662_v16, %v4610_v52  ;;  %v8113_v61 = vpop.f32.mrf.mxu1 }
 0x436   : > { %v4615_v62 = vpop.f32.mrf.mxu0  ;;  %8283 = vmatmul.mubr.msk.bf16.gmra.mxu0 %vm331_vm0, %v5642_v43  ;;  %v4670_v61 = vld [vmem:[#allocation3 + $0x48] sm:$0xff] }
 0x437   : > { %4688 = vst.msk [vmem:[#allocation3 + $0x8] sm:$0xff] %vm349_vm3, %v4675_v57  ;;  %v4676_v39 = vadd.f32 %v4663_v17, %v4615_v62  ;;  %v4808_v14 = vpop.f32.mrf.mxu1  ;;  %8286 = vmatprep.mubr.msk.bf16.mxu0 %vm8776_vm2, %v8775_v28 }
 0x438   : > { %v8080_v15 = vpop.f32.mrf.mxu0 }
 0x439   : > { %4689 = vst.msk [vmem:[#allocation3 + $0x10] sm:$0xff] %vm349_vm3, %v4676_v39  ;;  %v8116_v46 = vpop.f32.mrf.mxu1 }
 0x43a   : > { %v4618_v26 = vpop.f32.mrf.mxu0  ;;  %v4846_v54 = vld [vmem:[#allocation3] sm:$0xff]  ;;  %v4671_v46 = vld [vmem:[#allocation3 + $0x50] sm:$0xff] }
 0x43b   : > { %v4677_v24 = vadd.f32 %v4664_v25, %v4618_v26  ;;  %v4811_v58 = vpop.f32.mrf.mxu1  ;;  %v4859_v8 = vadd.f32 %v4846_v54, %v4792_v63 }
 0x43c   : > { %v8081_v23 = vpop.f32.mrf.mxu0 }
 0x43d   : > { %4690 = vst.msk [vmem:[#allocation3 + $0x18] sm:$0xff] %vm349_vm3, %v4677_v24  ;;  %v8117_v60 = vpop.f32.mrf.mxu1  ;;  %4872 = vst.msk [vmem:[#allocation3] sm:$0xff] %vm349_vm3, %v4859_v8 }
 0x43e   : > { %v4623_v12 = vpop.f32.mrf.mxu0  ;;  %8287 = vmatmul.mubr.msk.bf16.gmra.mxu0 %vm331_vm0, %v5643_v4  ;;  %v4847_v1 = vld [vmem:[#allocation3 + $0x8] sm:$0xff]  ;;  %v8621_v4 = vld [vmem:[%s11326_s5 + $0x18] sm:$0xff]   ;;  %v4672_v60 = vld [vmem:[#allocation3 + $0x58] sm:$0xff] }
 0x43f   : > { %v4678_v51 = vadd.f32 %v4665_v41, %v4623_v12  ;;  %v4816_v7 = vpop.f32.mrf.mxu1  ;;  %8290 = vmatprep.mubr.msk.bf16.mxu0 %vm8776_vm2, %v8775_v28  ;;  %v4860_v38 = vadd.f32 %v4847_v1, %v4795_v36  ;;  %8295 = vmatpush3.bf16.msra.mxu1 %v8621_v4 }
 0x440   : > { %v8084_v3 = vpop.f32.mrf.mxu0  ;;  %v4848_v18 = vld [vmem:[#allocation3 + $0x10] sm:$0xff]  ;;  %8296 = vmatprep.subr.bf16.mxu1 %v8775_v28 }
 0x441   : > { %4691 = vst.msk [vmem:[#allocation3 + $0x20] sm:$0xff] %vm349_vm3, %v4678_v51  ;;  %v8120_v31 = vpop.f32.mrf.mxu1  ;;  %4873 = vst.msk [vmem:[#allocation3 + $0x8] sm:$0xff] %vm349_vm3, %v4860_v38  ;;  %v4861_v10 = vadd.f32 %v4848_v18, %v4800_v40  ;;  %v4673_v3 = vld [vmem:[#allocation3 + $0x60] sm:$0xf] }
 0x442   : > { %v4626_v6 = vpop.f32.mrf.mxu0 }
 0x443   : > { %v4679_v53 = vadd.f32 %v4666_v37, %v4626_v6  ;;  %v4819_v48 = vpop.f32.mrf.mxu1  ;;  %4874 = vst.msk [vmem:[#allocation3 + $0x10] sm:$0xff] %vm349_vm3, %v4861_v10 }
 0x444   : > { %v8085_v29 = vpop.f32.mrf.mxu0  ;;  %v4849_v63 = vld [vmem:[#allocation3 + $0x18] sm:$0xff] }
 0x445   : > { %4692 = vst.msk [vmem:[#allocation3 + $0x28] sm:$0xff] %vm349_vm3, %v4679_v53  ;;  %v8121_v20 = vpop.f32.mrf.mxu1  ;;  %v4862_v19 = vadd.f32 %v4849_v63, %v4803_v0 }
 0x446   : > { %v4631_v35 = vpop.f32.mrf.mxu0  ;;  %8291 = vmatmul.mubr.msk.bf16.gmra.mxu0 %vm331_vm0, %v5644_v33 }
 0x447   : > { %v4680_v56 = vadd.f32 %v4667_v50, %v4631_v35  ;;  %v4824_v32 = vpop.f32.mrf.mxu1  ;;  %4875 = vst.msk [vmem:[#allocation3 + $0x18] sm:$0xff] %vm349_vm3, %v4862_v19  ;;  %8362 = vmatprep.mubr.msk.bf16.mxu0 %vm8776_vm2, %v8775_v28  ;;  %v5031_v50 = vld [vmem:[#allocation3] sm:$0xff] }
 0x448   : > { %v8088_v55 = vpop.f32.mrf.mxu0  ;;  %v4850_v13 = vld [vmem:[#allocation3 + $0x20] sm:$0xff] }
 0x449   : > { %4693 = vst.msk [vmem:[#allocation3 + $0x30] sm:$0xff] %vm349_vm3, %v4680_v56  ;;  %v8124_v36 = vpop.f32.mrf.mxu1  ;;  %v4863_v44 = vadd.f32 %v4850_v13, %v4808_v14 }
 0x44a   : > { %v4634_v45 = vpop.f32.mrf.mxu0 }
 0x44b   : > { %v4681_v42 = vadd.f32 %v4668_v59, %v4634_v45  ;;  %v4827_v49 = vpop.f32.mrf.mxu1  ;;  %4876 = vst.msk [vmem:[#allocation3 + $0x20] sm:$0xff] %vm349_vm3, %v4863_v44  ;;  %v5032_v59 = vld [vmem:[#allocation3 + $0x8] sm:$0xff] }
 0x44c   : > { %v8089_v40 = vpop.f32.mrf.mxu0  ;;  %v4851_v21 = vld [vmem:[#allocation3 + $0x28] sm:$0xff] }
 0x44d   : > { %4694 = vst.msk [vmem:[#allocation3 + $0x38] sm:$0xff] %vm349_vm3, %v4681_v42  ;;  %v8125_v27 = vpop.f32.mrf.mxu1  ;;  %v4864_v34 = vadd.f32 %v4851_v21, %v4811_v58 }
 0x44e   : > { %v4639_v30 = vpop.f32.mrf.mxu0 }
 0x44f   : > { %v4682_v5 = vadd.f32 %v4669_v2, %v4639_v30  ;;  %v4832_v52 = vpop.f32.mrf.mxu1  ;;  %4877 = vst.msk [vmem:[#allocation3 + $0x28] sm:$0xff] %vm349_vm3, %v4864_v34  ;;  %v5033_v34 = vld [vmem:[#allocation3 + $0x10] sm:$0xff] }
 0x450   : > { %v8092_v0 = vpop.f32.mrf.mxu0  ;;  %v4852_v16 = vld [vmem:[#allocation3 + $0x30] sm:$0xff] }
 0x451   : > { %4695 = vst.msk [vmem:[#allocation3 + $0x40] sm:$0xff] %vm349_vm3, %v4682_v5  ;;  %v8128_v47 = vpop.f32.mrf.mxu1  ;;  %v4865_v43 = vadd.f32 %v4852_v16, %v4816_v7 }
 0x452   : > { %v4642_v57 = vpop.f32.mrf.mxu0 }
 0x453   : > { %v4683_v62 = vadd.f32 %v4670_v61, %v4642_v57  ;;  %v4835_v17 = vpop.f32.mrf.mxu1  ;;  %4878 = vst.msk [vmem:[#allocation3 + $0x30] sm:$0xff] %vm349_vm3, %v4865_v43  ;;  %v5034_v43 = vld [vmem:[#allocation3 + $0x18] sm:$0xff] }
 0x454   : > { %v8093_v39 = vpop.f32.mrf.mxu0  ;;  %v4853_v14 = vld [vmem:[#allocation3 + $0x38] sm:$0xff] }
 0x455   : > { %4696 = vst.msk [vmem:[#allocation3 + $0x48] sm:$0xff] %vm349_vm3, %v4683_v62  ;;  %v8129_v9 = vpop.f32.mrf.mxu1  ;;  %v4866_v11 = vadd.f32 %v4853_v14, %v4819_v48  ;;  %v8622_v62 = vld [vmem:[%s11326_s5 + $0x10] sm:$0xff]  }
 0x456   : > { %v4647_v15 = vpop.f32.mrf.mxu0  ;;  %8297 = vmatpush3.bf16.msra.mxu1 %v8622_v62 }
 0x457   : > { %v4684_v26 = vadd.f32 %v4671_v46, %v4647_v15  ;;  %v4840_v25 = vpop.f32.mrf.mxu1  ;;  %4879 = vst.msk [vmem:[#allocation3 + $0x38] sm:$0xff] %vm349_vm3, %v4866_v11  ;;  %v5035_v15 = vld [vmem:[#allocation3 + $0x20] sm:$0xff]  ;;  %8298 = vmatprep.subr.bf16.mxu1 %v8775_v28 }
 0x458   : > { %v8096_v54 = vpop.f32.mrf.mxu0  ;;  %v4854_v24 = vld [vmem:[#allocation3 + $0x40] sm:$0xff] }
 0x459   : > { %4697 = vst.msk [vmem:[#allocation3 + $0x50] sm:$0xff] %vm349_vm3, %v4684_v26  ;;  %v8132_v58 = vpop.f32.mrf.mxu1  ;;  %v4867_v8 = vadd.f32 %v4854_v24, %v4824_v32 }
 0x45a   : > { %v4650_v23 = vpop.f32.mrf.mxu0  ;;  %v8623_v58 = vld [vmem:[%s11326_s5 + $0x8] sm:$0xff]  }
 0x45b   : > { %v4685_v12 = vadd.f32 %v4672_v60, %v4650_v23  ;;  %v4843_v41 = vpop.f32.mrf.mxu1  ;;  %4880 = vst.msk [vmem:[#allocation3 + $0x40] sm:$0xff] %vm349_vm3, %v4867_v8  ;;  %v5036_v23 = vld [vmem:[#allocation3 + $0x28] sm:$0xff]  ;;  %8299 = vmatpush3.bf16.msra.mxu1 %v8623_v58 }
 0x45c   : > { %v8097_v1 = vpop.f32.mrf.mxu0  ;;  %v4855_v51 = vld [vmem:[#allocation3 + $0x48] sm:$0xff]  ;;  %8300 = vmatprep.subr.bf16.mxu1 %v8775_v28 }
 0x45d   : > { %4698 = vst.msk [vmem:[#allocation3 + $0x58] sm:$0xff] %vm349_vm3, %v4685_v12  ;;  %v8133_v7 = vpop.f32.mrf.mxu1  ;;  %v4868_v22 = vadd.f32 %v4855_v51, %v4827_v49 }
 0x45e   : > { %v4655_v38 = vpop.f32.mrf.mxu0 }
 0x45f   : > { %v4686_v18 = vadd.f32 %v4673_v3, %v4655_v38  ;;  %v5162_v31 = vpop.f32.mrf.mxu1  ;;  %4881 = vst.msk [vmem:[#allocation3 + $0x48] sm:$0xff] %vm349_vm3, %v4868_v22  ;;  %v8624_v22 = vld [vmem:[%s11326_s5] sm:$0xff]   ;;  %v8625_v38 = vld [vmem:[%s11326_s5 + $0x78] sm:$0xff]  }
 0x460   : > { %v8100_v10 = vpop.f32.mrf.mxu0  ;;  %v4856_v6 = vld [vmem:[#allocation3 + $0x50] sm:$0xff]  ;;  %8301 = vmatpush3.bf16.msra.mxu1 %v8624_v22  ;;  %8355 = vmatpush3.bf16.msra.mxu0 %v8625_v38 }
 0x461   : > { %4699 = vst.msk [vmem:[#allocation3 + $0x60] sm:$0xf] %vm4328_vm5, %v4686_v18  ;;  %v8172_v37 = vpop.f32.mrf.mxu1  ;;  %v4869_v33 = vadd.f32 %v4856_v6, %v4832_v52  ;;  %v5037_v18 = vld [vmem:[#allocation3 + $0x30] sm:$0xff]  ;;  %8356 = vmatprep.subr.bf16.mxu0 %v8775_v28  ;;  %8314 = vmatprep.subr.bf16.mxu1 %v8775_v28 }
 0x462   : > { %v4658_v53 = vpop.f32.mrf.mxu0 }
 0x463   : > { %v5165_v48 = vpop.f32.mrf.mxu1  ;;  %4882 = vst.msk [vmem:[#allocation3 + $0x50] sm:$0xff] %vm349_vm3, %v4869_v33 }
 0x464   : > { %v8101_v29 = vpop.f32.mrf.mxu0  ;;  %v4857_v63 = vld [vmem:[#allocation3 + $0x58] sm:$0xff] }
 0x465   : > { %v8173_v20 = vpop.f32.mrf.mxu1  ;;  %v4870_v19 = vadd.f32 %v4857_v63, %v4835_v17  ;;  %v5038_v63 = vld [vmem:[#allocation3 + $0x38] sm:$0xff] }
 0x466   : > { %v4977_v35 = vpop.f32.mrf.mxu0 }
 0x467   : > { %v5044_v56 = vadd.f32 %v5031_v50, %v4977_v35  ;;  %v5170_v32 = vpop.f32.mrf.mxu1  ;;  %4883 = vst.msk [vmem:[#allocation3 + $0x58] sm:$0xff] %vm349_vm3, %v4870_v19 }
 0x468   : > { %v4858_v55 = vld [vmem:[#allocation3 + $0x60] sm:$0xf]  ;;  %v8140_v13 = vpop.f32.mrf.mxu0 }
 0x469   : > { %v4871_v36 = vadd.f32 %v4858_v55, %v4840_v25  ;;  %5057 = vst.msk [vmem:[#allocation3] sm:$0xff] %vm349_vm3, %v5044_v56  ;;  %v8176_v44 = vpop.f32.mrf.mxu1  ;;  %v8627_v55 = vld [vmem:[%s11326_s5 + $0x68] sm:$0xff]  }
 0x46a   : > { %v4980_v45 = vpop.f32.mrf.mxu0 }
 0x46b   : > { %4884 = vst.msk [vmem:[#allocation3 + $0x60] sm:$0xf] %vm4328_vm5, %v4871_v36  ;;  %v5045_v42 = vadd.f32 %v5032_v59, %v4980_v45  ;;  %v5173_v49 = vpop.f32.mrf.mxu1  ;;  %v5039_v36 = vld [vmem:[#allocation3 + $0x40] sm:$0xff] }
 0x46c   : > { %v8141_v40 = vpop.f32.mrf.mxu0 }
 0x46d   : > { %5058 = vst.msk [vmem:[#allocation3 + $0x8] sm:$0xff] %vm349_vm3, %v5045_v42  ;;  %v8177_v21 = vpop.f32.mrf.mxu1 }
 0x46e   : > { %v4985_v27 = vpop.f32.mrf.mxu0  ;;  %v8628_v21 = vld [vmem:[%s11326_s5 + $0x60] sm:$0xff]  }
 0x46f   : > { %v5046_v30 = vadd.f32 %v5033_v34, %v4985_v27  ;;  %v5178_v2 = vpop.f32.mrf.mxu1  ;;  %v5040_v34 = vld [vmem:[#allocation3 + $0x48] sm:$0xff] }
 0x470   : > { %v8144_v5 = vpop.f32.mrf.mxu0  ;;  %v5216_v52 = vld [vmem:[#allocation3] sm:$0xff] }
 0x471   : > { %5059 = vst.msk [vmem:[#allocation3 + $0x10] sm:$0xff] %vm349_vm3, %v5046_v30  ;;  %v8180_v0 = vpop.f32.mrf.mxu1  ;;  %v5229_v16 = vadd.f32 %v5216_v52, %v5162_v31 }
 0x472   : > { %v4988_v47 = vpop.f32.mrf.mxu0  ;;  %v5043_v58 = vld [vmem:[#allocation3 + $0x60] sm:$0xf] }
 0x473   : > { %v5047_v57 = vadd.f32 %v5034_v43, %v4988_v47  ;;  %v5181_v61 = vpop.f32.mrf.mxu1  ;;  %5242 = vst.msk [vmem:[#allocation3] sm:$0xff] %vm349_vm3, %v5229_v16  ;;  %v5041_v43 = vld [vmem:[#allocation3 + $0x50] sm:$0xff] }
 0x474   : > { %v8145_v17 = vpop.f32.mrf.mxu0  ;;  %v5217_v39 = vld [vmem:[#allocation3 + $0x8] sm:$0xff] }
 0x475   : > { %5060 = vst.msk [vmem:[#allocation3 + $0x18] sm:$0xff] %vm349_vm3, %v5047_v57  ;;  %v8181_v14 = vpop.f32.mrf.mxu1  ;;  %v5230_v9 = vadd.f32 %v5217_v39, %v5165_v48  ;;  %v8626_v48 = vld [vmem:[%s11326_s5 + $0x70] sm:$0xff]  }
 0x476   : > { %v4993_v11 = vpop.f32.mrf.mxu0  ;;  %8357 = vmatpush3.bf16.msra.mxu0 %v8626_v48 }
 0x477   : > { %v5048_v46 = vadd.f32 %v5035_v15, %v4993_v11  ;;  %v5186_v26 = vpop.f32.mrf.mxu1  ;;  %5243 = vst.msk [vmem:[#allocation3 + $0x8] sm:$0xff] %vm349_vm3, %v5230_v9  ;;  %8358 = vmatprep.subr.bf16.mxu0 %v8775_v28  ;;  %v5042_v11 = vld [vmem:[#allocation3 + $0x58] sm:$0xff] }
 0x478   : > { %v8148_v25 = vpop.f32.mrf.mxu0  ;;  %v5218_v4 = vld [vmem:[#allocation3 + $0x10] sm:$0xff] }
 0x479   : > { %5061 = vst.msk [vmem:[#allocation3 + $0x20] sm:$0xff] %vm349_vm3, %v5048_v46  ;;  %v8184_v54 = vpop.f32.mrf.mxu1  ;;  %v5231_v24 = vadd.f32 %v5218_v4, %v5170_v32 }
 0x47a   : > { %v4996_v8 = vpop.f32.mrf.mxu0  ;;  %8359 = vmatpush3.bf16.msra.mxu0 %v8627_v55 }
 0x47b   : > { %v5049_v60 = vadd.f32 %v5036_v23, %v4996_v8  ;;  %v10782_v12 = vpop.f32.mrf.mxu1  ;;  %5244 = vst.msk [vmem:[#allocation3 + $0x10] sm:$0xff] %vm349_vm3, %v5231_v24  ;;  %8360 = vmatprep.subr.bf16.mxu0 %v8775_v28 }
 0x47c   : > { %v8149_v41 = vpop.f32.mrf.mxu0  ;;  %v5219_v1 = vld [vmem:[#allocation3 + $0x18] sm:$0xff] }
 0x47d   : > { %5062 = vst.msk [vmem:[#allocation3 + $0x28] sm:$0xff] %vm349_vm3, %v5049_v60  ;;  %v8185_v51 = vpop.f32.mrf.mxu1  ;;  %v5232_v7 = vadd.f32 %v5219_v1, %v5173_v49 }
 0x47e   : > { %v5001_v3 = vpop.f32.mrf.mxu0  ;;  %8361 = vmatpush3.bf16.msra.mxu0 %v8628_v21 }
 0x47f   : > { %v5050_v31 = vadd.f32 %v5037_v18, %v5001_v3  ;;  %v5194_v10 = vpop.f32.mrf.mxu1  ;;  %5245 = vst.msk [vmem:[#allocation3 + $0x18] sm:$0xff] %vm349_vm3, %v5232_v7  ;;  %8394 = vmatprep.subr.bf16.mxu0 %v8775_v28 }
 0x480   : > { %v8152_v6 = vpop.f32.mrf.mxu0  ;;  %v5220_v37 = vld [vmem:[#allocation3 + $0x20] sm:$0xff] }
 0x481   : > { %5063 = vst.msk [vmem:[#allocation3 + $0x30] sm:$0xff] %vm349_vm3, %v5050_v31  ;;  %v8188_v33 = vpop.f32.mrf.mxu1  ;;  %v5233_v53 = vadd.f32 %v5220_v37, %v5178_v2 }
 0x482   : > { %v5004_v29 = vpop.f32.mrf.mxu0  ;;  %v5403_v55 = vld [vmem:[#allocation3 + $0x10] sm:$0xff] }
 0x483   : > { %v5051_v20 = vadd.f32 %v5038_v63, %v5004_v29  ;;  %v5197_v19 = vpop.f32.mrf.mxu1  ;;  %5246 = vst.msk [vmem:[#allocation3 + $0x20] sm:$0xff] %vm349_vm3, %v5233_v53 }
 0x484   : > { %v8153_v35 = vpop.f32.mrf.mxu0  ;;  %v5221_v50 = vld [vmem:[#allocation3 + $0x28] sm:$0xff] }
 0x485   : > { %5064 = vst.msk [vmem:[#allocation3 + $0x38] sm:$0xff] %vm349_vm3, %v5051_v20  ;;  %v8189_v56 = vpop.f32.mrf.mxu1  ;;  %v5234_v32 = vadd.f32 %v5221_v50, %v5181_v61  ;;  %v5402_v20 = vld [vmem:[#allocation3 + $0x8] sm:$0xff] }
 0x486   : > { %v5009_v13 = vpop.f32.mrf.mxu0 }
 0x487   : > { %v5052_v44 = vadd.f32 %v5039_v36, %v5009_v13  ;;  %v5202_v45 = vpop.f32.mrf.mxu1  ;;  %5247 = vst.msk [vmem:[#allocation3 + $0x28] sm:$0xff] %vm349_vm3, %v5234_v32 }
 0x488   : > { %v8156_v59 = vpop.f32.mrf.mxu0  ;;  %v5222_v42 = vld [vmem:[#allocation3 + $0x30] sm:$0xff] }
 0x489   : > { %5065 = vst.msk [vmem:[#allocation3 + $0x40] sm:$0xff] %vm349_vm3, %v5052_v44  ;;  %v8192_v49 = vpop.f32.mrf.mxu1  ;;  %v5235_v40 = vadd.f32 %v5222_v42, %v5186_v26 }
 0x48a   : > { %v5012_v27 = vpop.f32.mrf.mxu0 }
 0x48b   : > { %v5053_v30 = vadd.f32 %v5040_v34, %v5012_v27  ;;  %v5205_v2 = vpop.f32.mrf.mxu1  ;;  %5248 = vst.msk [vmem:[#allocation3 + $0x30] sm:$0xff] %vm349_vm3, %v5235_v40  ;;  %v5404_v40 = vld [vmem:[#allocation3 + $0x18] sm:$0xff] }
 0x48c   : > { %v8157_v5 = vpop.f32.mrf.mxu0  ;;  %v5223_v52 = vld [vmem:[#allocation3 + $0x38] sm:$0xff] }
 0x48d   : > { %5066 = vst.msk [vmem:[#allocation3 + $0x48] sm:$0xff] %vm349_vm3, %v5053_v30  ;;  %v8193_v0 = vpop.f32.mrf.mxu1  ;;  %v5236_v16 = vadd.f32 %v5223_v52, %v10782_v12 }
 0x48e   : > { %v5017_v47 = vpop.f32.mrf.mxu0  ;;  %v5405_v0 = vld [vmem:[#allocation3 + $0x20] sm:$0xff] }
 0x48f   : > { %v5054_v57 = vadd.f32 %v5041_v43, %v5017_v47  ;;  %v5210_v61 = vpop.f32.mrf.mxu1  ;;  %5249 = vst.msk [vmem:[#allocation3 + $0x38] sm:$0xff] %vm349_vm3, %v5236_v16 }
 0x490   : > { %v8160_v62 = vpop.f32.mrf.mxu0  ;;  %v5224_v17 = vld [vmem:[#allocation3 + $0x40] sm:$0xff] }
 0x491   : > { %5067 = vst.msk [vmem:[#allocation3 + $0x50] sm:$0xff] %vm349_vm3, %v5054_v57  ;;  %v8196_v39 = vpop.f32.mrf.mxu1  ;;  %v5237_v14 = vadd.f32 %v5224_v17, %v5194_v10  ;;  %v5401_v10 = vld [vmem:[#allocation3] sm:$0xff] }
 0x492   : > { %v5020_v9 = vpop.f32.mrf.mxu0  ;;  %v5406_v39 = vld [vmem:[#allocation3 + $0x28] sm:$0xff] }
 0x493   : > { %v5055_v15 = vadd.f32 %v5042_v11, %v5020_v9  ;;  %v5213_v46 = vpop.f32.mrf.mxu1  ;;  %5250 = vst.msk [vmem:[#allocation3 + $0x40] sm:$0xff] %vm349_vm3, %v5237_v14 }
 0x494   : > { %v8161_v26 = vpop.f32.mrf.mxu0  ;;  %v5225_v25 = vld [vmem:[#allocation3 + $0x48] sm:$0xff] }
 0x495   : > { %5068 = vst.msk [vmem:[#allocation3 + $0x58] sm:$0xff] %vm349_vm3, %v5055_v15  ;;  %v8197_v4 = vpop.f32.mrf.mxu1  ;;  %v5238_v54 = vadd.f32 %v5225_v25, %v5197_v19 }
 0x496   : > { %v5025_v24 = vpop.f32.mrf.mxu0  ;;  %v5407_v4 = vld [vmem:[#allocation3 + $0x30] sm:$0xff] }
 0x497   : > { %v5056_v8 = vadd.f32 %v5043_v58, %v5025_v24  ;;  %v5532_v23 = vpop.f32.mrf.mxu1  ;;  %5251 = vst.msk [vmem:[#allocation3 + $0x48] sm:$0xff] %vm349_vm3, %v5238_v54 }
 0x498   : > { %v8164_v60 = vpop.f32.mrf.mxu0  ;;  %v5226_v12 = vld [vmem:[#allocation3 + $0x50] sm:$0xff] }
 0x499   : > { %5069 = vst.msk [vmem:[#allocation3 + $0x60] sm:$0xf] %vm4328_vm5, %v5056_v8  ;;  %v8236_v41 = vpop.f32.mrf.mxu1  ;;  %v5239_v1 = vadd.f32 %v5226_v12, %v5202_v45 }
 0x49a   : > { %v5028_v51 = vpop.f32.mrf.mxu0  ;;  %v5408_v41 = vld [vmem:[#allocation3 + $0x38] sm:$0xff] }
 0x49b   : > { %v5535_v7 = vpop.f32.mrf.mxu1  ;;  %5252 = vst.msk [vmem:[#allocation3 + $0x50] sm:$0xff] %vm349_vm3, %v5239_v1 }
 0x49c   : > { %v8165_v22 = vpop.f32.mrf.mxu0  ;;  %v5227_v38 = vld [vmem:[#allocation3 + $0x58] sm:$0xff] }
 0x49d   : > { %v8237_v3 = vpop.f32.mrf.mxu1  ;;  %v5240_v18 = vadd.f32 %v5227_v38, %v5205_v2 }
 0x49e   : > { %v5347_v31 = vpop.f32.mrf.mxu0 }
 0x49f   : > { %v5414_v6 = vadd.f32 %v5401_v10, %v5347_v31  ;;  %v5540_v37 = vpop.f32.mrf.mxu1  ;;  %5253 = vst.msk [vmem:[#allocation3 + $0x58] sm:$0xff] %vm349_vm3, %v5240_v18  ;;  %v5409_v31 = vld [vmem:[#allocation3 + $0x40] sm:$0xff] }
 0x4a0   : > { %v5228_v33 = vld [vmem:[#allocation3 + $0x60] sm:$0xf]  ;;  %v8204_v53 = vpop.f32.mrf.mxu0 }
 0x4a1   : > { %v5241_v48 = vadd.f32 %v5228_v33, %v5210_v61  ;;  %5427 = vst.msk [vmem:[#allocation3] sm:$0xff] %vm349_vm3, %v5414_v6  ;;  %v8240_v29 = vpop.f32.mrf.mxu1 }
 0x4a2   : > { %v5350_v63 = vpop.f32.mrf.mxu0 }
 0x4a3   : > { %5254 = vst.msk [vmem:[#allocation3 + $0x60] sm:$0xf] %vm4328_vm5, %v5241_v48  ;;  %v5415_v19 = vadd.f32 %v5402_v20, %v5350_v63  ;;  %v5543_v35 = vpop.f32.mrf.mxu1  ;;  %v5410_v63 = vld [vmem:[#allocation3 + $0x48] sm:$0xff] }
 0x4a4   : > { %v8205_v50 = vpop.f32.mrf.mxu0 }
 0x4a5   : > { %5428 = vst.msk [vmem:[#allocation3 + $0x8] sm:$0xff] %vm349_vm3, %v5415_v19  ;;  %v8241_v56 = vpop.f32.mrf.mxu1 }
 0x4a6   : > { %v5355_v32 = vpop.f32.mrf.mxu0 }
 0x4a7   : > { %v5416_v13 = vadd.f32 %v5403_v55, %v5355_v32  ;;  %v5548_v36 = vpop.f32.mrf.mxu1 }
 0x4a8   : > { %v8208_v44 = vpop.f32.mrf.mxu0  ;;  %v5586_v45 = vld [vmem:[#allocation3] sm:$0xff] }
 0x4a9   : > { %5429 = vst.msk [vmem:[#allocation3 + $0x10] sm:$0xff] %vm349_vm3, %v5416_v13  ;;  %v8244_v59 = vpop.f32.mrf.mxu1  ;;  %v5599_v42 = vadd.f32 %v5586_v45, %v5532_v23  ;;  %v5411_v13 = vld [vmem:[#allocation3 + $0x50] sm:$0xff] }
 0x4aa   : > { %v5358_v49 = vpop.f32.mrf.mxu0 }
 0x4ab   : > { %v5417_v21 = vadd.f32 %v5404_v40, %v5358_v49  ;;  %v5551_v27 = vpop.f32.mrf.mxu1  ;;  %5612 = vst.msk [vmem:[#allocation3] sm:$0xff] %vm349_vm3, %v5599_v42 }
 0x4ac   : > { %v8209_v34 = vpop.f32.mrf.mxu0  ;;  %v5587_v30 = vld [vmem:[#allocation3 + $0x8] sm:$0xff] }
 0x4ad   : > { %5430 = vst.msk [vmem:[#allocation3 + $0x18] sm:$0xff] %vm349_vm3, %v5417_v21  ;;  %v8245_v2 = vpop.f32.mrf.mxu1  ;;  %v5600_v5 = vadd.f32 %v5587_v30, %v5535_v7  ;;  %v5412_v21 = vld [vmem:[#allocation3 + $0x58] sm:$0xff] }
 0x4ae   : > { %v5363_v52 = vpop.f32.mrf.mxu0 }
 0x4af   : > { %v5418_v16 = vadd.f32 %v5405_v0, %v5363_v52  ;;  %v5556_v47 = vpop.f32.mrf.mxu1  ;;  %5613 = vst.msk [vmem:[#allocation3 + $0x8] sm:$0xff] %vm349_vm3, %v5600_v5 }
 0x4b0   : > { %v8212_v43 = vpop.f32.mrf.mxu0  ;;  %v5588_v57 = vld [vmem:[#allocation3 + $0x10] sm:$0xff] }
 0x4b1   : > { %5431 = vst.msk [vmem:[#allocation3 + $0x20] sm:$0xff] %vm349_vm3, %v5418_v16  ;;  %v8248_v61 = vpop.f32.mrf.mxu1  ;;  %v5601_v62 = vadd.f32 %v5588_v57, %v5540_v37  ;;  %v5413_v16 = vld [vmem:[#allocation3 + $0x60] sm:$0xf] }
 0x4b2   : > { %v5366_v17 = vpop.f32.mrf.mxu0 }
 0x4b3   : > { %v5419_v14 = vadd.f32 %v5406_v39, %v5366_v17  ;;  %v5559_v9 = vpop.f32.mrf.mxu1  ;;  %5614 = vst.msk [vmem:[#allocation3 + $0x10] sm:$0xff] %vm349_vm3, %v5601_v62 }
 0x4b4   : > { %v8213_v11 = vpop.f32.mrf.mxu0  ;;  %v5589_v15 = vld [vmem:[#allocation3 + $0x18] sm:$0xff] }
 0x4b5   : > { %5432 = vst.msk [vmem:[#allocation3 + $0x28] sm:$0xff] %vm349_vm3, %v5419_v14  ;;  %v8249_v46 = vpop.f32.mrf.mxu1  ;;  %v5602_v26 = vadd.f32 %v5589_v15, %v5543_v35  ;;  %v5771_v11 = vld [vmem:[#allocation3] sm:$0xff] }
 0x4b6   : > { %v5371_v25 = vpop.f32.mrf.mxu0 }
 0x4b7   : > { %v5420_v54 = vadd.f32 %v5407_v4, %v5371_v25  ;;  %v5564_v24 = vpop.f32.mrf.mxu1  ;;  %5615 = vst.msk [vmem:[#allocation3 + $0x18] sm:$0xff] %vm349_vm3, %v5602_v26 }
 0x4b8   : > { %v8216_v58 = vpop.f32.mrf.mxu0  ;;  %v5590_v8 = vld [vmem:[#allocation3 + $0x20] sm:$0xff] }
 0x4b9   : > { %5433 = vst.msk [vmem:[#allocation3 + $0x30] sm:$0xff] %vm349_vm3, %v5420_v54  ;;  %v8252_v23 = vpop.f32.mrf.mxu1  ;;  %v5603_v60 = vadd.f32 %v5590_v8, %v5548_v36  ;;  %v5772_v54 = vld [vmem:[#allocation3 + $0x8] sm:$0xff] }
 0x4ba   : > { %v5374_v12 = vpop.f32.mrf.mxu0  ;;  %v5773_v23 = vld [vmem:[#allocation3 + $0x10] sm:$0xff] }
 0x4bb   : > { %v5421_v1 = vadd.f32 %v5408_v41, %v5374_v12  ;;  %v5567_v51 = vpop.f32.mrf.mxu1  ;;  %5616 = vst.msk [vmem:[#allocation3 + $0x20] sm:$0xff] %vm349_vm3, %v5603_v60 }
 0x4bc   : > { %v8217_v7 = vpop.f32.mrf.mxu0  ;;  %v5591_v22 = vld [vmem:[#allocation3 + $0x28] sm:$0xff] }
 0x4bd   : > { %5434 = vst.msk [vmem:[#allocation3 + $0x38] sm:$0xff] %vm349_vm3, %v5421_v1  ;;  %v8253_v38 = vpop.f32.mrf.mxu1  ;;  %v5604_v3 = vadd.f32 %v5591_v22, %v5551_v27 }
 0x4be   : > { %v5379_v18 = vpop.f32.mrf.mxu0  ;;  %v5774_v1 = vld [vmem:[#allocation3 + $0x18] sm:$0xff] }
 0x4bf   : > { %v5422_v10 = vadd.f32 %v5409_v31, %v5379_v18  ;;  %v5572_v6 = vpop.f32.mrf.mxu1  ;;  %5617 = vst.msk [vmem:[#allocation3 + $0x28] sm:$0xff] %vm349_vm3, %v5604_v3 }
 0x4c0   : > { %v8220_v37 = vpop.f32.mrf.mxu0  ;;  %v5592_v33 = vld [vmem:[#allocation3 + $0x30] sm:$0xff] }
 0x4c1   : > { %5435 = vst.msk [vmem:[#allocation3 + $0x40] sm:$0xff] %vm349_vm3, %v5422_v10  ;;  %v8256_v53 = vpop.f32.mrf.mxu1  ;;  %v5605_v48 = vadd.f32 %v5592_v33, %v5556_v47 }
 0x4c2   : > { %v5382_v29 = vpop.f32.mrf.mxu0  ;;  %v5775_v38 = vld [vmem:[#allocation3 + $0x20] sm:$0xff] }
 0x4c3   : > { %v5423_v20 = vadd.f32 %v5410_v63, %v5382_v29  ;;  %v5575_v19 = vpop.f32.mrf.mxu1  ;;  %5618 = vst.msk [vmem:[#allocation3 + $0x30] sm:$0xff] %vm349_vm3, %v5605_v48 }
 0x4c4   : > { %v8221_v35 = vpop.f32.mrf.mxu0  ;;  %v5593_v50 = vld [vmem:[#allocation3 + $0x38] sm:$0xff] }
 0x4c5   : > { %5436 = vst.msk [vmem:[#allocation3 + $0x48] sm:$0xff] %vm349_vm3, %v5423_v20  ;;  %v8257_v56 = vpop.f32.mrf.mxu1  ;;  %v5606_v32 = vadd.f32 %v5593_v50, %v5559_v9 }
 0x4c6   : > { %v5387_v55 = vpop.f32.mrf.mxu0  ;;  %v5776_v31 = vld [vmem:[#allocation3 + $0x28] sm:$0xff] }
 0x4c7   : > { %v5424_v36 = vadd.f32 %v5411_v13, %v5387_v55  ;;  %v5580_v44 = vpop.f32.mrf.mxu1  ;;  %5619 = vst.msk [vmem:[#allocation3 + $0x38] sm:$0xff] %vm349_vm3, %v5606_v32 }
 0x4c8   : > { %v8224_v45 = vpop.f32.mrf.mxu0  ;;  %v5594_v59 = vld [vmem:[#allocation3 + $0x40] sm:$0xff] }
 0x4c9   : > { %5437 = vst.msk [vmem:[#allocation3 + $0x50] sm:$0xff] %vm349_vm3, %v5424_v36  ;;  %v5607_v42 = vadd.f32 %v5594_v59, %v5564_v24  ;;  %v8260_v49 = vpop.f32.mrf.mxu1 }
 0x4ca   : > { %v5390_v40 = vpop.f32.mrf.mxu0  ;;  %v5777_v35 = vld [vmem:[#allocation3 + $0x30] sm:$0xff] }
 0x4cb   : > { %v5425_v27 = vadd.f32 %v5412_v21, %v5390_v40  ;;  %5620 = vst.msk [vmem:[#allocation3 + $0x40] sm:$0xff] %vm349_vm3, %v5607_v42  ;;  %v5583_v34 = vpop.f32.mrf.mxu1 }
 0x4cc   : > { %v8225_v30 = vpop.f32.mrf.mxu0  ;;  %v5595_v2 = vld [vmem:[#allocation3 + $0x48] sm:$0xff] }
 0x4cd   : > { %5438 = vst.msk [vmem:[#allocation3 + $0x58] sm:$0xff] %vm349_vm3, %v5425_v27  ;;  %v5608_v5 = vadd.f32 %v5595_v2, %v5567_v51  ;;  %v8261_v52 = vpop.f32.mrf.mxu1  ;;  %v5862_v27 = vld [vmem:[#allocation6] sm:$0xff] }
 0x4ce   : > { %v5395_v0 = vpop.f32.mrf.mxu0  ;;  %v5778_v36 = vld [vmem:[#allocation3 + $0x38] sm:$0xff] }
 0x4cf   : > { %v5426_v47 = vadd.f32 %v5413_v16, %v5395_v0  ;;  %5621 = vst.msk [vmem:[#allocation3 + $0x48] sm:$0xff] %vm349_vm3, %v5608_v5 }
 0x4d0   : > { %v8228_v43 = vpop.f32.mrf.mxu0  ;;  %v5596_v57 = vld [vmem:[#allocation3 + $0x50] sm:$0xff] }
 0x4d1   : > { %5439 = vst.msk [vmem:[#allocation3 + $0x60] sm:$0xf] %vm4328_vm5, %v5426_v47  ;;  %v5609_v61 = vadd.f32 %v5596_v57, %v5572_v6  ;;  %v8629_v43 = vld [vmem:[%s11326_s5 + $0x38] sm:$0xff]  }
 0x4d2   : > { %v5398_v62 = vpop.f32.mrf.mxu0  ;;  %v5779_v59 = vld [vmem:[#allocation3 + $0x40] sm:$0xff] }
 0x4d3   : > { %5622 = vst.msk [vmem:[#allocation3 + $0x50] sm:$0xff] %vm349_vm3, %v5609_v61 }
 0x4d4   : > { %v8229_v17 = vpop.f32.mrf.mxu0  ;;  %v5597_v39 = vld [vmem:[#allocation3 + $0x58] sm:$0xff] }
 0x4d5   : > { %v5610_v14 = vadd.f32 %v5597_v39, %v5575_v19 }
 0x4d6   : > { %v5717_v9 = vpop.f32.mrf.mxu0  ;;  %v5780_v16 = vld [vmem:[#allocation3 + $0x48] sm:$0xff] }
 0x4d7   : > { %5623 = vst.msk [vmem:[#allocation3 + $0x58] sm:$0xff] %vm349_vm3, %v5610_v14  ;;  %v5784_v15 = vadd.f32 %v5771_v11, %v5717_v9  ;;  %v8630_v9 = vld [vmem:[%s11326_s5 + $0x30] sm:$0xff]  }
 0x4d8   : > { %v5598_v46 = vld [vmem:[#allocation3 + $0x60] sm:$0xf]  ;;  %v8268_v26 = vpop.f32.mrf.mxu0 }
 0x4d9   : > { %5797 = vst.msk [vmem:[#allocation3] sm:$0xff] %vm349_vm3, %v5784_v15  ;;  %v5611_v25 = vadd.f32 %v5598_v46, %v5580_v44 }
 0x4da   : > { %v5720_v4 = vpop.f32.mrf.mxu0  ;;  %v5781_v14 = vld [vmem:[#allocation3 + $0x50] sm:$0xff] }
 0x4db   : > { %5624 = vst.msk [vmem:[#allocation3 + $0x60] sm:$0xf] %vm4328_vm5, %v5611_v25  ;;  %v5785_v24 = vadd.f32 %v5772_v54, %v5720_v4 }
 0x4dc   : > { %v8269_v58 = vpop.f32.mrf.mxu0 }
 0x4dd   : > { %5798 = vst.msk [vmem:[#allocation3 + $0x8] sm:$0xff] %vm349_vm3, %v5785_v24 }
 0x4de   : > { %v5725_v8 = vpop.f32.mrf.mxu0 }
 0x4df   : > { %v5786_v60 = vadd.f32 %v5773_v23, %v5725_v8  ;;  %v5782_v23 = vld [vmem:[#allocation3 + $0x58] sm:$0xff] }
 0x4e0   : > { %v8272_v12 = vpop.f32.mrf.mxu0 }
 0x4e1   : > { %5799 = vst.msk [vmem:[#allocation3 + $0x10] sm:$0xff] %vm349_vm3, %v5786_v60  ;;  %v8631_v60 = vld [vmem:[%s11326_s5 + $0x28] sm:$0xff]  }
 0x4e2   : > { %v5728_v41 = vpop.f32.mrf.mxu0 }
 0x4e3   : > { %v5787_v51 = vadd.f32 %v5774_v1, %v5728_v41 }
 0x4e4   : > { %v8273_v7 = vpop.f32.mrf.mxu0 }
 0x4e5   : > { %5800 = vst.msk [vmem:[#allocation3 + $0x18] sm:$0xff] %vm349_vm3, %v5787_v51  ;;  %v6221_v51 = vld [vmem:[#allocation6 + $0x6] sm:$0xff] }
 0x4e6   : > { %v5733_v22 = vpop.f32.mrf.mxu0 }
 0x4e7   : > { %v5788_v3 = vadd.f32 %v5775_v38, %v5733_v22  ;;  %v5783_v38 = vld [vmem:[#allocation3 + $0x60] sm:$0xf] }
 0x4e8   : > { %v8276_v18 = vpop.f32.mrf.mxu0  ;;  %v5811_v10 = vld [vmem:[#allocation3 + $0xb] ss:$2 sm:$0xf]  ;;  %v5813_v6 = vld [vmem:[#allocation3 + $0xc] ss:$2 sm:$0xf] }
 0x4e9   : > { %5801 = vst.msk [vmem:[#allocation3 + $0x20] sm:$0xff] %vm349_vm3, %v5788_v3  ;;  %v5818_v63 = vmax.f32 %v5811_v10, %v5813_v6  ;;  %v8632_v18 = vld [vmem:[%s11326_s5 + $0xb8] sm:$0xff]   ;;  %v8633_v6 = vld [vmem:[%s11326_s5 + $0x20] sm:$0xff]  }
 0x4ea   : > { %v5736_v37 = vpop.f32.mrf.mxu0 }
 0x4eb   : > { %v5789_v33 = vadd.f32 %v5776_v31, %v5736_v37 }
 0x4ec   : > { %v5815_v53 = vld [vmem:[#allocation3 + $0x15] ss:$2 sm:$0xf]  ;;  %v5817_v48 = vld [vmem:[#allocation3 + $0x16] ss:$2 sm:$0xf]  ;;  %v8277_v29 = vpop.f32.mrf.mxu0 }
 0x4ed   : > { %v5819_v20 = vmax.f32 %v5815_v53, %v5817_v48  ;;  %5802 = vst.msk [vmem:[#allocation3 + $0x28] sm:$0xff] %vm349_vm3, %v5789_v33  ;;  %v8634_v33 = vld [vmem:[%s11326_s5 + $0xb0] sm:$0xff]  }
 0x4ee   : > { %v5741_v19 = vpop.f32.mrf.mxu0 }
 0x4ef   : > { %v5820_v50 = vmax.f32 %v5818_v63, %v5819_v20  ;;  %v5790_v56 = vadd.f32 %v5777_v35, %v5741_v19 }
 0x4f0   : > { %v8280_v32 = vpop.f32.mrf.mxu0  ;;  %v5824_v42 = vld [vmem:[#allocation3 + $0x1f] ss:$2 sm:$0xf]  ;;  %v5826_v49 = vld [vmem:[#allocation3 + $0x20] ss:$2 sm:$0xf] }
 0x4f1   : > { %v5821_v55 = vmax.f32 %v5820_v50, 0.0  ;;  %5803 = vst.msk [vmem:[#allocation3 + $0x30] sm:$0xff] %vm349_vm3, %v5790_v56  ;;  %v5831_v5 = vmax.f32 %v5824_v42, %v5826_v49  ;;  %v8636_v56 = vld [vmem:[%s11326_s5 + $0xa8] sm:$0xff]   ;;  %v8637_v42 = vld [vmem:[%s11326_s5 + $0xa0] sm:$0xff]  }
 0x4f2   : > { %v5744_v13 = vpop.f32.mrf.mxu0 }
 0x4f3   : > { %5822 = vst.msk [vmem:[#allocation6 + $0xe] sm:$0xf] %vm4328_vm5, %v5821_v55  ;;  %v5791_v44 = vadd.f32 %v5778_v36, %v5744_v13 }
 0x4f4   : > { %v8281_v45 = vpop.f32.mrf.mxu0  ;;  %v5828_v34 = vld [vmem:[#allocation3 + $0x29] ss:$2 sm:$0xf] }
 0x4f5   : > { %5804 = vst.msk [vmem:[#allocation3 + $0x38] sm:$0xff] %vm349_vm3, %v5791_v44 }
 0x4f6   : > { %v5749_v40 = vpop.f32.mrf.mxu0 }
 0x4f7   : > { %v5792_v21 = vadd.f32 %v5779_v59, %v5749_v40 }
 0x4f8   : > { %v5830_v30 = vld [vmem:[#allocation3 + $0x2a] ss:$2 sm:$0xf]  ;;  %v8284_v2 = vpop.f32.mrf.mxu0 }
 0x4f9   : > { %v5832_v52 = vmax.f32 %v5828_v34, %v5830_v30  ;;  %5805 = vst.msk [vmem:[#allocation3 + $0x40] sm:$0xff] %vm349_vm3, %v5792_v21  ;;  %v6225_v34 = vld [vmem:[#allocation6 + $0x26] sm:$0xf] }
 0x4fa   : > { %v5752_v0 = vpop.f32.mrf.mxu0  ;;  %v10861_v47 = vld [vmem:[#allocation6 + $0x8] sm:$0xff] }
 0x4fb   : > { %v5833_v57 = vmax.f32 %v5831_v5, %v5832_v52  ;;  %v5793_v61 = vadd.f32 %v5780_v16, %v5752_v0  ;;  %v5867_v62 = vpack.c.bf16 %v10861_v47, %v5862_v27  ;;  %v5979_v30 = vld [vmem:[#allocation6 + $0x1] sm:$0xff]  ;;  %v5980_v2 = vld [vmem:[#allocation6 + $0x9] sm:$0xff]  ;;  %v6228_v5 = vpack.c.bf16 %v6225_v34, %v6225_v34  ;;  %v8638_v16 = vld [vmem:[%s11326_s5 + $0x50] sm:$0xff]  }
 0x4fc   : > { %v8285_v17 = vpop.f32.mrf.mxu0  ;;  %v5837_v11 = vld [vmem:[#allocation3 + $0x33] ss:$2 sm:$0xf]  ;;  %v5839_v15 = vld [vmem:[#allocation3 + $0x34] ss:$2 sm:$0xf]  ;;  %v5984_v0 = vpack.c.bf16 %v5980_v2, %v5979_v30 }
 0x4fd   : > { %v5834_v39 = vmax.f32 %v5833_v57, 0.0  ;;  %5806 = vst.msk [vmem:[#allocation3 + $0x48] sm:$0xff] %vm349_vm3, %v5793_v61  ;;  %8303 = vmatmul.mubr.msk.bf16.vlgmr.msra.gmra.mxu1 %vm349_vm3, %v5867_v62  ;;  %v5844_v24 = vmax.f32 %v5837_v11, %v5839_v15  ;;  %v8635_v52 = vld [vmem:[%s11326_s5 + $0x58] sm:$0xff]   ;;  %v8639_v61 = vld [vmem:[%s11326_s5 + $0x48] sm:$0xff]   ;;  %v8642_v11 = vld [vmem:[%s11326_s5 + $0xf0] sm:$0xff]  }
 0x4fe   : > { %v5757_v46 = vpop.f32.mrf.mxu0  ;;  %8315 = vmatpush3.bf16.msra.mxu1 %v8629_v43  ;;  %8306 = vmatprep.mubr.msk.bf16.mxu1 %vm8776_vm2, %v8775_v28  ;;  %v8654_v34 = vld [vmem:[%s11326_s5 + $0x110] sm:$0xff]   ;;  %v6587_v2 = vld [vmem:[#allocation6 + $0x24] sm:$0xff] }
 0x4ff   : > { %5835 = vst.msk [vmem:[#allocation6 + $0x14] sm:$0xf] %vm4328_vm5, %v5834_v39  ;;  %v5794_v26 = vadd.f32 %v5781_v14, %v5757_v46  ;;  %8316 = vmatprep.subr.bf16.mxu1 %v8775_v28  ;;  %v8640_v39 = vld [vmem:[%s11326_s5 + $0xf8] sm:$0xff]   ;;  %v8641_v14 = vld [vmem:[%s11326_s5 + $0x40] sm:$0xff]  }
 0x500   : > { %v5841_v25 = vld [vmem:[#allocation3 + $0x3d] ss:$2 sm:$0xf]  ;;  %v5843_v4 = vld [vmem:[#allocation3 + $0x3e] ss:$2 sm:$0xf]  ;;  %v8288_v54 = vpop.f32.mrf.mxu0 }
 0x501   : > { %v5845_v58 = vmax.f32 %v5841_v25, %v5843_v4  ;;  %5807 = vst.msk [vmem:[#allocation3 + $0x50] sm:$0xff] %vm349_vm3, %v5794_v26  ;;  %v8644_v26 = vld [vmem:[%s11326_s5 + $0xe8] sm:$0xff]   ;;  %v6467_v25 = vld [vmem:[#allocation6 + $0x28] sm:$0xf] }
 0x502   : > { %v5760_v8 = vpop.f32.mrf.mxu0  ;;  %8317 = vmatpush3.bf16.msra.mxu1 %v8630_v9  ;;  %v6100_v4 = vld [vmem:[#allocation6 + $0x2] sm:$0xff]  ;;  %v6101_v54 = vld [vmem:[#allocation6 + $0xa] sm:$0xff] }
 0x503   : > { %v5846_v12 = vmax.f32 %v5844_v24, %v5845_v58  ;;  %v5795_v41 = vadd.f32 %v5782_v23, %v5760_v8  ;;  %8318 = vmatprep.subr.bf16.mxu1 %v8775_v28  ;;  %v8645_v24 = vld [vmem:[%s11326_s5 + $0xe0] sm:$0xff]   ;;  %v6470_v58 = vpack.c.bf16 %v6467_v25, %v6467_v25  ;;  %v8643_v8 = vld [vmem:[%s11326_s5 + $0x98] sm:$0xff]   ;;  %v6105_v23 = vpack.c.bf16 %v6101_v54, %v6100_v4 }
 0x504   : > { %v8289_v1 = vpop.f32.mrf.mxu0  ;;  %v5850_v53 = vld [vmem:[#allocation3 + $0x47] ss:$2 sm:$0xf]  ;;  %v5852_v48 = vld [vmem:[#allocation3 + $0x48] ss:$2 sm:$0xf] }
 0x505   : > { %v5847_v7 = vmax.f32 %v5846_v12, 0.0  ;;  %5808 = vst.msk [vmem:[#allocation3 + $0x58] sm:$0xff] %vm349_vm3, %v5795_v41  ;;  %v5857_v35 = vmax.f32 %v5850_v53, %v5852_v48  ;;  %v6709_v53 = vld [vmem:[#allocation6 + $0x2d] sm:$0xf] }
 0x506   : > { %v5765_v22 = vpop.f32.mrf.mxu0  ;;  %v10883_v3 = vld [vmem:[#allocation6 + $0xe] sm:$0xff]  ;;  %8319 = vmatpush3.bf16.msra.mxu1 %v8631_v60  ;;  %v8646_v60 = vld [vmem:[%s11326_s5 + $0x90] sm:$0xff]  }
 0x507   : > { %5848 = vst.msk [vmem:[#allocation6 + $0x1a] sm:$0xf] %vm4328_vm5, %v5847_v7  ;;  %v5796_v31 = vadd.f32 %v5783_v38, %v5765_v22  ;;  %v6226_v10 = vpack.c.bf16 %v10883_v3, %v6221_v51  ;;  %8320 = vmatprep.subr.bf16.mxu1 %v8775_v28  ;;  %v5864_v32 = vld [vmem:[#allocation6 + $0x10] sm:$0xff] }
 0x508   : > { %v8292_v37 = vpop.f32.mrf.mxu0  ;;  %v5854_v63 = vld [vmem:[#allocation3 + $0x51] ss:$2 sm:$0xf]  ;;  %v5981_v57 = vld [vmem:[#allocation6 + $0x11] sm:$0xff]  ;;  %v6468_v17 = vpack.c.bf16 %v5864_v32, %v10861_v47 }
 0x509   : > { %5809 = vst.msk [vmem:[#allocation3 + $0x60] sm:$0xf] %vm4328_vm5, %v5796_v31  ;;  %8363 = vmatmul.mubr.msk.bf16.vlgmr.msra.gmra.mxu0 %vm349_vm3, %v6226_v10  ;;  %v6102_v1 = vld [vmem:[#allocation6 + $0x12] sm:$0xff] }
 0x50a   : > { %8366 = vmatprep.mubr.msk.bf16.mxu0 %vm8776_vm2, %v8775_v28  ;;  %8395 = vmatpush3.bf16.msra.mxu0 %v8632_v18  ;;  %v5768_v29 = vpop.f32.mrf.mxu0  ;;  %v6705_v51 = vld [vmem:[#allocation6 + $0xd] sm:$0xff] }
 0x50b   : > { %8321 = vmatpush3.bf16.msra.mxu1 %v8633_v6  ;;  %8396 = vmatprep.subr.bf16.mxu0 %v8775_v28  ;;  %v8647_v7 = vld [vmem:[%s11326_s5 + $0x88] sm:$0xff]   ;;  %v8648_v18 = vld [vmem:[%s11326_s5 + $0x80] sm:$0xff]   ;;  %v6712_v29 = vpack.c.bf16 %v6709_v53, %v6709_v53  ;;  %v8657_v53 = vld [vmem:[%s11328_s7 + $0x38] sm:$0xff]  }
 0x50c   : > { %v5856_v20 = vld [vmem:[#allocation3 + $0x52] ss:$2 sm:$0xf]  ;;  %8334 = vmatprep.subr.bf16.mxu1 %v8775_v28  ;;  %v8293_v19 = vpop.f32.mrf.mxu0  ;;  %v6343_v48 = vld [vmem:[#allocation6 + $0xf] sm:$0xff] }
 0x50d   : > { %v5858_v50 = vmax.f32 %v5854_v63, %v5856_v20  ;;  %v6708_v6 = vld [vmem:[#allocation6 + $0x25] sm:$0xff] }
 0x50e   : > { %v10906_v55 = vld [vmem:[#allocation6 + $0x18] sm:$0xff]  ;;  %8397 = vmatpush3.bf16.msra.mxu0 %v8634_v33  ;;  %v6342_v63 = vld [vmem:[#allocation6 + $0x7] sm:$0xff] }
 0x50f   : > { %v10908_v13 = vld [vmem:[#allocation6 + $0x16] sm:$0xff]  ;;  %v5859_v36 = vmax.f32 %v5857_v35, %v5858_v50  ;;  %v5868_v44 = vpack.c.bf16 %v10906_v55, %v5864_v32  ;;  %8398 = vmatprep.subr.bf16.mxu0 %v8775_v28  ;;  %v8649_v20 = vld [vmem:[%s11326_s5 + $0xd8] sm:$0xff]   ;;  %v6347_v19 = vpack.c.bf16 %v6343_v48, %v6342_v63 }
 0x510   : > { %v6831_v45 = vpack.c.bf16 %v10908_v13, %v10883_v3  ;;  %v6706_v41 = vld [vmem:[#allocation6 + $0x15] sm:$0xff]  ;;  %v7613_v3 = vld [vmem:[%s11327_s6] ss:$0 sm:$0xff]  ;;  %v8658_v48 = vld [vmem:[%s11328_s7 + $0x78] sm:$0xff]  }
 0x511   : > { %v5860_v59 = vmax.f32 %v5859_v36, 0.0  ;;  %8307 = vmatmul.mubr.msk.bf16.gmra.mxu1 %vm349_vm3, %v5868_v44  ;;  %v6710_v38 = vpack.c.bf16 %v6706_v41, %v6705_v51  ;;  %v8650_v35 = vld [vmem:[%s11326_s5 + $0xd0] sm:$0xff]   ;;  %v8651_v32 = vld [vmem:[%s11326_s5 + $0xc8] sm:$0xff]   ;;  %v6346_v36 = vld [vmem:[#allocation6 + $0x27] sm:$0xf] }
 0x512   : > { %8310 = vmatprep.mubr.msk.bf16.mxu1 %vm8776_vm2, %v8775_v28  ;;  %8399 = vmatpush3.bf16.msra.mxu0 %v8636_v56  ;;  %v6344_v56 = vld [vmem:[#allocation6 + $0x17] sm:$0xff]  ;;  %v8652_v44 = vld [vmem:[%s11326_s5 + $0xc0] sm:$0xff]  }
 0x513   : > { %5861 = vst.msk [vmem:[#allocation6 + $0x20] sm:$0xf] %vm4328_vm5, %v5860_v59  ;;  %8400 = vmatprep.subr.bf16.mxu0 %v8775_v28  ;;  %v6349_v59 = vpack.c.bf16 %v6346_v36, %v6346_v36 }
 0x516   : > { %8401 = vmatpush3.bf16.msra.mxu0 %v8637_v42  ;;  %v6585_v42 = vld [vmem:[#allocation6 + $0x14] sm:$0xff] }
 0x517   : > { %8434 = vmatprep.subr.bf16.mxu0 %v8775_v28 }
 0x51a   : > { %v5866_v49 = vld [vmem:[#allocation6 + $0x20] sm:$0xf] }
 0x51b   : > { %v10923_v40 = vld [vmem:[#allocation6 + $0x1e] sm:$0xff]  ;;  %v5869_v21 = vpack.c.bf16 %v5866_v49, %v5866_v49  ;;  %v6584_v49 = vld [vmem:[#allocation6 + $0xc] sm:$0xff] }
 0x51c   : > { %v6227_v27 = vpack.c.bf16 %v10923_v40, %v10908_v13  ;;  %v5982_v43 = vld [vmem:[#allocation6 + $0x19] sm:$0xff]  ;;  %v5983_v47 = vld [vmem:[#allocation6 + $0x21] sm:$0xf] }
 0x51d   : > { %8311 = vmatmul.mubr.msk.bf16.gmra.mxu1 %vm349_vm3, %v5869_v21  ;;  %v5985_v62 = vpack.c.bf16 %v5982_v43, %v5981_v57  ;;  %v6466_v9 = vld [vmem:[#allocation6 + $0x20] sm:$0xff]  ;;  %v5986_v15 = vpack.c.bf16 %v5983_v47, %v5983_v47 }
 0x51e   : > { %8367 = vmatmul.mubr.msk.bf16.gmra.mxu0 %vm349_vm3, %v6227_v27  ;;  %8322 = vmatprep.mubr.msk.bf16.mxu1 %vm8776_vm2, %v8775_v28  ;;  %v6469_v46 = vpack.c.bf16 %v6466_v9, %v10906_v55  ;;  %v6103_v12 = vld [vmem:[#allocation6 + $0x1a] sm:$0xff]  ;;  %v6104_v31 = vld [vmem:[#allocation6 + $0x22] sm:$0xf]  ;;  %v6589_v27 = vpack.c.bf16 %v6585_v42, %v6584_v49  ;;  %v6829_v57 = vld [vmem:[#allocation6 + $0x26] sm:$0xff] }
 0x51f   : > { %8370 = vmatprep.mubr.msk.bf16.mxu0 %vm8776_vm2, %v8775_v28  ;;  %v6106_v22 = vpack.c.bf16 %v6103_v12, %v6102_v1  ;;  %v6707_v10 = vld [vmem:[#allocation6 + $0x1d] sm:$0xff]  ;;  %v6107_v37 = vpack.c.bf16 %v6104_v31, %v6104_v31  ;;  %v8661_v42 = vld [vmem:[%s11328_s7 + $0x28] sm:$0xff]  }
 0x520   : > { %v6711_v33 = vpack.c.bf16 %v6708_v6, %v6707_v10  ;;  %v6345_v50 = vld [vmem:[#allocation6 + $0x1f] sm:$0xff]  ;;  %v8662_v49 = vld [vmem:[%s11328_s7 + $0x68] sm:$0xff]  }
 0x521   : > { %v6348_v55 = vpack.c.bf16 %v6345_v50, %v6344_v56  ;;  %v8653_v21 = vld [vmem:[%s11326_s5 + $0x118] sm:$0xff]   ;;  %v8659_v50 = vld [vmem:[%s11328_s7 + $0x30] sm:$0xff]  }
 0x522   : > { %v6586_v30 = vld [vmem:[#allocation6 + $0x1c] sm:$0xff] }
 0x523   : > { %v8660_v56 = vld [vmem:[%s11328_s7 + $0x70] sm:$0xff]  }
 0x525   : > { %8323 = vmatmul.mubr.msk.bf16.vlgmr.msra.gmra.mxu1 %vm349_vm3, %v5984_v0  ;;  %v6588_v0 = vld [vmem:[#allocation6 + $0x2c] sm:$0xf] }
 0x526   : > { %8371 = vmatmul.mubr.msk.bf16.gmra.mxu0 %vm349_vm3, %v6228_v5  ;;  %8335 = vmatpush3.bf16.msra.mxu1 %v8635_v52  ;;  %v8655_v5 = vld [vmem:[%s11326_s5 + $0x108] sm:$0xff]   ;;  %v6590_v52 = vpack.c.bf16 %v6587_v2, %v6586_v30  ;;  %v6591_v43 = vpack.c.bf16 %v6588_v0, %v6588_v0  ;;  %v8664_v0 = vld [vmem:[%s11328_s7 + $0x60] sm:$0xff]  }
 0x527   : > { %8326 = vmatprep.mubr.msk.bf16.mxu1 %vm8776_vm2, %v8775_v28  ;;  %8336 = vmatprep.subr.bf16.mxu1 %v8775_v28 }
 0x528   : > { %8402 = vmatprep.mubr.msk.bf16.mxu0 %vm8776_vm2, %v8775_v28 }
 0x52a   : > { %8337 = vmatpush3.bf16.msra.mxu1 %v8638_v16  ;;  %v8656_v16 = vld [vmem:[%s11326_s5 + $0x100] sm:$0xff]  }
 0x52b   : > { %8338 = vmatprep.subr.bf16.mxu1 %v8775_v28 }
 0x52d   : > { %8327 = vmatmul.mubr.msk.bf16.gmra.mxu1 %vm349_vm3, %v5985_v62  ;;  %v6830_v62 = vld [vmem:[#allocation6 + $0x2e] sm:$0xf] }
 0x52e   : > { %8403 = vmatmul.mubr.msk.bf16.vlgmr.msra.gmra.mxu0 %vm349_vm3, %v6468_v17  ;;  %8339 = vmatpush3.bf16.msra.mxu1 %v8639_v61  ;;  %v6832_v61 = vpack.c.bf16 %v6829_v57, %v10923_v40  ;;  %v6833_v17 = vpack.c.bf16 %v6830_v62, %v6830_v62 }
 0x52f   : > { %8330 = vmatprep.mubr.msk.bf16.mxu1 %vm8776_vm2, %v8775_v28  ;;  %8406 = vmatprep.mubr.msk.bf16.mxu0 %vm8776_vm2, %v8775_v28 }
 0x530   : > { %8340 = vmatprep.subr.bf16.mxu1 %v8775_v28  ;;  %8435 = vmatpush3.bf16.msra.mxu0 %v8640_v39 }
 0x531   : > { %8436 = vmatprep.subr.bf16.mxu0 %v8775_v28 }
 0x532   : > { %8341 = vmatpush3.bf16.msra.mxu1 %v8641_v14 }
 0x533   : > { %8374 = vmatprep.subr.bf16.mxu1 %v8775_v28 }
 0x534   : > { %8437 = vmatpush3.bf16.msra.mxu0 %v8642_v11 }
 0x535   : > { %8331 = vmatmul.mubr.msk.bf16.gmra.mxu1 %vm349_vm3, %v5986_v15  ;;  %8438 = vmatprep.subr.bf16.mxu0 %v8775_v28 }
 0x536   : > { %8407 = vmatmul.mubr.msk.bf16.gmra.mxu0 %vm349_vm3, %v6469_v46  ;;  %8342 = vmatprep.mubr.msk.bf16.mxu1 %vm8776_vm2, %v8775_v28 }
 0x537   : > { %8410 = vmatprep.mubr.msk.bf16.mxu0 %vm8776_vm2, %v8775_v28 }
 0x538   : > { %8439 = vmatpush3.bf16.msra.mxu0 %v8644_v26 }
 0x539   : > { %8440 = vmatprep.subr.bf16.mxu0 %v8775_v28 }
 0x53c   : > { %8441 = vmatpush3.bf16.msra.mxu0 %v8645_v24 }
 0x53d   : > { %8343 = vmatmul.mubr.msk.bf16.vlgmr.msra.gmra.mxu1 %vm349_vm3, %v6105_v23  ;;  %8474 = vmatprep.subr.bf16.mxu0 %v8775_v28 }
 0x53e   : > { %8411 = vmatmul.mubr.msk.bf16.gmra.mxu0 %vm349_vm3, %v6470_v58  ;;  %8375 = vmatpush3.bf16.msra.mxu1 %v8643_v8 }
 0x53f   : > { %8346 = vmatprep.mubr.msk.bf16.mxu1 %vm8776_vm2, %v8775_v28  ;;  %8376 = vmatprep.subr.bf16.mxu1 %v8775_v28 }
 0x540   : > { %8442 = vmatprep.mubr.msk.bf16.mxu0 %vm8776_vm2, %v8775_v28 }
 0x542   : > { %8377 = vmatpush3.bf16.msra.mxu1 %v8646_v60 }
 0x543   : > { %8378 = vmatprep.subr.bf16.mxu1 %v8775_v28 }
 0x545   : > { %8347 = vmatmul.mubr.msk.bf16.gmra.mxu1 %vm349_vm3, %v6106_v22 }
 0x546   : > { %8443 = vmatmul.mubr.msk.bf16.vlgmr.msra.gmra.mxu0 %vm349_vm3, %v6710_v38  ;;  %8379 = vmatpush3.bf16.msra.mxu1 %v8647_v7 }
 0x547   : > { %8350 = vmatprep.mubr.msk.bf16.mxu1 %vm8776_vm2, %v8775_v28  ;;  %8446 = vmatprep.mubr.msk.bf16.mxu0 %vm8776_vm2, %v8775_v28 }
 0x548   : > { %8380 = vmatprep.subr.bf16.mxu1 %v8775_v28  ;;  %8475 = vmatpush3.bf16.msra.mxu0 %v8657_v53 }
 0x549   : > { %8476 = vmatprep.subr.bf16.mxu0 %v8775_v28 }
 0x54a   : > { %8381 = vmatpush3.bf16.msra.mxu1 %v8648_v18 }
 0x54b   : > { %8414 = vmatprep.subr.bf16.mxu1 %v8775_v28 }
 0x54c   : > { %8477 = vmatpush3.bf16.msra.mxu0 %v8659_v50 }
 0x54d   : > { %8351 = vmatmul.mubr.msk.bf16.gmra.mxu1 %vm349_vm3, %v6107_v37  ;;  %8478 = vmatprep.subr.bf16.mxu0 %v8775_v28 }
 0x54e   : > { %8447 = vmatmul.mubr.msk.bf16.gmra.mxu0 %vm349_vm3, %v6711_v33  ;;  %8382 = vmatprep.mubr.msk.bf16.mxu1 %vm8776_vm2, %v8775_v28 }
 0x54f   : > { %8450 = vmatprep.mubr.msk.bf16.mxu0 %vm8776_vm2, %v8775_v28 }
 0x550   : > { %8479 = vmatpush3.bf16.msra.mxu0 %v8661_v42 }
 0x551   : > { %8480 = vmatprep.subr.bf16.mxu0 %v8775_v28 }
 0x555   : > { %8383 = vmatmul.mubr.msk.bf16.vlgmr.msra.gmra.mxu1 %vm349_vm3, %v6347_v19 }
 0x556   : > { %8451 = vmatmul.mubr.msk.bf16.gmra.mxu0 %vm349_vm3, %v6712_v29  ;;  %8415 = vmatpush3.bf16.msra.mxu1 %v8649_v20 }
 0x557   : > { %8386 = vmatprep.mubr.msk.bf16.mxu1 %vm8776_vm2, %v8775_v28  ;;  %8416 = vmatprep.subr.bf16.mxu1 %v8775_v28 }
 0x558   : > { %8490 = vmatprep.mubr.msk.bf16.mxu0 %vm8776_vm2, %v8775_v28 }
 0x55a   : > { %8417 = vmatpush3.bf16.msra.mxu1 %v8650_v35 }
 0x55b   : > { %8418 = vmatprep.subr.bf16.mxu1 %v8775_v28 }
 0x55d   : > { %8387 = vmatmul.mubr.msk.bf16.gmra.mxu1 %vm349_vm3, %v6348_v55 }
 0x55e   : > { %8419 = vmatpush3.bf16.msra.mxu1 %v8651_v32  ;;  %8390 = vmatprep.mubr.msk.bf16.mxu1 %vm8776_vm2, %v8775_v28 }
 0x55f   : > { %8420 = vmatprep.subr.bf16.mxu1 %v8775_v28 }
 0x562   : > { %8421 = vmatpush3.bf16.msra.mxu1 %v8652_v44 }
 0x563   : > { %8454 = vmatprep.subr.bf16.mxu1 %v8775_v28 }
 0x565   : > { %8391 = vmatmul.mubr.msk.bf16.gmra.mxu1 %vm349_vm3, %v6349_v59 }
 0x566   : > { %8422 = vmatprep.mubr.msk.bf16.mxu1 %vm8776_vm2, %v8775_v28 }
 0x56d   : > { %8423 = vmatmul.mubr.msk.bf16.vlgmr.msra.gmra.mxu1 %vm349_vm3, %v6589_v27 }
 0x56e   : > { %8455 = vmatpush3.bf16.msra.mxu1 %v8653_v21  ;;  %8426 = vmatprep.mubr.msk.bf16.mxu1 %vm8776_vm2, %v8775_v28 }
 0x56f   : > { %8456 = vmatprep.subr.bf16.mxu1 %v8775_v28 }
 0x572   : > { %8457 = vmatpush3.bf16.msra.mxu1 %v8654_v34 }
 0x573   : > { %8458 = vmatprep.subr.bf16.mxu1 %v8775_v28 }
 0x575   : > { %8427 = vmatmul.mubr.msk.bf16.gmra.mxu1 %vm349_vm3, %v6590_v52  ;;  %v8663_v52 = vld [vmem:[%s11328_s7 + $0x20] sm:$0xff]  }
 0x576   : > { %8459 = vmatpush3.bf16.msra.mxu1 %v8655_v5  ;;  %8430 = vmatprep.mubr.msk.bf16.mxu1 %vm8776_vm2, %v8775_v28 }
 0x577   : > { %8460 = vmatprep.subr.bf16.mxu1 %v8775_v28  ;;  %8481 = vmatpush3.bf16.msra.mxu0 %v8663_v52 }
 0x578   : > { %8482 = vmatprep.subr.bf16.mxu0 %v8775_v28 }
 0x57a   : > { %8461 = vmatpush3.bf16.msra.mxu1 %v8656_v16 }
 0x57b   : > { %8494 = vmatprep.subr.bf16.mxu1 %v8775_v28 }
 0x57d   : > { %8431 = vmatmul.mubr.msk.bf16.gmra.mxu1 %vm349_vm3, %v6591_v43 }
 0x57e   : > { %8462 = vmatprep.mubr.msk.bf16.mxu1 %vm8776_vm2, %v8775_v28 }
 0x585   : > { %8463 = vmatmul.mubr.msk.bf16.vlgmr.msra.gmra.mxu1 %vm349_vm3, %v6831_v45 }
 0x586   : > { %8466 = vmatprep.mubr.msk.bf16.mxu1 %vm8776_vm2, %v8775_v28  ;;  %8495 = vmatpush3.bf16.msra.mxu1 %v8658_v48 }
 0x587   : > { %8496 = vmatprep.subr.bf16.mxu1 %v8775_v28 }
 0x58a   : > { %8497 = vmatpush3.bf16.msra.mxu1 %v8660_v56 }
 0x58b   : > { %8498 = vmatprep.subr.bf16.mxu1 %v8775_v28 }
 0x58d   : > { %8467 = vmatmul.mubr.msk.bf16.gmra.mxu1 %vm349_vm3, %v6832_v61 }
 0x58e   : > { %8470 = vmatprep.mubr.msk.bf16.mxu1 %vm8776_vm2, %v8775_v28  ;;  %8499 = vmatpush3.bf16.msra.mxu1 %v8662_v49 }
 0x58f   : > { %8500 = vmatprep.subr.bf16.mxu1 %v8775_v28 }
 0x592   : > { %8501 = vmatpush3.bf16.msra.mxu1 %v8664_v0 }
 0x593   : > { %8502 = vmatprep.subr.bf16.mxu1 %v8775_v28 }
 0x595   : > { %8471 = vmatmul.mubr.msk.bf16.gmra.mxu1 %vm349_vm3, %v6833_v17  ;;  %v8665_v17 = vld [vmem:[%s11328_s7 + $0x18] sm:$0xff]  }
 0x596   : > { %8510 = vmatprep.mubr.msk.bf16.mxu1 %vm8776_vm2, %v8775_v28  ;;  %8483 = vmatpush3.bf16.msra.mxu0 %v8665_v17 }
 0x597   : > { %8484 = vmatprep.subr.bf16.mxu0 %v8775_v28 }
 0x5bd   : > { %v5952_v13 = vpop.f32.mrf.mxu1 }
 0x5be   : > { %v5953_v45 = vadd.f32 %v7613_v3, %v5952_v13 }
 0x5bf   : > { %v8304_v39 = vpop.f32.mrf.mxu1 }
 0x5c1   : > { %v5955_v40 = vpop.f32.mrf.mxu1 }
 0x5c2   : > { %v5956_v14 = vadd.f32 %v7613_v3, %v5955_v40 }
 0x5c3   : > { %v8305_v47 = vpop.f32.mrf.mxu1 }
 0x5c4   : > { %v8668_v47 = vld [vmem:[%s11328_s7 + $0x50] sm:$0xff]  }
 0x5c9   : > { %v11088_v9 = vpop.f32.mrf.mxu0 }
 0x5cb   : > { %v8364_v11 = vpop.f32.mrf.mxu0 }
 0x5cd   : > { %v11090_v15 = vpop.f32.mrf.mxu0 }
 0x5cf   : > { %v8365_v46 = vpop.f32.mrf.mxu0 }
 0x5d1   : > { %v5960_v26 = vpop.f32.mrf.mxu1 }
 0x5d2   : > { %v5961_v25 = vadd.f32 %v7613_v3, %v5960_v26 }
 0x5d3   : > { %v8308_v4 = vpop.f32.mrf.mxu1 }
 0x5d4   : > { %v8669_v4 = vld [vmem:[%s11328_s7 + $0x8] sm:$0xff]  }
 0x5d5   : > { %v5963_v54 = vpop.f32.mrf.mxu1 }
 0x5d6   : > { %v5964_v24 = vadd.f32 %v7613_v3, %v5963_v54  ;;  %v8670_v54 = vld [vmem:[%s11328_s7 + $0x48] sm:$0xff]  }
 0x5d7   : > { %v8309_v58 = vpop.f32.mrf.mxu1 }
 0x5dd   : > { %v5968_v8 = vpop.f32.mrf.mxu1 }
 0x5de   : > { %v11092_v23 = vpop.f32.mrf.mxu0  ;;  %v5969_v60 = vadd.f32 %v7613_v3, %v5968_v8  ;;  %v8666_v3 = vld [vmem:[%s11328_s7 + $0x58] sm:$0xff]  }
 0x5df   : > { %v8312_v12 = vpop.f32.mrf.mxu1  ;;  %8503 = vmatpush3.bf16.msra.mxu1 %v8666_v3 }
 0x5e0   : > { %v8368_v41 = vpop.f32.mrf.mxu0  ;;  %5978 = vst [vmem:[#allocation4 + $0x20] sm:$0xf] %v5969_v60  ;;  %8504 = vmatprep.subr.bf16.mxu1 %v8775_v28 }
 0x5e1   : > { %v5971_v1 = vpop.f32.mrf.mxu1  ;;  %v8672_v41 = vld [vmem:[%s11328_s7 + $0x40] sm:$0xff]  }
 0x5e2   : > { %v11094_v51 = vpop.f32.mrf.mxu0 }
 0x5e3   : > { %v8313_v7 = vpop.f32.mrf.mxu1  ;;  %8505 = vmatpush3.bf16.msra.mxu1 %v8668_v47 }
 0x5e4   : > { %v8369_v22 = vpop.f32.mrf.mxu0  ;;  %8506 = vmatprep.subr.bf16.mxu1 %v8775_v28 }
 0x5e5   : > { %v6063_v38 = vpop.f32.mrf.mxu1 }
 0x5e6   : > { %v11096_v18 = vpop.f32.mrf.mxu0  ;;  %v11098_v31 = vadd.f32 %v6063_v38, %v5953_v45 }
 0x5e7   : > { %v8324_v10 = vpop.f32.mrf.mxu1  ;;  %v6089_v2 = vld [vmem:[#allocation4 + $0x20] sm:$0xf]  ;;  %8507 = vmatpush3.bf16.msra.mxu1 %v8670_v54 }
 0x5e8   : > { %v8372_v6 = vpop.f32.mrf.mxu0  ;;  %8508 = vmatprep.subr.bf16.mxu1 %v8775_v28 }
 0x5e9   : > { %v6066_v37 = vpop.f32.mrf.mxu1 }
 0x5ea   : > { %v6324_v33 = vpop.f32.mrf.mxu0  ;;  %v11106_v29 = vadd.f32 %v6066_v37, %v5956_v14  ;;  %v8667_v14 = vld [vmem:[%s11328_s7 + $0x10] sm:$0xff]  }
 0x5eb   : > { %v8325_v63 = vpop.f32.mrf.mxu1  ;;  %8485 = vmatpush3.bf16.msra.mxu0 %v8667_v14  ;;  %8509 = vmatpush3.bf16.msra.mxu1 %v8672_v41 }
 0x5ec   : > { %v8373_v20 = vpop.f32.mrf.mxu0  ;;  %8486 = vmatprep.subr.bf16.mxu0 %v8775_v28  ;;  %8534 = vmatprep.subr.bf16.mxu1 %v8775_v28 }
 0x5ed   : > { %v6071_v19 = vpop.f32.mrf.mxu1 }
 0x5ee   : > { %v11110_v35 = vpop.f32.mrf.mxu0  ;;  %v11118_v32 = vadd.f32 %v6071_v19, %v5961_v25 }
 0x5ef   : > { %v8328_v55 = vpop.f32.mrf.mxu1  ;;  %8487 = vmatpush3.bf16.msra.mxu0 %v8669_v4 }
 0x5f0   : > { %v8404_v36 = vpop.f32.mrf.mxu0  ;;  %8488 = vmatprep.subr.bf16.mxu0 %v8775_v28 }
 0x5f1   : > { %v6074_v44 = vpop.f32.mrf.mxu1 }
 0x5f2   : > { %v11122_v59 = vpop.f32.mrf.mxu0  ;;  %v11130_v21 = vadd.f32 %v6074_v44, %v5964_v24 }
 0x5f3   : > { %v8329_v27 = vpop.f32.mrf.mxu1 }
 0x5f4   : > { %v8405_v34 = vpop.f32.mrf.mxu0 }
 0x5f5   : > { %v6079_v30 = vpop.f32.mrf.mxu1 }
 0x5f6   : > { %v11134_v5 = vpop.f32.mrf.mxu0  ;;  %v6094_v16 = vadd.f32 %v6089_v2, %v6079_v30 }
 0x5f7   : > { %v8332_v43 = vpop.f32.mrf.mxu1 }
 0x5f8   : > { %v8408_v57 = vpop.f32.mrf.mxu0  ;;  %6099 = vst [vmem:[#allocation4 + $0x20] sm:$0xf] %v6094_v16 }
 0x5f9   : > { %v6082_v61 = vpop.f32.mrf.mxu1 }
 0x5fa   : > { %v11144_v62 = vpop.f32.mrf.mxu0 }
 0x5fb   : > { %v8333_v13 = vpop.f32.mrf.mxu1 }
 0x5fc   : > { %v8409_v45 = vpop.f32.mrf.mxu0 }
 0x5fd   : > { %v6184_v39 = vpop.f32.mrf.mxu1 }
 0x5fe   : > { %v11154_v40 = vpop.f32.mrf.mxu0  ;;  %v6211_v11 = vadd.f32 %v6184_v39, %v11098_v31 }
 0x5ff   : > { %v8344_v46 = vpop.f32.mrf.mxu1  ;;  %v6210_v20 = vld [vmem:[#allocation4 + $0x20] sm:$0xf] }
 0x600   : > { %v8412_v26 = vpop.f32.mrf.mxu0  ;;  %v6332_v25 = vadd.f32 %v11088_v9, %v6211_v11  ;;  %v8671_v9 = vld [vmem:[%s11328_s7] sm:$0xff]  }
 0x601   : > { %v6187_v24 = vpop.f32.mrf.mxu1  ;;  %8489 = vmatpush3.bf16.msra.mxu0 %v8671_v9 }
 0x602   : > { %v6566_v58 = vpop.f32.mrf.mxu0  ;;  %v6212_v8 = vadd.f32 %v6187_v24, %v11106_v29  ;;  %8514 = vmatprep.subr.bf16.mxu0 %v8775_v28 }
 0x603   : > { %v8345_v60 = vpop.f32.mrf.mxu1 }
 0x604   : > { %v8413_v12 = vpop.f32.mrf.mxu0  ;;  %v6333_v1 = vadd.f32 %v11090_v15, %v6212_v8 }
 0x605   : > { %v6192_v7 = vpop.f32.mrf.mxu1 }
 0x606   : > { %v11182_v22 = vpop.f32.mrf.mxu0  ;;  %v6213_v38 = vadd.f32 %v6192_v7, %v11118_v32 }
 0x607   : > { %v8348_v31 = vpop.f32.mrf.mxu1 }
 0x608   : > { %v8444_v10 = vpop.f32.mrf.mxu0  ;;  %v6334_v6 = vadd.f32 %v11092_v23, %v6213_v38 }
 0x609   : > { %v6195_v15 = vpop.f32.mrf.mxu1 }
 0x60a   : > { %v11188_v37 = vpop.f32.mrf.mxu0  ;;  %v6214_v33 = vadd.f32 %v6195_v15, %v11130_v21 }
 0x60b   : > { %v8349_v53 = vpop.f32.mrf.mxu1 }
 0x60c   : > { %v8445_v48 = vpop.f32.mrf.mxu0  ;;  %v6335_v29 = vadd.f32 %v11094_v51, %v6214_v33 }
 0x60d   : > { %v6200_v63 = vpop.f32.mrf.mxu1 }
 0x60e   : > { %v11192_v19 = vpop.f32.mrf.mxu0  ;;  %v6215_v50 = vadd.f32 %v6210_v20, %v6200_v63 }
 0x60f   : > { %v8352_v56 = vpop.f32.mrf.mxu1 }
 0x610   : > { %v8448_v23 = vpop.f32.mrf.mxu0  ;;  %6220 = vst [vmem:[#allocation4 + $0x20] sm:$0xf] %v6215_v50 }
 0x611   : > { %v6203_v32 = vpop.f32.mrf.mxu1 }
 0x612   : > { %v11194_v55 = vpop.f32.mrf.mxu0 }
 0x613   : > { %v8353_v36 = vpop.f32.mrf.mxu1 }
 0x614   : > { %v8449_v44 = vpop.f32.mrf.mxu0 }
 0x615   : > { %v6426_v42 = vpop.f32.mrf.mxu1 }
 0x616   : > { %v6805_v49 = vpop.f32.mrf.mxu0  ;;  %v6453_v21 = vadd.f32 %v6426_v42, %v6332_v25 }
 0x617   : > { %v6331_v27 = vld [vmem:[#allocation4 + $0x20] sm:$0xf]  ;;  %v8384_v34 = vpop.f32.mrf.mxu1 }
 0x618   : > { %v8452_v30 = vpop.f32.mrf.mxu0  ;;  %v6336_v51 = vadd.f32 %v6331_v27, %v11096_v18  ;;  %v6574_v2 = vadd.f32 %v11110_v35, %v6453_v21 }
 0x619   : > { %v6429_v52 = vpop.f32.mrf.mxu1 }
 0x61a   : > { %v6808_v0 = vpop.f32.mrf.mxu0  ;;  %6341 = vst [vmem:[#allocation4 + $0x20] sm:$0xf] %v6336_v51  ;;  %v6454_v16 = vadd.f32 %v6429_v52, %v6333_v1 }
 0x61b   : > { %v8385_v43 = vpop.f32.mrf.mxu1 }
 0x61c   : > { %v8453_v57 = vpop.f32.mrf.mxu0  ;;  %v6575_v61 = vadd.f32 %v11122_v59, %v6454_v16 }
 0x61d   : > { %v6434_v17 = vpop.f32.mrf.mxu1 }
 0x61e   : > { %v6455_v3 = vadd.f32 %v6434_v17, %v6334_v6 }
 0x61f   : > { %v8388_v13 = vpop.f32.mrf.mxu1 }
 0x620   : > { %v6576_v45 = vadd.f32 %v11134_v5, %v6455_v3 }
 0x621   : > { %v6437_v39 = vpop.f32.mrf.mxu1  ;;  %v6452_v35 = vld [vmem:[#allocation4 + $0x20] sm:$0xf] }
 0x622   : > { %v6456_v14 = vadd.f32 %v6437_v39, %v6335_v29 }
 0x623   : > { %v8389_v47 = vpop.f32.mrf.mxu1 }
 0x624   : > { %v6577_v18 = vadd.f32 %v11144_v62, %v6456_v14 }
 0x625   : > { %v6442_v11 = vpop.f32.mrf.mxu1 }
 0x626   : > { %v6457_v46 = vadd.f32 %v6452_v35, %v6442_v11 }
 0x627   : > { %v8392_v26 = vpop.f32.mrf.mxu1 }
 0x628   : > { %6462 = vst [vmem:[#allocation4 + $0x20] sm:$0xf] %v6457_v46 }
 0x629   : > { %v6445_v25 = vpop.f32.mrf.mxu1 }
 0x62b   : > { %v8393_v4 = vpop.f32.mrf.mxu1 }
 0x62d   : > { %v6668_v54 = vpop.f32.mrf.mxu1 }
 0x62e   : > { %v6695_v31 = vadd.f32 %v6668_v54, %v6574_v2 }
 0x62f   : > { %v6573_v24 = vld [vmem:[#allocation4 + $0x20] sm:$0xf]  ;;  %v8424_v59 = vpop.f32.mrf.mxu1 }
 0x630   : > { %v6578_v58 = vadd.f32 %v6573_v24, %v11154_v40  ;;  %v6816_v33 = vadd.f32 %v11182_v22, %v6695_v31  ;;  %v8680_v31 = vld [vmem:[%s11328_s7 + $0xe0] sm:$0xff]  }
 0x631   : > { %v6671_v8 = vpop.f32.mrf.mxu1 }
 0x632   : > { %6583 = vst [vmem:[#allocation4 + $0x20] sm:$0xf] %v6578_v58  ;;  %v6696_v15 = vadd.f32 %v6671_v8, %v6575_v61  ;;  %v8673_v58 = vld [vmem:[%s11328_s7 + $0xb8] sm:$0xff]  }
 0x633   : > { %v8425_v5 = vpop.f32.mrf.mxu1 }
 0x634   : > { %v6817_v50 = vadd.f32 %v11188_v37, %v6696_v15  ;;  %v8683_v15 = vld [vmem:[%s11328_s7 + $0x90] sm:$0xff]  }
 0x635   : > { %v6676_v60 = vpop.f32.mrf.mxu1 }
 0x636   : > { %v6697_v63 = vadd.f32 %v6676_v60, %v6576_v45  ;;  %v8674_v60 = vld [vmem:[%s11328_s7 + $0xf8] sm:$0xff]  }
 0x637   : > { %v8428_v12 = vpop.f32.mrf.mxu1 }
 0x638   : > { %v6818_v44 = vadd.f32 %v11192_v19, %v6697_v63 }
 0x639   : > { %v6679_v9 = vpop.f32.mrf.mxu1  ;;  %v6694_v1 = vld [vmem:[#allocation4 + $0x20] sm:$0xf] }
 0x63a   : > { %v6698_v36 = vadd.f32 %v6679_v9, %v6577_v18 }
 0x63b   : > { %v8429_v41 = vpop.f32.mrf.mxu1 }
 0x63c   : > { %v6819_v27 = vadd.f32 %v11194_v55, %v6698_v36  ;;  %v8675_v41 = vld [vmem:[%s11328_s7 + $0xb0] sm:$0xff]  }
 0x63d   : > { %v6684_v62 = vpop.f32.mrf.mxu1 }
 0x63e   : > { %v6699_v7 = vadd.f32 %v6694_v1, %v6684_v62  ;;  %v8676_v62 = vld [vmem:[%s11328_s7 + $0xf0] sm:$0xff]   ;;  %v8677_v1 = vld [vmem:[%s11328_s7 + $0xa8] sm:$0xff]  }
 0x63f   : > { %v8432_v38 = vpop.f32.mrf.mxu1 }
 0x640   : > { %6704 = vst [vmem:[#allocation4 + $0x20] sm:$0xf] %v6699_v7  ;;  %v8678_v7 = vld [vmem:[%s11328_s7 + $0xe8] sm:$0xff]   ;;  %v8679_v38 = vld [vmem:[%s11328_s7 + $0xa0] sm:$0xff]  }
 0x641   : > { %v6687_v10 = vpop.f32.mrf.mxu1 }
 0x642   : > { %v8681_v10 = vld [vmem:[%s11328_s7 + $0x98] sm:$0xff]  }
 0x643   : > { %v8433_v6 = vpop.f32.mrf.mxu1 }
 0x644   : > { %v8682_v6 = vld [vmem:[%s11328_s7 + $0xd8] sm:$0xff]  }
 0x645   : > { %v6910_v53 = vpop.f32.mrf.mxu1 }
 0x646   : > { %v6937_v40 = vadd.f32 %v6910_v53, %v6816_v33  ;;  %v8684_v33 = vld [vmem:[%s11328_s7 + $0xd0] sm:$0xff]   ;;  %v8685_v53 = vld [vmem:[%s11328_s7 + $0x88] sm:$0xff]  }
 0x647   : > { %v6815_v48 = vld [vmem:[#allocation4 + $0x20] sm:$0xf]  ;;  %v8464_v29 = vpop.f32.mrf.mxu1 }
 0x648   : > { %6942 = vst [vmem:[#allocation4] sm:$0xff] %v6937_v40  ;;  %v6820_v20 = vadd.f32 %v6815_v48, %v6805_v49  ;;  %v8686_v40 = vld [vmem:[%s11328_s7 + $0xc8] sm:$0xff]   ;;  %v8687_v48 = vld [vmem:[%s11328_s7 + $0x80] sm:$0xff]  }
 0x649   : > { %v6913_v56 = vpop.f32.mrf.mxu1  ;;  %v8688_v29 = vld [vmem:[%s11328_s7 + $0xc0] sm:$0xff]  }
 0x64a   : > { %6825 = vst [vmem:[#allocation4 + $0x20] sm:$0xf] %v6820_v20  ;;  %v6938_v23 = vadd.f32 %v6913_v56, %v6817_v50 }
 0x64b   : > { %v8465_v32 = vpop.f32.mrf.mxu1 }
 0x64c   : > { %6943 = vst [vmem:[#allocation4 + $0x8] sm:$0xff] %v6938_v23 }
 0x64d   : > { %v6918_v42 = vpop.f32.mrf.mxu1 }
 0x64e   : > { %v6939_v21 = vadd.f32 %v6918_v42, %v6818_v44 }
 0x64f   : > { %v8468_v22 = vpop.f32.mrf.mxu1 }
 0x650   : > { %6944 = vst [vmem:[#allocation4 + $0x10] sm:$0xff] %v6939_v21 }
 0x651   : > { %v6921_v34 = vpop.f32.mrf.mxu1  ;;  %v6936_v49 = vld [vmem:[#allocation4 + $0x20] sm:$0xf] }
 0x652   : > { %v6940_v30 = vadd.f32 %v6921_v34, %v6819_v27 }
 0x653   : > { %v8469_v51 = vpop.f32.mrf.mxu1  ;;  %v6948_v37 = vld [vmem:[#allocation4 + $0x7] ss:$2 sm:$0x3]  ;;  %v6950_v2 = vld [vmem:[#allocation4 + $0x8] ss:$2 sm:$0x3] }
 0x654   : > { %6945 = vst [vmem:[#allocation4 + $0x18] sm:$0xff] %v6940_v30  ;;  %v6952_v16 = vld [vmem:[#allocation4 + $0xd] ss:$2 sm:$0x3]  ;;  %v6955_v61 = vmax.f32 %v6948_v37, %v6950_v2 }
 0x655   : > { %v6926_v52 = vpop.f32.mrf.mxu1 }
 0x656   : > { %v6941_v0 = vadd.f32 %v6936_v49, %v6926_v52 }
 0x657   : > { %v6954_v43 = vld [vmem:[#allocation4 + $0xe] ss:$2 sm:$0x3]  ;;  %v8472_v57 = vpop.f32.mrf.mxu1  ;;  %v6966_v17 = vld [vmem:[#allocation4 + $0x13] ss:$2 sm:$0x3] }
 0x658   : > { %v6956_v19 = vmax.f32 %v6952_v16, %v6954_v43  ;;  %6946 = vst [vmem:[#allocation4 + $0x20] sm:$0xf] %v6941_v0  ;;  %v6968_v3 = vld [vmem:[#allocation4 + $0x14] ss:$2 sm:$0x3] }
 0x659   : > { %v6929_v13 = vpop.f32.mrf.mxu1  ;;  %v6973_v18 = vmax.f32 %v6966_v17, %v6968_v3 }
 0x65a   : > { %v6957_v45 = vmax.f32 %v6955_v61, %v6956_v19 }
 0x65b   : > { %v6970_v55 = vld [vmem:[#allocation4 + $0x19] ss:$2 sm:$0x3]  ;;  %v6972_v39 = vld [vmem:[#allocation4 + $0x1a] ss:$2 sm:$0x3]  ;;  %v8473_v14 = vpop.f32.mrf.mxu1 }
 0x65c   : > { %v7741_v47 = vmul.f32 -1.442695, %v6957_v45  ;;  %v6974_v11 = vmax.f32 %v6970_v55, %v6972_v39 }
 0x65e   : > { %8689 = vpow2.f32 %v7741_v47  ;;  %v6975_v35 = vmax.f32 %v6973_v18, %v6974_v11 }
 0x660   : > { %v7742_v46 = vmul.f32 -1.442695, %v6975_v35 }
 0x662   : > { %8691 = vpow2.f32 %v7742_v46 }
 0x66b   : > { %v8690_v26 = vpop.eup %8689 }
 0x66c   : > { %v6961_v25 = vadd.f32 1.0, %v8690_v26 }
 0x66e   : > { %8693 = vrcp.f32 %v6961_v25 }
 0x66f   : > { %v8692_v4 = vpop.eup %8691 }
 0x670   : > { %v6979_v54 = vadd.f32 1.0, %v8692_v4 }
 0x672   : > { %8695 = vrcp.f32 %v6979_v54 }
 0x67b   : > { %v8694_v24 = vpop.eup %8693 }
 0x67c   : > { %6964 = vst [vmem:[#allocation7] sm:$0x3] %v8694_v24 }
 0x67f   : > { %v8696_v59 = vpop.eup %8695 }
 0x680   : > { %6982 = vst [vmem:[#allocation7 + $0x2] sm:$0x3] %v8696_v59 }
 0x683   : > { %v6984_v8 = vld [vmem:[#allocation7] sm:$0x1]  ;;  %v7091_v5 = vld [vmem:[#allocation7 + $0x1] sm:$0x1] }
 0x684   : > { %v6985_v12 = vpack.c.bf16 %v6984_v8, %v6984_v8  ;;  %v7092_v9 = vpack.c.bf16 %v7091_v5, %v7091_v5 }
 0x686   : > { %8491 = vmatmul.mubr.bf16.vlgmr.msra.gmra.mxu0 %v6985_v12  ;;  %8511 = vmatmul.mubr.bf16.vlgmr.msra.gmra.mxu1 %v7092_v9 }
 0x687   : > { %8515 = vmatpush3.bf16.msra.mxu0 %v8673_v58  ;;  %8535 = vmatpush3.bf16.msra.mxu1 %v8674_v60  ;;  %v7199_v63 = vld [vmem:[#allocation7 + $0x2] sm:$0x1]  ;;  %v7307_v20 = vld [vmem:[#allocation7 + $0x3] sm:$0x1] }
 0x688   : > { %8516 = vmatprep.subr.bf16.mxu0 %v8775_v28  ;;  %8536 = vmatprep.subr.bf16.mxu1 %v8775_v28  ;;  %v7200_v50 = vpack.c.bf16 %v7199_v63, %v7199_v63  ;;  %v7308_v56 = vpack.c.bf16 %v7307_v20, %v7307_v20 }
 0x689   : > { %8530 = vmatprep.mubr.msk.bf16.mxu0 %vm8776_vm2, %v8775_v28  ;;  %8550 = vmatprep.mubr.msk.bf16.mxu1 %vm8776_vm2, %v8775_v28 }
 0x68b   : > { %8517 = vmatpush3.bf16.msra.mxu0 %v8675_v41  ;;  %8537 = vmatpush3.bf16.msra.mxu1 %v8676_v62 }
 0x68c   : > { %8518 = vmatprep.subr.bf16.mxu0 %v8775_v28  ;;  %8538 = vmatprep.subr.bf16.mxu1 %v8775_v28 }
 0x68f   : > { %8519 = vmatpush3.bf16.msra.mxu0 %v8677_v1  ;;  %8539 = vmatpush3.bf16.msra.mxu1 %v8678_v7 }
 0x690   : > { %8520 = vmatprep.subr.bf16.mxu0 %v8775_v28  ;;  %8540 = vmatprep.subr.bf16.mxu1 %v8775_v28 }
 0x693   : > { %8521 = vmatpush3.bf16.msra.mxu0 %v8679_v38  ;;  %8541 = vmatpush3.bf16.msra.mxu1 %v8680_v31 }
 0x694   : > { %8522 = vmatprep.subr.bf16.mxu0 %v8775_v28  ;;  %8542 = vmatprep.subr.bf16.mxu1 %v8775_v28 }
 0x697   : > { %8523 = vmatpush3.bf16.msra.mxu0 %v8681_v10  ;;  %8543 = vmatpush3.bf16.msra.mxu1 %v8682_v6 }
 0x698   : > { %8524 = vmatprep.subr.bf16.mxu0 %v8775_v28  ;;  %8544 = vmatprep.subr.bf16.mxu1 %v8775_v28 }
 0x69b   : > { %8525 = vmatpush3.bf16.msra.mxu0 %v8683_v15  ;;  %8545 = vmatpush3.bf16.msra.mxu1 %v8684_v33 }
 0x69c   : > { %8526 = vmatprep.subr.bf16.mxu0 %v8775_v28  ;;  %8546 = vmatprep.subr.bf16.mxu1 %v8775_v28 }
 0x69f   : > { %8527 = vmatpush3.bf16.msra.mxu0 %v8685_v53  ;;  %8547 = vmatpush3.bf16.msra.mxu1 %v8686_v40 }
 0x6a0   : > { %8528 = vmatprep.subr.bf16.mxu0 %v8775_v28  ;;  %8548 = vmatprep.subr.bf16.mxu1 %v8775_v28  ;;  %v6983_v28 = vld [vmem:[%s11329_s8] sm:$0x1] }
 0x6a3   : > { %8529 = vmatpush3.bf16.msra.mxu0 %v8687_v48  ;;  %8549 = vmatpush3.bf16.msra.mxu1 %v8688_v29 }
 0x6a6   : > { %8531 = vmatmul.mubr.bf16.vlgmr.msra.gmra.mxu0 %v7200_v50  ;;  %8551 = vmatmul.mubr.bf16.vlgmr.msra.gmra.mxu1 %v7308_v56 }
 0x746   : > { %v7084_v23 = vpop.f32.mrf.mxu0  ;;  %v7192_v32 = vpop.f32.mrf.mxu1 }
 0x747   : > { %v7090_v34 = vadd.f32 %v7084_v23, %v6983_v28 }
 0x748   : > { %v8492_v36 = vpop.f32.mrf.mxu0  ;;  %v8512_v44 = vpop.f32.mrf.mxu1 }
 0x749   : > { %v7198_v30 = vadd.f32 %v7192_v32, %v7090_v34 }
 0x74a   : > { %v7087_v42 = vpop.f32.mrf.mxu0  ;;  %v7195_v21 = vpop.f32.mrf.mxu1 }
 0x74c   : > { %v8493_v22 = vpop.f32.mrf.mxu0  ;;  %v8513_v27 = vpop.f32.mrf.mxu1 }
 0x766   : > { %v7300_v51 = vpop.f32.mrf.mxu0  ;;  %v7408_v49 = vpop.f32.mrf.mxu1 }
 0x767   : > { %v7306_v37 = vadd.f32 %v7300_v51, %v7198_v30 }
 0x768   : > { %v8532_v2 = vpop.f32.mrf.mxu0  ;;  %v8552_v52 = vpop.f32.mrf.mxu1 }
 0x769   : > { %v7414_v0 = vadd.f32 %v7408_v49, %v7306_v37 }
 0x76a   : > { %v7303_v16 = vpop.f32.mrf.mxu0  ;;  %v7411_v43 = vpop.f32.mrf.mxu1 }
 0x76b   : > { %7415 = vst [vmem:[%s324_s16] sm:$0x1] %v7414_v0 }
 0x76c   : > { %v8533_v57 = vpop.f32.mrf.mxu0  ;;  %v8553_v61 = vpop.f32.mrf.mxu1 }
 0x76d   : > { %8725 = shalt.err (!%p8722_p3)
}
 0x76e   : > { %s8726_s28 = scalar_lea.hbm %s11280_s23, 16  ;;  %s8730_s16 = scalar_lea.hbm %s11330_s9, 32 }
 0x76f   : > { %p8727_p4 = scmp.ne.s32.totalorder %s11280_s23, %s8726_s28  ;;  %p8731_p9 = scmp.lt.s32.totalorder %s11280_s23, %s11330_s9 }
 0x770   : > { %p8732_p10 = scmp.lt.s32.totalorder %s8730_s16, %s8726_s28 }
 0x771   : > { %p8728_p7 = pnand %p8727_p4, %p8866_p5 }
 0x772   : > { %p8733_p11 = por %p8732_p10, %p8731_p9 }
 0x773   : > { %p8729_p8 = pneg %p8728_p7 }
 0x775   : > { %p8734_p12 = pnand %p8733_p11, %p8729_p8 }
 0x777   : > { %8737 = shalt.err (!%p8734_p12)
}
 0x778   : > { %8559 = dma.vmem_to_hbm [thread:$0]  (%p8866_p5), %s11282_s17, 16, %s11280_s23, %s7417_s13  }
 0x779 PF: > { %p8565_p13 = scmp.ge.s32.totalorder %s8772_s12, 2  ;;  %s7441_s24 = sand.u32 1, %s8760_s30  }
 0x77a   : > { %s7442_s26 = scalar_lea.sflag [#allocation9], %s7441_s24 }
 0x77b   : > { %p8562_p0 = pnand %p8565_p13, %p8870_p6 }
 0x77d   : > { %p8563_p1 = pneg %p8562_p0 }
 0x77f   : > { %8755 = dma.done.wait (%p8563_p1), %s7442_s26, 16  }
 0x780   : > { %8757 = vsyncadd (%p8563_p1), %s7442_s26, 4294967280  ;;  %p19_p2 = scmp.ge.s32.totalorder %s8853_s15, 4   ;;  %s11333_s30 = smov %s8764_s10 }
 0x781   : > { %s11334_s10 = smov %s8768_s11  ;;  %s11335_s11 = smov %s8864_s18 }
 0x782   : > { %s11336_s12 = smov %s8853_s15  ;;  %21 = sbr.rel (!%p19_p2) target bundleno = 3 (0x3), region = 166 }
 0x787   :  { %7446 = vsyncpa [#allocation9], 1 }
 0x788   :  { %7448 = vsyncpa [#allocation9 + $0x1], 1 }

</bundles_post_ra>
